<compile_context>
chip_gen: v7x
topology: tpu7x:2x2x1
jax: 0.10.0
libtpu: 0.0.40
codegen_flags: <defaults>
</compile_context>

<pallas_src>
import functools

import jax
import jax.numpy as jnp
import numpy as np
from jax.experimental import pallas as pl
from jax.experimental.pallas import tpu as pltpu

_H1, _H2 = 1024, 512
_NL = 128            # lane-padded width of the final (512, 1) layer
_TK = 2176           # = 17 * 128, lane-aligned K tile


# --------------------------------------------------------------------------
# Kernels
# --------------------------------------------------------------------------
def _disc_fused_kernel(x_ref, w1_ref, b1_ref, w2_ref, b2_ref, w3_ref, b3_ref,
                       o_ref, acc_ref):
    """Single fused kernel (v5e / v6e path): grid = (n_k,), K reduction."""
    k = pl.program_id(0)

    @pl.when(k == 0)
    def _():
        acc_ref[...] = jnp.zeros_like(acc_ref)

    # Layer-1 partial product: (Bp, tk) bf16 @ (tk, 1024) bf16 -> f32 acc.
    acc_ref[...] += jnp.dot(x_ref[...], w1_ref[...],
                            preferred_element_type=jnp.float32)

    @pl.when(k == pl.num_programs(0) - 1)
    def _():
        h1 = acc_ref[...] + b1_ref[...]                  # (Bp, 1024) f32
        h1 = jnp.where(h1 > 0, h1, 0.2 * h1)             # LeakyReLU(0.2)
        h2 = jnp.dot(h1.astype(jnp.bfloat16), w2_ref[...],
                     preferred_element_type=jnp.float32) + b2_ref[...]
        h2 = jnp.where(h2 > 0, h2, 0.2 * h2)             # LeakyReLU(0.2)
        h3 = jnp.dot(h2.astype(jnp.bfloat16), w3_ref[...],
                     preferred_element_type=jnp.float32) + b3_ref[...]
        o_ref[...] = jax.nn.sigmoid(h3)                  # (Bp, 128) lane-padded


def _l1_split_kernel(x_ref, w1_ref, b1_ref, h1_ref, acc_ref):
    """Layer 1 only (v7x path): grid = (2, n_k); axis 0 is 'parallel' and
    splits W1's N=1024 into two 512-column halves, one per TensorCore."""
    k = pl.program_id(1)

    @pl.when(k == 0)
    def _():
        acc_ref[...] = jnp.zeros_like(acc_ref)

    acc_ref[...] += jnp.dot(x_ref[...], w1_ref[...],
                            preferred_element_type=jnp.float32)

    @pl.when(k == pl.num_programs(1) - 1)
    def _():
        h = acc_ref[...] + b1_ref[...]
        h1_ref[...] = jnp.where(h > 0, h, 0.2 * h)       # LeakyReLU(0.2)


def _l23_kernel(h1_ref, w2_ref, b2_ref, w3_ref, b3_ref, o_ref):
    """Layers 2+3 (v7x path follow-up): a single tiny step."""
    h2 = jnp.dot(h1_ref[...].astype(jnp.bfloat16), w2_ref[...],
                 preferred_element_type=jnp.float32) + b2_ref[...]
    h2 = jnp.where(h2 > 0, h2, 0.2 * h2)                 # LeakyReLU(0.2)
    h3 = jnp.dot(h2.astype(jnp.bfloat16), w3_ref[...],
                 preferred_element_type=jnp.float32) + b3_ref[...]
    o_ref[...] = jax.nn.sigmoid(h3)


# --------------------------------------------------------------------------
# Parameter packing (one-time, outside the hot path)
# --------------------------------------------------------------------------
def prepare_params(params, tk=_TK):
    """Pad / reshape / cast weights once, outside the jitted forward."""
    w1, b1, w2, b2, w3, b3 = params
    D = w1.shape[0]
    n_k = max(2, -(-D // tk))            # keep n_k >= 2 (DMA/epilogue overlap)
    Dp = n_k * tk
    w1_p = jnp.zeros((Dp, _H1), jnp.bfloat16).at[:D, :].set(
        w1.astype(jnp.bfloat16))
    b1_p = b1.reshape(1, _H1).astype(jnp.float32)
    w2_p = w2.astype(jnp.bfloat16)                       # (1024, 512)
    b2_p = b2.reshape(1, _H2).astype(jnp.float32)
    w3_p = jnp.zeros((_H2, _NL), jnp.bfloat16).at[:, :1].set(
        w3.astype(jnp.bfloat16))
    b3_p = jnp.zeros((1, _NL), jnp.float32).at[:, :1].set(b3.reshape(1, 1))
    return (w1_p, b1_p, w2_p, b2_p, w3_p, b3_p)


@functools.lru_cache(maxsize=1)
def _two_tensorcore_chip():
    """Best-effort detection of a 2-TensorCore-per-chip generation (v7x+)."""
    try:
        kind = jax.devices()[0].device_kind.lower()
    except Exception:
        return False
    return "v7" in kind


# --------------------------------------------------------------------------
# Forward
# --------------------------------------------------------------------------
@functools.partial(jax.jit, static_argnames=("tk", "use_split"))
def _forward_impl(img, text_embedding, prepped, tk, use_split):
    w1_p, b1_p, w2_p, b2_p, w3_p, b3_p = prepped
    B = img.shape[0]
    x = jnp.concatenate([img.reshape(B, -1), text_embedding], axis=1)  # (B, D)
    D = x.shape[1]
    Dp = w1_p.shape[0]
    assert Dp % tk == 0 and D <= Dp, (D, Dp, tk)
    n_k = Dp // tk

    # Pad batch to 16 sublanes (bf16 packing) and build x_p directly in bf16.
    # TODO(synk): for training-sized batches, pass img-flat and text as two
    # separate inputs with their own BlockSpecs instead of materializing x_p.
    Bp = max(16, ((B + 15) // 16) * 16)
    x_p = jnp.zeros((Bp, Dp), jnp.bfloat16).at[:B, :D].set(
        x.astype(jnp.bfloat16))

    if not use_split:
        # ----- single fused kernel (optimal on 1-TC chips: v5e / v6e) -----
        flops = 2 * Bp * (Dp * _H1 + _H1 * _H2 + _H2 * _NL)
        bytes_accessed = (x_p.size * 2 + w1_p.size * 2 + b1_p.size * 4 +
                          w2_p.size * 2 + b2_p.size * 4 + w3_p.size * 2 +
                          b3_p.size * 4 + Bp * _NL * 4)
        out = pl.pallas_call(
            _disc_fused_kernel,
            out_shape=jax.ShapeDtypeStruct((Bp, _NL), jnp.float32),
            grid_spec=pltpu.PrefetchScalarGridSpec(
                num_scalar_prefetch=0,
                grid=(n_k,),
                in_specs=[
                    pl.BlockSpec((Bp, tk),   lambda k: (0, k)),   # x tile bf16
                    pl.BlockSpec((tk, _H1),  lambda k: (k, 0)),   # W1 tile bf16
                    pl.BlockSpec((1, _H1),   lambda k: (0, 0)),   # b1
                    pl.BlockSpec((_H1, _H2), lambda k: (0, 0)),   # W2 bf16
                    pl.BlockSpec((1, _H2),   lambda k: (0, 0)),   # b2
                    pl.BlockSpec((_H2, _NL), lambda k: (0, 0)),   # W3 bf16
                    pl.BlockSpec((1, _NL),   lambda k: (0, 0)),   # b3
                ],
                out_specs=pl.BlockSpec((Bp, _NL), lambda k: (0, 0)),
                scratch_shapes=[pltpu.VMEM((Bp, _H1), jnp.float32)],
            ),
            compiler_params=pltpu.CompilerParams(
                dimension_semantics=("arbitrary",)),
            cost_estimate=pl.CostEstimate(
                flops=flops, transcendentals=Bp * _NL,
                bytes_accessed=bytes_accessed),
        )(x_p, w1_p, b1_p, w2_p, b2_p, w3_p, b3_p)
        return out[:B, :1]

    # ----- v7x path: layer 1 split across 2 TensorCores, tiny tail call -----
    nh = _H1 // 2
    l1_flops = 2 * Bp * Dp * _H1
    l1_bytes = (2 * x_p.size * 2 + w1_p.size * 2 + b1_p.size * 4 +
                Bp * _H1 * 4)
    h1 = pl.pallas_call(
        _l1_split_kernel,
        out_shape=jax.ShapeDtypeStruct((Bp, _H1), jnp.float32),
        grid_spec=pltpu.PrefetchScalarGridSpec(
            num_scalar_prefetch=0,
            grid=(2, n_k),
            in_specs=[
                pl.BlockSpec((Bp, tk), lambda n, k: (0, k)),      # x tile bf16
                pl.BlockSpec((tk, nh), lambda n, k: (k, n)),      # W1 half bf16
                pl.BlockSpec((1, nh),  lambda n, k: (0, n)),      # b1 half
            ],
            out_specs=pl.BlockSpec((Bp, nh), lambda n, k: (0, n)),
            scratch_shapes=[pltpu.VMEM((Bp, nh), jnp.float32)],
        ),
        compiler_params=pltpu.CompilerParams(
            dimension_semantics=("parallel", "arbitrary")),
        cost_estimate=pl.CostEstimate(
            flops=l1_flops, transcendentals=0, bytes_accessed=l1_bytes),
    )(x_p, w1_p, b1_p)

    out = pl.pallas_call(
        _l23_kernel,
        out_shape=jax.ShapeDtypeStruct((Bp, _NL), jnp.float32),
        grid_spec=pltpu.PrefetchScalarGridSpec(
            num_scalar_prefetch=0,
            grid=(1,),
            in_specs=[
                pl.BlockSpec((Bp, _H1),  lambda i: (0, 0)),       # h1
                pl.BlockSpec((_H1, _H2), lambda i: (0, 0)),       # W2 bf16
                pl.BlockSpec((1, _H2),   lambda i: (0, 0)),       # b2
                pl.BlockSpec((_H2, _NL), lambda i: (0, 0)),       # W3 bf16
                pl.BlockSpec((1, _NL),   lambda i: (0, 0)),       # b3
            ],
            out_specs=pl.BlockSpec((Bp, _NL), lambda i: (0, 0)),
        ),
        compiler_params=pltpu.CompilerParams(
            dimension_semantics=("arbitrary",)),
    )(h1, w2_p, b2_p, w3_p, b3_p)
    return out[:B, :1]


def discriminator_forward(img, text_embedding, prepped, tk=_TK,
                          use_split=None):
    """img: (B, C, 64, 64) float32 NCHW; text_embedding: (B, text_dim)."""
    if use_split is None:
        use_split = _two_tensorcore_chip()
    return _forward_impl(img, text_embedding, prepped, tk, bool(use_split))


# --------------------------------------------------------------------------
# Init / reference / test
# --------------------------------------------------------------------------
def init_params(key, text_dim, img_channels):
    """Deterministic parameter init (PyTorch nn.Linear-style uniform bounds)."""
    d_in = img_channels * 64 * 64 + text_dim
    dims = [(d_in, _H1), (_H1, _H2), (_H2, 1)]
    params = []
    for (fan_in, fan_out) in dims:
        key, kw, kb = jax.random.split(key, 3)
        bound = 1.0 / np.sqrt(fan_in)
        w = jax.random.uniform(kw, (fan_in, fan_out), jnp.float32, -bound, bound)
        b = jax.random.uniform(kb, (fan_out,), jnp.float32, -bound, bound)
        params += [w, b]
    return tuple(params)


def _reference(img, text, params):
    w1, b1, w2, b2, w3, b3 = params
    x = jnp.concatenate([img.reshape(img.shape[0], -1), text], axis=1)
    h = x @ w1 + b1
    h = jnp.where(h > 0, h, 0.2 * h)
    h = h @ w2 + b2
    h = jnp.where(h > 0, h, 0.2 * h)
    return jax.nn.sigmoid(h @ w3 + b3)


if __name__ == "__main__":
    B, C, TEXT_DIM = 2, 1, 32   # spatial 64x64 is hard-coded by the module
    key = jax.random.PRNGKey(0)
    k_img, k_txt, k_par = jax.random.split(key, 3)

    img = jax.random.normal(k_img, (B, C, 64, 64), jnp.float32)
    text = jax.random.normal(k_txt, (B, TEXT_DIM), jnp.float32)
    params = init_params(k_par, TEXT_DIM, C)
    prepped = prepare_params(params)          # one-time weight packing

    ref = np.asarray(_reference(img, text, params))

    # Default (chip-appropriate) path.
    out = jax.block_until_ready(discriminator_forward(img, text, prepped))
    assert out.shape == (B, 1), out.shape
    # Tolerance loosened: W1/W2/W3 and x are bf16 (fp32 accumulation kept).
    np.testing.assert_allclose(np.asarray(out), ref, rtol=2e-2, atol=2e-2)

    # Validate both code paths regardless of the chip we happen to run on.
    out_fused = jax.block_until_ready(
        discriminator_forward(img, text, prepped, use_split=False))
    np.testing.assert_allclose(np.asarray(out_fused), ref, rtol=2e-2, atol=2e-2)

    out_split = jax.block_until_ready(
        discriminator_forward(img, text, prepped, use_split=True))
    np.testing.assert_allclose(np.asarray(out_split), ref, rtol=2e-2, atol=2e-2)

    print("KERNEL_OK")
</pallas_src>

<mosaic_0001>
module attributes {stable_mosaic.version = 11 : i64} {
  func.func @_disc_fused_kernel(%arg0: i32, %arg1: memref<16x2176xbf16, #tpu.memory_space<vmem>>, %arg2: memref<2176x1024xbf16, #tpu.memory_space<vmem>>, %arg3: memref<1x1024xf32, #tpu.memory_space<vmem>>, %arg4: memref<1024x512xbf16, #tpu.memory_space<vmem>>, %arg5: memref<1x512xf32, #tpu.memory_space<vmem>>, %arg6: memref<512x128xbf16, #tpu.memory_space<vmem>>, %arg7: memref<1x128xf32, #tpu.memory_space<vmem>>, %arg8: memref<16x128xf32, #tpu.memory_space<vmem>>, %arg9: memref<16x1024xf32, #tpu.memory_space<vmem>>) attributes {dimension_semantics = [#tpu.dimension_semantics<arbitrary>], iteration_bounds = array<i64: 2>, scalar_prefetch = 0 : i64, scratch_operands = 1 : i64, tpu.core_type = #tpu.core_type<tc>, window_params = [{transform_indices = @transform_0, window_bounds = array<i64: 16, 2176>}, {transform_indices = @transform_1, window_bounds = array<i64: 2176, 1024>}, {pipeline_mode = #tpu.pipeline_mode<synchronous>, transform_indices = @transform_2, window_bounds = array<i64: 1, 1024>}, {pipeline_mode = #tpu.pipeline_mode<synchronous>, transform_indices = @transform_3, window_bounds = array<i64: 1024, 512>}, {pipeline_mode = #tpu.pipeline_mode<synchronous>, transform_indices = @transform_4, window_bounds = array<i64: 1, 512>}, {pipeline_mode = #tpu.pipeline_mode<synchronous>, transform_indices = @transform_5, window_bounds = array<i64: 512, 128>}, {pipeline_mode = #tpu.pipeline_mode<synchronous>, transform_indices = @transform_6, window_bounds = array<i64: 1, 128>}, {pipeline_mode = #tpu.pipeline_mode<synchronous>, transform_indices = @transform_7, window_bounds = array<i64: 16, 128>}]} {
    %c0_i32 = arith.constant 0 : i32
    %0 = arith.cmpi eq, %arg0, %c0_i32 : i32
    %1 = arith.extui %0 : i1 to i32
    %c0_i32_0 = arith.constant 0 : i32
    %2 = arith.cmpi ne, %1, %c0_i32_0 : i32
    scf.if %2 {
      %cst_9 = arith.constant 0.000000e+00 : f32
      %12 = vector.broadcast %cst_9 : f32 to vector<16x1024xf32>
      %c0_10 = arith.constant 0 : index
      %c0_11 = arith.constant 0 : index
      %13 = vector.load %arg9[%c0_10, %c0_11] : memref<16x1024xf32, #tpu.memory_space<vmem>>, vector<16x1024xf32>
      tpu.vector_store %arg9[%c0_10, %c0_11], %12 {strides = array<i32>} : memref<16x1024xf32, #tpu.memory_space<vmem>>, vector<16x1024xf32>,
    } else {
    }
    %c0 = arith.constant 0 : index
    %c0_1 = arith.constant 0 : index
    %3 = vector.load %arg9[%c0, %c0_1] : memref<16x1024xf32, #tpu.memory_space<vmem>>, vector<16x1024xf32>
    %c0_2 = arith.constant 0 : index
    %c0_3 = arith.constant 0 : index
    %4 = vector.load %arg1[%c0_2, %c0_3] : memref<16x2176xbf16, #tpu.memory_space<vmem>>, vector<16x2176xbf16>
    %c0_4 = arith.constant 0 : index
    %c0_5 = arith.constant 0 : index
    %5 = vector.load %arg2[%c0_4, %c0_5] : memref<2176x1024xbf16, #tpu.memory_space<vmem>>, vector<2176x1024xbf16>
    %cst = arith.constant dense<0.000000e+00> : vector<16x1024xf32>
    %6 = tpu.matmul %4, %5, %cst {dimension_numbers = #tpu.dot_dimension_numbers<[1], [0], [0], [1], [0, 0, 1, 1], [], []>} : vector<16x2176xbf16>, vector<2176x1024xbf16>, vector<16x1024xf32> -> vector<16x1024xf32>
    %7 = arith.addf %3, %6 : vector<16x1024xf32>
    %c0_6 = arith.constant 0 : index
    %c0_7 = arith.constant 0 : index
    %8 = vector.load %arg9[%c0_6, %c0_7] : memref<16x1024xf32, #tpu.memory_space<vmem>>, vector<16x1024xf32>
    tpu.vector_store %arg9[%c0_6, %c0_7], %7 {strides = array<i32>} : memref<16x1024xf32, #tpu.memory_space<vmem>>, vector<16x1024xf32>,
    %c1_i32 = arith.constant 1 : i32
    %9 = arith.cmpi eq, %arg0, %c1_i32 : i32
    %10 = arith.extui %9 : i1 to i32
    %c0_i32_8 = arith.constant 0 : i32
    %11 = arith.cmpi ne, %10, %c0_i32_8 : i32
    scf.if %11 {
      %c0_9 = arith.constant 0 : index
      %c0_10 = arith.constant 0 : index
      %12 = vector.load %arg9[%c0_9, %c0_10] : memref<16x1024xf32, #tpu.memory_space<vmem>>, vector<16x1024xf32>
      %c0_11 = arith.constant 0 : index
      %c0_12 = arith.constant 0 : index
      %13 = vector.load %arg3[%c0_11, %c0_12] : memref<1x1024xf32, #tpu.memory_space<vmem>>, vector<1x1024xf32>
      %14 = vector.broadcast %13 : vector<1x1024xf32> to vector<16x1024xf32>
      %15 = arith.addf %12, %14 : vector<16x1024xf32>
      %cst_13 = arith.constant 0.000000e+00 : f32
      %16 = vector.broadcast %cst_13 : f32 to vector<16x1024xf32>
      %17 = arith.cmpf ogt, %15, %16 : vector<16x1024xf32>
      %cst_14 = arith.constant 2.000000e-01 : f32
      %18 = vector.broadcast %cst_14 : f32 to vector<16x1024xf32>
      %19 = arith.mulf %18, %15 : vector<16x1024xf32>
      %20 = arith.select %17, %15, %19 : vector<16x1024xi1>, vector<16x1024xf32>
      %21 = arith.truncf %20 : vector<16x1024xf32> to vector<16x1024xbf16>
      %c0_15 = arith.constant 0 : index
      %c0_16 = arith.constant 0 : index
      %22 = vector.load %arg4[%c0_15, %c0_16] : memref<1024x512xbf16, #tpu.memory_space<vmem>>, vector<1024x512xbf16>
      %cst_17 = arith.constant dense<0.000000e+00> : vector<16x512xf32>
      %23 = tpu.matmul %21, %22, %cst_17 {dimension_numbers = #tpu.dot_dimension_numbers<[1], [0], [0], [1], [0, 0, 1, 1], [], []>} : vector<16x1024xbf16>, vector<1024x512xbf16>, vector<16x512xf32> -> vector<16x512xf32>
      %c0_18 = arith.constant 0 : index
      %c0_19 = arith.constant 0 : index
      %24 = vector.load %arg5[%c0_18, %c0_19] : memref<1x512xf32, #tpu.memory_space<vmem>>, vector<1x512xf32>
      %25 = vector.broadcast %24 : vector<1x512xf32> to vector<16x512xf32>
      %26 = arith.addf %23, %25 : vector<16x512xf32>
      %cst_20 = arith.constant 0.000000e+00 : f32
      %27 = vector.broadcast %cst_20 : f32 to vector<16x512xf32>
      %28 = arith.cmpf ogt, %26, %27 : vector<16x512xf32>
      %cst_21 = arith.constant 2.000000e-01 : f32
      %29 = vector.broadcast %cst_21 : f32 to vector<16x512xf32>
      %30 = arith.mulf %29, %26 : vector<16x512xf32>
      %31 = arith.select %28, %26, %30 : vector<16x512xi1>, vector<16x512xf32>
      %32 = arith.truncf %31 : vector<16x512xf32> to vector<16x512xbf16>
      %c0_22 = arith.constant 0 : index
      %c0_23 = arith.constant 0 : index
      %33 = vector.load %arg6[%c0_22, %c0_23] : memref<512x128xbf16, #tpu.memory_space<vmem>>, vector<512x128xbf16>
      %cst_24 = arith.constant dense<0.000000e+00> : vector<16x128xf32>
      %34 = tpu.matmul %32, %33, %cst_24 {dimension_numbers = #tpu.dot_dimension_numbers<[1], [0], [0], [1], [0, 0, 1, 1], [], []>} : vector<16x512xbf16>, vector<512x128xbf16>, vector<16x128xf32> -> vector<16x128xf32>
      %c0_25 = arith.constant 0 : index
      %c0_26 = arith.constant 0 : index
      %35 = vector.load %arg7[%c0_25, %c0_26] : memref<1x128xf32, #tpu.memory_space<vmem>>, vector<1x128xf32>
      %36 = vector.broadcast %35 : vector<1x128xf32> to vector<16x128xf32>
      %37 = arith.addf %34, %36 : vector<16x128xf32>
      %38 = arith.negf %37 : vector<16x128xf32>
      %39 = math.exp %38 : vector<16x128xf32>
      %cst_27 = arith.constant 1.000000e+00 : f32
      %40 = vector.broadcast %cst_27 : f32 to vector<16x128xf32>
      %41 = arith.addf %40, %39 : vector<16x128xf32>
      %42 = arith.divf %40, %41 : vector<16x128xf32>
      %c0_28 = arith.constant 0 : index
      %c0_29 = arith.constant 0 : index
      %43 = vector.load %arg8[%c0_28, %c0_29] : memref<16x128xf32, #tpu.memory_space<vmem>>, vector<16x128xf32>
      tpu.vector_store %arg8[%c0_28, %c0_29], %42 {strides = array<i32>} : memref<16x128xf32, #tpu.memory_space<vmem>>, vector<16x128xf32>,
    } else {
    }
    return
  }
  func.func @transform_0(%arg0: i32) -> (i32, i32) {
    %c0_i32 = arith.constant 0 : i32
    %c0_i32_0 = arith.constant 0 : i32
    return %c0_i32, %arg0 : i32, i32
  }
  func.func @transform_1(%arg0: i32) -> (i32, i32) {
    %c0_i32 = arith.constant 0 : i32
    %c0_i32_0 = arith.constant 0 : i32
    return %arg0, %c0_i32 : i32, i32
  }
  func.func @transform_2(%arg0: i32) -> (i32, i32) {
    %c0_i32 = arith.constant 0 : i32
    %c0_i32_0 = arith.constant 0 : i32
    %c0_i32_1 = arith.constant 0 : i32
    return %c0_i32, %c0_i32_0 : i32, i32
  }
  func.func @transform_3(%arg0: i32) -> (i32, i32) {
    %c0_i32 = arith.constant 0 : i32
    %c0_i32_0 = arith.constant 0 : i32
    %c0_i32_1 = arith.constant 0 : i32
    return %c0_i32, %c0_i32_0 : i32, i32
  }
  func.func @transform_4(%arg0: i32) -> (i32, i32) {
    %c0_i32 = arith.constant 0 : i32
    %c0_i32_0 = arith.constant 0 : i32
    %c0_i32_1 = arith.constant 0 : i32
    return %c0_i32, %c0_i32_0 : i32, i32
  }
  func.func @transform_5(%arg0: i32) -> (i32, i32) {
    %c0_i32 = arith.constant 0 : i32
    %c0_i32_0 = arith.constant 0 : i32
    %c0_i32_1 = arith.constant 0 : i32
    return %c0_i32, %c0_i32_0 : i32, i32
  }
  func.func @transform_6(%arg0: i32) -> (i32, i32) {
    %c0_i32 = arith.constant 0 : i32
    %c0_i32_0 = arith.constant 0 : i32
    %c0_i32_1 = arith.constant 0 : i32
    return %c0_i32, %c0_i32_0 : i32, i32
  }
  func.func @transform_7(%arg0: i32) -> (i32, i32) {
    %c0_i32 = arith.constant 0 : i32
    %c0_i32_0 = arith.constant 0 : i32
    %c0_i32_1 = arith.constant 0 : i32
    return %c0_i32, %c0_i32_0 : i32, i32
  }
}

</mosaic_0001>

<bundles_post_ra>
// kernel: _forward_impl.1
= control target key start
LH: loop header
LB: loop body
LE: loop exit
PB: predicated region body
PF: predicated region fallthrough
CT: control target
= control target key end

     0   :  { %s15143_s0 = inlined_call_operand.vmem [shape: bf16[16,4352], index: 0, kind: input, shape index: {}]   ;;  %s15144_s1 = inlined_call_operand.hbm [shape: bf16[4352,1024], index: 1, kind: input, shape index: {}]   ;;  %s15145_s2 = inlined_call_operand.hbm [shape: f32[1,1024], index: 2, kind: input, shape index: {}]   ;;  %s15146_s3 = inlined_call_operand.hbm [shape: bf16[1024,512], index: 3, kind: input, shape index: {}]   ;;  %s15147_s4 = inlined_call_operand.hbm [shape: f32[1,512], index: 4, kind: input, shape index: {}]   ;;  %s15148_s5 = inlined_call_operand.hbm [shape: bf16[512,128], index: 5, kind: input, shape index: {}]   ;;  %s15149_s6 = inlined_call_operand.hbm [shape: f32[1,128], index: 6, kind: input, shape index: {}]   ;;  %s15150_s7 = inlined_call_operand.vmem [shape: f32[16,128], index: 7, kind: output, shape index: {}]  }
   0x1   :  { %15155 = sst [smem:[#allocation18_spill]] %s15145_s2 }
   0x2   :  { %15156 = sst [smem:[#allocation19_spill]] %s15147_s4 }
   0x3   :  { %12 = vsyncpa [#allocation5], 0 }
   0x4   :  { %14 = vsyncpa [#allocation5 + $0x1], 0 }
   0x5   :  { %15 = vsyncpa [#allocation7], 0 }
   0x6   :  { %16 = vsyncpa [#allocation10], 0 }
   0x7   :  { %17 = vsyncpa [#allocation13], 0  ;;  %s13681_s24 = smov 0   ;;  %s13683_s25 = smov 0  }
   0x8   :  { %s13685_s26 = smov 0   ;;  %s13687_s27 = smov 0  }
   0x9 LB: > { %s13700_s28 = sadd.s32 4294967295, %s13625_s27   ;;  %s13703_s29 = sadd.s32 1, %s13625_s27   ;;  %s13625_s27 = sphi %s13687_s27, %s15178_s27   ;;  %s13621_s26 = sphi %s13685_s26, %s15177_s26   ;;  %s13617_s25 = sphi %s13683_s25, %s15176_s25   ;;  %s13613_s24 = sphi %s13681_s24, %s15175_s24  }
   0xa   : > { %s27_s30 = ssub.s32 %s13625_s27, %s13703_s29  ;;  %s30_s8 = sadd.s32 1, %s13621_s26 }
   0xb   : > { %p28_p0 = scmp.eq.s32.totalorder %s27_s30, 0  ;;  %p37_p1 = scmp.ne.s32.totalorder %s13621_s26, %s13617_s25 }
   0xc   : > { %p38_p2 = scmp.eq.s32.totalorder %s13625_s27, 0  ;;  %p69_p3 = scmp.ne.s32.totalorder %s13617_s25, %s13613_s24 }
   0xd   : > { %s13713_s9 = scalar_select %p28_p0, %s13621_s26, %s30_s8  }
   0xe   : > { %p13715_p4 = por %p38_p2, %p37_p1  ;;  %p15151_p5 = scmp.eq.s32.totalorder %s13700_s28, 0 }
   0xf   : > { %p11219_p6 = scmp.ge.s32.totalorder %s13625_s27, 1  ;;  %p206_p7 = scmp.lt.s32.totalorder %s13625_s27, 3 }
  0x10   : > { %s15157_s10 = scalar_select %p13715_p4, 1, 0 }
  0x11   : > { %p13724_p8 = por %p15151_p5, %p69_p3  ;;  %p13729_p10 = pnand %p11219_p6, %p206_p7 }
  0x12   : > { %s13627_s13 = smov [#allocation6]   ;;  %s13628_s15 = smov [#allocation9]  }
  0x13   : > { %s15158_s11 = scalar_select %p13724_p8, 1, 0 }
  0x14   : > { %s15159_s12 = scalar_select %p13729_p10, 1, 0 }
  0x15   : > { %s219_s14 = sshll.u32 %s13627_s13, 4  ;;  %p12873_p11 = pneg %p13729_p10  ;;  %s220_s14 = int_to_ptr.vmem [resolvable:$true] %s219_s14 }
  0x16   : > { %s243_s16 = sshll.u32 %s13628_s15, 4  ;;  %s13629_s18 = smov [#allocation8]   ;;  %s13741_s16 = int_to_ptr.vmem [resolvable:$true] %s243_s16 }
  0x17   : > { %p13737_p12 = pnand %p12873_p11, %p15151_p5  ;;  %s229_s19 = sshll.u32 %s13629_s18, 4  ;;  %s13743_s19 = int_to_ptr.vmem [resolvable:$true] %s229_s19 }
  0x18   : > { %s15161_s2 = sld [smem:[#allocation18_spill]] }
  0x19   : > { %p13753_p0 = pneg %p13737_p12 }
  0x1e   : > { %s13411_s22 = scalar_lea.hbm %s15161_s2, 128 }
  0x1f   : > { %p13412_p13 = scmp.ne.s32.totalorder %s15161_s2, %s13411_s22  ;;  %p13418_p3 = scmp.lt.u32.totalorder %s13411_s22, %s15161_s2 }
  0x21   : > { %p13414_p1 = pnand %p13753_p0, %p13412_p13 }
  0x23   : > { %p13415_p2 = pneg %p13414_p1 }
  0x25   : > { %p13420_p6 = pnand %p13418_p3, %p13415_p2 }
  0x27   : > { %13423 = shalt.err (!%p13420_p6)
}
  0x28   : > { %s13424_s15 = scalar_lea.vmem %s220_s14, 128  ;;  %p13432_p5 = scmp.lt.s32.totalorder %s220_s14, %s220_s14 }
  0x29   : > { %p13425_p7 = scmp.ne.s32.totalorder %s220_s14, %s13424_s15  ;;  %p13433_p8 = scmp.lt.s32.totalorder %s13424_s15, %s13424_s15 }
  0x2b   : > { %p13427_p11 = pnand %p13425_p7, %p13753_p0  ;;  %p13434_p10 = por %p13433_p8, %p13432_p5 }
  0x2d   : > { %p13428_p9 = pneg %p13427_p11 }
  0x2f   : > { %p13435_p4 = pnand %p13434_p10, %p13428_p9 }
  0x31   : > { %13438 = shalt.err (!%p13435_p4)
}
  0x32   : > { %12876 = dma.hbm_to_vmem [thread:$0]  (!%p13737_p12), %s15161_s2, 128, %s220_s14, [#allocation7]  }
  0x33   : > { %s15163_s4 = sld [smem:[#allocation19_spill]] }
  0x39   : > { %s13439_s23 = scalar_lea.hbm %s15163_s4, 64 }
  0x3a   : > { %p13440_p13 = scmp.ne.s32.totalorder %s15163_s4, %s13439_s23  ;;  %p13446_p4 = scmp.lt.u32.totalorder %s13439_s23, %s15163_s4 }
  0x3c   : > { %p13442_p1 = pnand %p13440_p13, %p13753_p0 }
  0x3e   : > { %p13443_p5 = pneg %p13442_p1 }
  0x40   : > { %p13448_p8 = pnand %p13446_p4, %p13443_p5 }
  0x42   : > { %13451 = shalt.err (!%p13448_p8)
}
  0x43   : > { %s13452_s14 = scalar_lea.vmem %s13741_s16, 64  ;;  %p13460_p3 = scmp.lt.s32.totalorder %s13741_s16, %s13741_s16 }
  0x44   : > { %p13453_p9 = scmp.ne.s32.totalorder %s13741_s16, %s13452_s14  ;;  %p13461_p6 = scmp.lt.s32.totalorder %s13452_s14, %s13452_s14 }
  0x46   : > { %p13455_p10 = pnand %p13453_p9, %p13753_p0  ;;  %p13462_p7 = por %p13461_p6, %p13460_p3 }
  0x48   : > { %p13456_p2 = pneg %p13455_p10 }
  0x4a   : > { %p13463_p11 = pnand %p13462_p7, %p13456_p2 }
  0x4c   : > { %13466 = shalt.err (!%p13463_p11)
}
  0x4d   : > { %12882 = dma.hbm_to_vmem [thread:$0]  (!%p13737_p12), %s15163_s4, 64, %s13741_s16, [#allocation10]  }
  0x4e   : > { %s13467_s23 = scalar_lea.hbm %s15146_s3, 32768 }
  0x4f   : > { %p13468_p13 = scmp.ne.s32.totalorder %s15146_s3, %s13467_s23  ;;  %p13474_p4 = scmp.lt.u32.totalorder %s13467_s23, %s15146_s3 }
  0x51   : > { %p13470_p1 = pnand %p13468_p13, %p13753_p0 }
  0x53   : > { %p13471_p5 = pneg %p13470_p1 }
  0x55   : > { %p13476_p8 = pnand %p13474_p4, %p13471_p5 }
  0x57   : > { %13479 = shalt.err (!%p13476_p8)
}
  0x58   : > { %s13480_s16 = scalar_lea.vmem %s13743_s19, 32768  ;;  %p13488_p3 = scmp.lt.s32.totalorder %s13743_s19, %s13743_s19 }
  0x59   : > { %p13481_p9 = scmp.ne.s32.totalorder %s13743_s19, %s13480_s16  ;;  %p13489_p6 = scmp.lt.s32.totalorder %s13480_s16, %s13480_s16 }
  0x5b   : > { %p13483_p10 = pnand %p13481_p9, %p13753_p0  ;;  %p13490_p7 = por %p13489_p6, %p13488_p3 }
  0x5d   : > { %p13484_p2 = pneg %p13483_p10 }
  0x5f   : > { %p13491_p11 = pnand %p13490_p7, %p13484_p2 }
  0x61   : > { %13494 = shalt.err (!%p13491_p11)
}
  0x62   : > { %s13630_s14 = smov 256   ;;  %s13631_s18 = smov 16  }
  0x63   : > { %12879 = dma.hbm_to_vmem [thread:$0]  (!%p13737_p12), %s15146_s3, 32768, %s13743_s19, [#allocation7], %s13630_s14, %s13630_s14, %s13631_s18  }
  0x64   : > { %s13632_s22 = smov [#allocation11]   ;;  %s13495_s13 = scalar_lea.hbm %s15148_s5, 4096 }
  0x65   : > { %s253_s23 = sshll.u32 %s13632_s22, 4  ;;  %p13496_p13 = scmp.ne.s32.totalorder %s15148_s5, %s13495_s13  ;;  %s254_s23 = int_to_ptr.vmem [resolvable:$true] %s253_s23 }
  0x66   : > { %p13502_p4 = scmp.lt.u32.totalorder %s13495_s13, %s15148_s5 }
  0x67   : > { %p13498_p1 = pnand %p13496_p13, %p13753_p0 }
  0x69   : > { %p13499_p5 = pneg %p13498_p1 }
  0x6b   : > { %p13504_p8 = pnand %p13502_p4, %p13499_p5 }
  0x6d   : > { %13507 = shalt.err (!%p13504_p8)
}
  0x6e   : > { %s13508_s19 = scalar_lea.vmem %s254_s23, 4096  ;;  %p13516_p3 = scmp.lt.s32.totalorder %s254_s23, %s254_s23 }
  0x6f   : > { %p13509_p9 = scmp.ne.s32.totalorder %s254_s23, %s13508_s19  ;;  %p13517_p6 = scmp.lt.s32.totalorder %s13508_s19, %s13508_s19 }
  0x71   : > { %p13511_p10 = pnand %p13509_p9, %p13753_p0  ;;  %p13518_p7 = por %p13517_p6, %p13516_p3 }
  0x73   : > { %p13512_p2 = pneg %p13511_p10 }
  0x75   : > { %p13519_p11 = pnand %p13518_p7, %p13512_p2 }
  0x77   : > { %13522 = shalt.err (!%p13519_p11)
}
  0x78   : > { %s13633_s14 = smov 64   ;;  %s13634_s18 = smov 4  }
  0x79   : > { %12885 = dma.hbm_to_vmem [thread:$0]  (!%p13737_p12), %s15148_s5, 4096, %s254_s23, [#allocation10], %s13633_s14, %s13633_s14, %s13634_s18  }
  0x7a   : > { %s13635_s20 = smov [#allocation12]   ;;  %s13523_s8 = scalar_lea.hbm %s15149_s6, 16 }
  0x7b   : > { %s267_s21 = sshll.u32 %s13635_s20, 4  ;;  %p13524_p13 = scmp.ne.s32.totalorder %s15149_s6, %s13523_s8  ;;  %s268_s21 = int_to_ptr.vmem [resolvable:$true] %s267_s21 }
  0x7c   : > { %p13530_p4 = scmp.lt.u32.totalorder %s13523_s8, %s15149_s6 }
  0x7d   : > { %p13526_p1 = pnand %p13524_p13, %p13753_p0 }
  0x7f   : > { %p13527_p5 = pneg %p13526_p1 }
  0x81   : > { %p13532_p8 = pnand %p13530_p4, %p13527_p5 }
  0x83   : > { %13535 = shalt.err (!%p13532_p8)
}
  0x84   : > { %s13536_s23 = scalar_lea.vmem %s268_s21, 16  ;;  %s13543_s14 = scalar_lea.vmem %s268_s21, 32 }
  0x85   : > { %p13537_p9 = scmp.ne.s32.totalorder %s268_s21, %s13536_s23  ;;  %p13544_p3 = scmp.lt.s32.totalorder %s268_s21, %s268_s21 }
  0x86   : > { %p13545_p6 = scmp.lt.s32.totalorder %s13543_s14, %s13536_s23 }
  0x87   : > { %p13539_p10 = pnand %p13537_p9, %p13753_p0 }
  0x88   : > { %p13546_p7 = por %p13545_p6, %p13544_p3 }
  0x89   : > { %p13540_p2 = pneg %p13539_p10 }
  0x8b   : > { %p13547_p11 = pnand %p13546_p7, %p13540_p2 }
  0x8d   : > { %13550 = shalt.err (!%p13547_p11)
}
  0x8e   : > { %12888 = dma.hbm_to_vmem [thread:$0]  (!%p13737_p12), %s15149_s6, 16, %s268_s21, [#allocation13]  }
  0x8f   : > { %p11225_p13 = scmp.ge.s32.totalorder %s13625_s27, 2 }
  0x90   : > { %p15164_p1 = scmp.ne.s32.totalorder (!%p11225_p13), %s15157_s10, 0 }
  0x91   : > { %274 = sbr.rel (%p11225_p13) target bundleno = 193 (0xc1), region = 36 }
  0x98   : > { %277 = sbr.rel (!%p15164_p1) target bundleno = 166 (0xa6), region = 40  ;;  %s279_s30 = sand.u32 (%p15164_p1), 1, %s13621_s26  }
  0x99   : > { %s12639_s4 = smul.u32 (%p15164_p1), 68, %s13625_s27 }
  0x9a   : > { %s12847_s20 = smul.u32 (%p15164_p1), 136, %s279_s30 }
  0x9b   : > { %s13859_s8 = scalar_lea.vmem (%p15164_p1), %s15143_s0, %s12639_s4 }
  0x9c   : > { %v299_v0 = vld [vmem:[%s13859_s8] sm:$0xff] (%p15164_p1)  ;;  %v301_v1 = vld [vmem:[%s13859_s8 + $0x8] sm:$0xff] (%p15164_p1)  ;;  %v303_v2 = vld [vmem:[%s13859_s8 + $0x10] sm:$0xff] (%p15164_p1)  ;;  %s13864_s17 = scalar_lea.vmem (%p15164_p1), [#allocation3], %s12847_s20 }
  0x9d   : > { %300 = vst [vmem:[%s13864_s17] sm:$0xff] (%p15164_p1), %v299_v0  ;;  %302 = vst [vmem:[%s13864_s17 + $0x8] sm:$0xff] (%p15164_p1), %v301_v1  ;;  %v305_v3 = vld [vmem:[%s13859_s8 + $0x18] sm:$0xff] (%p15164_p1)  ;;  %v307_v4 = vld [vmem:[%s13859_s8 + $0x20] sm:$0xff] (%p15164_p1) }
  0x9e   : > { %304 = vst [vmem:[%s13864_s17 + $0x10] sm:$0xff] (%p15164_p1), %v303_v2  ;;  %v309_v5 = vld [vmem:[%s13859_s8 + $0x28] sm:$0xff] (%p15164_p1)  ;;  %306 = vst [vmem:[%s13864_s17 + $0x18] sm:$0xff] (%p15164_p1), %v305_v3  ;;  %v311_v6 = vld [vmem:[%s13859_s8 + $0x30] sm:$0xff] (%p15164_p1) }
  0x9f   : > { %308 = vst [vmem:[%s13864_s17 + $0x20] sm:$0xff] %v307_v4  ;;  %310 = vst [vmem:[%s13864_s17 + $0x28] sm:$0xff] %v309_v5  ;;  %v313_v7 = vld [vmem:[%s13859_s8 + $0x38] sm:$0xff]  ;;  %v315_v8 = vld [vmem:[%s13859_s8 + $0x88] sm:$0xff] }
  0xa0   : > { %312 = vst [vmem:[%s13864_s17 + $0x30] sm:$0xff] %v311_v6  ;;  %314 = vst [vmem:[%s13864_s17 + $0x38] sm:$0xff] %v313_v7  ;;  %v317_v9 = vld [vmem:[%s13859_s8 + $0x90] sm:$0xff]  ;;  %v319_v10 = vld [vmem:[%s13859_s8 + $0x98] sm:$0xff] }
  0xa1   : > { %316 = vst [vmem:[%s13864_s17 + $0x44] sm:$0xff] %v315_v8  ;;  %v321_v11 = vld [vmem:[%s13859_s8 + $0xa0] sm:$0xff]  ;;  %318 = vst [vmem:[%s13864_s17 + $0x4c] sm:$0xff] %v317_v9  ;;  %v323_v12 = vld [vmem:[%s13859_s8 + $0xa8] sm:$0xff] }
  0xa2   : > { %320 = vst [vmem:[%s13864_s17 + $0x54] sm:$0xff] %v319_v10  ;;  %322 = vst [vmem:[%s13864_s17 + $0x5c] sm:$0xff] %v321_v11  ;;  %v325_v13 = vld [vmem:[%s13859_s8 + $0xb0] sm:$0xff]  ;;  %v327_v14 = vld [vmem:[%s13859_s8 + $0xb8] sm:$0xff] }
  0xa3   : > { %324 = vst [vmem:[%s13864_s17 + $0x64] sm:$0xff] %v323_v12  ;;  %326 = vst [vmem:[%s13864_s17 + $0x6c] sm:$0xff] %v325_v13  ;;  %v329_v15 = vld [vmem:[%s13859_s8 + $0xc0] sm:$0xff]  ;;  %v11229_v17 = vld [vmem:[%s13859_s8 + $0xc8] sm:$0xf] }
  0xa4   : > { %328 = vst [vmem:[%s13864_s17 + $0x74] sm:$0xff] %v327_v14  ;;  %v11227_v16 = vld [vmem:[%s13859_s8 + $0x40] sm:$0xf]  ;;  %330 = vst [vmem:[%s13864_s17 + $0x7c] sm:$0xff] %v329_v15 }
  0xa5   : > { %11228 = vst [vmem:[%s13864_s17 + $0x40] sm:$0xf] %v11227_v16  ;;  %11230 = vst [vmem:[%s13864_s17 + $0x84] sm:$0xf] %v11229_v17 }
  0xa6 PF: > { %s348_s21 = sand.u32 1, %s13621_s26   ;;  %s12642_s13 = smul.u32 139264, %s13625_s27 }
  0xa7   : > { %s12848_s15 = smul.u32 8704, %s348_s21  ;;  %s13908_s2 = scalar_lea.sflag [#allocation5], %s348_s21 }
  0xa8   : > { %s13904_s23 = scalar_lea.hbm %s15144_s1, %s12642_s13  ;;  %p15165_p0 = scmp.ne.s32.totalorder %s15157_s10, 0 }
  0xa9   : > { %s352_s14 = scalar_lea.vmem [#allocation4], %s12848_s15  ;;  %s13551_s30 = scalar_lea.hbm %s13904_s23, 139264 }
  0xaa   : > { %s360_s18 = sshll.u32 %s352_s14, 4  ;;  %p13552_p12 = scmp.ne.s32.totalorder %s13904_s23, %s13551_s30  ;;  %s13906_s18 = int_to_ptr.vmem [resolvable:$true] %s360_s18 }
  0xab   : > { %s13555_s20 = scalar_lea.hbm %s15144_s1, 278528  ;;  %p13556_p8 = scmp.lt.u32.totalorder %s13904_s23, %s15144_s1 }
  0xac   : > { %p13553_p5 = pnand %p13552_p12, %p15165_p0  ;;  %p13557_p9 = scmp.lt.u32.totalorder %s13555_s20, %s13551_s30 }
  0xad   : > { %p13559_p2 = scmp.lt.u32.totalorder %s13551_s30, %s13904_s23 }
  0xae   : > { %p13554_p4 = pneg %p13553_p5  ;;  %p13558_p10 = por %p13557_p9, %p13556_p8 }
  0xb0   : > { %p13560_p3 = por %p13559_p2, %p13558_p10 }
  0xb2   : > { %p13561_p6 = pnand %p13560_p3, %p13554_p4 }
  0xb4   : > { %13564 = shalt.err (!%p13561_p6)
}
  0xb5   : > { %s13565_s8 = scalar_lea.vmem %s13906_s18, 139264  ;;  %s13636_s17 = smov [#allocation4]  }
  0xb6   : > { %p13566_p7 = scmp.ne.s32.totalorder %s13906_s18, %s13565_s8  ;;  %s13569_s21 = sshll.u32 %s13636_s17, 4  ;;  %s13570_s21 = int_to_ptr.vmem [resolvable:$false] %s13569_s21 }
  0xb7   : > { %s13571_s13 = scalar_lea.vmem %s13570_s21, 278528  ;;  %p13572_p1 = scmp.lt.s32.totalorder %s13906_s18, %s13570_s21 }
  0xb8   : > { %p13567_p11 = pnand %p13566_p7, %p15165_p0  ;;  %p13573_p12 = scmp.lt.s32.totalorder %s13571_s13, %s13565_s8 }
  0xba   : > { %p13568_p13 = pneg %p13567_p11  ;;  %p13574_p5 = por %p13573_p12, %p13572_p1 }
  0xbc   : > { %p13575_p8 = pnand %p13574_p5, %p13568_p13 }
  0xbe   : > { %13578 = shalt.err (!%p13575_p8)
}
  0xbf   : > { %s13637_s15 = smov 512   ;;  %s13638_s16 = smov 32  }
  0xc0   : > { %12861 = dma.hbm_to_vmem [thread:$0]  (%p15165_p0), %s13904_s23, 139264, %s13906_s18, %s13908_s2, %s13637_s15, %s13637_s15, %s13638_s16  }
  0xc1 PF: > { %p15166_p4 = scmp.ne.s32.totalorder %s15159_s12, 0 }
  0xc2   : > { %s375_s19 = sand.u32 (!%p15166_p4), 1, %s13617_s25   ;;  %p15167_p9 = scmp.ne.s32.totalorder (!%p15166_p4), %s15158_s11, 0 }
  0xc3   : > { %372 = sbr.rel (%p15166_p4) target bundleno = 2218 (0x8aa), region = 70  ;;  %s382_s4 = scalar_lea.sflag (!%p15166_p4), [#allocation5], %s375_s19 }
  0xc4   : > { %s12849_s14 = smul.u32 (!%p15166_p4), 136, %s375_s19 }
  0xc5   : > { %s12850_s30 = smul.u32 (!%p15166_p4), 8704, %s375_s19 }
  0xc6   : > { %s13935_s27 = scalar_lea.vmem (!%p15166_p4), [#allocation3], %s12849_s14 }
  0xc7   : > { %s13937_s20 = scalar_lea.vmem (!%p15166_p4), [#allocation4], %s12850_s30 }
  0xca   : > { %13596 = dma.done.wait (%p15167_p9), %s382_s4, 139264  }
  0xcb   : > { %13598 = vsyncadd (%p15167_p9), %s382_s4, 4294828032  ;;  %p15168_p0 = scmp.eq.s32.totalorder %s13700_s28, 0 }
  0xcd   : > { %13600 = dma.done.wait (%p15168_p0), [#allocation7], 32896   ;;  %p15169_p10 = pmov %p15168_p0 }
  0xce   : > { %p15170_p2 = pmov %p15168_p0 }
  0xcf   : > { %13602 = vsyncadd (%p15169_p10), [#allocation7], 4294934400 }
  0xd0   : > { %13604 = dma.done.wait (%p15170_p2), [#allocation10], 4160   ;;  %p15171_p3 = pmov %p15168_p0 }
  0xd1   : > { %p15172_p6 = pmov %p15168_p0 }
  0xd2   : > { %13606 = vsyncadd (%p15171_p3), [#allocation10], 4294963136 }
  0xd3   : > { %13608 = dma.done.wait (%p15172_p6), [#allocation13], 16   ;;  %p15173_p7 = pmov %p15168_p0 }
  0xd4   : > { %p15174_p11 = scmp.ne.s32.totalorder %s13700_s28, 0 }
  0xd5   : > { %13610 = vsyncadd (%p15173_p7), [#allocation13], 4294967280  ;;  %v13639_v18 = vmov (!%p15174_p11), 0.0  }
  0xd6   : > { %441 = sbr.rel (%p15174_p11) target bundleno = 222 (0xde), region = 102  ;;  %442 = vst [vmem:[#allocation2] sm:$0xff] (!%p15174_p11), %v13639_v18  ;;  %443 = vst [vmem:[#allocation2 + $0x8] sm:$0xff] (!%p15174_p11), %v13639_v18 }
  0xd7   : > { %444 = vst [vmem:[#allocation2 + $0x10] sm:$0xff] (!%p15174_p11), %v13639_v18  ;;  %445 = vst [vmem:[#allocation2 + $0x18] sm:$0xff] (!%p15174_p11), %v13639_v18 }
  0xd8   : > { %446 = vst [vmem:[#allocation2 + $0x20] sm:$0xff] (!%p15174_p11), %v13639_v18  ;;  %447 = vst [vmem:[#allocation2 + $0x28] sm:$0xff] (!%p15174_p11), %v13639_v18 }
  0xd9   : > { %448 = vst [vmem:[#allocation2 + $0x30] sm:$0xff] (!%p15174_p11), %v13639_v18  ;;  %449 = vst [vmem:[#allocation2 + $0x38] sm:$0xff] (!%p15174_p11), %v13639_v18 }
  0xda   : > { %450 = vst [vmem:[#allocation2 + $0x40] sm:$0xff] (!%p15174_p11), %v13639_v18  ;;  %451 = vst [vmem:[#allocation2 + $0x48] sm:$0xff] (!%p15174_p11), %v13639_v18 }
  0xdb   : > { %452 = vst [vmem:[#allocation2 + $0x50] sm:$0xff] (!%p15174_p11), %v13639_v18  ;;  %453 = vst [vmem:[#allocation2 + $0x58] sm:$0xff] (!%p15174_p11), %v13639_v18 }
  0xdc   : > { %454 = vst [vmem:[#allocation2 + $0x60] sm:$0xff] (!%p15174_p11), %v13639_v18  ;;  %455 = vst [vmem:[#allocation2 + $0x68] sm:$0xff] (!%p15174_p11), %v13639_v18 }
  0xdd   : > { %456 = vst [vmem:[#allocation2 + $0x70] sm:$0xff] %v13639_v18  ;;  %457 = vst [vmem:[#allocation2 + $0x78] sm:$0xff] %v13639_v18 }
  0xde PF: > { %v492_v19 = vld [vmem:[%s13937_s20] sm:$0xff]  ;;  %v493_v21 = vld [vmem:[%s13937_s20 + $0x8] sm:$0xff]  ;;  %p12345_p13 = scmp.ne.s32.totalorder %s13700_s28, 1 }
  0xdf   : > { %v496_v20 = vld [vmem:[%s13937_s20 + $0x20] sm:$0xff]  ;;  %v497_v23 = vld [vmem:[%s13937_s20 + $0x28] sm:$0xff] }
  0xe0   : > { %v11258_v22 = vcombine.high %v492_v19, %v496_v20  ;;  %v11257_v24 = vcombine.low %v492_v19, %v496_v20  ;;  %v500_v25 = vld [vmem:[%s13937_s20 + $0x40] sm:$0xff]  ;;  %v11260_v27 = vcombine.high %v493_v21, %v497_v23  ;;  %v11259_v28 = vcombine.low %v493_v21, %v497_v23  ;;  %v501_v30 = vld [vmem:[%s13937_s20 + $0x48] sm:$0xff] }
  0xe1   : > { %v504_v26 = vld [vmem:[%s13937_s20 + $0x60] sm:$0xff]  ;;  %v505_v31 = vld [vmem:[%s13937_s20 + $0x68] sm:$0xff] }
  0xe2   : > { %v11266_v29 = vcombine.high %v500_v25, %v504_v26  ;;  %v508_v32 = vld [vmem:[%s13937_s20 + $0x80] sm:$0xff]  ;;  %7106 = vmatprep.subr.bf16.mxu0 %v11258_v22  ;;  %v11268_v33 = vcombine.high %v501_v30, %v505_v31  ;;  %v509_v35 = vld [vmem:[%s13937_s20 + $0x88] sm:$0xff]  ;;  %7493 = vmatprep.subr.bf16.mxu1 %v11260_v27  ;;  %v11265_v37 = vcombine.low %v500_v25, %v504_v26 }
  0xe3   : > { %v512_v34 = vld [vmem:[%s13937_s20 + $0xa0] sm:$0xff]  ;;  %v513_v36 = vld [vmem:[%s13937_s20 + $0xa8] sm:$0xff]  ;;  %7107 = vmatpush1.bf16.msra.mxu0 %v11257_v24  ;;  %7494 = vmatpush1.bf16.msra.mxu1 %v11259_v28  ;;  %v11267_v38 = vcombine.low %v501_v30, %v505_v31 }
  0xe4   : > { %7108 = vmatprep.subr.bf16.mxu0 %v11266_v29  ;;  %v11274_v39 = vcombine.high %v508_v32, %v512_v34  ;;  %7495 = vmatprep.subr.bf16.mxu1 %v11268_v33  ;;  %v11276_v40 = vcombine.high %v509_v35, %v513_v36  ;;  %v516_v41 = vld [vmem:[%s13937_s20 + $0xc0] sm:$0xff]  ;;  %v517_v43 = vld [vmem:[%s13937_s20 + $0xc8] sm:$0xff]  ;;  %v11273_v45 = vcombine.low %v508_v32, %v512_v34 }
  0xe5   : > { %v520_v42 = vld [vmem:[%s13937_s20 + $0xe0] sm:$0xff]  ;;  %v521_v44 = vld [vmem:[%s13937_s20 + $0xe8] sm:$0xff]  ;;  %v11275_v46 = vcombine.low %v509_v35, %v513_v36 }
  0xe6   : > { %v11282_v47 = vcombine.high %v516_v41, %v520_v42  ;;  %v11284_v48 = vcombine.high %v517_v43, %v521_v44  ;;  %v524_v49 = vld [vmem:[%s13937_s20 + $0x100] sm:$0xff]  ;;  %v525_v51 = vld [vmem:[%s13937_s20 + $0x108] sm:$0xff]  ;;  %v11281_v53 = vcombine.low %v516_v41, %v520_v42  ;;  %v11283_v54 = vcombine.low %v517_v43, %v521_v44 }
  0xe7   : > { %7109 = vmatpush1.bf16.msra.mxu0 %v11265_v37  ;;  %7496 = vmatpush1.bf16.msra.mxu1 %v11267_v38  ;;  %v528_v50 = vld [vmem:[%s13937_s20 + $0x120] sm:$0xff]  ;;  %v529_v52 = vld [vmem:[%s13937_s20 + $0x128] sm:$0xff] }
  0xe8   : > { %7110 = vmatprep.subr.bf16.mxu0 %v11274_v39  ;;  %7497 = vmatprep.subr.bf16.mxu1 %v11276_v40  ;;  %v11290_v55 = vcombine.high %v524_v49, %v528_v50  ;;  %v11292_v56 = vcombine.high %v525_v51, %v529_v52  ;;  %v532_v57 = vld [vmem:[%s13937_s20 + $0x140] sm:$0xff]  ;;  %v533_v59 = vld [vmem:[%s13937_s20 + $0x148] sm:$0xff]  ;;  %v11289_v61 = vcombine.low %v524_v49, %v528_v50 }
  0xe9   : > { %v536_v58 = vld [vmem:[%s13937_s20 + $0x160] sm:$0xff]  ;;  %v537_v60 = vld [vmem:[%s13937_s20 + $0x168] sm:$0xff]  ;;  %v11291_v62 = vcombine.low %v525_v51, %v529_v52 }
  0xea   : > { %v11298_v63 = vcombine.high %v532_v57, %v536_v58  ;;  %v11300_v0 = vcombine.high %v533_v59, %v537_v60  ;;  %v540_v1 = vld [vmem:[%s13937_s20 + $0x180] sm:$0xff]  ;;  %v541_v3 = vld [vmem:[%s13937_s20 + $0x188] sm:$0xff]  ;;  %v11297_v5 = vcombine.low %v532_v57, %v536_v58  ;;  %v11299_v6 = vcombine.low %v533_v59, %v537_v60 }
  0xeb   : > { %7111 = vmatpush1.bf16.msra.mxu0 %v11273_v45  ;;  %7498 = vmatpush1.bf16.msra.mxu1 %v11275_v46  ;;  %v544_v2 = vld [vmem:[%s13937_s20 + $0x1a0] sm:$0xff]  ;;  %v545_v4 = vld [vmem:[%s13937_s20 + $0x1a8] sm:$0xff] }
  0xec   : > { %7112 = vmatprep.subr.bf16.mxu0 %v11282_v47  ;;  %7499 = vmatprep.subr.bf16.mxu1 %v11284_v48  ;;  %v11306_v7 = vcombine.high %v540_v1, %v544_v2  ;;  %v11308_v8 = vcombine.high %v541_v3, %v545_v4  ;;  %v548_v9 = vld [vmem:[%s13937_s20 + $0x1c0] sm:$0xff]  ;;  %v549_v12 = vld [vmem:[%s13937_s20 + $0x1c8] sm:$0xff]  ;;  %v11305_v14 = vcombine.low %v540_v1, %v544_v2 }
  0xed   : > { %v552_v10 = vld [vmem:[%s13937_s20 + $0x1e0] sm:$0xff]  ;;  %v553_v13 = vld [vmem:[%s13937_s20 + $0x1e8] sm:$0xff]  ;;  %v11307_v15 = vcombine.low %v541_v3, %v545_v4 }
  0xee   : > { %v12944_v11 = vld [vmem:[%s13935_s27 + $0x4] ss:$68 sps:$4 sm:$0xff]   ;;  %v11314_v16 = vcombine.high %v548_v9, %v552_v10  ;;  %v11316_v17 = vcombine.high %v549_v12, %v553_v13  ;;  %v557_v20 = vld [vmem:[%s13937_s20 + $0x208] sm:$0xff]  ;;  %v11313_v22 = vcombine.low %v548_v9, %v552_v10  ;;  %v11315_v23 = vcombine.low %v549_v12, %v553_v13 }
  0xef   : > { %7113 = vmatpush1.bf16.msra.mxu0 %v11281_v53  ;;  %7500 = vmatpush1.bf16.msra.mxu1 %v11283_v54  ;;  %v556_v18 = vld [vmem:[%s13937_s20 + $0x200] sm:$0xff]  ;;  %v561_v21 = vld [vmem:[%s13937_s20 + $0x228] sm:$0xff] }
  0xf0   : > { %7114 = vmatprep.subr.bf16.mxu0 %v11290_v55  ;;  %7501 = vmatprep.subr.bf16.mxu1 %v11292_v56  ;;  %v560_v19 = vld [vmem:[%s13937_s20 + $0x220] sm:$0xff]  ;;  %v11324_v25 = vcombine.high %v557_v20, %v561_v21  ;;  %v565_v28 = vld [vmem:[%s13937_s20 + $0x248] sm:$0xff]  ;;  %v11323_v31 = vcombine.low %v557_v20, %v561_v21 }
  0xf1   : > { %7138 = vmatprep.mubr.bf16.mxu0 %v12944_v11  ;;  %7525 = vmatprep.mubr.bf16.mxu1 %v12944_v11  ;;  %v11322_v24 = vcombine.high %v556_v18, %v560_v19  ;;  %v564_v26 = vld [vmem:[%s13937_s20 + $0x240] sm:$0xff]  ;;  %v569_v29 = vld [vmem:[%s13937_s20 + $0x268] sm:$0xff]  ;;  %v11321_v30 = vcombine.low %v556_v18, %v560_v19 }
  0xf2   : > { %v568_v27 = vld [vmem:[%s13937_s20 + $0x260] sm:$0xff]  ;;  %v11332_v33 = vcombine.high %v565_v28, %v569_v29  ;;  %v573_v36 = vld [vmem:[%s13937_s20 + $0x288] sm:$0xff]  ;;  %v11331_v39 = vcombine.low %v565_v28, %v569_v29  ;;  %v12946_v28 = vld [vmem:[%s13935_s27] ss:$68 sps:$4 sm:$0xff]  }
  0xf3   : > { %7115 = vmatpush1.bf16.msra.mxu0 %v11289_v61  ;;  %7502 = vmatpush1.bf16.msra.mxu1 %v11291_v62  ;;  %v11330_v32 = vcombine.high %v564_v26, %v568_v27  ;;  %v572_v34 = vld [vmem:[%s13937_s20 + $0x280] sm:$0xff]  ;;  %v577_v37 = vld [vmem:[%s13937_s20 + $0x2a8] sm:$0xff]  ;;  %v11329_v38 = vcombine.low %v564_v26, %v568_v27 }
  0xf4   : > { %7116 = vmatprep.subr.bf16.mxu0 %v11298_v63  ;;  %7503 = vmatprep.subr.bf16.mxu1 %v11300_v0  ;;  %v576_v35 = vld [vmem:[%s13937_s20 + $0x2a0] sm:$0xff]  ;;  %v11340_v41 = vcombine.high %v573_v36, %v577_v37  ;;  %v581_v44 = vld [vmem:[%s13937_s20 + $0x2c8] sm:$0xff]  ;;  %v11339_v47 = vcombine.low %v573_v36, %v577_v37 }
  0xf5   : > { %v11338_v40 = vcombine.high %v572_v34, %v576_v35  ;;  %v580_v42 = vld [vmem:[%s13937_s20 + $0x2c0] sm:$0xff]  ;;  %v585_v45 = vld [vmem:[%s13937_s20 + $0x2e8] sm:$0xff]  ;;  %v11337_v46 = vcombine.low %v572_v34, %v576_v35 }
  0xf6   : > { %v584_v43 = vld [vmem:[%s13937_s20 + $0x2e0] sm:$0xff]  ;;  %v11348_v49 = vcombine.high %v581_v44, %v585_v45  ;;  %v589_v52 = vld [vmem:[%s13937_s20 + $0x308] sm:$0xff]  ;;  %v11347_v55 = vcombine.low %v581_v44, %v585_v45 }
  0xf7   : > { %7117 = vmatpush1.bf16.msra.mxu0 %v11297_v5  ;;  %7504 = vmatpush1.bf16.msra.mxu1 %v11299_v6  ;;  %v11346_v48 = vcombine.high %v580_v42, %v584_v43  ;;  %v588_v50 = vld [vmem:[%s13937_s20 + $0x300] sm:$0xff]  ;;  %v593_v53 = vld [vmem:[%s13937_s20 + $0x328] sm:$0xff]  ;;  %v11345_v54 = vcombine.low %v580_v42, %v584_v43 }
  0xf8   : > { %7118 = vmatprep.subr.bf16.mxu0 %v11306_v7  ;;  %7505 = vmatprep.subr.bf16.mxu1 %v11308_v8  ;;  %v592_v51 = vld [vmem:[%s13937_s20 + $0x320] sm:$0xff]  ;;  %v11356_v57 = vcombine.high %v589_v52, %v593_v53  ;;  %v597_v60 = vld [vmem:[%s13937_s20 + $0x348] sm:$0xff]  ;;  %v11355_v63 = vcombine.low %v589_v52, %v593_v53 }
  0xf9   : > { %v11354_v56 = vcombine.high %v588_v50, %v592_v51  ;;  %v596_v58 = vld [vmem:[%s13937_s20 + $0x340] sm:$0xff]  ;;  %v601_v61 = vld [vmem:[%s13937_s20 + $0x368] sm:$0xff]  ;;  %v11353_v62 = vcombine.low %v588_v50, %v592_v51 }
  0xfa   : > { %v600_v59 = vld [vmem:[%s13937_s20 + $0x360] sm:$0xff]  ;;  %v11364_v1 = vcombine.high %v597_v60, %v601_v61  ;;  %v605_v4 = vld [vmem:[%s13937_s20 + $0x388] sm:$0xff]  ;;  %v11363_v7 = vcombine.low %v597_v60, %v601_v61 }
  0xfb   : > { %7119 = vmatpush1.bf16.msra.mxu0 %v11305_v14  ;;  %7506 = vmatpush1.bf16.msra.mxu1 %v11307_v15  ;;  %v11362_v0 = vcombine.high %v596_v58, %v600_v59  ;;  %v604_v2 = vld [vmem:[%s13937_s20 + $0x380] sm:$0xff]  ;;  %v609_v5 = vld [vmem:[%s13937_s20 + $0x3a8] sm:$0xff]  ;;  %v11361_v6 = vcombine.low %v596_v58, %v600_v59 }
  0xfc   : > { %7120 = vmatprep.subr.bf16.mxu0 %v11314_v16  ;;  %7507 = vmatprep.subr.bf16.mxu1 %v11316_v17  ;;  %v608_v3 = vld [vmem:[%s13937_s20 + $0x3a0] sm:$0xff]  ;;  %v11372_v9 = vcombine.high %v605_v4, %v609_v5  ;;  %v613_v12 = vld [vmem:[%s13937_s20 + $0x3c8] sm:$0xff]  ;;  %v11371_v15 = vcombine.low %v605_v4, %v609_v5 }
  0xfd   : > { %v11370_v8 = vcombine.high %v604_v2, %v608_v3  ;;  %v612_v10 = vld [vmem:[%s13937_s20 + $0x3c0] sm:$0xff]  ;;  %v617_v13 = vld [vmem:[%s13937_s20 + $0x3e8] sm:$0xff]  ;;  %v11369_v14 = vcombine.low %v604_v2, %v608_v3 }
  0xfe   : > { %v616_v11 = vld [vmem:[%s13937_s20 + $0x3e0] sm:$0xff]  ;;  %v11380_v17 = vcombine.high %v613_v12, %v617_v13  ;;  %v621_v20 = vld [vmem:[%s13937_s20 + $0x408] sm:$0xff] }
  0xff   : > { %7121 = vmatpush1.bf16.msra.mxu0 %v11313_v22  ;;  %7508 = vmatpush1.bf16.msra.mxu1 %v11315_v23  ;;  %v11378_v16 = vcombine.high %v612_v10, %v616_v11  ;;  %v620_v18 = vld [vmem:[%s13937_s20 + $0x400] sm:$0xff]  ;;  %v625_v21 = vld [vmem:[%s13937_s20 + $0x428] sm:$0xff]  ;;  %v11377_v22 = vcombine.low %v612_v10, %v616_v11  ;;  %v11379_v23 = vcombine.low %v613_v12, %v617_v13 }
 0x100   : > { %7122 = vmatprep.subr.bf16.mxu0 %v11322_v24  ;;  %7509 = vmatprep.subr.bf16.mxu1 %v11324_v25  ;;  %v624_v19 = vld [vmem:[%s13937_s20 + $0x420] sm:$0xff]  ;;  %v11388_v25 = vcombine.high %v621_v20, %v625_v21  ;;  %v629_v29 = vld [vmem:[%s13937_s20 + $0x448] sm:$0xff] }
 0x101   : > { %v11386_v24 = vcombine.high %v620_v18, %v624_v19  ;;  %v628_v26 = vld [vmem:[%s13937_s20 + $0x440] sm:$0xff]  ;;  %v653_v53 = vld [vmem:[%s13937_s20 + $0x508] sm:$0xff] }
 0x102   : > { %v632_v27 = vld [vmem:[%s13937_s20 + $0x460] sm:$0xff] }
 0x103   : > { %7123 = vmatpush1.bf16.msra.mxu0 %v11321_v30  ;;  %7510 = vmatpush1.bf16.msra.mxu1 %v11323_v31  ;;  %v633_v30 = vld [vmem:[%s13937_s20 + $0x468] sm:$0xff]  ;;  %v11385_v31 = vcombine.low %v620_v18, %v624_v19  ;;  %v636_v34 = vld [vmem:[%s13937_s20 + $0x480] sm:$0xff] }
 0x104   : > { %7124 = vmatprep.subr.bf16.mxu0 %v11330_v32  ;;  %7511 = vmatprep.subr.bf16.mxu1 %v11332_v33  ;;  %v11387_v32 = vcombine.low %v621_v20, %v625_v21  ;;  %v11394_v33 = vcombine.high %v628_v26, %v632_v27  ;;  %v11396_v35 = vcombine.high %v629_v29, %v633_v30  ;;  %v640_v36 = vld [vmem:[%s13937_s20 + $0x4a0] sm:$0xff] }
 0x105   : > { %v12947_v37 = vld [vmem:[%s13935_s27 + $0xc] ss:$68 sps:$4 sm:$0xff]   ;;  %v11402_v42 = vcombine.high %v636_v34, %v640_v36 }
 0x106   : > { %v644_v43 = vld [vmem:[%s13937_s20 + $0x4c0] sm:$0xff] }
 0x107   : > { %7125 = vmatpush1.bf16.msra.mxu0 %v11329_v38  ;;  %7512 = vmatpush1.bf16.msra.mxu1 %v11331_v39  ;;  %v637_v38 = vld [vmem:[%s13937_s20 + $0x488] sm:$0xff]  ;;  %v648_v44 = vld [vmem:[%s13937_s20 + $0x4e0] sm:$0xff] }
 0x108   : > { %7126 = vmatprep.subr.bf16.mxu0 %v11338_v40  ;;  %7513 = vmatprep.subr.bf16.mxu1 %v11340_v41  ;;  %v641_v39 = vld [vmem:[%s13937_s20 + $0x4a8] sm:$0xff]  ;;  %v11393_v40 = vcombine.low %v628_v26, %v632_v27  ;;  %v11395_v41 = vcombine.low %v629_v29, %v633_v30  ;;  %v11410_v50 = vcombine.high %v644_v43, %v648_v44  ;;  %v652_v51 = vld [vmem:[%s13937_s20 + $0x500] sm:$0xff] }
 0x109   : > { %v11404_v45 = vcombine.high %v637_v38, %v641_v39  ;;  %v656_v52 = vld [vmem:[%s13937_s20 + $0x520] sm:$0xff]  ;;  %v693_v30 = vld [vmem:[%s13937_s20 + $0x648] sm:$0xff] }
 0x10a   : > { %v11418_v58 = vcombine.high %v652_v51, %v656_v52  ;;  %v660_v60 = vld [vmem:[%s13937_s20 + $0x540] sm:$0xff] }
 0x10b   : > { %7127 = vmatpush1.bf16.msra.mxu0 %v11337_v46  ;;  %7514 = vmatpush1.bf16.msra.mxu1 %v11339_v47  ;;  %v645_v46 = vld [vmem:[%s13937_s20 + $0x4c8] sm:$0xff]  ;;  %v664_v61 = vld [vmem:[%s13937_s20 + $0x560] sm:$0xff] }
 0x10c   : > { %7128 = vmatprep.subr.bf16.mxu0 %v11346_v48  ;;  %7515 = vmatprep.subr.bf16.mxu1 %v11348_v49  ;;  %v649_v47 = vld [vmem:[%s13937_s20 + $0x4e8] sm:$0xff]  ;;  %v11401_v48 = vcombine.low %v636_v34, %v640_v36  ;;  %v11403_v49 = vcombine.low %v637_v38, %v641_v39  ;;  %v11426_v2 = vcombine.high %v660_v60, %v664_v61  ;;  %v668_v4 = vld [vmem:[%s13937_s20 + $0x580] sm:$0xff] }
 0x10d   : > { %v672_v5 = vld [vmem:[%s13937_s20 + $0x5a0] sm:$0xff]  ;;  %v701_v38 = vld [vmem:[%s13937_s20 + $0x688] sm:$0xff] }
 0x10e   : > { %v11434_v10 = vcombine.high %v668_v4, %v672_v5  ;;  %v676_v12 = vld [vmem:[%s13937_s20 + $0x5c0] sm:$0xff]  ;;  %v705_v39 = vld [vmem:[%s13937_s20 + $0x6a8] sm:$0xff] }
 0x10f   : > { %7129 = vmatpush1.bf16.msra.mxu0 %v11345_v54  ;;  %7516 = vmatpush1.bf16.msra.mxu1 %v11347_v55  ;;  %v11412_v54 = vcombine.high %v645_v46, %v649_v47  ;;  %v657_v55 = vld [vmem:[%s13937_s20 + $0x528] sm:$0xff]  ;;  %v680_v13 = vld [vmem:[%s13937_s20 + $0x5e0] sm:$0xff] }
 0x110   : > { %7130 = vmatprep.subr.bf16.mxu0 %v11354_v56  ;;  %7517 = vmatprep.subr.bf16.mxu1 %v11356_v57  ;;  %v11409_v56 = vcombine.low %v644_v43, %v648_v44  ;;  %v11411_v57 = vcombine.low %v645_v46, %v649_v47  ;;  %v11420_v59 = vcombine.high %v653_v53, %v657_v55  ;;  %v684_v20 = vld [vmem:[%s13937_s20 + $0x600] sm:$0xff]  ;;  %v709_v46 = vld [vmem:[%s13937_s20 + $0x6c8] sm:$0xff] }
 0x111   : > { %v11442_v18 = vcombine.high %v676_v12, %v680_v13  ;;  %v688_v21 = vld [vmem:[%s13937_s20 + $0x620] sm:$0xff]  ;;  %v11468_v43 = vcombine.high %v701_v38, %v705_v39  ;;  %v713_v47 = vld [vmem:[%s13937_s20 + $0x6e8] sm:$0xff] }
 0x112   : > { %v11450_v26 = vcombine.high %v684_v20, %v688_v21  ;;  %v696_v29 = vld [vmem:[%s13937_s20 + $0x660] sm:$0xff] }
 0x113   : > { %7131 = vmatpush1.bf16.msra.mxu0 %v11353_v62  ;;  %7518 = vmatpush1.bf16.msra.mxu1 %v11355_v63  ;;  %v661_v62 = vld [vmem:[%s13937_s20 + $0x548] sm:$0xff]  ;;  %v700_v36 = vld [vmem:[%s13937_s20 + $0x680] sm:$0xff] }
 0x114   : > { %7132 = vmatprep.subr.bf16.mxu0 %v11362_v0  ;;  %7519 = vmatprep.subr.bf16.mxu1 %v11364_v1  ;;  %v665_v63 = vld [vmem:[%s13937_s20 + $0x568] sm:$0xff]  ;;  %v11417_v0 = vcombine.low %v652_v51, %v656_v52  ;;  %v11419_v1 = vcombine.low %v653_v53, %v657_v55  ;;  %v708_v44 = vld [vmem:[%s13937_s20 + $0x6c0] sm:$0xff]  ;;  %v11476_v51 = vcombine.high %v709_v46, %v713_v47 }
 0x115   : > { %v11428_v3 = vcombine.high %v661_v62, %v665_v63  ;;  %v716_v52 = vld [vmem:[%s13937_s20 + $0x700] sm:$0xff]  ;;  %v721_v55 = vld [vmem:[%s13937_s20 + $0x728] sm:$0xff] }
 0x116   : > { %v720_v53 = vld [vmem:[%s13937_s20 + $0x720] sm:$0xff] }
 0x117   : > { %7133 = vmatpush1.bf16.msra.mxu0 %v11361_v6  ;;  %7520 = vmatpush1.bf16.msra.mxu1 %v11363_v7  ;;  %v669_v6 = vld [vmem:[%s13937_s20 + $0x588] sm:$0xff] }
 0x118   : > { %7134 = vmatprep.subr.bf16.mxu0 %v11370_v8  ;;  %7521 = vmatprep.subr.bf16.mxu1 %v11372_v9  ;;  %v673_v7 = vld [vmem:[%s13937_s20 + $0x5a8] sm:$0xff]  ;;  %v11425_v8 = vcombine.low %v660_v60, %v664_v61  ;;  %v11427_v9 = vcombine.low %v661_v62, %v665_v63  ;;  %v724_v60 = vld [vmem:[%s13937_s20 + $0x740] sm:$0xff] }
 0x119   : > { %v11436_v11 = vcombine.high %v669_v6, %v673_v7  ;;  %v728_v61 = vld [vmem:[%s13937_s20 + $0x760] sm:$0xff]  ;;  %v725_v62 = vld [vmem:[%s13937_s20 + $0x748] sm:$0xff] }
 0x11a   : > { %v729_v63 = vld [vmem:[%s13937_s20 + $0x768] sm:$0xff] }
 0x11b   : > { %7135 = vmatpush1.bf16.msra.mxu0 %v11369_v14  ;;  %7522 = vmatpush1.bf16.msra.mxu1 %v11371_v15  ;;  %v677_v14 = vld [vmem:[%s13937_s20 + $0x5c8] sm:$0xff] }
 0x11c   : > { %7136 = vmatprep.subr.bf16.mxu0 %v11378_v16  ;;  %7523 = vmatprep.subr.bf16.mxu1 %v11380_v17  ;;  %v681_v15 = vld [vmem:[%s13937_s20 + $0x5e8] sm:$0xff]  ;;  %v11433_v16 = vcombine.low %v668_v4, %v672_v5  ;;  %v11435_v17 = vcombine.low %v669_v6, %v673_v7  ;;  %v732_v4 = vld [vmem:[%s13937_s20 + $0x780] sm:$0xff] }
 0x11d   : > { %v11444_v19 = vcombine.high %v677_v14, %v681_v15  ;;  %v736_v5 = vld [vmem:[%s13937_s20 + $0x7a0] sm:$0xff]  ;;  %v733_v6 = vld [vmem:[%s13937_s20 + $0x788] sm:$0xff] }
 0x11e   : > { %v737_v7 = vld [vmem:[%s13937_s20 + $0x7a8] sm:$0xff] }
 0x11f   : > { %7137 = vmatpush1.bf16.msra.mxu0 %v11377_v22  ;;  %7524 = vmatpush1.bf16.msra.mxu1 %v11379_v23  ;;  %v685_v22 = vld [vmem:[%s13937_s20 + $0x608] sm:$0xff] }
 0x120   : > { %7149 = vmatprep.subr.bf16.mxu0 %v11386_v24  ;;  %7536 = vmatprep.subr.bf16.mxu1 %v11388_v25  ;;  %v689_v23 = vld [vmem:[%s13937_s20 + $0x628] sm:$0xff]  ;;  %v11441_v24 = vcombine.low %v676_v12, %v680_v13  ;;  %v11443_v25 = vcombine.low %v677_v14, %v681_v15  ;;  %v740_v12 = vld [vmem:[%s13937_s20 + $0x7c0] sm:$0xff] }
 0x121   : > { %v11452_v27 = vcombine.high %v685_v22, %v689_v23  ;;  %v744_v13 = vld [vmem:[%s13937_s20 + $0x7e0] sm:$0xff]  ;;  %v741_v14 = vld [vmem:[%s13937_s20 + $0x7c8] sm:$0xff] }
 0x122   : > { %7139 = vmatmul.mubr.bf16.vlgmr.msra.gmra.mrb[0].mxu0 %v12946_v28  ;;  %7526 = vmatmul.mubr.bf16.vlgmr.msra.gmra.mrb[0].mxu1 %v12946_v28  ;;  %v692_v28 = vld [vmem:[%s13937_s20 + $0x640] sm:$0xff]  ;;  %v745_v15 = vld [vmem:[%s13937_s20 + $0x7e8] sm:$0xff] }
 0x123   : > { %7150 = vmatpush1.bf16.msra.mxu0 %v11385_v31  ;;  %7537 = vmatpush1.bf16.msra.mxu1 %v11387_v32  ;;  %v697_v31 = vld [vmem:[%s13937_s20 + $0x668] sm:$0xff]  ;;  %v11449_v32 = vcombine.low %v684_v20, %v688_v21  ;;  %v11458_v34 = vcombine.high %v692_v28, %v696_v29  ;;  %v748_v20 = vld [vmem:[%s13937_s20 + $0x800] sm:$0xff] }
 0x124   : > { %7151 = vmatprep.subr.bf16.mxu0 %v11394_v33  ;;  %7538 = vmatprep.subr.bf16.mxu1 %v11396_v35  ;;  %v11451_v33 = vcombine.low %v685_v22, %v689_v23  ;;  %v11460_v35 = vcombine.high %v693_v30, %v697_v31  ;;  %v752_v21 = vld [vmem:[%s13937_s20 + $0x820] sm:$0xff]  ;;  %v749_v22 = vld [vmem:[%s13937_s20 + $0x808] sm:$0xff] }
 0x125   : > { %7181 = vmatprep.mubr.bf16.mxu0 %v12947_v37  ;;  %7568 = vmatprep.mubr.bf16.mxu1 %v12947_v37  ;;  %v704_v37 = vld [vmem:[%s13937_s20 + $0x6a0] sm:$0xff]  ;;  %v753_v23 = vld [vmem:[%s13937_s20 + $0x828] sm:$0xff] }
 0x127   : > { %7152 = vmatpush1.bf16.msra.mxu0 %v11393_v40  ;;  %7539 = vmatpush1.bf16.msra.mxu1 %v11395_v41  ;;  %v11457_v40 = vcombine.low %v692_v28, %v696_v29  ;;  %v11459_v41 = vcombine.low %v693_v30, %v697_v31  ;;  %v756_v28 = vld [vmem:[%s13937_s20 + $0x840] sm:$0xff]  ;;  %v757_v31 = vld [vmem:[%s13937_s20 + $0x848] sm:$0xff] }
 0x128   : > { %7153 = vmatprep.subr.bf16.mxu0 %v11402_v42  ;;  %7540 = vmatprep.subr.bf16.mxu1 %v11404_v45  ;;  %v11466_v42 = vcombine.high %v700_v36, %v704_v37  ;;  %v712_v45 = vld [vmem:[%s13937_s20 + $0x6e0] sm:$0xff] }
 0x129   : > { %v760_v29 = vld [vmem:[%s13937_s20 + $0x860] sm:$0xff] }
 0x12a   : > { %v12949_v30 = vld [vmem:[%s13935_s27 + $0x8] ss:$68 sps:$4 sm:$0xff]  }
 0x12b   : > { %7154 = vmatpush1.bf16.msra.mxu0 %v11401_v48  ;;  %7541 = vmatpush1.bf16.msra.mxu1 %v11403_v49  ;;  %v11465_v48 = vcombine.low %v700_v36, %v704_v37  ;;  %v11467_v49 = vcombine.low %v701_v38, %v705_v39  ;;  %v764_v37 = vld [vmem:[%s13937_s20 + $0x880] sm:$0xff] }
 0x12c   : > { %7155 = vmatprep.subr.bf16.mxu0 %v11410_v50  ;;  %7542 = vmatprep.subr.bf16.mxu1 %v11412_v54  ;;  %v11474_v50 = vcombine.high %v708_v44, %v712_v45  ;;  %v717_v54 = vld [vmem:[%s13937_s20 + $0x708] sm:$0xff]  ;;  %v768_v38 = vld [vmem:[%s13937_s20 + $0x8a0] sm:$0xff] }
 0x12d   : > { %v12950_v39 = vld [vmem:[%s13935_s27 + $0x14] ss:$68 sps:$4 sm:$0xff]  }
 0x12f   : > { %7156 = vmatpush1.bf16.msra.mxu0 %v11409_v56  ;;  %7543 = vmatpush1.bf16.msra.mxu1 %v11411_v57  ;;  %v11473_v56 = vcombine.low %v708_v44, %v712_v45  ;;  %v11475_v57 = vcombine.low %v709_v46, %v713_v47  ;;  %v11530_v44 = vcombine.high %v764_v37, %v768_v38  ;;  %v772_v46 = vld [vmem:[%s13937_s20 + $0x8c0] sm:$0xff] }
 0x130   : > { %7157 = vmatprep.subr.bf16.mxu0 %v11418_v58  ;;  %7544 = vmatprep.subr.bf16.mxu1 %v11420_v59  ;;  %v11482_v58 = vcombine.high %v716_v52, %v720_v53  ;;  %v11484_v59 = vcombine.high %v717_v54, %v721_v55  ;;  %v776_v47 = vld [vmem:[%s13937_s20 + $0x8e0] sm:$0xff] }
 0x133   : > { %7158 = vmatpush1.bf16.msra.mxu0 %v11417_v0  ;;  %7545 = vmatpush1.bf16.msra.mxu1 %v11419_v1  ;;  %v11481_v0 = vcombine.low %v716_v52, %v720_v53  ;;  %v11483_v1 = vcombine.low %v717_v54, %v721_v55  ;;  %v11538_v52 = vcombine.high %v772_v46, %v776_v47  ;;  %v780_v54 = vld [vmem:[%s13937_s20 + $0x900] sm:$0xff] }
 0x134   : > { %7159 = vmatprep.subr.bf16.mxu0 %v11426_v2  ;;  %7546 = vmatprep.subr.bf16.mxu1 %v11428_v3  ;;  %v11490_v2 = vcombine.high %v724_v60, %v728_v61  ;;  %v11492_v3 = vcombine.high %v725_v62, %v729_v63  ;;  %v784_v55 = vld [vmem:[%s13937_s20 + $0x920] sm:$0xff] }
 0x137   : > { %7160 = vmatpush1.bf16.msra.mxu0 %v11425_v8  ;;  %7547 = vmatpush1.bf16.msra.mxu1 %v11427_v9  ;;  %v11489_v8 = vcombine.low %v724_v60, %v728_v61  ;;  %v11491_v9 = vcombine.low %v725_v62, %v729_v63  ;;  %v11546_v60 = vcombine.high %v780_v54, %v784_v55  ;;  %v788_v62 = vld [vmem:[%s13937_s20 + $0x940] sm:$0xff] }
 0x138   : > { %7161 = vmatprep.subr.bf16.mxu0 %v11434_v10  ;;  %7548 = vmatprep.subr.bf16.mxu1 %v11436_v11  ;;  %v11498_v10 = vcombine.high %v732_v4, %v736_v5  ;;  %v11500_v11 = vcombine.high %v733_v6, %v737_v7  ;;  %v792_v63 = vld [vmem:[%s13937_s20 + $0x960] sm:$0xff] }
 0x13b   : > { %7162 = vmatpush1.bf16.msra.mxu0 %v11433_v16  ;;  %7549 = vmatpush1.bf16.msra.mxu1 %v11435_v17  ;;  %v11497_v16 = vcombine.low %v732_v4, %v736_v5  ;;  %v11499_v17 = vcombine.low %v733_v6, %v737_v7  ;;  %v11554_v4 = vcombine.high %v788_v62, %v792_v63  ;;  %v796_v6 = vld [vmem:[%s13937_s20 + $0x980] sm:$0xff] }
 0x13c   : > { %7163 = vmatprep.subr.bf16.mxu0 %v11442_v18  ;;  %7550 = vmatprep.subr.bf16.mxu1 %v11444_v19  ;;  %v11506_v18 = vcombine.high %v740_v12, %v744_v13  ;;  %v11508_v19 = vcombine.high %v741_v14, %v745_v15  ;;  %v800_v7 = vld [vmem:[%s13937_s20 + $0x9a0] sm:$0xff] }
 0x13f   : > { %7164 = vmatpush1.bf16.msra.mxu0 %v11441_v24  ;;  %7551 = vmatpush1.bf16.msra.mxu1 %v11443_v25  ;;  %v11505_v24 = vcombine.low %v740_v12, %v744_v13  ;;  %v11507_v25 = vcombine.low %v741_v14, %v745_v15  ;;  %v11562_v12 = vcombine.high %v796_v6, %v800_v7  ;;  %v804_v14 = vld [vmem:[%s13937_s20 + $0x9c0] sm:$0xff] }
 0x140   : > { %7165 = vmatprep.subr.bf16.mxu0 %v11450_v26  ;;  %7552 = vmatprep.subr.bf16.mxu1 %v11452_v27  ;;  %v11514_v26 = vcombine.high %v748_v20, %v752_v21  ;;  %v11516_v27 = vcombine.high %v749_v22, %v753_v23  ;;  %v808_v15 = vld [vmem:[%s13937_s20 + $0x9e0] sm:$0xff] }
 0x143   : > { %7166 = vmatpush1.bf16.msra.mxu0 %v11449_v32  ;;  %7553 = vmatpush1.bf16.msra.mxu1 %v11451_v33  ;;  %v761_v32 = vld [vmem:[%s13937_s20 + $0x868] sm:$0xff]  ;;  %v11513_v33 = vcombine.low %v748_v20, %v752_v21  ;;  %v11570_v20 = vcombine.high %v804_v14, %v808_v15 }
 0x144   : > { %7167 = vmatprep.subr.bf16.mxu0 %v11458_v34  ;;  %7554 = vmatprep.subr.bf16.mxu1 %v11460_v35  ;;  %v11515_v34 = vcombine.low %v749_v22, %v753_v23  ;;  %v11522_v35 = vcombine.high %v756_v28, %v760_v29  ;;  %v11524_v36 = vcombine.high %v757_v31, %v761_v32  ;;  %v812_v22 = vld [vmem:[%s13937_s20 + $0xa00] sm:$0xff] }
 0x145   : > { %v816_v23 = vld [vmem:[%s13937_s20 + $0xa20] sm:$0xff] }
 0x147   : > { %7168 = vmatpush1.bf16.msra.mxu0 %v11457_v40  ;;  %7555 = vmatpush1.bf16.msra.mxu1 %v11459_v41  ;;  %v765_v40 = vld [vmem:[%s13937_s20 + $0x888] sm:$0xff] }
 0x148   : > { %7169 = vmatprep.subr.bf16.mxu0 %v11466_v42  ;;  %7556 = vmatprep.subr.bf16.mxu1 %v11468_v43  ;;  %v769_v41 = vld [vmem:[%s13937_s20 + $0x8a8] sm:$0xff]  ;;  %v11521_v42 = vcombine.low %v756_v28, %v760_v29  ;;  %v11523_v43 = vcombine.low %v757_v31, %v761_v32  ;;  %v11578_v28 = vcombine.high %v812_v22, %v816_v23  ;;  %v824_v31 = vld [vmem:[%s13937_s20 + $0xa60] sm:$0xff] }
 0x149   : > { %v11532_v45 = vcombine.high %v765_v40, %v769_v41  ;;  %v821_v32 = vld [vmem:[%s13937_s20 + $0xa48] sm:$0xff] }
 0x14b   : > { %7170 = vmatpush1.bf16.msra.mxu0 %v11465_v48  ;;  %7557 = vmatpush1.bf16.msra.mxu1 %v11467_v49  ;;  %v773_v48 = vld [vmem:[%s13937_s20 + $0x8c8] sm:$0xff] }
 0x14c   : > { %7171 = vmatprep.subr.bf16.mxu0 %v11474_v50  ;;  %7558 = vmatprep.subr.bf16.mxu1 %v11476_v51  ;;  %v777_v49 = vld [vmem:[%s13937_s20 + $0x8e8] sm:$0xff]  ;;  %v11529_v50 = vcombine.low %v764_v37, %v768_v38  ;;  %v11531_v51 = vcombine.low %v765_v40, %v769_v41  ;;  %v828_v38 = vld [vmem:[%s13937_s20 + $0xa80] sm:$0xff] }
 0x14d   : > { %v11540_v53 = vcombine.high %v773_v48, %v777_v49  ;;  %v829_v40 = vld [vmem:[%s13937_s20 + $0xa88] sm:$0xff] }
 0x14e   : > { %v833_v41 = vld [vmem:[%s13937_s20 + $0xaa8] sm:$0xff] }
 0x14f   : > { %7172 = vmatpush1.bf16.msra.mxu0 %v11473_v56  ;;  %7559 = vmatpush1.bf16.msra.mxu1 %v11475_v57  ;;  %v781_v56 = vld [vmem:[%s13937_s20 + $0x908] sm:$0xff] }
 0x150   : > { %7173 = vmatprep.subr.bf16.mxu0 %v11482_v58  ;;  %7560 = vmatprep.subr.bf16.mxu1 %v11484_v59  ;;  %v785_v57 = vld [vmem:[%s13937_s20 + $0x928] sm:$0xff]  ;;  %v11537_v58 = vcombine.low %v772_v46, %v776_v47  ;;  %v11539_v59 = vcombine.low %v773_v48, %v777_v49  ;;  %v836_v46 = vld [vmem:[%s13937_s20 + $0xac0] sm:$0xff] }
 0x151   : > { %v11548_v61 = vcombine.high %v781_v56, %v785_v57  ;;  %v840_v47 = vld [vmem:[%s13937_s20 + $0xae0] sm:$0xff]  ;;  %v837_v48 = vld [vmem:[%s13937_s20 + $0xac8] sm:$0xff] }
 0x152   : > { %v841_v49 = vld [vmem:[%s13937_s20 + $0xae8] sm:$0xff] }
 0x153   : > { %7174 = vmatpush1.bf16.msra.mxu0 %v11481_v0  ;;  %7561 = vmatpush1.bf16.msra.mxu1 %v11483_v1  ;;  %v789_v0 = vld [vmem:[%s13937_s20 + $0x948] sm:$0xff] }
 0x154   : > { %7175 = vmatprep.subr.bf16.mxu0 %v11490_v2  ;;  %7562 = vmatprep.subr.bf16.mxu1 %v11492_v3  ;;  %v793_v1 = vld [vmem:[%s13937_s20 + $0x968] sm:$0xff]  ;;  %v11545_v2 = vcombine.low %v780_v54, %v784_v55  ;;  %v11547_v3 = vcombine.low %v781_v56, %v785_v57  ;;  %v844_v54 = vld [vmem:[%s13937_s20 + $0xb00] sm:$0xff] }
 0x155   : > { %v11556_v5 = vcombine.high %v789_v0, %v793_v1  ;;  %v848_v55 = vld [vmem:[%s13937_s20 + $0xb20] sm:$0xff]  ;;  %v845_v56 = vld [vmem:[%s13937_s20 + $0xb08] sm:$0xff] }
 0x156   : > { %v849_v57 = vld [vmem:[%s13937_s20 + $0xb28] sm:$0xff] }
 0x157   : > { %7176 = vmatpush1.bf16.msra.mxu0 %v11489_v8  ;;  %7563 = vmatpush1.bf16.msra.mxu1 %v11491_v9  ;;  %v797_v8 = vld [vmem:[%s13937_s20 + $0x988] sm:$0xff] }
 0x158   : > { %7177 = vmatprep.subr.bf16.mxu0 %v11498_v10  ;;  %7564 = vmatprep.subr.bf16.mxu1 %v11500_v11  ;;  %v801_v9 = vld [vmem:[%s13937_s20 + $0x9a8] sm:$0xff]  ;;  %v11553_v10 = vcombine.low %v788_v62, %v792_v63  ;;  %v11555_v11 = vcombine.low %v789_v0, %v793_v1  ;;  %v852_v62 = vld [vmem:[%s13937_s20 + $0xb40] sm:$0xff] }
 0x159   : > { %v11564_v13 = vcombine.high %v797_v8, %v801_v9  ;;  %v856_v63 = vld [vmem:[%s13937_s20 + $0xb60] sm:$0xff]  ;;  %v853_v0 = vld [vmem:[%s13937_s20 + $0xb48] sm:$0xff] }
 0x15a   : > { %v857_v1 = vld [vmem:[%s13937_s20 + $0xb68] sm:$0xff] }
 0x15b   : > { %7178 = vmatpush1.bf16.msra.mxu0 %v11497_v16  ;;  %7565 = vmatpush1.bf16.msra.mxu1 %v11499_v17  ;;  %v805_v16 = vld [vmem:[%s13937_s20 + $0x9c8] sm:$0xff] }
 0x15c   : > { %7179 = vmatprep.subr.bf16.mxu0 %v11506_v18  ;;  %7566 = vmatprep.subr.bf16.mxu1 %v11508_v19  ;;  %v809_v17 = vld [vmem:[%s13937_s20 + $0x9e8] sm:$0xff]  ;;  %v11561_v18 = vcombine.low %v796_v6, %v800_v7  ;;  %v11563_v19 = vcombine.low %v797_v8, %v801_v9  ;;  %v860_v6 = vld [vmem:[%s13937_s20 + $0xb80] sm:$0xff] }
 0x15d   : > { %v11572_v21 = vcombine.high %v805_v16, %v809_v17  ;;  %v864_v7 = vld [vmem:[%s13937_s20 + $0xba0] sm:$0xff]  ;;  %v861_v8 = vld [vmem:[%s13937_s20 + $0xb88] sm:$0xff] }
 0x15e   : > { %v865_v9 = vld [vmem:[%s13937_s20 + $0xba8] sm:$0xff] }
 0x15f   : > { %7180 = vmatpush1.bf16.msra.mxu0 %v11505_v24  ;;  %7567 = vmatpush1.bf16.msra.mxu1 %v11507_v25  ;;  %v813_v24 = vld [vmem:[%s13937_s20 + $0xa08] sm:$0xff] }
 0x160   : > { %7192 = vmatprep.subr.bf16.mxu0 %v11514_v26  ;;  %7579 = vmatprep.subr.bf16.mxu1 %v11516_v27  ;;  %v817_v25 = vld [vmem:[%s13937_s20 + $0xa28] sm:$0xff]  ;;  %v11569_v26 = vcombine.low %v804_v14, %v808_v15  ;;  %v11571_v27 = vcombine.low %v805_v16, %v809_v17  ;;  %v868_v14 = vld [vmem:[%s13937_s20 + $0xbc0] sm:$0xff] }
 0x161   : > { %v11580_v29 = vcombine.high %v813_v24, %v817_v25  ;;  %v872_v15 = vld [vmem:[%s13937_s20 + $0xbe0] sm:$0xff]  ;;  %v869_v16 = vld [vmem:[%s13937_s20 + $0xbc8] sm:$0xff] }
 0x162   : > { %7182 = vmatmul.mubr.bf16.vlgmr.msra.gmra.mrb[0].mxu0 %v12949_v30  ;;  %7569 = vmatmul.mubr.bf16.vlgmr.msra.gmra.mrb[0].mxu1 %v12949_v30  ;;  %v820_v30 = vld [vmem:[%s13937_s20 + $0xa40] sm:$0xff]  ;;  %v873_v17 = vld [vmem:[%s13937_s20 + $0xbe8] sm:$0xff] }
 0x163   : > { %7193 = vmatpush1.bf16.msra.mxu0 %v11513_v33  ;;  %7580 = vmatpush1.bf16.msra.mxu1 %v11515_v34  ;;  %v825_v33 = vld [vmem:[%s13937_s20 + $0xa68] sm:$0xff]  ;;  %v11577_v34 = vcombine.low %v812_v22, %v816_v23  ;;  %v876_v22 = vld [vmem:[%s13937_s20 + $0xc00] sm:$0xff] }
 0x164   : > { %7194 = vmatprep.subr.bf16.mxu0 %v11522_v35  ;;  %7581 = vmatprep.subr.bf16.mxu1 %v11524_v36  ;;  %v11579_v35 = vcombine.low %v813_v24, %v817_v25  ;;  %v11586_v36 = vcombine.high %v820_v30, %v824_v31  ;;  %v11588_v37 = vcombine.high %v821_v32, %v825_v33  ;;  %v880_v23 = vld [vmem:[%s13937_s20 + $0xc20] sm:$0xff]  ;;  %v877_v24 = vld [vmem:[%s13937_s20 + $0xc08] sm:$0xff] }
 0x165   : > { %7224 = vmatprep.mubr.bf16.mxu0 %v12950_v39  ;;  %7611 = vmatprep.mubr.bf16.mxu1 %v12950_v39  ;;  %v832_v39 = vld [vmem:[%s13937_s20 + $0xaa0] sm:$0xff]  ;;  %v881_v25 = vld [vmem:[%s13937_s20 + $0xc28] sm:$0xff] }
 0x167   : > { %7195 = vmatpush1.bf16.msra.mxu0 %v11521_v42  ;;  %7582 = vmatpush1.bf16.msra.mxu1 %v11523_v43  ;;  %v11585_v42 = vcombine.low %v820_v30, %v824_v31  ;;  %v11587_v43 = vcombine.low %v821_v32, %v825_v33  ;;  %v884_v30 = vld [vmem:[%s13937_s20 + $0xc40] sm:$0xff]  ;;  %v885_v33 = vld [vmem:[%s13937_s20 + $0xc48] sm:$0xff] }
 0x168   : > { %7196 = vmatprep.subr.bf16.mxu0 %v11530_v44  ;;  %7583 = vmatprep.subr.bf16.mxu1 %v11532_v45  ;;  %v11594_v44 = vcombine.high %v828_v38, %v832_v39  ;;  %v11596_v45 = vcombine.high %v829_v40, %v833_v41  ;;  %v888_v31 = vld [vmem:[%s13937_s20 + $0xc60] sm:$0xff] }
 0x169   : > { %v12952_v32 = vld [vmem:[%s13935_s27 + $0x10] ss:$68 sps:$4 sm:$0xff]  }
 0x16b   : > { %7197 = vmatpush1.bf16.msra.mxu0 %v11529_v50  ;;  %7584 = vmatpush1.bf16.msra.mxu1 %v11531_v51  ;;  %v11593_v50 = vcombine.low %v828_v38, %v832_v39  ;;  %v11595_v51 = vcombine.low %v829_v40, %v833_v41  ;;  %v892_v39 = vld [vmem:[%s13937_s20 + $0xc80] sm:$0xff]  ;;  %v12953_v41 = vld [vmem:[%s13935_s27 + $0x1c] ss:$68 sps:$4 sm:$0xff]  }
 0x16c   : > { %7198 = vmatprep.subr.bf16.mxu0 %v11538_v52  ;;  %7585 = vmatprep.subr.bf16.mxu1 %v11540_v53  ;;  %v11602_v52 = vcombine.high %v836_v46, %v840_v47  ;;  %v11604_v53 = vcombine.high %v837_v48, %v841_v49  ;;  %v896_v40 = vld [vmem:[%s13937_s20 + $0xca0] sm:$0xff] }
 0x16f   : > { %7199 = vmatpush1.bf16.msra.mxu0 %v11537_v58  ;;  %7586 = vmatpush1.bf16.msra.mxu1 %v11539_v59  ;;  %v11601_v58 = vcombine.low %v836_v46, %v840_v47  ;;  %v11603_v59 = vcombine.low %v837_v48, %v841_v49  ;;  %v11658_v46 = vcombine.high %v892_v39, %v896_v40  ;;  %v900_v48 = vld [vmem:[%s13937_s20 + $0xcc0] sm:$0xff] }
 0x170   : > { %7200 = vmatprep.subr.bf16.mxu0 %v11546_v60  ;;  %7587 = vmatprep.subr.bf16.mxu1 %v11548_v61  ;;  %v11610_v60 = vcombine.high %v844_v54, %v848_v55  ;;  %v11612_v61 = vcombine.high %v845_v56, %v849_v57  ;;  %v904_v49 = vld [vmem:[%s13937_s20 + $0xce0] sm:$0xff] }
 0x173   : > { %7201 = vmatpush1.bf16.msra.mxu0 %v11545_v2  ;;  %7588 = vmatpush1.bf16.msra.mxu1 %v11547_v3  ;;  %v11609_v2 = vcombine.low %v844_v54, %v848_v55  ;;  %v11611_v3 = vcombine.low %v845_v56, %v849_v57  ;;  %v11666_v54 = vcombine.high %v900_v48, %v904_v49  ;;  %v908_v56 = vld [vmem:[%s13937_s20 + $0xd00] sm:$0xff] }
 0x174   : > { %7202 = vmatprep.subr.bf16.mxu0 %v11554_v4  ;;  %7589 = vmatprep.subr.bf16.mxu1 %v11556_v5  ;;  %v11618_v4 = vcombine.high %v852_v62, %v856_v63  ;;  %v11620_v5 = vcombine.high %v853_v0, %v857_v1  ;;  %v912_v57 = vld [vmem:[%s13937_s20 + $0xd20] sm:$0xff] }
 0x177   : > { %7203 = vmatpush1.bf16.msra.mxu0 %v11553_v10  ;;  %7590 = vmatpush1.bf16.msra.mxu1 %v11555_v11  ;;  %v11617_v10 = vcombine.low %v852_v62, %v856_v63  ;;  %v11619_v11 = vcombine.low %v853_v0, %v857_v1  ;;  %v11674_v62 = vcombine.high %v908_v56, %v912_v57  ;;  %v916_v0 = vld [vmem:[%s13937_s20 + $0xd40] sm:$0xff] }
 0x178   : > { %7204 = vmatprep.subr.bf16.mxu0 %v11562_v12  ;;  %7591 = vmatprep.subr.bf16.mxu1 %v11564_v13  ;;  %v11626_v12 = vcombine.high %v860_v6, %v864_v7  ;;  %v11628_v13 = vcombine.high %v861_v8, %v865_v9  ;;  %v920_v1 = vld [vmem:[%s13937_s20 + $0xd60] sm:$0xff] }
 0x17b   : > { %7205 = vmatpush1.bf16.msra.mxu0 %v11561_v18  ;;  %7592 = vmatpush1.bf16.msra.mxu1 %v11563_v19  ;;  %v11625_v18 = vcombine.low %v860_v6, %v864_v7  ;;  %v11627_v19 = vcombine.low %v861_v8, %v865_v9  ;;  %v11682_v6 = vcombine.high %v916_v0, %v920_v1  ;;  %v924_v8 = vld [vmem:[%s13937_s20 + $0xd80] sm:$0xff] }
 0x17c   : > { %7206 = vmatprep.subr.bf16.mxu0 %v11570_v20  ;;  %7593 = vmatprep.subr.bf16.mxu1 %v11572_v21  ;;  %v11634_v20 = vcombine.high %v868_v14, %v872_v15  ;;  %v11636_v21 = vcombine.high %v869_v16, %v873_v17  ;;  %v928_v9 = vld [vmem:[%s13937_s20 + $0xda0] sm:$0xff] }
 0x17f   : > { %7207 = vmatpush1.bf16.msra.mxu0 %v11569_v26  ;;  %7594 = vmatpush1.bf16.msra.mxu1 %v11571_v27  ;;  %v11633_v26 = vcombine.low %v868_v14, %v872_v15  ;;  %v11635_v27 = vcombine.low %v869_v16, %v873_v17  ;;  %v11690_v14 = vcombine.high %v924_v8, %v928_v9  ;;  %v932_v16 = vld [vmem:[%s13937_s20 + $0xdc0] sm:$0xff] }
 0x180   : > { %7208 = vmatprep.subr.bf16.mxu0 %v11578_v28  ;;  %7595 = vmatprep.subr.bf16.mxu1 %v11580_v29  ;;  %v11642_v28 = vcombine.high %v876_v22, %v880_v23  ;;  %v11644_v29 = vcombine.high %v877_v24, %v881_v25  ;;  %v936_v17 = vld [vmem:[%s13937_s20 + $0xde0] sm:$0xff] }
 0x183   : > { %7209 = vmatpush1.bf16.msra.mxu0 %v11577_v34  ;;  %7596 = vmatpush1.bf16.msra.mxu1 %v11579_v35  ;;  %v889_v34 = vld [vmem:[%s13937_s20 + $0xc68] sm:$0xff]  ;;  %v11641_v35 = vcombine.low %v876_v22, %v880_v23  ;;  %v11698_v22 = vcombine.high %v932_v16, %v936_v17 }
 0x184   : > { %7210 = vmatprep.subr.bf16.mxu0 %v11586_v36  ;;  %7597 = vmatprep.subr.bf16.mxu1 %v11588_v37  ;;  %v11643_v36 = vcombine.low %v877_v24, %v881_v25  ;;  %v11650_v37 = vcombine.high %v884_v30, %v888_v31  ;;  %v11652_v38 = vcombine.high %v885_v33, %v889_v34  ;;  %v940_v24 = vld [vmem:[%s13937_s20 + $0xe00] sm:$0xff] }
 0x185   : > { %v944_v25 = vld [vmem:[%s13937_s20 + $0xe20] sm:$0xff] }
 0x187   : > { %7211 = vmatpush1.bf16.msra.mxu0 %v11585_v42  ;;  %7598 = vmatpush1.bf16.msra.mxu1 %v11587_v43  ;;  %v893_v42 = vld [vmem:[%s13937_s20 + $0xc88] sm:$0xff] }
 0x188   : > { %7212 = vmatprep.subr.bf16.mxu0 %v11594_v44  ;;  %7599 = vmatprep.subr.bf16.mxu1 %v11596_v45  ;;  %v897_v43 = vld [vmem:[%s13937_s20 + $0xca8] sm:$0xff]  ;;  %v11649_v44 = vcombine.low %v884_v30, %v888_v31  ;;  %v11651_v45 = vcombine.low %v885_v33, %v889_v34  ;;  %v11706_v30 = vcombine.high %v940_v24, %v944_v25  ;;  %v952_v33 = vld [vmem:[%s13937_s20 + $0xe60] sm:$0xff] }
 0x189   : > { %v11660_v47 = vcombine.high %v893_v42, %v897_v43  ;;  %v949_v34 = vld [vmem:[%s13937_s20 + $0xe48] sm:$0xff] }
 0x18b   : > { %7213 = vmatpush1.bf16.msra.mxu0 %v11593_v50  ;;  %7600 = vmatpush1.bf16.msra.mxu1 %v11595_v51  ;;  %v901_v50 = vld [vmem:[%s13937_s20 + $0xcc8] sm:$0xff] }
 0x18c   : > { %7214 = vmatprep.subr.bf16.mxu0 %v11602_v52  ;;  %7601 = vmatprep.subr.bf16.mxu1 %v11604_v53  ;;  %v905_v51 = vld [vmem:[%s13937_s20 + $0xce8] sm:$0xff]  ;;  %v11657_v52 = vcombine.low %v892_v39, %v896_v40  ;;  %v11659_v53 = vcombine.low %v893_v42, %v897_v43  ;;  %v956_v40 = vld [vmem:[%s13937_s20 + $0xe80] sm:$0xff] }
 0x18d   : > { %v11668_v55 = vcombine.high %v901_v50, %v905_v51  ;;  %v957_v42 = vld [vmem:[%s13937_s20 + $0xe88] sm:$0xff] }
 0x18e   : > { %v961_v43 = vld [vmem:[%s13937_s20 + $0xea8] sm:$0xff] }
 0x18f   : > { %7215 = vmatpush1.bf16.msra.mxu0 %v11601_v58  ;;  %7602 = vmatpush1.bf16.msra.mxu1 %v11603_v59  ;;  %v909_v58 = vld [vmem:[%s13937_s20 + $0xd08] sm:$0xff] }
 0x190   : > { %7216 = vmatprep.subr.bf16.mxu0 %v11610_v60  ;;  %7603 = vmatprep.subr.bf16.mxu1 %v11612_v61  ;;  %v913_v59 = vld [vmem:[%s13937_s20 + $0xd28] sm:$0xff]  ;;  %v11665_v60 = vcombine.low %v900_v48, %v904_v49  ;;  %v11667_v61 = vcombine.low %v901_v50, %v905_v51  ;;  %v964_v48 = vld [vmem:[%s13937_s20 + $0xec0] sm:$0xff] }
 0x191   : > { %v11676_v63 = vcombine.high %v909_v58, %v913_v59  ;;  %v968_v49 = vld [vmem:[%s13937_s20 + $0xee0] sm:$0xff]  ;;  %v965_v50 = vld [vmem:[%s13937_s20 + $0xec8] sm:$0xff] }
 0x192   : > { %v969_v51 = vld [vmem:[%s13937_s20 + $0xee8] sm:$0xff] }
 0x193   : > { %7217 = vmatpush1.bf16.msra.mxu0 %v11609_v2  ;;  %7604 = vmatpush1.bf16.msra.mxu1 %v11611_v3  ;;  %v917_v2 = vld [vmem:[%s13937_s20 + $0xd48] sm:$0xff] }
 0x194   : > { %7218 = vmatprep.subr.bf16.mxu0 %v11618_v4  ;;  %7605 = vmatprep.subr.bf16.mxu1 %v11620_v5  ;;  %v921_v3 = vld [vmem:[%s13937_s20 + $0xd68] sm:$0xff]  ;;  %v11673_v4 = vcombine.low %v908_v56, %v912_v57  ;;  %v11675_v5 = vcombine.low %v909_v58, %v913_v59  ;;  %v972_v56 = vld [vmem:[%s13937_s20 + $0xf00] sm:$0xff] }
 0x195   : > { %v11684_v7 = vcombine.high %v917_v2, %v921_v3  ;;  %v976_v57 = vld [vmem:[%s13937_s20 + $0xf20] sm:$0xff]  ;;  %v973_v58 = vld [vmem:[%s13937_s20 + $0xf08] sm:$0xff] }
 0x196   : > { %v977_v59 = vld [vmem:[%s13937_s20 + $0xf28] sm:$0xff] }
 0x197   : > { %7219 = vmatpush1.bf16.msra.mxu0 %v11617_v10  ;;  %7606 = vmatpush1.bf16.msra.mxu1 %v11619_v11  ;;  %v925_v10 = vld [vmem:[%s13937_s20 + $0xd88] sm:$0xff] }
 0x198   : > { %7220 = vmatprep.subr.bf16.mxu0 %v11626_v12  ;;  %7607 = vmatprep.subr.bf16.mxu1 %v11628_v13  ;;  %v929_v11 = vld [vmem:[%s13937_s20 + $0xda8] sm:$0xff]  ;;  %v11681_v12 = vcombine.low %v916_v0, %v920_v1  ;;  %v11683_v13 = vcombine.low %v917_v2, %v921_v3  ;;  %v980_v0 = vld [vmem:[%s13937_s20 + $0xf40] sm:$0xff] }
 0x199   : > { %v11692_v15 = vcombine.high %v925_v10, %v929_v11  ;;  %v984_v1 = vld [vmem:[%s13937_s20 + $0xf60] sm:$0xff]  ;;  %v981_v2 = vld [vmem:[%s13937_s20 + $0xf48] sm:$0xff] }
 0x19a   : > { %v985_v3 = vld [vmem:[%s13937_s20 + $0xf68] sm:$0xff] }
 0x19b   : > { %7221 = vmatpush1.bf16.msra.mxu0 %v11625_v18  ;;  %7608 = vmatpush1.bf16.msra.mxu1 %v11627_v19  ;;  %v933_v18 = vld [vmem:[%s13937_s20 + $0xdc8] sm:$0xff] }
 0x19c   : > { %7222 = vmatprep.subr.bf16.mxu0 %v11634_v20  ;;  %7609 = vmatprep.subr.bf16.mxu1 %v11636_v21  ;;  %v937_v19 = vld [vmem:[%s13937_s20 + $0xde8] sm:$0xff]  ;;  %v11689_v20 = vcombine.low %v924_v8, %v928_v9  ;;  %v11691_v21 = vcombine.low %v925_v10, %v929_v11  ;;  %v988_v8 = vld [vmem:[%s13937_s20 + $0xf80] sm:$0xff] }
 0x19d   : > { %v11700_v23 = vcombine.high %v933_v18, %v937_v19  ;;  %v992_v9 = vld [vmem:[%s13937_s20 + $0xfa0] sm:$0xff]  ;;  %v989_v10 = vld [vmem:[%s13937_s20 + $0xf88] sm:$0xff] }
 0x19e   : > { %v993_v11 = vld [vmem:[%s13937_s20 + $0xfa8] sm:$0xff] }
 0x19f   : > { %7223 = vmatpush1.bf16.msra.mxu0 %v11633_v26  ;;  %7610 = vmatpush1.bf16.msra.mxu1 %v11635_v27  ;;  %v941_v26 = vld [vmem:[%s13937_s20 + $0xe08] sm:$0xff] }
 0x1a0   : > { %7235 = vmatprep.subr.bf16.mxu0 %v11642_v28  ;;  %7622 = vmatprep.subr.bf16.mxu1 %v11644_v29  ;;  %v945_v27 = vld [vmem:[%s13937_s20 + $0xe28] sm:$0xff]  ;;  %v11697_v28 = vcombine.low %v932_v16, %v936_v17  ;;  %v11699_v29 = vcombine.low %v933_v18, %v937_v19  ;;  %v996_v16 = vld [vmem:[%s13937_s20 + $0xfc0] sm:$0xff] }
 0x1a1   : > { %v11708_v31 = vcombine.high %v941_v26, %v945_v27  ;;  %v1000_v17 = vld [vmem:[%s13937_s20 + $0xfe0] sm:$0xff]  ;;  %v997_v18 = vld [vmem:[%s13937_s20 + $0xfc8] sm:$0xff] }
 0x1a2   : > { %7225 = vmatmul.mubr.bf16.vlgmr.msra.gmra.mrb[0].mxu0 %v12952_v32  ;;  %7612 = vmatmul.mubr.bf16.vlgmr.msra.gmra.mrb[0].mxu1 %v12952_v32  ;;  %v948_v32 = vld [vmem:[%s13937_s20 + $0xe40] sm:$0xff]  ;;  %v1001_v19 = vld [vmem:[%s13937_s20 + $0xfe8] sm:$0xff] }
 0x1a3   : > { %7236 = vmatpush1.bf16.msra.mxu0 %v11641_v35  ;;  %7623 = vmatpush1.bf16.msra.mxu1 %v11643_v36  ;;  %v953_v35 = vld [vmem:[%s13937_s20 + $0xe68] sm:$0xff]  ;;  %v11705_v36 = vcombine.low %v940_v24, %v944_v25  ;;  %v1004_v24 = vld [vmem:[%s13937_s20 + $0x1000] sm:$0xff] }
 0x1a4   : > { %7237 = vmatprep.subr.bf16.mxu0 %v11650_v37  ;;  %7624 = vmatprep.subr.bf16.mxu1 %v11652_v38  ;;  %v11707_v37 = vcombine.low %v941_v26, %v945_v27  ;;  %v11714_v38 = vcombine.high %v948_v32, %v952_v33  ;;  %v11716_v39 = vcombine.high %v949_v34, %v953_v35  ;;  %v1008_v25 = vld [vmem:[%s13937_s20 + $0x1020] sm:$0xff]  ;;  %v1005_v26 = vld [vmem:[%s13937_s20 + $0x1008] sm:$0xff] }
 0x1a5   : > { %7267 = vmatprep.mubr.bf16.mxu0 %v12953_v41  ;;  %7654 = vmatprep.mubr.bf16.mxu1 %v12953_v41  ;;  %v960_v41 = vld [vmem:[%s13937_s20 + $0xea0] sm:$0xff]  ;;  %v1009_v27 = vld [vmem:[%s13937_s20 + $0x1028] sm:$0xff] }
 0x1a7   : > { %7238 = vmatpush1.bf16.msra.mxu0 %v11649_v44  ;;  %7625 = vmatpush1.bf16.msra.mxu1 %v11651_v45  ;;  %v11713_v44 = vcombine.low %v948_v32, %v952_v33  ;;  %v11715_v45 = vcombine.low %v949_v34, %v953_v35  ;;  %v1012_v32 = vld [vmem:[%s13937_s20 + $0x1040] sm:$0xff]  ;;  %v12955_v34 = vld [vmem:[%s13935_s27 + $0x18] ss:$68 sps:$4 sm:$0xff]  }
 0x1a8   : > { %7239 = vmatprep.subr.bf16.mxu0 %v11658_v46  ;;  %7626 = vmatprep.subr.bf16.mxu1 %v11660_v47  ;;  %v11722_v46 = vcombine.high %v956_v40, %v960_v41  ;;  %v11724_v47 = vcombine.high %v957_v42, %v961_v43  ;;  %v1016_v33 = vld [vmem:[%s13937_s20 + $0x1060] sm:$0xff]  ;;  %v1013_v35 = vld [vmem:[%s13937_s20 + $0x1048] sm:$0xff] }
 0x1ab   : > { %7240 = vmatpush1.bf16.msra.mxu0 %v11657_v52  ;;  %7627 = vmatpush1.bf16.msra.mxu1 %v11659_v53  ;;  %v11721_v52 = vcombine.low %v956_v40, %v960_v41  ;;  %v11723_v53 = vcombine.low %v957_v42, %v961_v43  ;;  %v1020_v41 = vld [vmem:[%s13937_s20 + $0x1080] sm:$0xff] }
 0x1ac   : > { %7241 = vmatprep.subr.bf16.mxu0 %v11666_v54  ;;  %7628 = vmatprep.subr.bf16.mxu1 %v11668_v55  ;;  %v11730_v54 = vcombine.high %v964_v48, %v968_v49  ;;  %v11732_v55 = vcombine.high %v965_v50, %v969_v51  ;;  %v1024_v42 = vld [vmem:[%s13937_s20 + $0x10a0] sm:$0xff] }
 0x1ad   : > { %v12956_v43 = vld [vmem:[%s13935_s27 + $0x24] ss:$68 sps:$4 sm:$0xff]  }
 0x1af   : > { %7242 = vmatpush1.bf16.msra.mxu0 %v11665_v60  ;;  %7629 = vmatpush1.bf16.msra.mxu1 %v11667_v61  ;;  %v11729_v60 = vcombine.low %v964_v48, %v968_v49  ;;  %v11731_v61 = vcombine.low %v965_v50, %v969_v51  ;;  %v11786_v48 = vcombine.high %v1020_v41, %v1024_v42  ;;  %v1028_v50 = vld [vmem:[%s13937_s20 + $0x10c0] sm:$0xff] }
 0x1b0   : > { %7243 = vmatprep.subr.bf16.mxu0 %v11674_v62  ;;  %7630 = vmatprep.subr.bf16.mxu1 %v11676_v63  ;;  %v11738_v62 = vcombine.high %v972_v56, %v976_v57  ;;  %v11740_v63 = vcombine.high %v973_v58, %v977_v59  ;;  %v1032_v51 = vld [vmem:[%s13937_s20 + $0x10e0] sm:$0xff] }
 0x1b3   : > { %7244 = vmatpush1.bf16.msra.mxu0 %v11673_v4  ;;  %7631 = vmatpush1.bf16.msra.mxu1 %v11675_v5  ;;  %v11737_v4 = vcombine.low %v972_v56, %v976_v57  ;;  %v11739_v5 = vcombine.low %v973_v58, %v977_v59  ;;  %v11794_v56 = vcombine.high %v1028_v50, %v1032_v51  ;;  %v1036_v58 = vld [vmem:[%s13937_s20 + $0x1100] sm:$0xff] }
 0x1b4   : > { %7245 = vmatprep.subr.bf16.mxu0 %v11682_v6  ;;  %7632 = vmatprep.subr.bf16.mxu1 %v11684_v7  ;;  %v11746_v6 = vcombine.high %v980_v0, %v984_v1  ;;  %v11748_v7 = vcombine.high %v981_v2, %v985_v3  ;;  %v1040_v59 = vld [vmem:[%s13937_s20 + $0x1120] sm:$0xff] }
 0x1b7   : > { %7246 = vmatpush1.bf16.msra.mxu0 %v11681_v12  ;;  %7633 = vmatpush1.bf16.msra.mxu1 %v11683_v13  ;;  %v11745_v12 = vcombine.low %v980_v0, %v984_v1  ;;  %v11747_v13 = vcombine.low %v981_v2, %v985_v3  ;;  %v11802_v0 = vcombine.high %v1036_v58, %v1040_v59  ;;  %v1044_v2 = vld [vmem:[%s13937_s20 + $0x1140] sm:$0xff] }
 0x1b8   : > { %7247 = vmatprep.subr.bf16.mxu0 %v11690_v14  ;;  %7634 = vmatprep.subr.bf16.mxu1 %v11692_v15  ;;  %v11754_v14 = vcombine.high %v988_v8, %v992_v9  ;;  %v11756_v15 = vcombine.high %v989_v10, %v993_v11  ;;  %v1048_v3 = vld [vmem:[%s13937_s20 + $0x1160] sm:$0xff] }
 0x1bb   : > { %7248 = vmatpush1.bf16.msra.mxu0 %v11689_v20  ;;  %7635 = vmatpush1.bf16.msra.mxu1 %v11691_v21  ;;  %v11753_v20 = vcombine.low %v988_v8, %v992_v9  ;;  %v11755_v21 = vcombine.low %v989_v10, %v993_v11  ;;  %v11810_v8 = vcombine.high %v1044_v2, %v1048_v3  ;;  %v1052_v10 = vld [vmem:[%s13937_s20 + $0x1180] sm:$0xff] }
 0x1bc   : > { %7249 = vmatprep.subr.bf16.mxu0 %v11698_v22  ;;  %7636 = vmatprep.subr.bf16.mxu1 %v11700_v23  ;;  %v11762_v22 = vcombine.high %v996_v16, %v1000_v17  ;;  %v11764_v23 = vcombine.high %v997_v18, %v1001_v19  ;;  %v1056_v11 = vld [vmem:[%s13937_s20 + $0x11a0] sm:$0xff] }
 0x1bf   : > { %7250 = vmatpush1.bf16.msra.mxu0 %v11697_v28  ;;  %7637 = vmatpush1.bf16.msra.mxu1 %v11699_v29  ;;  %v11761_v28 = vcombine.low %v996_v16, %v1000_v17  ;;  %v11763_v29 = vcombine.low %v997_v18, %v1001_v19  ;;  %v11818_v16 = vcombine.high %v1052_v10, %v1056_v11  ;;  %v1060_v18 = vld [vmem:[%s13937_s20 + $0x11c0] sm:$0xff] }
 0x1c0   : > { %7251 = vmatprep.subr.bf16.mxu0 %v11706_v30  ;;  %7638 = vmatprep.subr.bf16.mxu1 %v11708_v31  ;;  %v11770_v30 = vcombine.high %v1004_v24, %v1008_v25  ;;  %v11772_v31 = vcombine.high %v1005_v26, %v1009_v27  ;;  %v1064_v19 = vld [vmem:[%s13937_s20 + $0x11e0] sm:$0xff] }
 0x1c3   : > { %7252 = vmatpush1.bf16.msra.mxu0 %v11705_v36  ;;  %7639 = vmatpush1.bf16.msra.mxu1 %v11707_v37  ;;  %v1017_v36 = vld [vmem:[%s13937_s20 + $0x1068] sm:$0xff]  ;;  %v11769_v37 = vcombine.low %v1004_v24, %v1008_v25  ;;  %v11826_v24 = vcombine.high %v1060_v18, %v1064_v19 }
 0x1c4   : > { %7253 = vmatprep.subr.bf16.mxu0 %v11714_v38  ;;  %7640 = vmatprep.subr.bf16.mxu1 %v11716_v39  ;;  %v11771_v38 = vcombine.low %v1005_v26, %v1009_v27  ;;  %v11778_v39 = vcombine.high %v1012_v32, %v1016_v33  ;;  %v11780_v40 = vcombine.high %v1013_v35, %v1017_v36  ;;  %v1068_v26 = vld [vmem:[%s13937_s20 + $0x1200] sm:$0xff] }
 0x1c5   : > { %v1072_v27 = vld [vmem:[%s13937_s20 + $0x1220] sm:$0xff] }
 0x1c7   : > { %7254 = vmatpush1.bf16.msra.mxu0 %v11713_v44  ;;  %7641 = vmatpush1.bf16.msra.mxu1 %v11715_v45  ;;  %v1021_v44 = vld [vmem:[%s13937_s20 + $0x1088] sm:$0xff] }
 0x1c8   : > { %7255 = vmatprep.subr.bf16.mxu0 %v11722_v46  ;;  %7642 = vmatprep.subr.bf16.mxu1 %v11724_v47  ;;  %v1025_v45 = vld [vmem:[%s13937_s20 + $0x10a8] sm:$0xff]  ;;  %v11777_v46 = vcombine.low %v1012_v32, %v1016_v33  ;;  %v11779_v47 = vcombine.low %v1013_v35, %v1017_v36  ;;  %v11834_v32 = vcombine.high %v1068_v26, %v1072_v27  ;;  %v1080_v35 = vld [vmem:[%s13937_s20 + $0x1260] sm:$0xff] }
 0x1c9   : > { %v11788_v49 = vcombine.high %v1021_v44, %v1025_v45  ;;  %v1077_v36 = vld [vmem:[%s13937_s20 + $0x1248] sm:$0xff] }
 0x1cb   : > { %7256 = vmatpush1.bf16.msra.mxu0 %v11721_v52  ;;  %7643 = vmatpush1.bf16.msra.mxu1 %v11723_v53  ;;  %v1029_v52 = vld [vmem:[%s13937_s20 + $0x10c8] sm:$0xff] }
 0x1cc   : > { %7257 = vmatprep.subr.bf16.mxu0 %v11730_v54  ;;  %7644 = vmatprep.subr.bf16.mxu1 %v11732_v55  ;;  %v1033_v53 = vld [vmem:[%s13937_s20 + $0x10e8] sm:$0xff]  ;;  %v11785_v54 = vcombine.low %v1020_v41, %v1024_v42  ;;  %v11787_v55 = vcombine.low %v1021_v44, %v1025_v45  ;;  %v1084_v42 = vld [vmem:[%s13937_s20 + $0x1280] sm:$0xff] }
 0x1cd   : > { %v11796_v57 = vcombine.high %v1029_v52, %v1033_v53  ;;  %v1085_v44 = vld [vmem:[%s13937_s20 + $0x1288] sm:$0xff] }
 0x1ce   : > { %v1089_v45 = vld [vmem:[%s13937_s20 + $0x12a8] sm:$0xff] }
 0x1cf   : > { %7258 = vmatpush1.bf16.msra.mxu0 %v11729_v60  ;;  %7645 = vmatpush1.bf16.msra.mxu1 %v11731_v61  ;;  %v1037_v60 = vld [vmem:[%s13937_s20 + $0x1108] sm:$0xff] }
 0x1d0   : > { %7259 = vmatprep.subr.bf16.mxu0 %v11738_v62  ;;  %7646 = vmatprep.subr.bf16.mxu1 %v11740_v63  ;;  %v1041_v61 = vld [vmem:[%s13937_s20 + $0x1128] sm:$0xff]  ;;  %v11793_v62 = vcombine.low %v1028_v50, %v1032_v51  ;;  %v11795_v63 = vcombine.low %v1029_v52, %v1033_v53  ;;  %v1092_v50 = vld [vmem:[%s13937_s20 + $0x12c0] sm:$0xff] }
 0x1d1   : > { %v11804_v1 = vcombine.high %v1037_v60, %v1041_v61  ;;  %v1096_v51 = vld [vmem:[%s13937_s20 + $0x12e0] sm:$0xff]  ;;  %v1093_v52 = vld [vmem:[%s13937_s20 + $0x12c8] sm:$0xff] }
 0x1d2   : > { %v1097_v53 = vld [vmem:[%s13937_s20 + $0x12e8] sm:$0xff] }
 0x1d3   : > { %7260 = vmatpush1.bf16.msra.mxu0 %v11737_v4  ;;  %7647 = vmatpush1.bf16.msra.mxu1 %v11739_v5  ;;  %v1045_v4 = vld [vmem:[%s13937_s20 + $0x1148] sm:$0xff] }
 0x1d4   : > { %7261 = vmatprep.subr.bf16.mxu0 %v11746_v6  ;;  %7648 = vmatprep.subr.bf16.mxu1 %v11748_v7  ;;  %v1049_v5 = vld [vmem:[%s13937_s20 + $0x1168] sm:$0xff]  ;;  %v11801_v6 = vcombine.low %v1036_v58, %v1040_v59  ;;  %v11803_v7 = vcombine.low %v1037_v60, %v1041_v61  ;;  %v1100_v58 = vld [vmem:[%s13937_s20 + $0x1300] sm:$0xff] }
 0x1d5   : > { %v11812_v9 = vcombine.high %v1045_v4, %v1049_v5  ;;  %v1104_v59 = vld [vmem:[%s13937_s20 + $0x1320] sm:$0xff]  ;;  %v1101_v60 = vld [vmem:[%s13937_s20 + $0x1308] sm:$0xff] }
 0x1d6   : > { %v1105_v61 = vld [vmem:[%s13937_s20 + $0x1328] sm:$0xff] }
 0x1d7   : > { %7262 = vmatpush1.bf16.msra.mxu0 %v11745_v12  ;;  %7649 = vmatpush1.bf16.msra.mxu1 %v11747_v13  ;;  %v1053_v12 = vld [vmem:[%s13937_s20 + $0x1188] sm:$0xff] }
 0x1d8   : > { %7263 = vmatprep.subr.bf16.mxu0 %v11754_v14  ;;  %7650 = vmatprep.subr.bf16.mxu1 %v11756_v15  ;;  %v1057_v13 = vld [vmem:[%s13937_s20 + $0x11a8] sm:$0xff]  ;;  %v11809_v14 = vcombine.low %v1044_v2, %v1048_v3  ;;  %v11811_v15 = vcombine.low %v1045_v4, %v1049_v5  ;;  %v1108_v2 = vld [vmem:[%s13937_s20 + $0x1340] sm:$0xff] }
 0x1d9   : > { %v11820_v17 = vcombine.high %v1053_v12, %v1057_v13  ;;  %v1112_v3 = vld [vmem:[%s13937_s20 + $0x1360] sm:$0xff]  ;;  %v1109_v4 = vld [vmem:[%s13937_s20 + $0x1348] sm:$0xff] }
 0x1da   : > { %v1113_v5 = vld [vmem:[%s13937_s20 + $0x1368] sm:$0xff] }
 0x1db   : > { %7264 = vmatpush1.bf16.msra.mxu0 %v11753_v20  ;;  %7651 = vmatpush1.bf16.msra.mxu1 %v11755_v21  ;;  %v1061_v20 = vld [vmem:[%s13937_s20 + $0x11c8] sm:$0xff] }
 0x1dc   : > { %7265 = vmatprep.subr.bf16.mxu0 %v11762_v22  ;;  %7652 = vmatprep.subr.bf16.mxu1 %v11764_v23  ;;  %v1065_v21 = vld [vmem:[%s13937_s20 + $0x11e8] sm:$0xff]  ;;  %v11817_v22 = vcombine.low %v1052_v10, %v1056_v11  ;;  %v11819_v23 = vcombine.low %v1053_v12, %v1057_v13  ;;  %v1116_v10 = vld [vmem:[%s13937_s20 + $0x1380] sm:$0xff] }
 0x1dd   : > { %v11828_v25 = vcombine.high %v1061_v20, %v1065_v21  ;;  %v1120_v11 = vld [vmem:[%s13937_s20 + $0x13a0] sm:$0xff]  ;;  %v1117_v12 = vld [vmem:[%s13937_s20 + $0x1388] sm:$0xff] }
 0x1de   : > { %v1121_v13 = vld [vmem:[%s13937_s20 + $0x13a8] sm:$0xff] }
 0x1df   : > { %7266 = vmatpush1.bf16.msra.mxu0 %v11761_v28  ;;  %7653 = vmatpush1.bf16.msra.mxu1 %v11763_v29  ;;  %v1069_v28 = vld [vmem:[%s13937_s20 + $0x1208] sm:$0xff] }
 0x1e0   : > { %7278 = vmatprep.subr.bf16.mxu0 %v11770_v30  ;;  %7665 = vmatprep.subr.bf16.mxu1 %v11772_v31  ;;  %v1073_v29 = vld [vmem:[%s13937_s20 + $0x1228] sm:$0xff]  ;;  %v11825_v30 = vcombine.low %v1060_v18, %v1064_v19  ;;  %v11827_v31 = vcombine.low %v1061_v20, %v1065_v21  ;;  %v1124_v18 = vld [vmem:[%s13937_s20 + $0x13c0] sm:$0xff] }
 0x1e1   : > { %v11836_v33 = vcombine.high %v1069_v28, %v1073_v29  ;;  %v1128_v19 = vld [vmem:[%s13937_s20 + $0x13e0] sm:$0xff]  ;;  %v1125_v20 = vld [vmem:[%s13937_s20 + $0x13c8] sm:$0xff] }
 0x1e2   : > { %7268 = vmatmul.mubr.bf16.vlgmr.msra.gmra.mrb[0].mxu0 %v12955_v34  ;;  %7655 = vmatmul.mubr.bf16.vlgmr.msra.gmra.mrb[0].mxu1 %v12955_v34  ;;  %v1076_v34 = vld [vmem:[%s13937_s20 + $0x1240] sm:$0xff]  ;;  %v1129_v21 = vld [vmem:[%s13937_s20 + $0x13e8] sm:$0xff] }
 0x1e3   : > { %7279 = vmatpush1.bf16.msra.mxu0 %v11769_v37  ;;  %7666 = vmatpush1.bf16.msra.mxu1 %v11771_v38  ;;  %v1081_v37 = vld [vmem:[%s13937_s20 + $0x1268] sm:$0xff]  ;;  %v11833_v38 = vcombine.low %v1068_v26, %v1072_v27  ;;  %v1132_v26 = vld [vmem:[%s13937_s20 + $0x1400] sm:$0xff] }
 0x1e4   : > { %7280 = vmatprep.subr.bf16.mxu0 %v11778_v39  ;;  %7667 = vmatprep.subr.bf16.mxu1 %v11780_v40  ;;  %v11835_v39 = vcombine.low %v1069_v28, %v1073_v29  ;;  %v11842_v40 = vcombine.high %v1076_v34, %v1080_v35  ;;  %v11844_v41 = vcombine.high %v1077_v36, %v1081_v37  ;;  %v1136_v27 = vld [vmem:[%s13937_s20 + $0x1420] sm:$0xff]  ;;  %v1133_v28 = vld [vmem:[%s13937_s20 + $0x1408] sm:$0xff] }
 0x1e5   : > { %7310 = vmatprep.mubr.bf16.mxu0 %v12956_v43  ;;  %7697 = vmatprep.mubr.bf16.mxu1 %v12956_v43  ;;  %v1088_v43 = vld [vmem:[%s13937_s20 + $0x12a0] sm:$0xff]  ;;  %v1137_v29 = vld [vmem:[%s13937_s20 + $0x1428] sm:$0xff] }
 0x1e7   : > { %7281 = vmatpush1.bf16.msra.mxu0 %v11777_v46  ;;  %7668 = vmatpush1.bf16.msra.mxu1 %v11779_v47  ;;  %v11841_v46 = vcombine.low %v1076_v34, %v1080_v35  ;;  %v11843_v47 = vcombine.low %v1077_v36, %v1081_v37  ;;  %v1140_v34 = vld [vmem:[%s13937_s20 + $0x1440] sm:$0xff]  ;;  %v12958_v36 = vld [vmem:[%s13935_s27 + $0x20] ss:$68 sps:$4 sm:$0xff]   ;;  %v1141_v37 = vld [vmem:[%s13937_s20 + $0x1448] sm:$0xff] }
 0x1e8   : > { %7282 = vmatprep.subr.bf16.mxu0 %v11786_v48  ;;  %7669 = vmatprep.subr.bf16.mxu1 %v11788_v49  ;;  %v11850_v48 = vcombine.high %v1084_v42, %v1088_v43  ;;  %v11852_v49 = vcombine.high %v1085_v44, %v1089_v45  ;;  %v1144_v35 = vld [vmem:[%s13937_s20 + $0x1460] sm:$0xff] }
 0x1eb   : > { %7283 = vmatpush1.bf16.msra.mxu0 %v11785_v54  ;;  %7670 = vmatpush1.bf16.msra.mxu1 %v11787_v55  ;;  %v11849_v54 = vcombine.low %v1084_v42, %v1088_v43  ;;  %v11851_v55 = vcombine.low %v1085_v44, %v1089_v45  ;;  %v1148_v43 = vld [vmem:[%s13937_s20 + $0x1480] sm:$0xff] }
 0x1ec   : > { %7284 = vmatprep.subr.bf16.mxu0 %v11794_v56  ;;  %7671 = vmatprep.subr.bf16.mxu1 %v11796_v57  ;;  %v11858_v56 = vcombine.high %v1092_v50, %v1096_v51  ;;  %v11860_v57 = vcombine.high %v1093_v52, %v1097_v53  ;;  %v1152_v44 = vld [vmem:[%s13937_s20 + $0x14a0] sm:$0xff] }
 0x1ed   : > { %v12959_v45 = vld [vmem:[%s13935_s27 + $0x2c] ss:$68 sps:$4 sm:$0xff]  }
 0x1ef   : > { %7285 = vmatpush1.bf16.msra.mxu0 %v11793_v62  ;;  %7672 = vmatpush1.bf16.msra.mxu1 %v11795_v63  ;;  %v11857_v62 = vcombine.low %v1092_v50, %v1096_v51  ;;  %v11859_v63 = vcombine.low %v1093_v52, %v1097_v53  ;;  %v11914_v50 = vcombine.high %v1148_v43, %v1152_v44  ;;  %v1156_v52 = vld [vmem:[%s13937_s20 + $0x14c0] sm:$0xff] }
 0x1f0   : > { %7286 = vmatprep.subr.bf16.mxu0 %v11802_v0  ;;  %7673 = vmatprep.subr.bf16.mxu1 %v11804_v1  ;;  %v11866_v0 = vcombine.high %v1100_v58, %v1104_v59  ;;  %v11868_v1 = vcombine.high %v1101_v60, %v1105_v61  ;;  %v1160_v53 = vld [vmem:[%s13937_s20 + $0x14e0] sm:$0xff] }
 0x1f3   : > { %7287 = vmatpush1.bf16.msra.mxu0 %v11801_v6  ;;  %7674 = vmatpush1.bf16.msra.mxu1 %v11803_v7  ;;  %v11865_v6 = vcombine.low %v1100_v58, %v1104_v59  ;;  %v11867_v7 = vcombine.low %v1101_v60, %v1105_v61  ;;  %v11922_v58 = vcombine.high %v1156_v52, %v1160_v53  ;;  %v1164_v60 = vld [vmem:[%s13937_s20 + $0x1500] sm:$0xff] }
 0x1f4   : > { %7288 = vmatprep.subr.bf16.mxu0 %v11810_v8  ;;  %7675 = vmatprep.subr.bf16.mxu1 %v11812_v9  ;;  %v11874_v8 = vcombine.high %v1108_v2, %v1112_v3  ;;  %v11876_v9 = vcombine.high %v1109_v4, %v1113_v5  ;;  %v1168_v61 = vld [vmem:[%s13937_s20 + $0x1520] sm:$0xff] }
 0x1f7   : > { %7289 = vmatpush1.bf16.msra.mxu0 %v11809_v14  ;;  %7676 = vmatpush1.bf16.msra.mxu1 %v11811_v15  ;;  %v11873_v14 = vcombine.low %v1108_v2, %v1112_v3  ;;  %v11875_v15 = vcombine.low %v1109_v4, %v1113_v5  ;;  %v11930_v2 = vcombine.high %v1164_v60, %v1168_v61  ;;  %v1172_v4 = vld [vmem:[%s13937_s20 + $0x1540] sm:$0xff] }
 0x1f8   : > { %7290 = vmatprep.subr.bf16.mxu0 %v11818_v16  ;;  %7677 = vmatprep.subr.bf16.mxu1 %v11820_v17  ;;  %v11882_v16 = vcombine.high %v1116_v10, %v1120_v11  ;;  %v11884_v17 = vcombine.high %v1117_v12, %v1121_v13  ;;  %v1176_v5 = vld [vmem:[%s13937_s20 + $0x1560] sm:$0xff] }
 0x1fb   : > { %7291 = vmatpush1.bf16.msra.mxu0 %v11817_v22  ;;  %7678 = vmatpush1.bf16.msra.mxu1 %v11819_v23  ;;  %v11881_v22 = vcombine.low %v1116_v10, %v1120_v11  ;;  %v11883_v23 = vcombine.low %v1117_v12, %v1121_v13  ;;  %v11938_v10 = vcombine.high %v1172_v4, %v1176_v5  ;;  %v1180_v12 = vld [vmem:[%s13937_s20 + $0x1580] sm:$0xff] }
 0x1fc   : > { %7292 = vmatprep.subr.bf16.mxu0 %v11826_v24  ;;  %7679 = vmatprep.subr.bf16.mxu1 %v11828_v25  ;;  %v11890_v24 = vcombine.high %v1124_v18, %v1128_v19  ;;  %v11892_v25 = vcombine.high %v1125_v20, %v1129_v21  ;;  %v1184_v13 = vld [vmem:[%s13937_s20 + $0x15a0] sm:$0xff] }
 0x1ff   : > { %7293 = vmatpush1.bf16.msra.mxu0 %v11825_v30  ;;  %7680 = vmatpush1.bf16.msra.mxu1 %v11827_v31  ;;  %v11889_v30 = vcombine.low %v1124_v18, %v1128_v19  ;;  %v11891_v31 = vcombine.low %v1125_v20, %v1129_v21  ;;  %v11946_v18 = vcombine.high %v1180_v12, %v1184_v13  ;;  %v1188_v20 = vld [vmem:[%s13937_s20 + $0x15c0] sm:$0xff] }
 0x200   : > { %7294 = vmatprep.subr.bf16.mxu0 %v11834_v32  ;;  %7681 = vmatprep.subr.bf16.mxu1 %v11836_v33  ;;  %v11898_v32 = vcombine.high %v1132_v26, %v1136_v27  ;;  %v11900_v33 = vcombine.high %v1133_v28, %v1137_v29  ;;  %v1192_v21 = vld [vmem:[%s13937_s20 + $0x15e0] sm:$0xff] }
 0x203   : > { %7295 = vmatpush1.bf16.msra.mxu0 %v11833_v38  ;;  %7682 = vmatpush1.bf16.msra.mxu1 %v11835_v39  ;;  %v1145_v38 = vld [vmem:[%s13937_s20 + $0x1468] sm:$0xff]  ;;  %v11897_v39 = vcombine.low %v1132_v26, %v1136_v27  ;;  %v11954_v26 = vcombine.high %v1188_v20, %v1192_v21 }
 0x204   : > { %7296 = vmatprep.subr.bf16.mxu0 %v11842_v40  ;;  %7683 = vmatprep.subr.bf16.mxu1 %v11844_v41  ;;  %v11899_v40 = vcombine.low %v1133_v28, %v1137_v29  ;;  %v11906_v41 = vcombine.high %v1140_v34, %v1144_v35  ;;  %v11908_v42 = vcombine.high %v1141_v37, %v1145_v38  ;;  %v1196_v28 = vld [vmem:[%s13937_s20 + $0x1600] sm:$0xff] }
 0x205   : > { %v1200_v29 = vld [vmem:[%s13937_s20 + $0x1620] sm:$0xff] }
 0x207   : > { %7297 = vmatpush1.bf16.msra.mxu0 %v11841_v46  ;;  %7684 = vmatpush1.bf16.msra.mxu1 %v11843_v47  ;;  %v1149_v46 = vld [vmem:[%s13937_s20 + $0x1488] sm:$0xff] }
 0x208   : > { %7298 = vmatprep.subr.bf16.mxu0 %v11850_v48  ;;  %7685 = vmatprep.subr.bf16.mxu1 %v11852_v49  ;;  %v1153_v47 = vld [vmem:[%s13937_s20 + $0x14a8] sm:$0xff]  ;;  %v11905_v48 = vcombine.low %v1140_v34, %v1144_v35  ;;  %v11907_v49 = vcombine.low %v1141_v37, %v1145_v38  ;;  %v11962_v34 = vcombine.high %v1196_v28, %v1200_v29  ;;  %v1208_v37 = vld [vmem:[%s13937_s20 + $0x1660] sm:$0xff] }
 0x209   : > { %v11916_v51 = vcombine.high %v1149_v46, %v1153_v47  ;;  %v1205_v38 = vld [vmem:[%s13937_s20 + $0x1648] sm:$0xff] }
 0x20b   : > { %7299 = vmatpush1.bf16.msra.mxu0 %v11849_v54  ;;  %7686 = vmatpush1.bf16.msra.mxu1 %v11851_v55  ;;  %v1157_v54 = vld [vmem:[%s13937_s20 + $0x14c8] sm:$0xff] }
 0x20c   : > { %7300 = vmatprep.subr.bf16.mxu0 %v11858_v56  ;;  %7687 = vmatprep.subr.bf16.mxu1 %v11860_v57  ;;  %v1161_v55 = vld [vmem:[%s13937_s20 + $0x14e8] sm:$0xff]  ;;  %v11913_v56 = vcombine.low %v1148_v43, %v1152_v44  ;;  %v11915_v57 = vcombine.low %v1149_v46, %v1153_v47  ;;  %v1212_v44 = vld [vmem:[%s13937_s20 + $0x1680] sm:$0xff] }
 0x20d   : > { %v11924_v59 = vcombine.high %v1157_v54, %v1161_v55  ;;  %v1213_v46 = vld [vmem:[%s13937_s20 + $0x1688] sm:$0xff] }
 0x20e   : > { %v1217_v47 = vld [vmem:[%s13937_s20 + $0x16a8] sm:$0xff] }
 0x20f   : > { %7301 = vmatpush1.bf16.msra.mxu0 %v11857_v62  ;;  %7688 = vmatpush1.bf16.msra.mxu1 %v11859_v63  ;;  %v1165_v62 = vld [vmem:[%s13937_s20 + $0x1508] sm:$0xff] }
 0x210   : > { %7302 = vmatprep.subr.bf16.mxu0 %v11866_v0  ;;  %7689 = vmatprep.subr.bf16.mxu1 %v11868_v1  ;;  %v1169_v63 = vld [vmem:[%s13937_s20 + $0x1528] sm:$0xff]  ;;  %v11921_v0 = vcombine.low %v1156_v52, %v1160_v53  ;;  %v11923_v1 = vcombine.low %v1157_v54, %v1161_v55  ;;  %v1220_v52 = vld [vmem:[%s13937_s20 + $0x16c0] sm:$0xff] }
 0x211   : > { %v11932_v3 = vcombine.high %v1165_v62, %v1169_v63  ;;  %v1224_v53 = vld [vmem:[%s13937_s20 + $0x16e0] sm:$0xff]  ;;  %v1221_v54 = vld [vmem:[%s13937_s20 + $0x16c8] sm:$0xff] }
 0x212   : > { %v1225_v55 = vld [vmem:[%s13937_s20 + $0x16e8] sm:$0xff] }
 0x213   : > { %7303 = vmatpush1.bf16.msra.mxu0 %v11865_v6  ;;  %7690 = vmatpush1.bf16.msra.mxu1 %v11867_v7  ;;  %v1173_v6 = vld [vmem:[%s13937_s20 + $0x1548] sm:$0xff] }
 0x214   : > { %7304 = vmatprep.subr.bf16.mxu0 %v11874_v8  ;;  %7691 = vmatprep.subr.bf16.mxu1 %v11876_v9  ;;  %v1177_v7 = vld [vmem:[%s13937_s20 + $0x1568] sm:$0xff]  ;;  %v11929_v8 = vcombine.low %v1164_v60, %v1168_v61  ;;  %v11931_v9 = vcombine.low %v1165_v62, %v1169_v63  ;;  %v1228_v60 = vld [vmem:[%s13937_s20 + $0x1700] sm:$0xff] }
 0x215   : > { %v11940_v11 = vcombine.high %v1173_v6, %v1177_v7  ;;  %v1232_v61 = vld [vmem:[%s13937_s20 + $0x1720] sm:$0xff]  ;;  %v1229_v62 = vld [vmem:[%s13937_s20 + $0x1708] sm:$0xff] }
 0x216   : > { %v1233_v63 = vld [vmem:[%s13937_s20 + $0x1728] sm:$0xff] }
 0x217   : > { %7305 = vmatpush1.bf16.msra.mxu0 %v11873_v14  ;;  %7692 = vmatpush1.bf16.msra.mxu1 %v11875_v15  ;;  %v1181_v14 = vld [vmem:[%s13937_s20 + $0x1588] sm:$0xff] }
 0x218   : > { %7306 = vmatprep.subr.bf16.mxu0 %v11882_v16  ;;  %7693 = vmatprep.subr.bf16.mxu1 %v11884_v17  ;;  %v1185_v15 = vld [vmem:[%s13937_s20 + $0x15a8] sm:$0xff]  ;;  %v11937_v16 = vcombine.low %v1172_v4, %v1176_v5  ;;  %v11939_v17 = vcombine.low %v1173_v6, %v1177_v7  ;;  %v1236_v4 = vld [vmem:[%s13937_s20 + $0x1740] sm:$0xff] }
 0x219   : > { %v11948_v19 = vcombine.high %v1181_v14, %v1185_v15  ;;  %v1240_v5 = vld [vmem:[%s13937_s20 + $0x1760] sm:$0xff]  ;;  %v1237_v6 = vld [vmem:[%s13937_s20 + $0x1748] sm:$0xff] }
 0x21a   : > { %v1241_v7 = vld [vmem:[%s13937_s20 + $0x1768] sm:$0xff] }
 0x21b   : > { %7307 = vmatpush1.bf16.msra.mxu0 %v11881_v22  ;;  %7694 = vmatpush1.bf16.msra.mxu1 %v11883_v23  ;;  %v1189_v22 = vld [vmem:[%s13937_s20 + $0x15c8] sm:$0xff] }
 0x21c   : > { %7308 = vmatprep.subr.bf16.mxu0 %v11890_v24  ;;  %7695 = vmatprep.subr.bf16.mxu1 %v11892_v25  ;;  %v1193_v23 = vld [vmem:[%s13937_s20 + $0x15e8] sm:$0xff]  ;;  %v11945_v24 = vcombine.low %v1180_v12, %v1184_v13  ;;  %v11947_v25 = vcombine.low %v1181_v14, %v1185_v15  ;;  %v1244_v12 = vld [vmem:[%s13937_s20 + $0x1780] sm:$0xff] }
 0x21d   : > { %v11956_v27 = vcombine.high %v1189_v22, %v1193_v23  ;;  %v1248_v13 = vld [vmem:[%s13937_s20 + $0x17a0] sm:$0xff]  ;;  %v1245_v14 = vld [vmem:[%s13937_s20 + $0x1788] sm:$0xff] }
 0x21e   : > { %v1249_v15 = vld [vmem:[%s13937_s20 + $0x17a8] sm:$0xff] }
 0x21f   : > { %7309 = vmatpush1.bf16.msra.mxu0 %v11889_v30  ;;  %7696 = vmatpush1.bf16.msra.mxu1 %v11891_v31  ;;  %v1197_v30 = vld [vmem:[%s13937_s20 + $0x1608] sm:$0xff] }
 0x220   : > { %7321 = vmatprep.subr.bf16.mxu0 %v11898_v32  ;;  %7708 = vmatprep.subr.bf16.mxu1 %v11900_v33  ;;  %v1201_v31 = vld [vmem:[%s13937_s20 + $0x1628] sm:$0xff]  ;;  %v11953_v32 = vcombine.low %v1188_v20, %v1192_v21  ;;  %v11955_v33 = vcombine.low %v1189_v22, %v1193_v23  ;;  %v1252_v20 = vld [vmem:[%s13937_s20 + $0x17c0] sm:$0xff] }
 0x221   : > { %v11964_v35 = vcombine.high %v1197_v30, %v1201_v31  ;;  %v1256_v21 = vld [vmem:[%s13937_s20 + $0x17e0] sm:$0xff]  ;;  %v1253_v22 = vld [vmem:[%s13937_s20 + $0x17c8] sm:$0xff] }
 0x222   : > { %7311 = vmatmul.mubr.bf16.vlgmr.msra.gmra.mrb[0].mxu0 %v12958_v36  ;;  %7698 = vmatmul.mubr.bf16.vlgmr.msra.gmra.mrb[0].mxu1 %v12958_v36  ;;  %v1204_v36 = vld [vmem:[%s13937_s20 + $0x1640] sm:$0xff]  ;;  %v1257_v23 = vld [vmem:[%s13937_s20 + $0x17e8] sm:$0xff] }
 0x223   : > { %7322 = vmatpush1.bf16.msra.mxu0 %v11897_v39  ;;  %7709 = vmatpush1.bf16.msra.mxu1 %v11899_v40  ;;  %v1209_v39 = vld [vmem:[%s13937_s20 + $0x1668] sm:$0xff]  ;;  %v11961_v40 = vcombine.low %v1196_v28, %v1200_v29  ;;  %v1260_v28 = vld [vmem:[%s13937_s20 + $0x1800] sm:$0xff] }
 0x224   : > { %7323 = vmatprep.subr.bf16.mxu0 %v11906_v41  ;;  %7710 = vmatprep.subr.bf16.mxu1 %v11908_v42  ;;  %v11963_v41 = vcombine.low %v1197_v30, %v1201_v31  ;;  %v11970_v42 = vcombine.high %v1204_v36, %v1208_v37  ;;  %v11972_v43 = vcombine.high %v1205_v38, %v1209_v39  ;;  %v1264_v29 = vld [vmem:[%s13937_s20 + $0x1820] sm:$0xff]  ;;  %v1261_v30 = vld [vmem:[%s13937_s20 + $0x1808] sm:$0xff] }
 0x225   : > { %7353 = vmatprep.mubr.bf16.mxu0 %v12959_v45  ;;  %7740 = vmatprep.mubr.bf16.mxu1 %v12959_v45  ;;  %v1216_v45 = vld [vmem:[%s13937_s20 + $0x16a0] sm:$0xff]  ;;  %v1265_v31 = vld [vmem:[%s13937_s20 + $0x1828] sm:$0xff] }
 0x227   : > { %7324 = vmatpush1.bf16.msra.mxu0 %v11905_v48  ;;  %7711 = vmatpush1.bf16.msra.mxu1 %v11907_v49  ;;  %v11969_v48 = vcombine.low %v1204_v36, %v1208_v37  ;;  %v11971_v49 = vcombine.low %v1205_v38, %v1209_v39  ;;  %v1268_v36 = vld [vmem:[%s13937_s20 + $0x1840] sm:$0xff]  ;;  %v1269_v39 = vld [vmem:[%s13937_s20 + $0x1848] sm:$0xff] }
 0x228   : > { %7325 = vmatprep.subr.bf16.mxu0 %v11914_v50  ;;  %7712 = vmatprep.subr.bf16.mxu1 %v11916_v51  ;;  %v11978_v50 = vcombine.high %v1212_v44, %v1216_v45  ;;  %v11980_v51 = vcombine.high %v1213_v46, %v1217_v47  ;;  %v1272_v37 = vld [vmem:[%s13937_s20 + $0x1860] sm:$0xff] }
 0x229   : > { %v12961_v38 = vld [vmem:[%s13935_s27 + $0x28] ss:$68 sps:$4 sm:$0xff]  }
 0x22b   : > { %7326 = vmatpush1.bf16.msra.mxu0 %v11913_v56  ;;  %7713 = vmatpush1.bf16.msra.mxu1 %v11915_v57  ;;  %v11977_v56 = vcombine.low %v1212_v44, %v1216_v45  ;;  %v11979_v57 = vcombine.low %v1213_v46, %v1217_v47  ;;  %v1276_v45 = vld [vmem:[%s13937_s20 + $0x1880] sm:$0xff] }
 0x22c   : > { %7327 = vmatprep.subr.bf16.mxu0 %v11922_v58  ;;  %7714 = vmatprep.subr.bf16.mxu1 %v11924_v59  ;;  %v11986_v58 = vcombine.high %v1220_v52, %v1224_v53  ;;  %v11988_v59 = vcombine.high %v1221_v54, %v1225_v55  ;;  %v1280_v46 = vld [vmem:[%s13937_s20 + $0x18a0] sm:$0xff] }
 0x22d   : > { %v12962_v47 = vld [vmem:[%s13935_s27 + $0x34] ss:$68 sps:$4 sm:$0xff]  }
 0x22f   : > { %7328 = vmatpush1.bf16.msra.mxu0 %v11921_v0  ;;  %7715 = vmatpush1.bf16.msra.mxu1 %v11923_v1  ;;  %v11985_v0 = vcombine.low %v1220_v52, %v1224_v53  ;;  %v11987_v1 = vcombine.low %v1221_v54, %v1225_v55  ;;  %v12042_v52 = vcombine.high %v1276_v45, %v1280_v46  ;;  %v1284_v54 = vld [vmem:[%s13937_s20 + $0x18c0] sm:$0xff] }
 0x230   : > { %7329 = vmatprep.subr.bf16.mxu0 %v11930_v2  ;;  %7716 = vmatprep.subr.bf16.mxu1 %v11932_v3  ;;  %v11994_v2 = vcombine.high %v1228_v60, %v1232_v61  ;;  %v11996_v3 = vcombine.high %v1229_v62, %v1233_v63  ;;  %v1288_v55 = vld [vmem:[%s13937_s20 + $0x18e0] sm:$0xff] }
 0x233   : > { %7330 = vmatpush1.bf16.msra.mxu0 %v11929_v8  ;;  %7717 = vmatpush1.bf16.msra.mxu1 %v11931_v9  ;;  %v11993_v8 = vcombine.low %v1228_v60, %v1232_v61  ;;  %v11995_v9 = vcombine.low %v1229_v62, %v1233_v63  ;;  %v12050_v60 = vcombine.high %v1284_v54, %v1288_v55  ;;  %v1292_v62 = vld [vmem:[%s13937_s20 + $0x1900] sm:$0xff] }
 0x234   : > { %7331 = vmatprep.subr.bf16.mxu0 %v11938_v10  ;;  %7718 = vmatprep.subr.bf16.mxu1 %v11940_v11  ;;  %v12002_v10 = vcombine.high %v1236_v4, %v1240_v5  ;;  %v12004_v11 = vcombine.high %v1237_v6, %v1241_v7  ;;  %v1296_v63 = vld [vmem:[%s13937_s20 + $0x1920] sm:$0xff] }
 0x237   : > { %7332 = vmatpush1.bf16.msra.mxu0 %v11937_v16  ;;  %7719 = vmatpush1.bf16.msra.mxu1 %v11939_v17  ;;  %v12001_v16 = vcombine.low %v1236_v4, %v1240_v5  ;;  %v12003_v17 = vcombine.low %v1237_v6, %v1241_v7  ;;  %v12058_v4 = vcombine.high %v1292_v62, %v1296_v63  ;;  %v1300_v6 = vld [vmem:[%s13937_s20 + $0x1940] sm:$0xff] }
 0x238   : > { %7333 = vmatprep.subr.bf16.mxu0 %v11946_v18  ;;  %7720 = vmatprep.subr.bf16.mxu1 %v11948_v19  ;;  %v12010_v18 = vcombine.high %v1244_v12, %v1248_v13  ;;  %v12012_v19 = vcombine.high %v1245_v14, %v1249_v15  ;;  %v1304_v7 = vld [vmem:[%s13937_s20 + $0x1960] sm:$0xff] }
 0x23b   : > { %7334 = vmatpush1.bf16.msra.mxu0 %v11945_v24  ;;  %7721 = vmatpush1.bf16.msra.mxu1 %v11947_v25  ;;  %v12009_v24 = vcombine.low %v1244_v12, %v1248_v13  ;;  %v12011_v25 = vcombine.low %v1245_v14, %v1249_v15  ;;  %v12066_v12 = vcombine.high %v1300_v6, %v1304_v7  ;;  %v1308_v14 = vld [vmem:[%s13937_s20 + $0x1980] sm:$0xff] }
 0x23c   : > { %7335 = vmatprep.subr.bf16.mxu0 %v11954_v26  ;;  %7722 = vmatprep.subr.bf16.mxu1 %v11956_v27  ;;  %v12018_v26 = vcombine.high %v1252_v20, %v1256_v21  ;;  %v12020_v27 = vcombine.high %v1253_v22, %v1257_v23  ;;  %v1312_v15 = vld [vmem:[%s13937_s20 + $0x19a0] sm:$0xff] }
 0x23f   : > { %7336 = vmatpush1.bf16.msra.mxu0 %v11953_v32  ;;  %7723 = vmatpush1.bf16.msra.mxu1 %v11955_v33  ;;  %v12017_v32 = vcombine.low %v1252_v20, %v1256_v21  ;;  %v12019_v33 = vcombine.low %v1253_v22, %v1257_v23  ;;  %v12074_v20 = vcombine.high %v1308_v14, %v1312_v15  ;;  %v1316_v22 = vld [vmem:[%s13937_s20 + $0x19c0] sm:$0xff] }
 0x240   : > { %7337 = vmatprep.subr.bf16.mxu0 %v11962_v34  ;;  %7724 = vmatprep.subr.bf16.mxu1 %v11964_v35  ;;  %v12026_v34 = vcombine.high %v1260_v28, %v1264_v29  ;;  %v12028_v35 = vcombine.high %v1261_v30, %v1265_v31  ;;  %v1320_v23 = vld [vmem:[%s13937_s20 + $0x19e0] sm:$0xff] }
 0x243   : > { %7338 = vmatpush1.bf16.msra.mxu0 %v11961_v40  ;;  %7725 = vmatpush1.bf16.msra.mxu1 %v11963_v41  ;;  %v1273_v40 = vld [vmem:[%s13937_s20 + $0x1868] sm:$0xff]  ;;  %v12025_v41 = vcombine.low %v1260_v28, %v1264_v29  ;;  %v12082_v28 = vcombine.high %v1316_v22, %v1320_v23 }
 0x244   : > { %7339 = vmatprep.subr.bf16.mxu0 %v11970_v42  ;;  %7726 = vmatprep.subr.bf16.mxu1 %v11972_v43  ;;  %v12027_v42 = vcombine.low %v1261_v30, %v1265_v31  ;;  %v12034_v43 = vcombine.high %v1268_v36, %v1272_v37  ;;  %v12036_v44 = vcombine.high %v1269_v39, %v1273_v40  ;;  %v1324_v30 = vld [vmem:[%s13937_s20 + $0x1a00] sm:$0xff] }
 0x245   : > { %v1328_v31 = vld [vmem:[%s13937_s20 + $0x1a20] sm:$0xff] }
 0x247   : > { %7340 = vmatpush1.bf16.msra.mxu0 %v11969_v48  ;;  %7727 = vmatpush1.bf16.msra.mxu1 %v11971_v49  ;;  %v1277_v48 = vld [vmem:[%s13937_s20 + $0x1888] sm:$0xff] }
 0x248   : > { %7341 = vmatprep.subr.bf16.mxu0 %v11978_v50  ;;  %7728 = vmatprep.subr.bf16.mxu1 %v11980_v51  ;;  %v1281_v49 = vld [vmem:[%s13937_s20 + $0x18a8] sm:$0xff]  ;;  %v12033_v50 = vcombine.low %v1268_v36, %v1272_v37  ;;  %v12035_v51 = vcombine.low %v1269_v39, %v1273_v40  ;;  %v12090_v36 = vcombine.high %v1324_v30, %v1328_v31  ;;  %v1336_v39 = vld [vmem:[%s13937_s20 + $0x1a60] sm:$0xff] }
 0x249   : > { %v12044_v53 = vcombine.high %v1277_v48, %v1281_v49  ;;  %v1333_v40 = vld [vmem:[%s13937_s20 + $0x1a48] sm:$0xff] }
 0x24b   : > { %7342 = vmatpush1.bf16.msra.mxu0 %v11977_v56  ;;  %7729 = vmatpush1.bf16.msra.mxu1 %v11979_v57  ;;  %v1285_v56 = vld [vmem:[%s13937_s20 + $0x18c8] sm:$0xff] }
 0x24c   : > { %7343 = vmatprep.subr.bf16.mxu0 %v11986_v58  ;;  %7730 = vmatprep.subr.bf16.mxu1 %v11988_v59  ;;  %v1289_v57 = vld [vmem:[%s13937_s20 + $0x18e8] sm:$0xff]  ;;  %v12041_v58 = vcombine.low %v1276_v45, %v1280_v46  ;;  %v12043_v59 = vcombine.low %v1277_v48, %v1281_v49  ;;  %v1340_v46 = vld [vmem:[%s13937_s20 + $0x1a80] sm:$0xff] }
 0x24d   : > { %v12052_v61 = vcombine.high %v1285_v56, %v1289_v57  ;;  %v1341_v48 = vld [vmem:[%s13937_s20 + $0x1a88] sm:$0xff] }
 0x24e   : > { %v1345_v49 = vld [vmem:[%s13937_s20 + $0x1aa8] sm:$0xff] }
 0x24f   : > { %7344 = vmatpush1.bf16.msra.mxu0 %v11985_v0  ;;  %7731 = vmatpush1.bf16.msra.mxu1 %v11987_v1  ;;  %v1293_v0 = vld [vmem:[%s13937_s20 + $0x1908] sm:$0xff] }
 0x250   : > { %7345 = vmatprep.subr.bf16.mxu0 %v11994_v2  ;;  %7732 = vmatprep.subr.bf16.mxu1 %v11996_v3  ;;  %v1297_v1 = vld [vmem:[%s13937_s20 + $0x1928] sm:$0xff]  ;;  %v12049_v2 = vcombine.low %v1284_v54, %v1288_v55  ;;  %v12051_v3 = vcombine.low %v1285_v56, %v1289_v57  ;;  %v1348_v54 = vld [vmem:[%s13937_s20 + $0x1ac0] sm:$0xff] }
 0x251   : > { %v12060_v5 = vcombine.high %v1293_v0, %v1297_v1  ;;  %v1352_v55 = vld [vmem:[%s13937_s20 + $0x1ae0] sm:$0xff]  ;;  %v1349_v56 = vld [vmem:[%s13937_s20 + $0x1ac8] sm:$0xff] }
 0x252   : > { %v1353_v57 = vld [vmem:[%s13937_s20 + $0x1ae8] sm:$0xff] }
 0x253   : > { %7346 = vmatpush1.bf16.msra.mxu0 %v11993_v8  ;;  %7733 = vmatpush1.bf16.msra.mxu1 %v11995_v9  ;;  %v1301_v8 = vld [vmem:[%s13937_s20 + $0x1948] sm:$0xff] }
 0x254   : > { %7347 = vmatprep.subr.bf16.mxu0 %v12002_v10  ;;  %7734 = vmatprep.subr.bf16.mxu1 %v12004_v11  ;;  %v1305_v9 = vld [vmem:[%s13937_s20 + $0x1968] sm:$0xff]  ;;  %v12057_v10 = vcombine.low %v1292_v62, %v1296_v63  ;;  %v12059_v11 = vcombine.low %v1293_v0, %v1297_v1  ;;  %v1356_v62 = vld [vmem:[%s13937_s20 + $0x1b00] sm:$0xff] }
 0x255   : > { %v12068_v13 = vcombine.high %v1301_v8, %v1305_v9  ;;  %v1360_v63 = vld [vmem:[%s13937_s20 + $0x1b20] sm:$0xff]  ;;  %v1357_v0 = vld [vmem:[%s13937_s20 + $0x1b08] sm:$0xff] }
 0x256   : > { %v1361_v1 = vld [vmem:[%s13937_s20 + $0x1b28] sm:$0xff] }
 0x257   : > { %7348 = vmatpush1.bf16.msra.mxu0 %v12001_v16  ;;  %7735 = vmatpush1.bf16.msra.mxu1 %v12003_v17  ;;  %v1309_v16 = vld [vmem:[%s13937_s20 + $0x1988] sm:$0xff] }
 0x258   : > { %7349 = vmatprep.subr.bf16.mxu0 %v12010_v18  ;;  %7736 = vmatprep.subr.bf16.mxu1 %v12012_v19  ;;  %v1313_v17 = vld [vmem:[%s13937_s20 + $0x19a8] sm:$0xff]  ;;  %v12065_v18 = vcombine.low %v1300_v6, %v1304_v7  ;;  %v12067_v19 = vcombine.low %v1301_v8, %v1305_v9  ;;  %v1364_v6 = vld [vmem:[%s13937_s20 + $0x1b40] sm:$0xff] }
 0x259   : > { %v12076_v21 = vcombine.high %v1309_v16, %v1313_v17  ;;  %v1368_v7 = vld [vmem:[%s13937_s20 + $0x1b60] sm:$0xff]  ;;  %v1365_v8 = vld [vmem:[%s13937_s20 + $0x1b48] sm:$0xff] }
 0x25a   : > { %v1369_v9 = vld [vmem:[%s13937_s20 + $0x1b68] sm:$0xff] }
 0x25b   : > { %7350 = vmatpush1.bf16.msra.mxu0 %v12009_v24  ;;  %7737 = vmatpush1.bf16.msra.mxu1 %v12011_v25  ;;  %v1317_v24 = vld [vmem:[%s13937_s20 + $0x19c8] sm:$0xff] }
 0x25c   : > { %7351 = vmatprep.subr.bf16.mxu0 %v12018_v26  ;;  %7738 = vmatprep.subr.bf16.mxu1 %v12020_v27  ;;  %v1321_v25 = vld [vmem:[%s13937_s20 + $0x19e8] sm:$0xff]  ;;  %v12073_v26 = vcombine.low %v1308_v14, %v1312_v15  ;;  %v12075_v27 = vcombine.low %v1309_v16, %v1313_v17  ;;  %v1372_v14 = vld [vmem:[%s13937_s20 + $0x1b80] sm:$0xff] }
 0x25d   : > { %v12084_v29 = vcombine.high %v1317_v24, %v1321_v25  ;;  %v1376_v15 = vld [vmem:[%s13937_s20 + $0x1ba0] sm:$0xff]  ;;  %v1373_v16 = vld [vmem:[%s13937_s20 + $0x1b88] sm:$0xff] }
 0x25e   : > { %v1377_v17 = vld [vmem:[%s13937_s20 + $0x1ba8] sm:$0xff] }
 0x25f   : > { %7352 = vmatpush1.bf16.msra.mxu0 %v12017_v32  ;;  %7739 = vmatpush1.bf16.msra.mxu1 %v12019_v33  ;;  %v1325_v32 = vld [vmem:[%s13937_s20 + $0x1a08] sm:$0xff] }
 0x260   : > { %7364 = vmatprep.subr.bf16.mxu0 %v12026_v34  ;;  %7751 = vmatprep.subr.bf16.mxu1 %v12028_v35  ;;  %v1329_v33 = vld [vmem:[%s13937_s20 + $0x1a28] sm:$0xff]  ;;  %v12081_v34 = vcombine.low %v1316_v22, %v1320_v23  ;;  %v12083_v35 = vcombine.low %v1317_v24, %v1321_v25  ;;  %v1380_v22 = vld [vmem:[%s13937_s20 + $0x1bc0] sm:$0xff] }
 0x261   : > { %v12092_v37 = vcombine.high %v1325_v32, %v1329_v33  ;;  %v1384_v23 = vld [vmem:[%s13937_s20 + $0x1be0] sm:$0xff]  ;;  %v1381_v24 = vld [vmem:[%s13937_s20 + $0x1bc8] sm:$0xff] }
 0x262   : > { %7354 = vmatmul.mubr.bf16.vlgmr.msra.gmra.mrb[0].mxu0 %v12961_v38  ;;  %7741 = vmatmul.mubr.bf16.vlgmr.msra.gmra.mrb[0].mxu1 %v12961_v38  ;;  %v1332_v38 = vld [vmem:[%s13937_s20 + $0x1a40] sm:$0xff]  ;;  %v1385_v25 = vld [vmem:[%s13937_s20 + $0x1be8] sm:$0xff] }
 0x263   : > { %7365 = vmatpush1.bf16.msra.mxu0 %v12025_v41  ;;  %7752 = vmatpush1.bf16.msra.mxu1 %v12027_v42  ;;  %v1337_v41 = vld [vmem:[%s13937_s20 + $0x1a68] sm:$0xff]  ;;  %v12089_v42 = vcombine.low %v1324_v30, %v1328_v31  ;;  %v1388_v30 = vld [vmem:[%s13937_s20 + $0x1c00] sm:$0xff] }
 0x264   : > { %7366 = vmatprep.subr.bf16.mxu0 %v12034_v43  ;;  %7753 = vmatprep.subr.bf16.mxu1 %v12036_v44  ;;  %v12091_v43 = vcombine.low %v1325_v32, %v1329_v33  ;;  %v12098_v44 = vcombine.high %v1332_v38, %v1336_v39  ;;  %v12100_v45 = vcombine.high %v1333_v40, %v1337_v41  ;;  %v1392_v31 = vld [vmem:[%s13937_s20 + $0x1c20] sm:$0xff]  ;;  %v1389_v32 = vld [vmem:[%s13937_s20 + $0x1c08] sm:$0xff] }
 0x265   : > { %7396 = vmatprep.mubr.bf16.mxu0 %v12962_v47  ;;  %7783 = vmatprep.mubr.bf16.mxu1 %v12962_v47  ;;  %v1344_v47 = vld [vmem:[%s13937_s20 + $0x1aa0] sm:$0xff]  ;;  %v1393_v33 = vld [vmem:[%s13937_s20 + $0x1c28] sm:$0xff] }
 0x267   : > { %7367 = vmatpush1.bf16.msra.mxu0 %v12033_v50  ;;  %7754 = vmatpush1.bf16.msra.mxu1 %v12035_v51  ;;  %v12097_v50 = vcombine.low %v1332_v38, %v1336_v39  ;;  %v12099_v51 = vcombine.low %v1333_v40, %v1337_v41  ;;  %v1396_v38 = vld [vmem:[%s13937_s20 + $0x1c40] sm:$0xff]  ;;  %v1397_v41 = vld [vmem:[%s13937_s20 + $0x1c48] sm:$0xff] }
 0x268   : > { %7368 = vmatprep.subr.bf16.mxu0 %v12042_v52  ;;  %7755 = vmatprep.subr.bf16.mxu1 %v12044_v53  ;;  %v12106_v52 = vcombine.high %v1340_v46, %v1344_v47  ;;  %v12108_v53 = vcombine.high %v1341_v48, %v1345_v49  ;;  %v1400_v39 = vld [vmem:[%s13937_s20 + $0x1c60] sm:$0xff] }
 0x269   : > { %v12964_v40 = vld [vmem:[%s13935_s27 + $0x30] ss:$68 sps:$4 sm:$0xff]  }
 0x26b   : > { %7369 = vmatpush1.bf16.msra.mxu0 %v12041_v58  ;;  %7756 = vmatpush1.bf16.msra.mxu1 %v12043_v59  ;;  %v12105_v58 = vcombine.low %v1340_v46, %v1344_v47  ;;  %v12107_v59 = vcombine.low %v1341_v48, %v1345_v49  ;;  %v1404_v47 = vld [vmem:[%s13937_s20 + $0x1c80] sm:$0xff]  ;;  %v12965_v49 = vld [vmem:[%s13935_s27 + $0x3c] ss:$68 sps:$4 sm:$0xff]  }
 0x26c   : > { %7370 = vmatprep.subr.bf16.mxu0 %v12050_v60  ;;  %7757 = vmatprep.subr.bf16.mxu1 %v12052_v61  ;;  %v12114_v60 = vcombine.high %v1348_v54, %v1352_v55  ;;  %v12116_v61 = vcombine.high %v1349_v56, %v1353_v57  ;;  %v1408_v48 = vld [vmem:[%s13937_s20 + $0x1ca0] sm:$0xff] }
 0x26f   : > { %7371 = vmatpush1.bf16.msra.mxu0 %v12049_v2  ;;  %7758 = vmatpush1.bf16.msra.mxu1 %v12051_v3  ;;  %v12113_v2 = vcombine.low %v1348_v54, %v1352_v55  ;;  %v12115_v3 = vcombine.low %v1349_v56, %v1353_v57  ;;  %v12170_v54 = vcombine.high %v1404_v47, %v1408_v48  ;;  %v1412_v56 = vld [vmem:[%s13937_s20 + $0x1cc0] sm:$0xff] }
 0x270   : > { %7372 = vmatprep.subr.bf16.mxu0 %v12058_v4  ;;  %7759 = vmatprep.subr.bf16.mxu1 %v12060_v5  ;;  %v12122_v4 = vcombine.high %v1356_v62, %v1360_v63  ;;  %v12124_v5 = vcombine.high %v1357_v0, %v1361_v1  ;;  %v1416_v57 = vld [vmem:[%s13937_s20 + $0x1ce0] sm:$0xff] }
 0x273   : > { %7373 = vmatpush1.bf16.msra.mxu0 %v12057_v10  ;;  %7760 = vmatpush1.bf16.msra.mxu1 %v12059_v11  ;;  %v12121_v10 = vcombine.low %v1356_v62, %v1360_v63  ;;  %v12123_v11 = vcombine.low %v1357_v0, %v1361_v1  ;;  %v12178_v62 = vcombine.high %v1412_v56, %v1416_v57  ;;  %v1420_v0 = vld [vmem:[%s13937_s20 + $0x1d00] sm:$0xff] }
 0x274   : > { %7374 = vmatprep.subr.bf16.mxu0 %v12066_v12  ;;  %7761 = vmatprep.subr.bf16.mxu1 %v12068_v13  ;;  %v12130_v12 = vcombine.high %v1364_v6, %v1368_v7  ;;  %v12132_v13 = vcombine.high %v1365_v8, %v1369_v9  ;;  %v1424_v1 = vld [vmem:[%s13937_s20 + $0x1d20] sm:$0xff] }
 0x277   : > { %7375 = vmatpush1.bf16.msra.mxu0 %v12065_v18  ;;  %7762 = vmatpush1.bf16.msra.mxu1 %v12067_v19  ;;  %v12129_v18 = vcombine.low %v1364_v6, %v1368_v7  ;;  %v12131_v19 = vcombine.low %v1365_v8, %v1369_v9  ;;  %v12186_v6 = vcombine.high %v1420_v0, %v1424_v1  ;;  %v1428_v8 = vld [vmem:[%s13937_s20 + $0x1d40] sm:$0xff] }
 0x278   : > { %7376 = vmatprep.subr.bf16.mxu0 %v12074_v20  ;;  %7763 = vmatprep.subr.bf16.mxu1 %v12076_v21  ;;  %v12138_v20 = vcombine.high %v1372_v14, %v1376_v15  ;;  %v12140_v21 = vcombine.high %v1373_v16, %v1377_v17  ;;  %v1432_v9 = vld [vmem:[%s13937_s20 + $0x1d60] sm:$0xff] }
 0x27b   : > { %7377 = vmatpush1.bf16.msra.mxu0 %v12073_v26  ;;  %7764 = vmatpush1.bf16.msra.mxu1 %v12075_v27  ;;  %v12137_v26 = vcombine.low %v1372_v14, %v1376_v15  ;;  %v12139_v27 = vcombine.low %v1373_v16, %v1377_v17  ;;  %v12194_v14 = vcombine.high %v1428_v8, %v1432_v9  ;;  %v1436_v16 = vld [vmem:[%s13937_s20 + $0x1d80] sm:$0xff] }
 0x27c   : > { %7378 = vmatprep.subr.bf16.mxu0 %v12082_v28  ;;  %7765 = vmatprep.subr.bf16.mxu1 %v12084_v29  ;;  %v12146_v28 = vcombine.high %v1380_v22, %v1384_v23  ;;  %v12148_v29 = vcombine.high %v1381_v24, %v1385_v25  ;;  %v1440_v17 = vld [vmem:[%s13937_s20 + $0x1da0] sm:$0xff] }
 0x27f   : > { %7379 = vmatpush1.bf16.msra.mxu0 %v12081_v34  ;;  %7766 = vmatpush1.bf16.msra.mxu1 %v12083_v35  ;;  %v12145_v34 = vcombine.low %v1380_v22, %v1384_v23  ;;  %v12147_v35 = vcombine.low %v1381_v24, %v1385_v25  ;;  %v12202_v22 = vcombine.high %v1436_v16, %v1440_v17  ;;  %v1444_v24 = vld [vmem:[%s13937_s20 + $0x1dc0] sm:$0xff] }
 0x280   : > { %7380 = vmatprep.subr.bf16.mxu0 %v12090_v36  ;;  %7767 = vmatprep.subr.bf16.mxu1 %v12092_v37  ;;  %v12154_v36 = vcombine.high %v1388_v30, %v1392_v31  ;;  %v12156_v37 = vcombine.high %v1389_v32, %v1393_v33  ;;  %v1448_v25 = vld [vmem:[%s13937_s20 + $0x1de0] sm:$0xff] }
 0x283   : > { %7381 = vmatpush1.bf16.msra.mxu0 %v12089_v42  ;;  %7768 = vmatpush1.bf16.msra.mxu1 %v12091_v43  ;;  %v1401_v42 = vld [vmem:[%s13937_s20 + $0x1c68] sm:$0xff]  ;;  %v12153_v43 = vcombine.low %v1388_v30, %v1392_v31  ;;  %v12210_v30 = vcombine.high %v1444_v24, %v1448_v25 }
 0x284   : > { %7382 = vmatprep.subr.bf16.mxu0 %v12098_v44  ;;  %7769 = vmatprep.subr.bf16.mxu1 %v12100_v45  ;;  %v12155_v44 = vcombine.low %v1389_v32, %v1393_v33  ;;  %v12162_v45 = vcombine.high %v1396_v38, %v1400_v39  ;;  %v12164_v46 = vcombine.high %v1397_v41, %v1401_v42  ;;  %v1452_v32 = vld [vmem:[%s13937_s20 + $0x1e00] sm:$0xff] }
 0x285   : > { %v1456_v33 = vld [vmem:[%s13937_s20 + $0x1e20] sm:$0xff] }
 0x287   : > { %7383 = vmatpush1.bf16.msra.mxu0 %v12097_v50  ;;  %7770 = vmatpush1.bf16.msra.mxu1 %v12099_v51  ;;  %v1405_v50 = vld [vmem:[%s13937_s20 + $0x1c88] sm:$0xff] }
 0x288   : > { %7384 = vmatprep.subr.bf16.mxu0 %v12106_v52  ;;  %7771 = vmatprep.subr.bf16.mxu1 %v12108_v53  ;;  %v1409_v51 = vld [vmem:[%s13937_s20 + $0x1ca8] sm:$0xff]  ;;  %v12161_v52 = vcombine.low %v1396_v38, %v1400_v39  ;;  %v12163_v53 = vcombine.low %v1397_v41, %v1401_v42  ;;  %v12218_v38 = vcombine.high %v1452_v32, %v1456_v33  ;;  %v1464_v41 = vld [vmem:[%s13937_s20 + $0x1e60] sm:$0xff] }
 0x289   : > { %v12172_v55 = vcombine.high %v1405_v50, %v1409_v51  ;;  %v1461_v42 = vld [vmem:[%s13937_s20 + $0x1e48] sm:$0xff] }
 0x28b   : > { %7385 = vmatpush1.bf16.msra.mxu0 %v12105_v58  ;;  %7772 = vmatpush1.bf16.msra.mxu1 %v12107_v59  ;;  %v1413_v58 = vld [vmem:[%s13937_s20 + $0x1cc8] sm:$0xff] }
 0x28c   : > { %7386 = vmatprep.subr.bf16.mxu0 %v12114_v60  ;;  %7773 = vmatprep.subr.bf16.mxu1 %v12116_v61  ;;  %v1417_v59 = vld [vmem:[%s13937_s20 + $0x1ce8] sm:$0xff]  ;;  %v12169_v60 = vcombine.low %v1404_v47, %v1408_v48  ;;  %v12171_v61 = vcombine.low %v1405_v50, %v1409_v51  ;;  %v1468_v48 = vld [vmem:[%s13937_s20 + $0x1e80] sm:$0xff] }
 0x28d   : > { %v12180_v63 = vcombine.high %v1413_v58, %v1417_v59  ;;  %v1469_v50 = vld [vmem:[%s13937_s20 + $0x1e88] sm:$0xff] }
 0x28e   : > { %v1473_v51 = vld [vmem:[%s13937_s20 + $0x1ea8] sm:$0xff] }
 0x28f   : > { %7387 = vmatpush1.bf16.msra.mxu0 %v12113_v2  ;;  %7774 = vmatpush1.bf16.msra.mxu1 %v12115_v3  ;;  %v1421_v2 = vld [vmem:[%s13937_s20 + $0x1d08] sm:$0xff] }
 0x290   : > { %7388 = vmatprep.subr.bf16.mxu0 %v12122_v4  ;;  %7775 = vmatprep.subr.bf16.mxu1 %v12124_v5  ;;  %v1425_v3 = vld [vmem:[%s13937_s20 + $0x1d28] sm:$0xff]  ;;  %v12177_v4 = vcombine.low %v1412_v56, %v1416_v57  ;;  %v12179_v5 = vcombine.low %v1413_v58, %v1417_v59  ;;  %v1476_v56 = vld [vmem:[%s13937_s20 + $0x1ec0] sm:$0xff] }
 0x291   : > { %v12188_v7 = vcombine.high %v1421_v2, %v1425_v3  ;;  %v1480_v57 = vld [vmem:[%s13937_s20 + $0x1ee0] sm:$0xff]  ;;  %v1477_v58 = vld [vmem:[%s13937_s20 + $0x1ec8] sm:$0xff] }
 0x292   : > { %v1481_v59 = vld [vmem:[%s13937_s20 + $0x1ee8] sm:$0xff] }
 0x293   : > { %7389 = vmatpush1.bf16.msra.mxu0 %v12121_v10  ;;  %7776 = vmatpush1.bf16.msra.mxu1 %v12123_v11  ;;  %v1429_v10 = vld [vmem:[%s13937_s20 + $0x1d48] sm:$0xff] }
 0x294   : > { %7390 = vmatprep.subr.bf16.mxu0 %v12130_v12  ;;  %7777 = vmatprep.subr.bf16.mxu1 %v12132_v13  ;;  %v1433_v11 = vld [vmem:[%s13937_s20 + $0x1d68] sm:$0xff]  ;;  %v12185_v12 = vcombine.low %v1420_v0, %v1424_v1  ;;  %v12187_v13 = vcombine.low %v1421_v2, %v1425_v3  ;;  %v1484_v0 = vld [vmem:[%s13937_s20 + $0x1f00] sm:$0xff] }
 0x295   : > { %v12196_v15 = vcombine.high %v1429_v10, %v1433_v11  ;;  %v1488_v1 = vld [vmem:[%s13937_s20 + $0x1f20] sm:$0xff]  ;;  %v1485_v2 = vld [vmem:[%s13937_s20 + $0x1f08] sm:$0xff] }
 0x296   : > { %v1489_v3 = vld [vmem:[%s13937_s20 + $0x1f28] sm:$0xff] }
 0x297   : > { %7391 = vmatpush1.bf16.msra.mxu0 %v12129_v18  ;;  %7778 = vmatpush1.bf16.msra.mxu1 %v12131_v19  ;;  %v1437_v18 = vld [vmem:[%s13937_s20 + $0x1d88] sm:$0xff] }
 0x298   : > { %7392 = vmatprep.subr.bf16.mxu0 %v12138_v20  ;;  %7779 = vmatprep.subr.bf16.mxu1 %v12140_v21  ;;  %v1441_v19 = vld [vmem:[%s13937_s20 + $0x1da8] sm:$0xff]  ;;  %v12193_v20 = vcombine.low %v1428_v8, %v1432_v9  ;;  %v12195_v21 = vcombine.low %v1429_v10, %v1433_v11  ;;  %v1492_v8 = vld [vmem:[%s13937_s20 + $0x1f40] sm:$0xff] }
 0x299   : > { %v12204_v23 = vcombine.high %v1437_v18, %v1441_v19  ;;  %v1496_v9 = vld [vmem:[%s13937_s20 + $0x1f60] sm:$0xff]  ;;  %v1493_v10 = vld [vmem:[%s13937_s20 + $0x1f48] sm:$0xff] }
 0x29a   : > { %v1497_v11 = vld [vmem:[%s13937_s20 + $0x1f68] sm:$0xff] }
 0x29b   : > { %7393 = vmatpush1.bf16.msra.mxu0 %v12137_v26  ;;  %7780 = vmatpush1.bf16.msra.mxu1 %v12139_v27  ;;  %v1445_v26 = vld [vmem:[%s13937_s20 + $0x1dc8] sm:$0xff] }
 0x29c   : > { %7394 = vmatprep.subr.bf16.mxu0 %v12146_v28  ;;  %7781 = vmatprep.subr.bf16.mxu1 %v12148_v29  ;;  %v1449_v27 = vld [vmem:[%s13937_s20 + $0x1de8] sm:$0xff]  ;;  %v12201_v28 = vcombine.low %v1436_v16, %v1440_v17  ;;  %v12203_v29 = vcombine.low %v1437_v18, %v1441_v19  ;;  %v1500_v16 = vld [vmem:[%s13937_s20 + $0x1f80] sm:$0xff] }
 0x29d   : > { %v12212_v31 = vcombine.high %v1445_v26, %v1449_v27  ;;  %v1504_v17 = vld [vmem:[%s13937_s20 + $0x1fa0] sm:$0xff]  ;;  %v1501_v18 = vld [vmem:[%s13937_s20 + $0x1f88] sm:$0xff] }
 0x29e   : > { %v1505_v19 = vld [vmem:[%s13937_s20 + $0x1fa8] sm:$0xff] }
 0x29f   : > { %7395 = vmatpush1.bf16.msra.mxu0 %v12145_v34  ;;  %7782 = vmatpush1.bf16.msra.mxu1 %v12147_v35  ;;  %v1453_v34 = vld [vmem:[%s13937_s20 + $0x1e08] sm:$0xff] }
 0x2a0   : > { %7407 = vmatprep.subr.bf16.mxu0 %v12154_v36  ;;  %7794 = vmatprep.subr.bf16.mxu1 %v12156_v37  ;;  %v1457_v35 = vld [vmem:[%s13937_s20 + $0x1e28] sm:$0xff]  ;;  %v12209_v36 = vcombine.low %v1444_v24, %v1448_v25  ;;  %v12211_v37 = vcombine.low %v1445_v26, %v1449_v27  ;;  %v1508_v24 = vld [vmem:[%s13937_s20 + $0x1fc0] sm:$0xff] }
 0x2a1   : > { %v12220_v39 = vcombine.high %v1453_v34, %v1457_v35  ;;  %v1512_v25 = vld [vmem:[%s13937_s20 + $0x1fe0] sm:$0xff]  ;;  %v1509_v26 = vld [vmem:[%s13937_s20 + $0x1fc8] sm:$0xff] }
 0x2a2   : > { %7397 = vmatmul.mubr.bf16.vlgmr.msra.gmra.mrb[0].mxu0 %v12964_v40  ;;  %7784 = vmatmul.mubr.bf16.vlgmr.msra.gmra.mrb[0].mxu1 %v12964_v40  ;;  %v1460_v40 = vld [vmem:[%s13937_s20 + $0x1e40] sm:$0xff]  ;;  %v1513_v27 = vld [vmem:[%s13937_s20 + $0x1fe8] sm:$0xff] }
 0x2a3   : > { %7408 = vmatpush1.bf16.msra.mxu0 %v12153_v43  ;;  %7795 = vmatpush1.bf16.msra.mxu1 %v12155_v44  ;;  %v1465_v43 = vld [vmem:[%s13937_s20 + $0x1e68] sm:$0xff]  ;;  %v12217_v44 = vcombine.low %v1452_v32, %v1456_v33  ;;  %v1516_v32 = vld [vmem:[%s13937_s20 + $0x2000] sm:$0xff] }
 0x2a4   : > { %7409 = vmatprep.subr.bf16.mxu0 %v12162_v45  ;;  %7796 = vmatprep.subr.bf16.mxu1 %v12164_v46  ;;  %v12219_v45 = vcombine.low %v1453_v34, %v1457_v35  ;;  %v12226_v46 = vcombine.high %v1460_v40, %v1464_v41  ;;  %v12228_v47 = vcombine.high %v1461_v42, %v1465_v43  ;;  %v1520_v33 = vld [vmem:[%s13937_s20 + $0x2020] sm:$0xff]  ;;  %v1517_v34 = vld [vmem:[%s13937_s20 + $0x2008] sm:$0xff] }
 0x2a5   : > { %7439 = vmatprep.mubr.bf16.mxu0 %v12965_v49  ;;  %7826 = vmatprep.mubr.bf16.mxu1 %v12965_v49  ;;  %v1472_v49 = vld [vmem:[%s13937_s20 + $0x1ea0] sm:$0xff]  ;;  %v1521_v35 = vld [vmem:[%s13937_s20 + $0x2028] sm:$0xff] }
 0x2a7   : > { %7410 = vmatpush1.bf16.msra.mxu0 %v12161_v52  ;;  %7797 = vmatpush1.bf16.msra.mxu1 %v12163_v53  ;;  %v12225_v52 = vcombine.low %v1460_v40, %v1464_v41  ;;  %v12227_v53 = vcombine.low %v1461_v42, %v1465_v43  ;;  %v1524_v40 = vld [vmem:[%s13937_s20 + $0x2040] sm:$0xff]  ;;  %v12967_v42 = vld [vmem:[%s13935_s27 + $0x38] ss:$68 sps:$4 sm:$0xff]  }
 0x2a8   : > { %7411 = vmatprep.subr.bf16.mxu0 %v12170_v54  ;;  %7798 = vmatprep.subr.bf16.mxu1 %v12172_v55  ;;  %v12234_v54 = vcombine.high %v1468_v48, %v1472_v49  ;;  %v12236_v55 = vcombine.high %v1469_v50, %v1473_v51  ;;  %v1528_v41 = vld [vmem:[%s13937_s20 + $0x2060] sm:$0xff]  ;;  %v1525_v43 = vld [vmem:[%s13937_s20 + $0x2048] sm:$0xff] }
 0x2ab   : > { %7412 = vmatpush1.bf16.msra.mxu0 %v12169_v60  ;;  %7799 = vmatpush1.bf16.msra.mxu1 %v12171_v61  ;;  %v12233_v60 = vcombine.low %v1468_v48, %v1472_v49  ;;  %v12235_v61 = vcombine.low %v1469_v50, %v1473_v51  ;;  %v1532_v49 = vld [vmem:[%s13937_s20 + $0x2080] sm:$0xff]  ;;  %v1533_v51 = vld [vmem:[%s13937_s20 + $0x2088] sm:$0xff] }
 0x2ac   : > { %7413 = vmatprep.subr.bf16.mxu0 %v12178_v62  ;;  %7800 = vmatprep.subr.bf16.mxu1 %v12180_v63  ;;  %v12242_v62 = vcombine.high %v1476_v56, %v1480_v57  ;;  %v12244_v63 = vcombine.high %v1477_v58, %v1481_v59  ;;  %v1536_v50 = vld [vmem:[%s13937_s20 + $0x20a0] sm:$0xff] }
 0x2af   : > { %7414 = vmatpush1.bf16.msra.mxu0 %v12177_v4  ;;  %7801 = vmatpush1.bf16.msra.mxu1 %v12179_v5  ;;  %v12241_v4 = vcombine.low %v1476_v56, %v1480_v57  ;;  %v12243_v5 = vcombine.low %v1477_v58, %v1481_v59  ;;  %v1540_v57 = vld [vmem:[%s13937_s20 + $0x20c0] sm:$0xff]  ;;  %v13640_v59 = vmov 0  }
 0x2b0   : > { %7415 = vmatprep.subr.bf16.mxu0 %v12186_v6  ;;  %7802 = vmatprep.subr.bf16.mxu1 %v12188_v7  ;;  %v12250_v6 = vcombine.high %v1484_v0, %v1488_v1  ;;  %v12252_v7 = vcombine.high %v1485_v2, %v1489_v3  ;;  %v1544_v58 = vld [vmem:[%s13937_s20 + $0x20e0] sm:$0xff] }
 0x2b3   : > { %7416 = vmatpush1.bf16.msra.mxu0 %v12185_v12  ;;  %7803 = vmatpush1.bf16.msra.mxu1 %v12187_v13  ;;  %v12249_v12 = vcombine.low %v1484_v0, %v1488_v1  ;;  %v12251_v13 = vcombine.low %v1485_v2, %v1489_v3  ;;  %v12306_v0 = vcombine.high %v1540_v57, %v1544_v58  ;;  %v1548_v2 = vld [vmem:[%s13937_s20 + $0x2100] sm:$0xff] }
 0x2b4   : > { %7417 = vmatprep.subr.bf16.mxu0 %v12194_v14  ;;  %7804 = vmatprep.subr.bf16.mxu1 %v12196_v15  ;;  %v12258_v14 = vcombine.high %v1492_v8, %v1496_v9  ;;  %v12260_v15 = vcombine.high %v1493_v10, %v1497_v11  ;;  %v1552_v3 = vld [vmem:[%s13937_s20 + $0x2120] sm:$0xff] }
 0x2b7   : > { %7418 = vmatpush1.bf16.msra.mxu0 %v12193_v20  ;;  %7805 = vmatpush1.bf16.msra.mxu1 %v12195_v21  ;;  %v12257_v20 = vcombine.low %v1492_v8, %v1496_v9  ;;  %v12259_v21 = vcombine.low %v1493_v10, %v1497_v11  ;;  %v12314_v8 = vcombine.high %v1548_v2, %v1552_v3  ;;  %v1556_v10 = vld [vmem:[%s13937_s20 + $0x2140] sm:$0xff] }
 0x2b8   : > { %7419 = vmatprep.subr.bf16.mxu0 %v12202_v22  ;;  %7806 = vmatprep.subr.bf16.mxu1 %v12204_v23  ;;  %v12266_v22 = vcombine.high %v1500_v16, %v1504_v17  ;;  %v12268_v23 = vcombine.high %v1501_v18, %v1505_v19  ;;  %v1560_v11 = vld [vmem:[%s13937_s20 + $0x2160] sm:$0xff] }
 0x2bb   : > { %7420 = vmatpush1.bf16.msra.mxu0 %v12201_v28  ;;  %7807 = vmatpush1.bf16.msra.mxu1 %v12203_v29  ;;  %v12265_v28 = vcombine.low %v1500_v16, %v1504_v17  ;;  %v12267_v29 = vcombine.low %v1501_v18, %v1505_v19  ;;  %v12322_v16 = vcombine.high %v1556_v10, %v1560_v11  ;;  %v1564_v18 = vld [vmem:[%s13937_s20 + $0x2180] sm:$0xff] }
 0x2bc   : > { %7421 = vmatprep.subr.bf16.mxu0 %v12210_v30  ;;  %7808 = vmatprep.subr.bf16.mxu1 %v12212_v31  ;;  %v12274_v30 = vcombine.high %v1508_v24, %v1512_v25  ;;  %v12276_v31 = vcombine.high %v1509_v26, %v1513_v27  ;;  %v1568_v19 = vld [vmem:[%s13937_s20 + $0x21a0] sm:$0xff] }
 0x2bf   : > { %7422 = vmatpush1.bf16.msra.mxu0 %v12209_v36  ;;  %7809 = vmatpush1.bf16.msra.mxu1 %v12211_v37  ;;  %v12273_v36 = vcombine.low %v1508_v24, %v1512_v25  ;;  %v12275_v37 = vcombine.low %v1509_v26, %v1513_v27  ;;  %v12330_v24 = vcombine.high %v1564_v18, %v1568_v19  ;;  %v1572_v26 = vld [vmem:[%s13937_s20 + $0x21c0] sm:$0xff] }
 0x2c0   : > { %7423 = vmatprep.subr.bf16.mxu0 %v12218_v38  ;;  %7810 = vmatprep.subr.bf16.mxu1 %v12220_v39  ;;  %v12282_v38 = vcombine.high %v1516_v32, %v1520_v33  ;;  %v12284_v39 = vcombine.high %v1517_v34, %v1521_v35  ;;  %v1576_v27 = vld [vmem:[%s13937_s20 + $0x21e0] sm:$0xff] }
 0x2c3   : > { %7424 = vmatpush1.bf16.msra.mxu0 %v12217_v44  ;;  %7811 = vmatpush1.bf16.msra.mxu1 %v12219_v45  ;;  %v1529_v44 = vld [vmem:[%s13937_s20 + $0x2068] sm:$0xff]  ;;  %v12281_v45 = vcombine.low %v1516_v32, %v1520_v33  ;;  %v12338_v32 = vcombine.high %v1572_v26, %v1576_v27 }
 0x2c4   : > { %7425 = vmatprep.subr.bf16.mxu0 %v12226_v46  ;;  %7812 = vmatprep.subr.bf16.mxu1 %v12228_v47  ;;  %v12283_v46 = vcombine.low %v1517_v34, %v1521_v35  ;;  %v12290_v47 = vcombine.high %v1524_v40, %v1528_v41  ;;  %v12292_v48 = vcombine.high %v1525_v43, %v1529_v44  ;;  %v494_v34 = vld [vmem:[%s13937_s20 + $0x10] sm:$0xff] }
 0x2c5   : > { %v498_v35 = vld [vmem:[%s13937_s20 + $0x30] sm:$0xff] }
 0x2c7   : > { %7426 = vmatpush1.bf16.msra.mxu0 %v12225_v52  ;;  %7813 = vmatpush1.bf16.msra.mxu1 %v12227_v53  ;;  %v1537_v52 = vld [vmem:[%s13937_s20 + $0x20a8] sm:$0xff]  ;;  %v12289_v53 = vcombine.low %v1524_v40, %v1528_v41  ;;  %v11262_v40 = vcombine.high %v494_v34, %v498_v35 }
 0x2c8   : > { %7427 = vmatprep.subr.bf16.mxu0 %v12234_v54  ;;  %7814 = vmatprep.subr.bf16.mxu1 %v12236_v55  ;;  %v12291_v54 = vcombine.low %v1525_v43, %v1529_v44  ;;  %v12298_v55 = vcombine.high %v1532_v49, %v1536_v50  ;;  %v12300_v56 = vcombine.high %v1533_v51, %v1537_v52  ;;  %v506_v43 = vld [vmem:[%s13937_s20 + $0x70] sm:$0xff] }
 0x2c9   : > { %v12968_v44 = vld [vmem:[%s13935_s27 + $0x40] ss:$68 sps:$4 sm:$0xff]  }
 0x2cb   : > { %7428 = vmatpush1.bf16.msra.mxu0 %v12233_v60  ;;  %7815 = vmatpush1.bf16.msra.mxu1 %v12235_v61  ;;  %v1541_v60 = vld [vmem:[%s13937_s20 + $0x20c8] sm:$0xff] }
 0x2cc   : > { %7429 = vmatprep.subr.bf16.mxu0 %v12242_v62  ;;  %7816 = vmatprep.subr.bf16.mxu1 %v12244_v63  ;;  %v1545_v61 = vld [vmem:[%s13937_s20 + $0x20e8] sm:$0xff]  ;;  %v12297_v62 = vcombine.low %v1532_v49, %v1536_v50  ;;  %v12299_v63 = vcombine.low %v1533_v51, %v1537_v52  ;;  %v510_v51 = vld [vmem:[%s13937_s20 + $0x90] sm:$0xff] }
 0x2cd   : > { %v12308_v1 = vcombine.high %v1541_v60, %v1545_v61  ;;  %v514_v52 = vld [vmem:[%s13937_s20 + $0xb0] sm:$0xff] }
 0x2cf   : > { %7430 = vmatpush1.bf16.msra.mxu0 %v12241_v4  ;;  %7817 = vmatpush1.bf16.msra.mxu1 %v12243_v5  ;;  %v1549_v4 = vld [vmem:[%s13937_s20 + $0x2108] sm:$0xff] }
 0x2d0   : > { %7431 = vmatprep.subr.bf16.mxu0 %v12250_v6  ;;  %7818 = vmatprep.subr.bf16.mxu1 %v12252_v7  ;;  %v1553_v5 = vld [vmem:[%s13937_s20 + $0x2128] sm:$0xff]  ;;  %v12305_v6 = vcombine.low %v1540_v57, %v1544_v58  ;;  %v12307_v7 = vcombine.low %v1541_v60, %v1545_v61  ;;  %v11278_v57 = vcombine.high %v510_v51, %v514_v52  ;;  %v518_v60 = vld [vmem:[%s13937_s20 + $0xd0] sm:$0xff] }
 0x2d1   : > { %v12316_v9 = vcombine.high %v1549_v4, %v1553_v5  ;;  %v522_v61 = vld [vmem:[%s13937_s20 + $0xf0] sm:$0xff] }
 0x2d3   : > { %7432 = vmatpush1.bf16.msra.mxu0 %v12249_v12  ;;  %7819 = vmatpush1.bf16.msra.mxu1 %v12251_v13  ;;  %v1557_v12 = vld [vmem:[%s13937_s20 + $0x2148] sm:$0xff] }
 0x2d4   : > { %7433 = vmatprep.subr.bf16.mxu0 %v12258_v14  ;;  %7820 = vmatprep.subr.bf16.mxu1 %v12260_v15  ;;  %v1561_v13 = vld [vmem:[%s13937_s20 + $0x2168] sm:$0xff]  ;;  %v12313_v14 = vcombine.low %v1548_v2, %v1552_v3  ;;  %v12315_v15 = vcombine.low %v1549_v4, %v1553_v5  ;;  %v11286_v3 = vcombine.high %v518_v60, %v522_v61  ;;  %v526_v5 = vld [vmem:[%s13937_s20 + $0x110] sm:$0xff] }
 0x2d5   : > { %v12324_v17 = vcombine.high %v1557_v12, %v1561_v13 }
 0x2d7   : > { %7434 = vmatpush1.bf16.msra.mxu0 %v12257_v20  ;;  %7821 = vmatpush1.bf16.msra.mxu1 %v12259_v21  ;;  %v1565_v20 = vld [vmem:[%s13937_s20 + $0x2188] sm:$0xff] }
 0x2d8   : > { %7435 = vmatprep.subr.bf16.mxu0 %v12266_v22  ;;  %7822 = vmatprep.subr.bf16.mxu1 %v12268_v23  ;;  %v1569_v21 = vld [vmem:[%s13937_s20 + $0x21a8] sm:$0xff]  ;;  %v12321_v22 = vcombine.low %v1556_v10, %v1560_v11  ;;  %v12323_v23 = vcombine.low %v1557_v12, %v1561_v13  ;;  %v534_v13 = vld [vmem:[%s13937_s20 + $0x150] sm:$0xff] }
 0x2d9   : > { %v12332_v25 = vcombine.high %v1565_v20, %v1569_v21 }
 0x2db   : > { %7436 = vmatpush1.bf16.msra.mxu0 %v12265_v28  ;;  %7823 = vmatpush1.bf16.msra.mxu1 %v12267_v29  ;;  %v1573_v28 = vld [vmem:[%s13937_s20 + $0x21c8] sm:$0xff] }
 0x2dc   : > { %7437 = vmatprep.subr.bf16.mxu0 %v12274_v30  ;;  %7824 = vmatprep.subr.bf16.mxu1 %v12276_v31  ;;  %v1577_v29 = vld [vmem:[%s13937_s20 + $0x21e8] sm:$0xff]  ;;  %v12329_v30 = vcombine.low %v1564_v18, %v1568_v19  ;;  %v12331_v31 = vcombine.low %v1565_v20, %v1569_v21  ;;  %v542_v21 = vld [vmem:[%s13937_s20 + $0x190] sm:$0xff] }
 0x2dd   : > { %v12340_v33 = vcombine.high %v1573_v28, %v1577_v29 }
 0x2df   : > { %7438 = vmatpush1.bf16.msra.mxu0 %v12273_v36  ;;  %7825 = vmatpush1.bf16.msra.mxu1 %v12275_v37  ;;  %v495_v36 = vld [vmem:[%s13937_s20 + $0x18] sm:$0xff] }
 0x2e0   : > { %7450 = vmatprep.subr.bf16.mxu0 %v12282_v38  ;;  %7837 = vmatprep.subr.bf16.mxu1 %v12284_v39  ;;  %v499_v37 = vld [vmem:[%s13937_s20 + $0x38] sm:$0xff]  ;;  %v12337_v38 = vcombine.low %v1572_v26, %v1576_v27  ;;  %v12339_v39 = vcombine.low %v1573_v28, %v1577_v29  ;;  %v550_v29 = vld [vmem:[%s13937_s20 + $0x1d0] sm:$0xff] }
 0x2e1   : > { %v11264_v41 = vcombine.high %v495_v36, %v499_v37 }
 0x2e2   : > { %7440 = vmatmul.mubr.bf16.vlgmr.msra.gmra.mrb[0].mxu0 %v12967_v42  ;;  %7827 = vmatmul.mubr.bf16.vlgmr.msra.gmra.mrb[0].mxu1 %v12967_v42  ;;  %v502_v42 = vld [vmem:[%s13937_s20 + $0x50] sm:$0xff] }
 0x2e3   : > { %7451 = vmatpush1.bf16.msra.mxu0 %v12281_v45  ;;  %7838 = vmatpush1.bf16.msra.mxu1 %v12283_v46  ;;  %v503_v45 = vld [vmem:[%s13937_s20 + $0x58] sm:$0xff]  ;;  %v11270_v49 = vcombine.high %v502_v42, %v506_v43 }
 0x2e4   : > { %7452 = vmatprep.subr.bf16.mxu0 %v12290_v47  ;;  %7839 = vmatprep.subr.bf16.mxu1 %v12292_v48  ;;  %v507_v46 = vld [vmem:[%s13937_s20 + $0x78] sm:$0xff]  ;;  %v11261_v47 = vcombine.low %v494_v34, %v498_v35  ;;  %v11263_v48 = vcombine.low %v495_v36, %v499_v37  ;;  %v558_v37 = vld [vmem:[%s13937_s20 + $0x210] sm:$0xff] }
 0x2e5   : > { %7482 = vmatprep.mubr.bf16.mxu0 %v13640_v59  ;;  %7869 = vmatprep.mubr.bf16.mxu1 %v13640_v59  ;;  %v11272_v50 = vcombine.high %v503_v45, %v507_v46 }
 0x2e7   : > { %7453 = vmatpush1.bf16.msra.mxu0 %v12289_v53  ;;  %7840 = vmatpush1.bf16.msra.mxu1 %v12291_v54  ;;  %v511_v53 = vld [vmem:[%s13937_s20 + $0x98] sm:$0xff] }
 0x2e8   : > { %7454 = vmatprep.subr.bf16.mxu0 %v12298_v55  ;;  %7841 = vmatprep.subr.bf16.mxu1 %v12300_v56  ;;  %v515_v54 = vld [vmem:[%s13937_s20 + $0xb8] sm:$0xff]  ;;  %v11269_v55 = vcombine.low %v502_v42, %v506_v43  ;;  %v11271_v56 = vcombine.low %v503_v45, %v507_v46  ;;  %v566_v45 = vld [vmem:[%s13937_s20 + $0x250] sm:$0xff] }
 0x2e9   : > { %v11280_v58 = vcombine.high %v511_v53, %v515_v54  ;;  %v11279_v2 = vcombine.low %v511_v53, %v515_v54  ;;  %v570_v46 = vld [vmem:[%s13937_s20 + $0x270] sm:$0xff] }
 0x2ea   : > { %v574_v53 = vld [vmem:[%s13937_s20 + $0x290] sm:$0xff] }
 0x2eb   : > { %7455 = vmatpush1.bf16.msra.mxu0 %v12297_v62  ;;  %7842 = vmatpush1.bf16.msra.mxu1 %v12299_v63  ;;  %v12969_v62 = vld [vmem:[%s13935_s27 + $0x4] ss:$68 sps:$4 sm:$0xff]  }
 0x2ec   : > { %7456 = vmatprep.subr.bf16.mxu0 %v12306_v0  ;;  %7843 = vmatprep.subr.bf16.mxu1 %v12308_v1  ;;  %v519_v63 = vld [vmem:[%s13937_s20 + $0xd8] sm:$0xff]  ;;  %v11277_v1 = vcombine.low %v510_v51, %v514_v52  ;;  %v11334_v51 = vcombine.high %v566_v45, %v570_v46  ;;  %v578_v54 = vld [vmem:[%s13937_s20 + $0x2b0] sm:$0xff] }
 0x2ed   : > { %v523_v0 = vld [vmem:[%s13937_s20 + $0xf8] sm:$0xff] }
 0x2ee   : > { %v11288_v4 = vcombine.high %v519_v63, %v523_v0  ;;  %v11287_v10 = vcombine.low %v519_v63, %v523_v0  ;;  %v586_v63 = vld [vmem:[%s13937_s20 + $0x2f0] sm:$0xff]  ;;  %v583_v0 = vld [vmem:[%s13937_s20 + $0x2d8] sm:$0xff] }
 0x2ef   : > { %7457 = vmatpush1.bf16.msra.mxu0 %v12305_v6  ;;  %7844 = vmatpush1.bf16.msra.mxu1 %v12307_v7  ;;  %v530_v6 = vld [vmem:[%s13937_s20 + $0x130] sm:$0xff]  ;;  %v527_v7 = vld [vmem:[%s13937_s20 + $0x118] sm:$0xff] }
 0x2f0   : > { %7458 = vmatprep.subr.bf16.mxu0 %v12314_v8  ;;  %7845 = vmatprep.subr.bf16.mxu1 %v12316_v9  ;;  %v531_v8 = vld [vmem:[%s13937_s20 + $0x138] sm:$0xff]  ;;  %v11285_v9 = vcombine.low %v518_v60, %v522_v61  ;;  %v11294_v11 = vcombine.high %v526_v5, %v530_v6  ;;  %v11342_v60 = vcombine.high %v574_v53, %v578_v54 }
 0x2f1   : > { %v11296_v12 = vcombine.high %v527_v7, %v531_v8  ;;  %v11295_v18 = vcombine.low %v527_v7, %v531_v8  ;;  %v594_v7 = vld [vmem:[%s13937_s20 + $0x330] sm:$0xff]  ;;  %v591_v8 = vld [vmem:[%s13937_s20 + $0x318] sm:$0xff] }
 0x2f3   : > { %7459 = vmatpush1.bf16.msra.mxu0 %v12313_v14  ;;  %7846 = vmatpush1.bf16.msra.mxu1 %v12315_v15  ;;  %v538_v14 = vld [vmem:[%s13937_s20 + $0x170] sm:$0xff]  ;;  %v535_v15 = vld [vmem:[%s13937_s20 + $0x158] sm:$0xff] }
 0x2f4   : > { %7460 = vmatprep.subr.bf16.mxu0 %v12322_v16  ;;  %7847 = vmatprep.subr.bf16.mxu1 %v12324_v17  ;;  %v539_v16 = vld [vmem:[%s13937_s20 + $0x178] sm:$0xff]  ;;  %v11293_v17 = vcombine.low %v526_v5, %v530_v6  ;;  %v11302_v19 = vcombine.high %v534_v13, %v538_v14  ;;  %v590_v6 = vld [vmem:[%s13937_s20 + $0x310] sm:$0xff] }
 0x2f5   : > { %v11304_v20 = vcombine.high %v535_v15, %v539_v16  ;;  %v11303_v26 = vcombine.low %v535_v15, %v539_v16  ;;  %v602_v15 = vld [vmem:[%s13937_s20 + $0x370] sm:$0xff]  ;;  %v599_v16 = vld [vmem:[%s13937_s20 + $0x358] sm:$0xff] }
 0x2f7   : > { %7461 = vmatpush1.bf16.msra.mxu0 %v12321_v22  ;;  %7848 = vmatpush1.bf16.msra.mxu1 %v12323_v23  ;;  %v546_v22 = vld [vmem:[%s13937_s20 + $0x1b0] sm:$0xff]  ;;  %v543_v23 = vld [vmem:[%s13937_s20 + $0x198] sm:$0xff] }
 0x2f8   : > { %7462 = vmatprep.subr.bf16.mxu0 %v12330_v24  ;;  %7849 = vmatprep.subr.bf16.mxu1 %v12332_v25  ;;  %v547_v24 = vld [vmem:[%s13937_s20 + $0x1b8] sm:$0xff]  ;;  %v11301_v25 = vcombine.low %v534_v13, %v538_v14  ;;  %v11310_v27 = vcombine.high %v542_v21, %v546_v22  ;;  %v598_v14 = vld [vmem:[%s13937_s20 + $0x350] sm:$0xff] }
 0x2f9   : > { %v11312_v28 = vcombine.high %v543_v23, %v547_v24  ;;  %v11311_v34 = vcombine.low %v543_v23, %v547_v24  ;;  %v610_v23 = vld [vmem:[%s13937_s20 + $0x3b0] sm:$0xff]  ;;  %v607_v24 = vld [vmem:[%s13937_s20 + $0x398] sm:$0xff] }
 0x2fb   : > { %7463 = vmatpush1.bf16.msra.mxu0 %v12329_v30  ;;  %7850 = vmatpush1.bf16.msra.mxu1 %v12331_v31  ;;  %v554_v30 = vld [vmem:[%s13937_s20 + $0x1f0] sm:$0xff]  ;;  %v551_v31 = vld [vmem:[%s13937_s20 + $0x1d8] sm:$0xff] }
 0x2fc   : > { %7464 = vmatprep.subr.bf16.mxu0 %v12338_v32  ;;  %7851 = vmatprep.subr.bf16.mxu1 %v12340_v33  ;;  %v555_v32 = vld [vmem:[%s13937_s20 + $0x1f8] sm:$0xff]  ;;  %v11309_v33 = vcombine.low %v542_v21, %v546_v22  ;;  %v11318_v35 = vcombine.high %v550_v29, %v554_v30  ;;  %v606_v22 = vld [vmem:[%s13937_s20 + $0x390] sm:$0xff] }
 0x2fd   : > { %v11320_v36 = vcombine.high %v551_v31, %v555_v32  ;;  %v11319_v42 = vcombine.low %v551_v31, %v555_v32  ;;  %v618_v31 = vld [vmem:[%s13937_s20 + $0x3f0] sm:$0xff]  ;;  %v615_v32 = vld [vmem:[%s13937_s20 + $0x3d8] sm:$0xff] }
 0x2ff   : > { %7465 = vmatpush1.bf16.msra.mxu0 %v12337_v38  ;;  %7852 = vmatpush1.bf16.msra.mxu1 %v12339_v39  ;;  %v562_v38 = vld [vmem:[%s13937_s20 + $0x230] sm:$0xff]  ;;  %v559_v39 = vld [vmem:[%s13937_s20 + $0x218] sm:$0xff] }
 0x300   : > { %7880 = vmatprep.subr.bf16.mxu0 %v11262_v40  ;;  %8267 = vmatprep.subr.bf16.mxu1 %v11264_v41  ;;  %v563_v40 = vld [vmem:[%s13937_s20 + $0x238] sm:$0xff]  ;;  %v11317_v41 = vcombine.low %v550_v29, %v554_v30  ;;  %v11326_v43 = vcombine.high %v558_v37, %v562_v38  ;;  %v614_v30 = vld [vmem:[%s13937_s20 + $0x3d0] sm:$0xff] }
 0x302   : > { %7483 = vmatmul.mubr.bf16.vlgmr.msra.gmra.mrb[0].mxu0 %v12968_v44  ;;  %7870 = vmatmul.mubr.bf16.vlgmr.msra.gmra.mrb[0].mxu1 %v12968_v44  ;;  %v11328_v44 = vcombine.high %v559_v39, %v563_v40 }
 0x303   : > { %7881 = vmatpush1.bf16.msra.mxu0 %v11261_v47  ;;  %8268 = vmatpush1.bf16.msra.mxu1 %v11263_v48  ;;  %v567_v47 = vld [vmem:[%s13937_s20 + $0x258] sm:$0xff] }
 0x304   : > { %7882 = vmatprep.subr.bf16.mxu0 %v11270_v49  ;;  %8269 = vmatprep.subr.bf16.mxu1 %v11272_v50  ;;  %v571_v48 = vld [vmem:[%s13937_s20 + $0x278] sm:$0xff]  ;;  %v11325_v49 = vcombine.low %v558_v37, %v562_v38  ;;  %v11327_v50 = vcombine.low %v559_v39, %v563_v40  ;;  %v622_v38 = vld [vmem:[%s13937_s20 + $0x410] sm:$0xff] }
 0x305   : > { %7912 = vmatprep.mubr.bf16.mxu0 %v12969_v62  ;;  %8299 = vmatprep.mubr.bf16.mxu1 %v12969_v62  ;;  %v11336_v52 = vcombine.high %v567_v47, %v571_v48  ;;  %v582_v62 = vld [vmem:[%s13937_s20 + $0x2d0] sm:$0xff]  ;;  %v623_v40 = vld [vmem:[%s13937_s20 + $0x418] sm:$0xff] }
 0x306   : > { %v626_v39 = vld [vmem:[%s13937_s20 + $0x430] sm:$0xff] }
 0x307   : > { %7883 = vmatpush1.bf16.msra.mxu0 %v11269_v55  ;;  %8270 = vmatpush1.bf16.msra.mxu1 %v11271_v56  ;;  %v575_v55 = vld [vmem:[%s13937_s20 + $0x298] sm:$0xff] }
 0x308   : > { %7884 = vmatprep.subr.bf16.mxu0 %v11278_v57  ;;  %8271 = vmatprep.subr.bf16.mxu1 %v11280_v58  ;;  %v579_v56 = vld [vmem:[%s13937_s20 + $0x2b8] sm:$0xff]  ;;  %v11333_v57 = vcombine.low %v566_v45, %v570_v46  ;;  %v11335_v58 = vcombine.low %v567_v47, %v571_v48  ;;  %v630_v46 = vld [vmem:[%s13937_s20 + $0x450] sm:$0xff] }
 0x309   : > { %v11344_v61 = vcombine.high %v575_v55, %v579_v56  ;;  %v634_v47 = vld [vmem:[%s13937_s20 + $0x470] sm:$0xff]  ;;  %v631_v48 = vld [vmem:[%s13937_s20 + $0x458] sm:$0xff] }
 0x30b   : > { %7885 = vmatpush1.bf16.msra.mxu0 %v11277_v1  ;;  %8272 = vmatpush1.bf16.msra.mxu1 %v11279_v2  ;;  %v587_v1 = vld [vmem:[%s13937_s20 + $0x2f8] sm:$0xff]  ;;  %v11341_v2 = vcombine.low %v574_v53, %v578_v54  ;;  %v638_v54 = vld [vmem:[%s13937_s20 + $0x490] sm:$0xff] }
 0x30c   : > { %7886 = vmatprep.subr.bf16.mxu0 %v11286_v3  ;;  %8273 = vmatprep.subr.bf16.mxu1 %v11288_v4  ;;  %v11343_v3 = vcombine.low %v575_v55, %v579_v56  ;;  %v11350_v4 = vcombine.high %v582_v62, %v586_v63  ;;  %v11352_v5 = vcombine.high %v583_v0, %v587_v1  ;;  %v642_v55 = vld [vmem:[%s13937_s20 + $0x4b0] sm:$0xff] }
 0x30d   : > { %v12970_v56 = vld [vmem:[%s13935_s27] ss:$68 sps:$4 sm:$0xff]  }
 0x30f   : > { %7887 = vmatpush1.bf16.msra.mxu0 %v11285_v9  ;;  %8274 = vmatpush1.bf16.msra.mxu1 %v11287_v10  ;;  %v595_v9 = vld [vmem:[%s13937_s20 + $0x338] sm:$0xff]  ;;  %v11349_v10 = vcombine.low %v582_v62, %v586_v63  ;;  %v11406_v62 = vcombine.high %v638_v54, %v642_v55 }
 0x310   : > { %7888 = vmatprep.subr.bf16.mxu0 %v11294_v11  ;;  %8275 = vmatprep.subr.bf16.mxu1 %v11296_v12  ;;  %v11351_v11 = vcombine.low %v583_v0, %v587_v1  ;;  %v11358_v12 = vcombine.high %v590_v6, %v594_v7  ;;  %v11360_v13 = vcombine.high %v591_v8, %v595_v9  ;;  %v646_v0 = vld [vmem:[%s13937_s20 + $0x4d0] sm:$0xff] }
 0x311   : > { %v650_v1 = vld [vmem:[%s13937_s20 + $0x4f0] sm:$0xff] }
 0x313   : > { %7889 = vmatpush1.bf16.msra.mxu0 %v11293_v17  ;;  %8276 = vmatpush1.bf16.msra.mxu1 %v11295_v18  ;;  %v603_v17 = vld [vmem:[%s13937_s20 + $0x378] sm:$0xff]  ;;  %v11357_v18 = vcombine.low %v590_v6, %v594_v7  ;;  %v11414_v7 = vcombine.high %v646_v0, %v650_v1 }
 0x314   : > { %7890 = vmatprep.subr.bf16.mxu0 %v11302_v19  ;;  %8277 = vmatprep.subr.bf16.mxu1 %v11304_v20  ;;  %v11359_v19 = vcombine.low %v591_v8, %v595_v9  ;;  %v11366_v20 = vcombine.high %v598_v14, %v602_v15  ;;  %v11368_v21 = vcombine.high %v599_v16, %v603_v17  ;;  %v654_v9 = vld [vmem:[%s13937_s20 + $0x510] sm:$0xff] }
 0x317   : > { %7891 = vmatpush1.bf16.msra.mxu0 %v11301_v25  ;;  %8278 = vmatpush1.bf16.msra.mxu1 %v11303_v26  ;;  %v611_v25 = vld [vmem:[%s13937_s20 + $0x3b8] sm:$0xff]  ;;  %v11365_v26 = vcombine.low %v598_v14, %v602_v15 }
 0x318   : > { %7892 = vmatprep.subr.bf16.mxu0 %v11310_v27  ;;  %8279 = vmatprep.subr.bf16.mxu1 %v11312_v28  ;;  %v11367_v27 = vcombine.low %v599_v16, %v603_v17  ;;  %v11374_v28 = vcombine.high %v606_v22, %v610_v23  ;;  %v11376_v29 = vcombine.high %v607_v24, %v611_v25  ;;  %v662_v17 = vld [vmem:[%s13937_s20 + $0x550] sm:$0xff] }
 0x31b   : > { %7893 = vmatpush1.bf16.msra.mxu0 %v11309_v33  ;;  %8280 = vmatpush1.bf16.msra.mxu1 %v11311_v34  ;;  %v619_v33 = vld [vmem:[%s13937_s20 + $0x3f8] sm:$0xff]  ;;  %v11373_v34 = vcombine.low %v606_v22, %v610_v23 }
 0x31c   : > { %7894 = vmatprep.subr.bf16.mxu0 %v11318_v35  ;;  %8281 = vmatprep.subr.bf16.mxu1 %v11320_v36  ;;  %v11375_v35 = vcombine.low %v607_v24, %v611_v25  ;;  %v11382_v36 = vcombine.high %v614_v30, %v618_v31  ;;  %v11384_v37 = vcombine.high %v615_v32, %v619_v33  ;;  %v670_v25 = vld [vmem:[%s13937_s20 + $0x590] sm:$0xff] }
 0x31f   : > { %7895 = vmatpush1.bf16.msra.mxu0 %v11317_v41  ;;  %8282 = vmatpush1.bf16.msra.mxu1 %v11319_v42  ;;  %v627_v41 = vld [vmem:[%s13937_s20 + $0x438] sm:$0xff]  ;;  %v11381_v42 = vcombine.low %v614_v30, %v618_v31 }
 0x320   : > { %7896 = vmatprep.subr.bf16.mxu0 %v11326_v43  ;;  %8283 = vmatprep.subr.bf16.mxu1 %v11328_v44  ;;  %v11383_v43 = vcombine.low %v615_v32, %v619_v33  ;;  %v11390_v44 = vcombine.high %v622_v38, %v626_v39  ;;  %v11392_v45 = vcombine.high %v623_v40, %v627_v41  ;;  %v678_v33 = vld [vmem:[%s13937_s20 + $0x5d0] sm:$0xff] }
 0x323   : > { %7897 = vmatpush1.bf16.msra.mxu0 %v11325_v49  ;;  %8284 = vmatpush1.bf16.msra.mxu1 %v11327_v50  ;;  %v635_v49 = vld [vmem:[%s13937_s20 + $0x478] sm:$0xff]  ;;  %v11389_v50 = vcombine.low %v622_v38, %v626_v39 }
 0x324   : > { %7898 = vmatprep.subr.bf16.mxu0 %v11334_v51  ;;  %8285 = vmatprep.subr.bf16.mxu1 %v11336_v52  ;;  %v11391_v51 = vcombine.low %v623_v40, %v627_v41  ;;  %v11398_v52 = vcombine.high %v630_v46, %v634_v47  ;;  %v11400_v53 = vcombine.high %v631_v48, %v635_v49  ;;  %v686_v41 = vld [vmem:[%s13937_s20 + $0x610] sm:$0xff] }
 0x327   : > { %7899 = vmatpush1.bf16.msra.mxu0 %v11333_v57  ;;  %8286 = vmatpush1.bf16.msra.mxu1 %v11335_v58  ;;  %v639_v57 = vld [vmem:[%s13937_s20 + $0x498] sm:$0xff] }
 0x328   : > { %7900 = vmatprep.subr.bf16.mxu0 %v11342_v60  ;;  %8287 = vmatprep.subr.bf16.mxu1 %v11344_v61  ;;  %v643_v58 = vld [vmem:[%s13937_s20 + $0x4b8] sm:$0xff]  ;;  %v11397_v60 = vcombine.low %v630_v46, %v634_v47  ;;  %v11399_v61 = vcombine.low %v631_v48, %v635_v49  ;;  %v694_v49 = vld [vmem:[%s13937_s20 + $0x650] sm:$0xff] }
 0x329   : > { %v11408_v63 = vcombine.high %v639_v57, %v643_v58  ;;  %v11407_v6 = vcombine.low %v639_v57, %v643_v58  ;;  %v702_v57 = vld [vmem:[%s13937_s20 + $0x690] sm:$0xff] }
 0x32a   : > { %v706_v58 = vld [vmem:[%s13937_s20 + $0x6b0] sm:$0xff] }
 0x32b   : > { %7901 = vmatpush1.bf16.msra.mxu0 %v11341_v2  ;;  %8288 = vmatpush1.bf16.msra.mxu1 %v11343_v3  ;;  %v12971_v2 = vld [vmem:[%s13935_s27 + $0xc] ss:$68 sps:$4 sm:$0xff]  }
 0x32c   : > { %7902 = vmatprep.subr.bf16.mxu0 %v11350_v4  ;;  %8289 = vmatprep.subr.bf16.mxu1 %v11352_v5  ;;  %v647_v3 = vld [vmem:[%s13937_s20 + $0x4d8] sm:$0xff]  ;;  %v11405_v5 = vcombine.low %v638_v54, %v642_v55 }
 0x32d   : > { %v651_v4 = vld [vmem:[%s13937_s20 + $0x4f8] sm:$0xff] }
 0x32e   : > { %v11416_v8 = vcombine.high %v647_v3, %v651_v4  ;;  %v11415_v14 = vcombine.low %v647_v3, %v651_v4  ;;  %v714_v3 = vld [vmem:[%s13937_s20 + $0x6f0] sm:$0xff]  ;;  %v711_v4 = vld [vmem:[%s13937_s20 + $0x6d8] sm:$0xff] }
 0x32f   : > { %7903 = vmatpush1.bf16.msra.mxu0 %v11349_v10  ;;  %8290 = vmatpush1.bf16.msra.mxu1 %v11351_v11  ;;  %v658_v10 = vld [vmem:[%s13937_s20 + $0x530] sm:$0xff]  ;;  %v655_v11 = vld [vmem:[%s13937_s20 + $0x518] sm:$0xff] }
 0x330   : > { %7904 = vmatprep.subr.bf16.mxu0 %v11358_v12  ;;  %8291 = vmatprep.subr.bf16.mxu1 %v11360_v13  ;;  %v659_v12 = vld [vmem:[%s13937_s20 + $0x538] sm:$0xff]  ;;  %v11413_v13 = vcombine.low %v646_v0, %v650_v1  ;;  %v11422_v15 = vcombine.high %v654_v9, %v658_v10  ;;  %v11470_v0 = vcombine.high %v702_v57, %v706_v58 }
 0x331   : > { %v11424_v16 = vcombine.high %v655_v11, %v659_v12  ;;  %v11423_v22 = vcombine.low %v655_v11, %v659_v12  ;;  %v722_v11 = vld [vmem:[%s13937_s20 + $0x730] sm:$0xff]  ;;  %v719_v12 = vld [vmem:[%s13937_s20 + $0x718] sm:$0xff] }
 0x333   : > { %7905 = vmatpush1.bf16.msra.mxu0 %v11357_v18  ;;  %8292 = vmatpush1.bf16.msra.mxu1 %v11359_v19  ;;  %v666_v18 = vld [vmem:[%s13937_s20 + $0x570] sm:$0xff]  ;;  %v663_v19 = vld [vmem:[%s13937_s20 + $0x558] sm:$0xff] }
 0x334   : > { %7906 = vmatprep.subr.bf16.mxu0 %v11366_v20  ;;  %8293 = vmatprep.subr.bf16.mxu1 %v11368_v21  ;;  %v667_v20 = vld [vmem:[%s13937_s20 + $0x578] sm:$0xff]  ;;  %v11421_v21 = vcombine.low %v654_v9, %v658_v10  ;;  %v11430_v23 = vcombine.high %v662_v17, %v666_v18  ;;  %v718_v10 = vld [vmem:[%s13937_s20 + $0x710] sm:$0xff] }
 0x335   : > { %v11432_v24 = vcombine.high %v663_v19, %v667_v20  ;;  %v11431_v30 = vcombine.low %v663_v19, %v667_v20  ;;  %v730_v19 = vld [vmem:[%s13937_s20 + $0x770] sm:$0xff]  ;;  %v727_v20 = vld [vmem:[%s13937_s20 + $0x758] sm:$0xff] }
 0x337   : > { %7907 = vmatpush1.bf16.msra.mxu0 %v11365_v26  ;;  %8294 = vmatpush1.bf16.msra.mxu1 %v11367_v27  ;;  %v674_v26 = vld [vmem:[%s13937_s20 + $0x5b0] sm:$0xff]  ;;  %v671_v27 = vld [vmem:[%s13937_s20 + $0x598] sm:$0xff] }
 0x338   : > { %7908 = vmatprep.subr.bf16.mxu0 %v11374_v28  ;;  %8295 = vmatprep.subr.bf16.mxu1 %v11376_v29  ;;  %v675_v28 = vld [vmem:[%s13937_s20 + $0x5b8] sm:$0xff]  ;;  %v11429_v29 = vcombine.low %v662_v17, %v666_v18  ;;  %v11438_v31 = vcombine.high %v670_v25, %v674_v26  ;;  %v726_v18 = vld [vmem:[%s13937_s20 + $0x750] sm:$0xff] }
 0x339   : > { %v11440_v32 = vcombine.high %v671_v27, %v675_v28  ;;  %v11439_v38 = vcombine.low %v671_v27, %v675_v28  ;;  %v738_v27 = vld [vmem:[%s13937_s20 + $0x7b0] sm:$0xff]  ;;  %v735_v28 = vld [vmem:[%s13937_s20 + $0x798] sm:$0xff] }
 0x33b   : > { %7909 = vmatpush1.bf16.msra.mxu0 %v11373_v34  ;;  %8296 = vmatpush1.bf16.msra.mxu1 %v11375_v35  ;;  %v682_v34 = vld [vmem:[%s13937_s20 + $0x5f0] sm:$0xff]  ;;  %v679_v35 = vld [vmem:[%s13937_s20 + $0x5d8] sm:$0xff] }
 0x33c   : > { %7910 = vmatprep.subr.bf16.mxu0 %v11382_v36  ;;  %8297 = vmatprep.subr.bf16.mxu1 %v11384_v37  ;;  %v683_v36 = vld [vmem:[%s13937_s20 + $0x5f8] sm:$0xff]  ;;  %v11437_v37 = vcombine.low %v670_v25, %v674_v26  ;;  %v11446_v39 = vcombine.high %v678_v33, %v682_v34  ;;  %v734_v26 = vld [vmem:[%s13937_s20 + $0x790] sm:$0xff] }
 0x33d   : > { %v11448_v40 = vcombine.high %v679_v35, %v683_v36  ;;  %v11447_v46 = vcombine.low %v679_v35, %v683_v36  ;;  %v746_v35 = vld [vmem:[%s13937_s20 + $0x7f0] sm:$0xff]  ;;  %v743_v36 = vld [vmem:[%s13937_s20 + $0x7d8] sm:$0xff] }
 0x33f   : > { %7911 = vmatpush1.bf16.msra.mxu0 %v11381_v42  ;;  %8298 = vmatpush1.bf16.msra.mxu1 %v11383_v43  ;;  %v690_v42 = vld [vmem:[%s13937_s20 + $0x630] sm:$0xff]  ;;  %v687_v43 = vld [vmem:[%s13937_s20 + $0x618] sm:$0xff] }
 0x340   : > { %7923 = vmatprep.subr.bf16.mxu0 %v11390_v44  ;;  %8310 = vmatprep.subr.bf16.mxu1 %v11392_v45  ;;  %v691_v44 = vld [vmem:[%s13937_s20 + $0x638] sm:$0xff]  ;;  %v11445_v45 = vcombine.low %v678_v33, %v682_v34  ;;  %v11454_v47 = vcombine.high %v686_v41, %v690_v42  ;;  %v742_v34 = vld [vmem:[%s13937_s20 + $0x7d0] sm:$0xff] }
 0x341   : > { %v11456_v48 = vcombine.high %v687_v43, %v691_v44  ;;  %v11455_v54 = vcombine.low %v687_v43, %v691_v44  ;;  %v754_v43 = vld [vmem:[%s13937_s20 + $0x830] sm:$0xff]  ;;  %v751_v44 = vld [vmem:[%s13937_s20 + $0x818] sm:$0xff] }
 0x342   : > { %7913 = vmatmul.mubr.bf16.vlgmr.msra.gmra.mrb[4].mxu0 %v12970_v56  ;;  %8300 = vmatmul.mubr.bf16.vlgmr.msra.gmra.mrb[4].mxu1 %v12970_v56 }
 0x343   : > { %7924 = vmatpush1.bf16.msra.mxu0 %v11389_v50  ;;  %8311 = vmatpush1.bf16.msra.mxu1 %v11391_v51  ;;  %v698_v50 = vld [vmem:[%s13937_s20 + $0x670] sm:$0xff]  ;;  %v695_v51 = vld [vmem:[%s13937_s20 + $0x658] sm:$0xff] }
 0x344   : > { %7925 = vmatprep.subr.bf16.mxu0 %v11398_v52  ;;  %8312 = vmatprep.subr.bf16.mxu1 %v11400_v53  ;;  %v699_v52 = vld [vmem:[%s13937_s20 + $0x678] sm:$0xff]  ;;  %v11453_v53 = vcombine.low %v686_v41, %v690_v42  ;;  %v11462_v55 = vcombine.high %v694_v49, %v698_v50  ;;  %v750_v42 = vld [vmem:[%s13937_s20 + $0x810] sm:$0xff] }
 0x345   : > { %7955 = vmatprep.mubr.bf16.mxu0 %v12971_v2  ;;  %8342 = vmatprep.mubr.bf16.mxu1 %v12971_v2  ;;  %v11464_v56 = vcombine.high %v695_v51, %v699_v52  ;;  %v710_v2 = vld [vmem:[%s13937_s20 + $0x6d0] sm:$0xff] }
 0x347   : > { %7926 = vmatpush1.bf16.msra.mxu0 %v11397_v60  ;;  %8313 = vmatpush1.bf16.msra.mxu1 %v11399_v61  ;;  %v703_v60 = vld [vmem:[%s13937_s20 + $0x698] sm:$0xff] }
 0x348   : > { %7927 = vmatprep.subr.bf16.mxu0 %v11406_v62  ;;  %8314 = vmatprep.subr.bf16.mxu1 %v11408_v63  ;;  %v707_v61 = vld [vmem:[%s13937_s20 + $0x6b8] sm:$0xff]  ;;  %v11461_v62 = vcombine.low %v694_v49, %v698_v50  ;;  %v11463_v63 = vcombine.low %v695_v51, %v699_v52  ;;  %v758_v50 = vld [vmem:[%s13937_s20 + $0x850] sm:$0xff] }
 0x349   : > { %v11472_v1 = vcombine.high %v703_v60, %v707_v61  ;;  %v762_v51 = vld [vmem:[%s13937_s20 + $0x870] sm:$0xff]  ;;  %v759_v52 = vld [vmem:[%s13937_s20 + $0x858] sm:$0xff] }
 0x34b   : > { %7928 = vmatpush1.bf16.msra.mxu0 %v11405_v5  ;;  %8315 = vmatpush1.bf16.msra.mxu1 %v11407_v6  ;;  %v715_v5 = vld [vmem:[%s13937_s20 + $0x6f8] sm:$0xff]  ;;  %v11469_v6 = vcombine.low %v702_v57, %v706_v58  ;;  %v766_v58 = vld [vmem:[%s13937_s20 + $0x890] sm:$0xff] }
 0x34c   : > { %7929 = vmatprep.subr.bf16.mxu0 %v11414_v7  ;;  %8316 = vmatprep.subr.bf16.mxu1 %v11416_v8  ;;  %v11471_v7 = vcombine.low %v703_v60, %v707_v61  ;;  %v11478_v8 = vcombine.high %v710_v2, %v714_v3  ;;  %v11480_v9 = vcombine.high %v711_v4, %v715_v5  ;;  %v770_v60 = vld [vmem:[%s13937_s20 + $0x8b0] sm:$0xff]  ;;  %v12972_v61 = vld [vmem:[%s13935_s27 + $0x8] ss:$68 sps:$4 sm:$0xff]  }
 0x34f   : > { %7930 = vmatpush1.bf16.msra.mxu0 %v11413_v13  ;;  %8317 = vmatpush1.bf16.msra.mxu1 %v11415_v14  ;;  %v723_v13 = vld [vmem:[%s13937_s20 + $0x738] sm:$0xff]  ;;  %v11477_v14 = vcombine.low %v710_v2, %v714_v3  ;;  %v11534_v2 = vcombine.high %v766_v58, %v770_v60 }
 0x350   : > { %7931 = vmatprep.subr.bf16.mxu0 %v11422_v15  ;;  %8318 = vmatprep.subr.bf16.mxu1 %v11424_v16  ;;  %v11479_v15 = vcombine.low %v711_v4, %v715_v5  ;;  %v11486_v16 = vcombine.high %v718_v10, %v722_v11  ;;  %v11488_v17 = vcombine.high %v719_v12, %v723_v13  ;;  %v774_v4 = vld [vmem:[%s13937_s20 + $0x8d0] sm:$0xff] }
 0x351   : > { %v778_v5 = vld [vmem:[%s13937_s20 + $0x8f0] sm:$0xff] }
 0x353   : > { %7932 = vmatpush1.bf16.msra.mxu0 %v11421_v21  ;;  %8319 = vmatpush1.bf16.msra.mxu1 %v11423_v22  ;;  %v731_v21 = vld [vmem:[%s13937_s20 + $0x778] sm:$0xff]  ;;  %v11485_v22 = vcombine.low %v718_v10, %v722_v11  ;;  %v11542_v11 = vcombine.high %v774_v4, %v778_v5 }
 0x354   : > { %7933 = vmatprep.subr.bf16.mxu0 %v11430_v23  ;;  %8320 = vmatprep.subr.bf16.mxu1 %v11432_v24  ;;  %v11487_v23 = vcombine.low %v719_v12, %v723_v13  ;;  %v11494_v24 = vcombine.high %v726_v18, %v730_v19  ;;  %v11496_v25 = vcombine.high %v727_v20, %v731_v21  ;;  %v782_v13 = vld [vmem:[%s13937_s20 + $0x910] sm:$0xff] }
 0x357   : > { %7934 = vmatpush1.bf16.msra.mxu0 %v11429_v29  ;;  %8321 = vmatpush1.bf16.msra.mxu1 %v11431_v30  ;;  %v739_v29 = vld [vmem:[%s13937_s20 + $0x7b8] sm:$0xff]  ;;  %v11493_v30 = vcombine.low %v726_v18, %v730_v19 }
 0x358   : > { %7935 = vmatprep.subr.bf16.mxu0 %v11438_v31  ;;  %8322 = vmatprep.subr.bf16.mxu1 %v11440_v32  ;;  %v11495_v31 = vcombine.low %v727_v20, %v731_v21  ;;  %v11502_v32 = vcombine.high %v734_v26, %v738_v27  ;;  %v11504_v33 = vcombine.high %v735_v28, %v739_v29  ;;  %v790_v21 = vld [vmem:[%s13937_s20 + $0x950] sm:$0xff] }
 0x35b   : > { %7936 = vmatpush1.bf16.msra.mxu0 %v11437_v37  ;;  %8323 = vmatpush1.bf16.msra.mxu1 %v11439_v38  ;;  %v747_v37 = vld [vmem:[%s13937_s20 + $0x7f8] sm:$0xff]  ;;  %v11501_v38 = vcombine.low %v734_v26, %v738_v27 }
 0x35c   : > { %7937 = vmatprep.subr.bf16.mxu0 %v11446_v39  ;;  %8324 = vmatprep.subr.bf16.mxu1 %v11448_v40  ;;  %v11503_v39 = vcombine.low %v735_v28, %v739_v29  ;;  %v11510_v40 = vcombine.high %v742_v34, %v746_v35  ;;  %v11512_v41 = vcombine.high %v743_v36, %v747_v37  ;;  %v798_v29 = vld [vmem:[%s13937_s20 + $0x990] sm:$0xff] }
 0x35f   : > { %7938 = vmatpush1.bf16.msra.mxu0 %v11445_v45  ;;  %8325 = vmatpush1.bf16.msra.mxu1 %v11447_v46  ;;  %v755_v45 = vld [vmem:[%s13937_s20 + $0x838] sm:$0xff]  ;;  %v11509_v46 = vcombine.low %v742_v34, %v746_v35 }
 0x360   : > { %7939 = vmatprep.subr.bf16.mxu0 %v11454_v47  ;;  %8326 = vmatprep.subr.bf16.mxu1 %v11456_v48  ;;  %v11511_v47 = vcombine.low %v743_v36, %v747_v37  ;;  %v11518_v48 = vcombine.high %v750_v42, %v754_v43  ;;  %v11520_v49 = vcombine.high %v751_v44, %v755_v45  ;;  %v806_v37 = vld [vmem:[%s13937_s20 + $0x9d0] sm:$0xff] }
 0x363   : > { %7940 = vmatpush1.bf16.msra.mxu0 %v11453_v53  ;;  %8327 = vmatpush1.bf16.msra.mxu1 %v11455_v54  ;;  %v763_v53 = vld [vmem:[%s13937_s20 + $0x878] sm:$0xff]  ;;  %v11517_v54 = vcombine.low %v750_v42, %v754_v43 }
 0x364   : > { %7941 = vmatprep.subr.bf16.mxu0 %v11462_v55  ;;  %8328 = vmatprep.subr.bf16.mxu1 %v11464_v56  ;;  %v11519_v55 = vcombine.low %v751_v44, %v755_v45  ;;  %v11526_v56 = vcombine.high %v758_v50, %v762_v51  ;;  %v11528_v57 = vcombine.high %v759_v52, %v763_v53  ;;  %v814_v45 = vld [vmem:[%s13937_s20 + $0xa10] sm:$0xff] }
 0x367   : > { %7942 = vmatpush1.bf16.msra.mxu0 %v11461_v62  ;;  %8329 = vmatpush1.bf16.msra.mxu1 %v11463_v63  ;;  %v767_v62 = vld [vmem:[%s13937_s20 + $0x898] sm:$0xff] }
 0x368   : > { %7943 = vmatprep.subr.bf16.mxu0 %v11470_v0  ;;  %8330 = vmatprep.subr.bf16.mxu1 %v11472_v1  ;;  %v771_v63 = vld [vmem:[%s13937_s20 + $0x8b8] sm:$0xff]  ;;  %v11525_v0 = vcombine.low %v758_v50, %v762_v51  ;;  %v11527_v1 = vcombine.low %v759_v52, %v763_v53  ;;  %v822_v53 = vld [vmem:[%s13937_s20 + $0xa50] sm:$0xff] }
 0x369   : > { %v11536_v3 = vcombine.high %v767_v62, %v771_v63  ;;  %v11535_v10 = vcombine.low %v767_v62, %v771_v63  ;;  %v830_v62 = vld [vmem:[%s13937_s20 + $0xa90] sm:$0xff] }
 0x36a   : > { %v834_v63 = vld [vmem:[%s13937_s20 + $0xab0] sm:$0xff] }
 0x36b   : > { %7944 = vmatpush1.bf16.msra.mxu0 %v11469_v6  ;;  %8331 = vmatpush1.bf16.msra.mxu1 %v11471_v7  ;;  %v12973_v6 = vld [vmem:[%s13935_s27 + $0x14] ss:$68 sps:$4 sm:$0xff]   ;;  %v775_v7 = vld [vmem:[%s13937_s20 + $0x8d8] sm:$0xff] }
 0x36c   : > { %7945 = vmatprep.subr.bf16.mxu0 %v11478_v8  ;;  %8332 = vmatprep.subr.bf16.mxu1 %v11480_v9  ;;  %v779_v8 = vld [vmem:[%s13937_s20 + $0x8f8] sm:$0xff]  ;;  %v11533_v9 = vcombine.low %v766_v58, %v770_v60 }
 0x36d   : > { %v11544_v12 = vcombine.high %v775_v7, %v779_v8  ;;  %v11543_v18 = vcombine.low %v775_v7, %v779_v8  ;;  %v842_v7 = vld [vmem:[%s13937_s20 + $0xaf0] sm:$0xff]  ;;  %v839_v8 = vld [vmem:[%s13937_s20 + $0xad8] sm:$0xff] }
 0x36f   : > { %7946 = vmatpush1.bf16.msra.mxu0 %v11477_v14  ;;  %8333 = vmatpush1.bf16.msra.mxu1 %v11479_v15  ;;  %v786_v14 = vld [vmem:[%s13937_s20 + $0x930] sm:$0xff]  ;;  %v783_v15 = vld [vmem:[%s13937_s20 + $0x918] sm:$0xff] }
 0x370   : > { %7947 = vmatprep.subr.bf16.mxu0 %v11486_v16  ;;  %8334 = vmatprep.subr.bf16.mxu1 %v11488_v17  ;;  %v787_v16 = vld [vmem:[%s13937_s20 + $0x938] sm:$0xff]  ;;  %v11541_v17 = vcombine.low %v774_v4, %v778_v5  ;;  %v11550_v19 = vcombine.high %v782_v13, %v786_v14  ;;  %v11598_v4 = vcombine.high %v830_v62, %v834_v63 }
 0x371   : > { %v11552_v20 = vcombine.high %v783_v15, %v787_v16  ;;  %v11551_v26 = vcombine.low %v783_v15, %v787_v16  ;;  %v850_v15 = vld [vmem:[%s13937_s20 + $0xb30] sm:$0xff]  ;;  %v847_v16 = vld [vmem:[%s13937_s20 + $0xb18] sm:$0xff] }
 0x373   : > { %7948 = vmatpush1.bf16.msra.mxu0 %v11485_v22  ;;  %8335 = vmatpush1.bf16.msra.mxu1 %v11487_v23  ;;  %v794_v22 = vld [vmem:[%s13937_s20 + $0x970] sm:$0xff]  ;;  %v791_v23 = vld [vmem:[%s13937_s20 + $0x958] sm:$0xff] }
 0x374   : > { %7949 = vmatprep.subr.bf16.mxu0 %v11494_v24  ;;  %8336 = vmatprep.subr.bf16.mxu1 %v11496_v25  ;;  %v795_v24 = vld [vmem:[%s13937_s20 + $0x978] sm:$0xff]  ;;  %v11549_v25 = vcombine.low %v782_v13, %v786_v14  ;;  %v11558_v27 = vcombine.high %v790_v21, %v794_v22  ;;  %v846_v14 = vld [vmem:[%s13937_s20 + $0xb10] sm:$0xff] }
 0x375   : > { %v11560_v28 = vcombine.high %v791_v23, %v795_v24  ;;  %v11559_v34 = vcombine.low %v791_v23, %v795_v24  ;;  %v858_v23 = vld [vmem:[%s13937_s20 + $0xb70] sm:$0xff]  ;;  %v855_v24 = vld [vmem:[%s13937_s20 + $0xb58] sm:$0xff] }
 0x377   : > { %7950 = vmatpush1.bf16.msra.mxu0 %v11493_v30  ;;  %8337 = vmatpush1.bf16.msra.mxu1 %v11495_v31  ;;  %v802_v30 = vld [vmem:[%s13937_s20 + $0x9b0] sm:$0xff]  ;;  %v799_v31 = vld [vmem:[%s13937_s20 + $0x998] sm:$0xff] }
 0x378   : > { %7951 = vmatprep.subr.bf16.mxu0 %v11502_v32  ;;  %8338 = vmatprep.subr.bf16.mxu1 %v11504_v33  ;;  %v803_v32 = vld [vmem:[%s13937_s20 + $0x9b8] sm:$0xff]  ;;  %v11557_v33 = vcombine.low %v790_v21, %v794_v22  ;;  %v11566_v35 = vcombine.high %v798_v29, %v802_v30  ;;  %v854_v22 = vld [vmem:[%s13937_s20 + $0xb50] sm:$0xff] }
 0x379   : > { %v11568_v36 = vcombine.high %v799_v31, %v803_v32  ;;  %v11567_v42 = vcombine.low %v799_v31, %v803_v32  ;;  %v866_v31 = vld [vmem:[%s13937_s20 + $0xbb0] sm:$0xff]  ;;  %v863_v32 = vld [vmem:[%s13937_s20 + $0xb98] sm:$0xff] }
 0x37b   : > { %7952 = vmatpush1.bf16.msra.mxu0 %v11501_v38  ;;  %8339 = vmatpush1.bf16.msra.mxu1 %v11503_v39  ;;  %v810_v38 = vld [vmem:[%s13937_s20 + $0x9f0] sm:$0xff]  ;;  %v807_v39 = vld [vmem:[%s13937_s20 + $0x9d8] sm:$0xff] }
 0x37c   : > { %7953 = vmatprep.subr.bf16.mxu0 %v11510_v40  ;;  %8340 = vmatprep.subr.bf16.mxu1 %v11512_v41  ;;  %v811_v40 = vld [vmem:[%s13937_s20 + $0x9f8] sm:$0xff]  ;;  %v11565_v41 = vcombine.low %v798_v29, %v802_v30  ;;  %v11574_v43 = vcombine.high %v806_v37, %v810_v38  ;;  %v862_v30 = vld [vmem:[%s13937_s20 + $0xb90] sm:$0xff] }
 0x37d   : > { %v11576_v44 = vcombine.high %v807_v39, %v811_v40  ;;  %v11575_v50 = vcombine.low %v807_v39, %v811_v40  ;;  %v874_v39 = vld [vmem:[%s13937_s20 + $0xbf0] sm:$0xff]  ;;  %v871_v40 = vld [vmem:[%s13937_s20 + $0xbd8] sm:$0xff] }
 0x37f   : > { %7954 = vmatpush1.bf16.msra.mxu0 %v11509_v46  ;;  %8341 = vmatpush1.bf16.msra.mxu1 %v11511_v47  ;;  %v818_v46 = vld [vmem:[%s13937_s20 + $0xa30] sm:$0xff]  ;;  %v815_v47 = vld [vmem:[%s13937_s20 + $0xa18] sm:$0xff] }
 0x380   : > { %7966 = vmatprep.subr.bf16.mxu0 %v11518_v48  ;;  %8353 = vmatprep.subr.bf16.mxu1 %v11520_v49  ;;  %v819_v48 = vld [vmem:[%s13937_s20 + $0xa38] sm:$0xff]  ;;  %v11573_v49 = vcombine.low %v806_v37, %v810_v38  ;;  %v11582_v51 = vcombine.high %v814_v45, %v818_v46  ;;  %v870_v38 = vld [vmem:[%s13937_s20 + $0xbd0] sm:$0xff] }
 0x381   : > { %v11584_v52 = vcombine.high %v815_v47, %v819_v48  ;;  %v11583_v58 = vcombine.low %v815_v47, %v819_v48  ;;  %v882_v47 = vld [vmem:[%s13937_s20 + $0xc30] sm:$0xff]  ;;  %v879_v48 = vld [vmem:[%s13937_s20 + $0xc18] sm:$0xff] }
 0x382   : > { %7956 = vmatmul.mubr.bf16.vlgmr.msra.gmra.mrb[4].mxu0 %v12972_v61  ;;  %8343 = vmatmul.mubr.bf16.vlgmr.msra.gmra.mrb[4].mxu1 %v12972_v61 }
 0x383   : > { %7967 = vmatpush1.bf16.msra.mxu0 %v11517_v54  ;;  %8354 = vmatpush1.bf16.msra.mxu1 %v11519_v55  ;;  %v826_v54 = vld [vmem:[%s13937_s20 + $0xa70] sm:$0xff]  ;;  %v823_v55 = vld [vmem:[%s13937_s20 + $0xa58] sm:$0xff] }
 0x384   : > { %7968 = vmatprep.subr.bf16.mxu0 %v11526_v56  ;;  %8355 = vmatprep.subr.bf16.mxu1 %v11528_v57  ;;  %v827_v56 = vld [vmem:[%s13937_s20 + $0xa78] sm:$0xff]  ;;  %v11581_v57 = vcombine.low %v814_v45, %v818_v46  ;;  %v11590_v60 = vcombine.high %v822_v53, %v826_v54  ;;  %v878_v46 = vld [vmem:[%s13937_s20 + $0xc10] sm:$0xff] }
 0x385   : > { %7998 = vmatprep.mubr.bf16.mxu0 %v12973_v6  ;;  %8385 = vmatprep.mubr.bf16.mxu1 %v12973_v6  ;;  %v11592_v61 = vcombine.high %v823_v55, %v827_v56  ;;  %v838_v6 = vld [vmem:[%s13937_s20 + $0xad0] sm:$0xff] }
 0x387   : > { %7969 = vmatpush1.bf16.msra.mxu0 %v11525_v0  ;;  %8356 = vmatpush1.bf16.msra.mxu1 %v11527_v1  ;;  %v831_v0 = vld [vmem:[%s13937_s20 + $0xa98] sm:$0xff] }
 0x388   : > { %7970 = vmatprep.subr.bf16.mxu0 %v11534_v2  ;;  %8357 = vmatprep.subr.bf16.mxu1 %v11536_v3  ;;  %v835_v1 = vld [vmem:[%s13937_s20 + $0xab8] sm:$0xff]  ;;  %v11589_v2 = vcombine.low %v822_v53, %v826_v54  ;;  %v11591_v3 = vcombine.low %v823_v55, %v827_v56  ;;  %v886_v54 = vld [vmem:[%s13937_s20 + $0xc50] sm:$0xff] }
 0x389   : > { %v11600_v5 = vcombine.high %v831_v0, %v835_v1  ;;  %v890_v55 = vld [vmem:[%s13937_s20 + $0xc70] sm:$0xff]  ;;  %v887_v56 = vld [vmem:[%s13937_s20 + $0xc58] sm:$0xff] }
 0x38b   : > { %7971 = vmatpush1.bf16.msra.mxu0 %v11533_v9  ;;  %8358 = vmatpush1.bf16.msra.mxu1 %v11535_v10  ;;  %v843_v9 = vld [vmem:[%s13937_s20 + $0xaf8] sm:$0xff]  ;;  %v11597_v10 = vcombine.low %v830_v62, %v834_v63  ;;  %v894_v63 = vld [vmem:[%s13937_s20 + $0xc90] sm:$0xff] }
 0x38c   : > { %7972 = vmatprep.subr.bf16.mxu0 %v11542_v11  ;;  %8359 = vmatprep.subr.bf16.mxu1 %v11544_v12  ;;  %v11599_v11 = vcombine.low %v831_v0, %v835_v1  ;;  %v11606_v12 = vcombine.high %v838_v6, %v842_v7  ;;  %v11608_v13 = vcombine.high %v839_v8, %v843_v9  ;;  %v898_v0 = vld [vmem:[%s13937_s20 + $0xcb0] sm:$0xff]  ;;  %v12974_v1 = vld [vmem:[%s13935_s27 + $0x10] ss:$68 sps:$4 sm:$0xff]  }
 0x38f   : > { %7973 = vmatpush1.bf16.msra.mxu0 %v11541_v17  ;;  %8360 = vmatpush1.bf16.msra.mxu1 %v11543_v18  ;;  %v851_v17 = vld [vmem:[%s13937_s20 + $0xb38] sm:$0xff]  ;;  %v11605_v18 = vcombine.low %v838_v6, %v842_v7  ;;  %v11662_v6 = vcombine.high %v894_v63, %v898_v0 }
 0x390   : > { %7974 = vmatprep.subr.bf16.mxu0 %v11550_v19  ;;  %8361 = vmatprep.subr.bf16.mxu1 %v11552_v20  ;;  %v11607_v19 = vcombine.low %v839_v8, %v843_v9  ;;  %v11614_v20 = vcombine.high %v846_v14, %v850_v15  ;;  %v11616_v21 = vcombine.high %v847_v16, %v851_v17  ;;  %v902_v8 = vld [vmem:[%s13937_s20 + $0xcd0] sm:$0xff] }
 0x391   : > { %v906_v9 = vld [vmem:[%s13937_s20 + $0xcf0] sm:$0xff] }
 0x393   : > { %7975 = vmatpush1.bf16.msra.mxu0 %v11549_v25  ;;  %8362 = vmatpush1.bf16.msra.mxu1 %v11551_v26  ;;  %v859_v25 = vld [vmem:[%s13937_s20 + $0xb78] sm:$0xff]  ;;  %v11613_v26 = vcombine.low %v846_v14, %v850_v15  ;;  %v11670_v15 = vcombine.high %v902_v8, %v906_v9 }
 0x394   : > { %7976 = vmatprep.subr.bf16.mxu0 %v11558_v27  ;;  %8363 = vmatprep.subr.bf16.mxu1 %v11560_v28  ;;  %v11615_v27 = vcombine.low %v847_v16, %v851_v17  ;;  %v11622_v28 = vcombine.high %v854_v22, %v858_v23  ;;  %v11624_v29 = vcombine.high %v855_v24, %v859_v25  ;;  %v910_v17 = vld [vmem:[%s13937_s20 + $0xd10] sm:$0xff] }
 0x397   : > { %7977 = vmatpush1.bf16.msra.mxu0 %v11557_v33  ;;  %8364 = vmatpush1.bf16.msra.mxu1 %v11559_v34  ;;  %v867_v33 = vld [vmem:[%s13937_s20 + $0xbb8] sm:$0xff]  ;;  %v11621_v34 = vcombine.low %v854_v22, %v858_v23 }
 0x398   : > { %7978 = vmatprep.subr.bf16.mxu0 %v11566_v35  ;;  %8365 = vmatprep.subr.bf16.mxu1 %v11568_v36  ;;  %v11623_v35 = vcombine.low %v855_v24, %v859_v25  ;;  %v11630_v36 = vcombine.high %v862_v30, %v866_v31  ;;  %v11632_v37 = vcombine.high %v863_v32, %v867_v33  ;;  %v918_v25 = vld [vmem:[%s13937_s20 + $0xd50] sm:$0xff] }
 0x39b   : > { %7979 = vmatpush1.bf16.msra.mxu0 %v11565_v41  ;;  %8366 = vmatpush1.bf16.msra.mxu1 %v11567_v42  ;;  %v875_v41 = vld [vmem:[%s13937_s20 + $0xbf8] sm:$0xff]  ;;  %v11629_v42 = vcombine.low %v862_v30, %v866_v31 }
 0x39c   : > { %7980 = vmatprep.subr.bf16.mxu0 %v11574_v43  ;;  %8367 = vmatprep.subr.bf16.mxu1 %v11576_v44  ;;  %v11631_v43 = vcombine.low %v863_v32, %v867_v33  ;;  %v11638_v44 = vcombine.high %v870_v38, %v874_v39  ;;  %v11640_v45 = vcombine.high %v871_v40, %v875_v41  ;;  %v926_v33 = vld [vmem:[%s13937_s20 + $0xd90] sm:$0xff] }
 0x39f   : > { %7981 = vmatpush1.bf16.msra.mxu0 %v11573_v49  ;;  %8368 = vmatpush1.bf16.msra.mxu1 %v11575_v50  ;;  %v883_v49 = vld [vmem:[%s13937_s20 + $0xc38] sm:$0xff]  ;;  %v11637_v50 = vcombine.low %v870_v38, %v874_v39  ;;  %v460_v38 = vld [vmem:[#allocation2 + $0x10] sm:$0xff] }
 0x3a0   : > { %7982 = vmatprep.subr.bf16.mxu0 %v11582_v51  ;;  %8369 = vmatprep.subr.bf16.mxu1 %v11584_v52  ;;  %v11639_v51 = vcombine.low %v871_v40, %v875_v41  ;;  %v11646_v52 = vcombine.high %v878_v46, %v882_v47  ;;  %v11648_v53 = vcombine.high %v879_v48, %v883_v49  ;;  %v459_v40 = vld [vmem:[#allocation2 + $0x8] sm:$0xff]  ;;  %v461_v41 = vld [vmem:[#allocation2 + $0x18] sm:$0xff] }
 0x3a3   : > { %7983 = vmatpush1.bf16.msra.mxu0 %v11581_v57  ;;  %8370 = vmatpush1.bf16.msra.mxu1 %v11583_v58  ;;  %v891_v57 = vld [vmem:[%s13937_s20 + $0xc78] sm:$0xff]  ;;  %v11645_v58 = vcombine.low %v878_v46, %v882_v47  ;;  %v468_v46 = vld [vmem:[#allocation2 + $0x50] sm:$0xff] }
 0x3a4   : > { %7984 = vmatprep.subr.bf16.mxu0 %v11590_v60  ;;  %8371 = vmatprep.subr.bf16.mxu1 %v11592_v61  ;;  %v11647_v60 = vcombine.low %v879_v48, %v883_v49  ;;  %v11654_v61 = vcombine.high %v886_v54, %v890_v55  ;;  %v11656_v62 = vcombine.high %v887_v56, %v891_v57  ;;  %v934_v48 = vld [vmem:[%s13937_s20 + $0xdd0] sm:$0xff] }
 0x3a5   : > { %v938_v49 = vld [vmem:[%s13937_s20 + $0xdf0] sm:$0xff] }
 0x3a7   : > { %7985 = vmatpush1.bf16.msra.mxu0 %v11589_v2  ;;  %8372 = vmatpush1.bf16.msra.mxu1 %v11591_v3  ;;  %v895_v2 = vld [vmem:[%s13937_s20 + $0xc98] sm:$0xff] }
 0x3a8   : > { %7986 = vmatprep.subr.bf16.mxu0 %v11598_v4  ;;  %8373 = vmatprep.subr.bf16.mxu1 %v11600_v5  ;;  %v899_v3 = vld [vmem:[%s13937_s20 + $0xcb8] sm:$0xff]  ;;  %v11653_v4 = vcombine.low %v886_v54, %v890_v55  ;;  %v11655_v5 = vcombine.low %v887_v56, %v891_v57 }
 0x3a9   : > { %v11664_v7 = vcombine.high %v895_v2, %v899_v3  ;;  %v11663_v14 = vcombine.low %v895_v2, %v899_v3  ;;  %v935_v54 = vld [vmem:[%s13937_s20 + $0xdd8] sm:$0xff] }
 0x3aa   : > { %v939_v55 = vld [vmem:[%s13937_s20 + $0xdf8] sm:$0xff] }
 0x3ab   : > { %7987 = vmatpush1.bf16.msra.mxu0 %v11597_v10  ;;  %8374 = vmatpush1.bf16.msra.mxu1 %v11599_v11  ;;  %v12975_v10 = vld [vmem:[%s13935_s27 + $0x1c] ss:$68 sps:$4 sm:$0xff]  }
 0x3ac   : > { %7988 = vmatprep.subr.bf16.mxu0 %v11606_v12  ;;  %8375 = vmatprep.subr.bf16.mxu1 %v11608_v13  ;;  %v903_v11 = vld [vmem:[%s13937_s20 + $0xcd8] sm:$0xff]  ;;  %v11661_v13 = vcombine.low %v894_v63, %v898_v0 }
 0x3ad   : > { %v907_v12 = vld [vmem:[%s13937_s20 + $0xcf8] sm:$0xff] }
 0x3ae   : > { %v11672_v16 = vcombine.high %v903_v11, %v907_v12  ;;  %v11671_v22 = vcombine.low %v903_v11, %v907_v12  ;;  %v943_v12 = vld [vmem:[%s13937_s20 + $0xe18] sm:$0xff] }
 0x3af   : > { %7989 = vmatpush1.bf16.msra.mxu0 %v11605_v18  ;;  %8376 = vmatpush1.bf16.msra.mxu1 %v11607_v19  ;;  %v914_v18 = vld [vmem:[%s13937_s20 + $0xd30] sm:$0xff]  ;;  %v911_v19 = vld [vmem:[%s13937_s20 + $0xd18] sm:$0xff] }
 0x3b0   : > { %7990 = vmatprep.subr.bf16.mxu0 %v11614_v20  ;;  %8377 = vmatprep.subr.bf16.mxu1 %v11616_v21  ;;  %v915_v20 = vld [vmem:[%s13937_s20 + $0xd38] sm:$0xff]  ;;  %v11669_v21 = vcombine.low %v902_v8, %v906_v9  ;;  %v11678_v23 = vcombine.high %v910_v17, %v914_v18  ;;  %v11704_v8 = vcombine.high %v935_v54, %v939_v55  ;;  %v942_v9 = vld [vmem:[%s13937_s20 + $0xe10] sm:$0xff] }
 0x3b1   : > { %v11680_v24 = vcombine.high %v911_v19, %v915_v20  ;;  %v11679_v30 = vcombine.low %v911_v19, %v915_v20  ;;  %v954_v19 = vld [vmem:[%s13937_s20 + $0xe70] sm:$0xff]  ;;  %v951_v20 = vld [vmem:[%s13937_s20 + $0xe58] sm:$0xff] }
 0x3b3   : > { %7991 = vmatpush1.bf16.msra.mxu0 %v11613_v26  ;;  %8378 = vmatpush1.bf16.msra.mxu1 %v11615_v27  ;;  %v922_v26 = vld [vmem:[%s13937_s20 + $0xd70] sm:$0xff]  ;;  %v919_v27 = vld [vmem:[%s13937_s20 + $0xd58] sm:$0xff] }
 0x3b4   : > { %7992 = vmatprep.subr.bf16.mxu0 %v11622_v28  ;;  %8379 = vmatprep.subr.bf16.mxu1 %v11624_v29  ;;  %v923_v28 = vld [vmem:[%s13937_s20 + $0xd78] sm:$0xff]  ;;  %v11677_v29 = vcombine.low %v910_v17, %v914_v18  ;;  %v11686_v31 = vcombine.high %v918_v25, %v922_v26  ;;  %v11685_v39 = vcombine.low %v918_v25, %v922_v26  ;;  %v950_v18 = vld [vmem:[%s13937_s20 + $0xe50] sm:$0xff] }
 0x3b5   : > { %v11688_v32 = vcombine.high %v919_v27, %v923_v28  ;;  %v958_v26 = vld [vmem:[%s13937_s20 + $0xe90] sm:$0xff] }
 0x3b7   : > { %7993 = vmatpush1.bf16.msra.mxu0 %v11621_v34  ;;  %8380 = vmatpush1.bf16.msra.mxu1 %v11623_v35  ;;  %v930_v34 = vld [vmem:[%s13937_s20 + $0xdb0] sm:$0xff]  ;;  %v927_v35 = vld [vmem:[%s13937_s20 + $0xd98] sm:$0xff] }
 0x3b8   : > { %7994 = vmatprep.subr.bf16.mxu0 %v11630_v36  ;;  %8381 = vmatprep.subr.bf16.mxu1 %v11632_v37  ;;  %v931_v36 = vld [vmem:[%s13937_s20 + $0xdb8] sm:$0xff]  ;;  %v458_v37 = vld [vmem:[#allocation2] sm:$0xff] }
 0x3b9   : > { %v11696_v47 = vcombine.high %v927_v35, %v931_v36  ;;  %v11695_v63 = vcombine.low %v927_v35, %v931_v36  ;;  %v970_v35 = vld [vmem:[%s13937_s20 + $0xef0] sm:$0xff]  ;;  %v967_v36 = vld [vmem:[%s13937_s20 + $0xed8] sm:$0xff] }
 0x3bb   : > { %7995 = vmatpush1.bf16.msra.mxu0 %v11629_v42  ;;  %8382 = vmatpush1.bf16.msra.mxu1 %v11631_v43  ;;  %v11687_v42 = vcombine.low %v919_v27, %v923_v28  ;;  %v466_v43 = vld [vmem:[#allocation2 + $0x40] sm:$0xff]  ;;  %v959_v28 = vld [vmem:[%s13937_s20 + $0xe98] sm:$0xff] }
 0x3bc   : > { %7996 = vmatprep.subr.bf16.mxu0 %v11638_v44  ;;  %8383 = vmatprep.subr.bf16.mxu1 %v11640_v45  ;;  %v11694_v44 = vcombine.high %v926_v33, %v930_v34  ;;  %v962_v27 = vld [vmem:[%s13937_s20 + $0xeb0] sm:$0xff] }
 0x3bf   : > { %7997 = vmatpush1.bf16.msra.mxu0 %v11637_v50  ;;  %8384 = vmatpush1.bf16.msra.mxu1 %v11639_v51 }
 0x3c0   : > { %8009 = vmatprep.subr.bf16.mxu0 %v11646_v52  ;;  %8396 = vmatprep.subr.bf16.mxu1 %v11648_v53  ;;  %v467_v53 = vld [vmem:[#allocation2 + $0x48] sm:$0xff] }
 0x3c2   : > { %7999 = vmatmul.mubr.bf16.vlgmr.msra.gmra.mrb[4].mxu0 %v12974_v1  ;;  %8386 = vmatmul.mubr.bf16.vlgmr.msra.gmra.mrb[4].mxu1 %v12974_v1 }
 0x3c3   : > { %8010 = vmatpush1.bf16.msra.mxu0 %v11645_v58  ;;  %8397 = vmatpush1.bf16.msra.mxu1 %v11647_v60 }
 0x3c4   : > { %8011 = vmatprep.subr.bf16.mxu0 %v11654_v61  ;;  %8398 = vmatprep.subr.bf16.mxu1 %v11656_v62  ;;  %v469_v61 = vld [vmem:[#allocation2 + $0x58] sm:$0xff]  ;;  %v11693_v62 = vcombine.low %v926_v33, %v930_v34  ;;  %v966_v34 = vld [vmem:[%s13937_s20 + $0xed0] sm:$0xff] }
 0x3c5   : > { %8041 = vmatprep.mubr.bf16.mxu0 %v12975_v10  ;;  %8428 = vmatprep.mubr.bf16.mxu1 %v12975_v10  ;;  %v946_v10 = vld [vmem:[%s13937_s20 + $0xe30] sm:$0xff] }
 0x3c7   : > { %8012 = vmatpush1.bf16.msra.mxu0 %v11653_v4  ;;  %8399 = vmatpush1.bf16.msra.mxu1 %v11655_v5  ;;  %v11702_v4 = vcombine.high %v934_v48, %v938_v49 }
 0x3c8   : > { %8013 = vmatprep.subr.bf16.mxu0 %v11662_v6  ;;  %8400 = vmatprep.subr.bf16.mxu1 %v11664_v7 }
 0x3cb   : > { %8014 = vmatpush1.bf16.msra.mxu0 %v11661_v13  ;;  %8401 = vmatpush1.bf16.msra.mxu1 %v11663_v14  ;;  %v947_v13 = vld [vmem:[%s13937_s20 + $0xe38] sm:$0xff]  ;;  %v11701_v14 = vcombine.low %v934_v48, %v938_v49 }
 0x3cc   : > { %8015 = vmatprep.subr.bf16.mxu0 %v11670_v15  ;;  %8402 = vmatprep.subr.bf16.mxu1 %v11672_v16  ;;  %v11703_v15 = vcombine.low %v935_v54, %v939_v55  ;;  %v11710_v16 = vcombine.high %v942_v9, %v946_v10  ;;  %v11712_v17 = vcombine.high %v943_v12, %v947_v13 }
 0x3cf   : > { %8016 = vmatpush1.bf16.msra.mxu0 %v11669_v21  ;;  %8403 = vmatpush1.bf16.msra.mxu1 %v11671_v22  ;;  %v955_v21 = vld [vmem:[%s13937_s20 + $0xe78] sm:$0xff]  ;;  %v11709_v22 = vcombine.low %v942_v9, %v946_v10 }
 0x3d0   : > { %8017 = vmatprep.subr.bf16.mxu0 %v11678_v23  ;;  %8404 = vmatprep.subr.bf16.mxu1 %v11680_v24  ;;  %v11711_v23 = vcombine.low %v943_v12, %v947_v13  ;;  %v11718_v24 = vcombine.high %v950_v18, %v954_v19  ;;  %v11720_v25 = vcombine.high %v951_v20, %v955_v21  ;;  %v1010_v12 = vld [vmem:[%s13937_s20 + $0x1030] sm:$0xff]  ;;  %v1007_v13 = vld [vmem:[%s13937_s20 + $0x1018] sm:$0xff] }
 0x3d3   : > { %8018 = vmatpush1.bf16.msra.mxu0 %v11677_v29  ;;  %8405 = vmatpush1.bf16.msra.mxu1 %v11679_v30  ;;  %v963_v29 = vld [vmem:[%s13937_s20 + $0xeb8] sm:$0xff]  ;;  %v11717_v30 = vcombine.low %v950_v18, %v954_v19  ;;  %v1014_v19 = vld [vmem:[%s13937_s20 + $0x1050] sm:$0xff] }
 0x3d4   : > { %8019 = vmatprep.subr.bf16.mxu0 %v11686_v31  ;;  %8406 = vmatprep.subr.bf16.mxu1 %v11688_v32  ;;  %v11719_v31 = vcombine.low %v951_v20, %v955_v21  ;;  %v11726_v32 = vcombine.high %v958_v26, %v962_v27  ;;  %v11728_v33 = vcombine.high %v959_v28, %v963_v29  ;;  %v1018_v20 = vld [vmem:[%s13937_s20 + $0x1070] sm:$0xff]  ;;  %v1015_v21 = vld [vmem:[%s13937_s20 + $0x1058] sm:$0xff] }
 0x3d5   : > { %v7484_v45 = vpop.f32.mrb[0].mxu0  ;;  %v7871_v51 = vpop.f32.mrb[0].mxu1 }
 0x3d6   : > { %v8654_v50 = vadd.f32 %v7484_v45, %v458_v37  ;;  %v7486_v52 = vpop.f32.mrb[1].mxu0  ;;  %v8656_v56 = vadd.f32 %v7871_v51, %v460_v38  ;;  %v7873_v58 = vpop.f32.mrb[1].mxu1  ;;  %v971_v37 = vld [vmem:[%s13937_s20 + $0xef8] sm:$0xff]  ;;  %v11725_v38 = vcombine.low %v958_v26, %v962_v27  ;;  %v986_v51 = vld [vmem:[%s13937_s20 + $0xf70] sm:$0xff] }
 0x3d7   : > { %v8655_v57 = vadd.f32 %v7486_v52, %v459_v40  ;;  %v7488_v60 = vpop.f32.mrb[2].mxu0  ;;  %8020 = vmatpush1.bf16.msra.mxu0 %v11685_v39  ;;  %v8657_v0 = vadd.f32 %v7873_v58, %v461_v41  ;;  %v7875_v2 = vpop.f32.mrb[2].mxu1  ;;  %8407 = vmatpush1.bf16.msra.mxu1 %v11687_v42  ;;  %v11727_v39 = vcombine.low %v959_v28, %v963_v29  ;;  %v974_v42 = vld [vmem:[%s13937_s20 + $0xf10] sm:$0xff]  ;;  %v979_v45 = vld [vmem:[%s13937_s20 + $0xf38] sm:$0xff] }
 0x3d8   : > { %8670 = vst [vmem:[#allocation2] sm:$0xff] %v8654_v50  ;;  %v8662_v1 = vadd.f32 %v7488_v60, %v466_v43  ;;  %v7490_v3 = vpop.f32.mrb[3].mxu0  ;;  %8021 = vmatprep.subr.bf16.mxu0 %v11694_v44  ;;  %8672 = vst [vmem:[#allocation2 + $0x10] sm:$0xff] %v8656_v56  ;;  %v8664_v5 = vadd.f32 %v7875_v2, %v468_v46  ;;  %v7877_v7 = vpop.f32.mrb[3].mxu1  ;;  %8408 = vmatprep.subr.bf16.mxu1 %v11696_v47  ;;  %v978_v43 = vld [vmem:[%s13937_s20 + $0xf30] sm:$0xff]  ;;  %v975_v44 = vld [vmem:[%s13937_s20 + $0xf18] sm:$0xff] }
 0x3d9   : > { %8671 = vst [vmem:[#allocation2 + $0x8] sm:$0xff] %v8655_v57  ;;  %v8663_v6 = vadd.f32 %v7490_v3, %v467_v53  ;;  %8673 = vst [vmem:[#allocation2 + $0x18] sm:$0xff] %v8657_v0  ;;  %v8665_v11 = vadd.f32 %v7877_v7, %v469_v61  ;;  %v11734_v40 = vcombine.high %v966_v34, %v970_v35  ;;  %v982_v50 = vld [vmem:[%s13937_s20 + $0xf50] sm:$0xff]  ;;  %v983_v52 = vld [vmem:[%s13937_s20 + $0xf58] sm:$0xff] }
 0x3da   : > { %8678 = vst [vmem:[#allocation2 + $0x40] sm:$0xff] %v8662_v1  ;;  %8680 = vst [vmem:[#allocation2 + $0x50] sm:$0xff] %v8664_v5  ;;  %v11736_v41 = vcombine.high %v967_v36, %v971_v37  ;;  %v11733_v46 = vcombine.low %v966_v34, %v970_v35  ;;  %v11735_v47 = vcombine.low %v967_v36, %v971_v37  ;;  %v987_v53 = vld [vmem:[%s13937_s20 + $0xf78] sm:$0xff]  ;;  %v990_v58 = vld [vmem:[%s13937_s20 + $0xf90] sm:$0xff] }
 0x3db   : > { %8679 = vst [vmem:[#allocation2 + $0x48] sm:$0xff] %v8663_v6  ;;  %8022 = vmatpush1.bf16.msra.mxu0 %v11693_v62  ;;  %8681 = vst [vmem:[#allocation2 + $0x58] sm:$0xff] %v8665_v11  ;;  %8409 = vmatpush1.bf16.msra.mxu1 %v11695_v63  ;;  %v11742_v48 = vcombine.high %v974_v42, %v978_v43  ;;  %v11744_v49 = vcombine.high %v975_v44, %v979_v45  ;;  %v994_v60 = vld [vmem:[%s13937_s20 + $0xfb0] sm:$0xff]  ;;  %v991_v61 = vld [vmem:[%s13937_s20 + $0xf98] sm:$0xff] }
 0x3dc   : > { %8023 = vmatprep.subr.bf16.mxu0 %v11702_v4  ;;  %8410 = vmatprep.subr.bf16.mxu1 %v11704_v8  ;;  %v11741_v54 = vcombine.low %v974_v42, %v978_v43  ;;  %v11743_v55 = vcombine.low %v975_v44, %v979_v45  ;;  %v11750_v56 = vcombine.high %v982_v50, %v986_v51  ;;  %v995_v62 = vld [vmem:[%s13937_s20 + $0xfb8] sm:$0xff]  ;;  %v998_v3 = vld [vmem:[%s13937_s20 + $0xfd0] sm:$0xff] }
 0x3dd   : > { %v11752_v57 = vcombine.high %v983_v52, %v987_v53  ;;  %v11749_v63 = vcombine.low %v982_v50, %v986_v51  ;;  %v11751_v0 = vcombine.low %v983_v52, %v987_v53  ;;  %v11758_v1 = vcombine.high %v990_v58, %v994_v60  ;;  %v1002_v4 = vld [vmem:[%s13937_s20 + $0xff0] sm:$0xff]  ;;  %v999_v5 = vld [vmem:[%s13937_s20 + $0xfd8] sm:$0xff] }
 0x3de   : > { %v11760_v2 = vcombine.high %v991_v61, %v995_v62  ;;  %v1003_v6 = vld [vmem:[%s13937_s20 + $0xff8] sm:$0xff]  ;;  %v11757_v7 = vcombine.low %v990_v58, %v994_v60  ;;  %v11759_v8 = vcombine.low %v991_v61, %v995_v62  ;;  %v11766_v9 = vcombine.high %v998_v3, %v1002_v4  ;;  %v1006_v11 = vld [vmem:[%s13937_s20 + $0x1010] sm:$0xff] }
 0x3df   : > { %8024 = vmatpush1.bf16.msra.mxu0 %v11701_v14  ;;  %8411 = vmatpush1.bf16.msra.mxu1 %v11703_v15  ;;  %v11768_v10 = vcombine.high %v999_v5, %v1003_v6  ;;  %v1011_v14 = vld [vmem:[%s13937_s20 + $0x1038] sm:$0xff]  ;;  %v11765_v15 = vcombine.low %v998_v3, %v1002_v4  ;;  %v1022_v27 = vld [vmem:[%s13937_s20 + $0x1090] sm:$0xff] }
 0x3e0   : > { %8025 = vmatprep.subr.bf16.mxu0 %v11710_v16  ;;  %8412 = vmatprep.subr.bf16.mxu1 %v11712_v17  ;;  %v11767_v16 = vcombine.low %v999_v5, %v1003_v6  ;;  %v11774_v17 = vcombine.high %v1006_v11, %v1010_v12  ;;  %v11776_v18 = vcombine.high %v1007_v13, %v1011_v14  ;;  %v1026_v28 = vld [vmem:[%s13937_s20 + $0x10b0] sm:$0xff] }
 0x3e1   : > { %v12976_v29 = vld [vmem:[%s13935_s27 + $0x18] ss:$68 sps:$4 sm:$0xff]   ;;  %v11790_v34 = vcombine.high %v1022_v27, %v1026_v28 }
 0x3e2   : > { %v1030_v36 = vld [vmem:[%s13937_s20 + $0x10d0] sm:$0xff] }
 0x3e3   : > { %8026 = vmatpush1.bf16.msra.mxu0 %v11709_v22  ;;  %8413 = vmatpush1.bf16.msra.mxu1 %v11711_v23  ;;  %v1019_v22 = vld [vmem:[%s13937_s20 + $0x1078] sm:$0xff]  ;;  %v11773_v23 = vcombine.low %v1006_v11, %v1010_v12  ;;  %v1034_v37 = vld [vmem:[%s13937_s20 + $0x10f0] sm:$0xff] }
 0x3e4   : > { %8027 = vmatprep.subr.bf16.mxu0 %v11718_v24  ;;  %8414 = vmatprep.subr.bf16.mxu1 %v11720_v25  ;;  %v11775_v24 = vcombine.low %v1007_v13, %v1011_v14  ;;  %v11782_v25 = vcombine.high %v1014_v19, %v1018_v20  ;;  %v11784_v26 = vcombine.high %v1015_v21, %v1019_v22  ;;  %v1038_v45 = vld [vmem:[%s13937_s20 + $0x1110] sm:$0xff] }
 0x3e5   : > { %v11798_v43 = vcombine.high %v1030_v36, %v1034_v37  ;;  %v1046_v53 = vld [vmem:[%s13937_s20 + $0x1150] sm:$0xff] }
 0x3e6   : > { %v1054_v62 = vld [vmem:[%s13937_s20 + $0x1190] sm:$0xff] }
 0x3e7   : > { %8028 = vmatpush1.bf16.msra.mxu0 %v11717_v30  ;;  %8415 = vmatpush1.bf16.msra.mxu1 %v11719_v31  ;;  %v1023_v30 = vld [vmem:[%s13937_s20 + $0x1098] sm:$0xff]  ;;  %v1062_v6 = vld [vmem:[%s13937_s20 + $0x11d0] sm:$0xff] }
 0x3e8   : > { %8029 = vmatprep.subr.bf16.mxu0 %v11726_v32  ;;  %8416 = vmatprep.subr.bf16.mxu1 %v11728_v33  ;;  %v1027_v31 = vld [vmem:[%s13937_s20 + $0x10b8] sm:$0xff]  ;;  %v11781_v32 = vcombine.low %v1014_v19, %v1018_v20  ;;  %v11783_v33 = vcombine.low %v1015_v21, %v1019_v22  ;;  %v1070_v14 = vld [vmem:[%s13937_s20 + $0x1210] sm:$0xff] }
 0x3e9   : > { %v11792_v35 = vcombine.high %v1023_v30, %v1027_v31  ;;  %v11791_v42 = vcombine.low %v1023_v30, %v1027_v31  ;;  %v1078_v22 = vld [vmem:[%s13937_s20 + $0x1250] sm:$0xff] }
 0x3ea   : > { %v1086_v30 = vld [vmem:[%s13937_s20 + $0x1290] sm:$0xff] }
 0x3eb   : > { %8030 = vmatpush1.bf16.msra.mxu0 %v11725_v38  ;;  %8417 = vmatpush1.bf16.msra.mxu1 %v11727_v39  ;;  %v12977_v38 = vld [vmem:[%s13935_s27 + $0x24] ss:$68 sps:$4 sm:$0xff]  }
 0x3ec   : > { %8031 = vmatprep.subr.bf16.mxu0 %v11734_v40  ;;  %8418 = vmatprep.subr.bf16.mxu1 %v11736_v41  ;;  %v1031_v39 = vld [vmem:[%s13937_s20 + $0x10d8] sm:$0xff]  ;;  %v11789_v41 = vcombine.low %v1022_v27, %v1026_v28  ;;  %v1090_v31 = vld [vmem:[%s13937_s20 + $0x12b0] sm:$0xff] }
 0x3ed   : > { %v1035_v40 = vld [vmem:[%s13937_s20 + $0x10f8] sm:$0xff] }
 0x3ee   : > { %v11800_v44 = vcombine.high %v1031_v39, %v1035_v40  ;;  %v11799_v50 = vcombine.low %v1031_v39, %v1035_v40  ;;  %v1098_v39 = vld [vmem:[%s13937_s20 + $0x12f0] sm:$0xff]  ;;  %v1095_v40 = vld [vmem:[%s13937_s20 + $0x12d8] sm:$0xff] }
 0x3ef   : > { %8032 = vmatpush1.bf16.msra.mxu0 %v11733_v46  ;;  %8419 = vmatpush1.bf16.msra.mxu1 %v11735_v47  ;;  %v1042_v46 = vld [vmem:[%s13937_s20 + $0x1130] sm:$0xff]  ;;  %v1039_v47 = vld [vmem:[%s13937_s20 + $0x1118] sm:$0xff] }
 0x3f0   : > { %8033 = vmatprep.subr.bf16.mxu0 %v11742_v48  ;;  %8420 = vmatprep.subr.bf16.mxu1 %v11744_v49  ;;  %v1043_v48 = vld [vmem:[%s13937_s20 + $0x1138] sm:$0xff]  ;;  %v11797_v49 = vcombine.low %v1030_v36, %v1034_v37  ;;  %v11806_v51 = vcombine.high %v1038_v45, %v1042_v46  ;;  %v11854_v36 = vcombine.high %v1086_v30, %v1090_v31 }
 0x3f1   : > { %v11808_v52 = vcombine.high %v1039_v47, %v1043_v48  ;;  %v11807_v58 = vcombine.low %v1039_v47, %v1043_v48  ;;  %v1106_v47 = vld [vmem:[%s13937_s20 + $0x1330] sm:$0xff]  ;;  %v1103_v48 = vld [vmem:[%s13937_s20 + $0x1318] sm:$0xff] }
 0x3f3   : > { %8034 = vmatpush1.bf16.msra.mxu0 %v11741_v54  ;;  %8421 = vmatpush1.bf16.msra.mxu1 %v11743_v55  ;;  %v1050_v54 = vld [vmem:[%s13937_s20 + $0x1170] sm:$0xff]  ;;  %v1047_v55 = vld [vmem:[%s13937_s20 + $0x1158] sm:$0xff] }
 0x3f4   : > { %8035 = vmatprep.subr.bf16.mxu0 %v11750_v56  ;;  %8422 = vmatprep.subr.bf16.mxu1 %v11752_v57  ;;  %v1051_v56 = vld [vmem:[%s13937_s20 + $0x1178] sm:$0xff]  ;;  %v11805_v57 = vcombine.low %v1038_v45, %v1042_v46  ;;  %v11814_v60 = vcombine.high %v1046_v53, %v1050_v54  ;;  %v1102_v46 = vld [vmem:[%s13937_s20 + $0x1310] sm:$0xff] }
 0x3f5   : > { %v11816_v61 = vcombine.high %v1047_v55, %v1051_v56  ;;  %v11815_v3 = vcombine.low %v1047_v55, %v1051_v56  ;;  %v1114_v55 = vld [vmem:[%s13937_s20 + $0x1370] sm:$0xff]  ;;  %v1111_v56 = vld [vmem:[%s13937_s20 + $0x1358] sm:$0xff] }
 0x3f7   : > { %8036 = vmatpush1.bf16.msra.mxu0 %v11749_v63  ;;  %8423 = vmatpush1.bf16.msra.mxu1 %v11751_v0  ;;  %v1058_v63 = vld [vmem:[%s13937_s20 + $0x11b0] sm:$0xff]  ;;  %v1055_v0 = vld [vmem:[%s13937_s20 + $0x1198] sm:$0xff] }
 0x3f8   : > { %8037 = vmatprep.subr.bf16.mxu0 %v11758_v1  ;;  %8424 = vmatprep.subr.bf16.mxu1 %v11760_v2  ;;  %v1059_v1 = vld [vmem:[%s13937_s20 + $0x11b8] sm:$0xff]  ;;  %v11813_v2 = vcombine.low %v1046_v53, %v1050_v54  ;;  %v11822_v4 = vcombine.high %v1054_v62, %v1058_v63  ;;  %v1110_v54 = vld [vmem:[%s13937_s20 + $0x1350] sm:$0xff] }
 0x3f9   : > { %v11824_v5 = vcombine.high %v1055_v0, %v1059_v1  ;;  %v11823_v11 = vcombine.low %v1055_v0, %v1059_v1  ;;  %v1122_v0 = vld [vmem:[%s13937_s20 + $0x13b0] sm:$0xff]  ;;  %v1119_v1 = vld [vmem:[%s13937_s20 + $0x1398] sm:$0xff] }
 0x3fb   : > { %8038 = vmatpush1.bf16.msra.mxu0 %v11757_v7  ;;  %8425 = vmatpush1.bf16.msra.mxu1 %v11759_v8  ;;  %v1066_v7 = vld [vmem:[%s13937_s20 + $0x11f0] sm:$0xff]  ;;  %v1063_v8 = vld [vmem:[%s13937_s20 + $0x11d8] sm:$0xff] }
 0x3fc   : > { %8039 = vmatprep.subr.bf16.mxu0 %v11766_v9  ;;  %8426 = vmatprep.subr.bf16.mxu1 %v11768_v10  ;;  %v1067_v9 = vld [vmem:[%s13937_s20 + $0x11f8] sm:$0xff]  ;;  %v11821_v10 = vcombine.low %v1054_v62, %v1058_v63  ;;  %v11830_v12 = vcombine.high %v1062_v6, %v1066_v7  ;;  %v1118_v63 = vld [vmem:[%s13937_s20 + $0x1390] sm:$0xff] }
 0x3fd   : > { %v11832_v13 = vcombine.high %v1063_v8, %v1067_v9  ;;  %v11831_v19 = vcombine.low %v1063_v8, %v1067_v9  ;;  %v1130_v8 = vld [vmem:[%s13937_s20 + $0x13f0] sm:$0xff]  ;;  %v1127_v9 = vld [vmem:[%s13937_s20 + $0x13d8] sm:$0xff] }
 0x3ff   : > { %8040 = vmatpush1.bf16.msra.mxu0 %v11765_v15  ;;  %8427 = vmatpush1.bf16.msra.mxu1 %v11767_v16  ;;  %v1074_v15 = vld [vmem:[%s13937_s20 + $0x1230] sm:$0xff]  ;;  %v1071_v16 = vld [vmem:[%s13937_s20 + $0x1218] sm:$0xff] }
 0x400   : > { %8052 = vmatprep.subr.bf16.mxu0 %v11774_v17  ;;  %8439 = vmatprep.subr.bf16.mxu1 %v11776_v18  ;;  %v1075_v17 = vld [vmem:[%s13937_s20 + $0x1238] sm:$0xff]  ;;  %v11829_v18 = vcombine.low %v1062_v6, %v1066_v7  ;;  %v11838_v20 = vcombine.high %v1070_v14, %v1074_v15  ;;  %v1126_v7 = vld [vmem:[%s13937_s20 + $0x13d0] sm:$0xff] }
 0x401   : > { %v11840_v21 = vcombine.high %v1071_v16, %v1075_v17  ;;  %v11839_v27 = vcombine.low %v1071_v16, %v1075_v17  ;;  %v1138_v16 = vld [vmem:[%s13937_s20 + $0x1430] sm:$0xff]  ;;  %v1135_v17 = vld [vmem:[%s13937_s20 + $0x1418] sm:$0xff] }
 0x402   : > { %8042 = vmatmul.mubr.bf16.vlgmr.msra.gmra.mrb[4].mxu0 %v12976_v29  ;;  %8429 = vmatmul.mubr.bf16.vlgmr.msra.gmra.mrb[4].mxu1 %v12976_v29 }
 0x403   : > { %8053 = vmatpush1.bf16.msra.mxu0 %v11773_v23  ;;  %8440 = vmatpush1.bf16.msra.mxu1 %v11775_v24  ;;  %v1082_v23 = vld [vmem:[%s13937_s20 + $0x1270] sm:$0xff]  ;;  %v1079_v24 = vld [vmem:[%s13937_s20 + $0x1258] sm:$0xff] }
 0x404   : > { %8054 = vmatprep.subr.bf16.mxu0 %v11782_v25  ;;  %8441 = vmatprep.subr.bf16.mxu1 %v11784_v26  ;;  %v1083_v25 = vld [vmem:[%s13937_s20 + $0x1278] sm:$0xff]  ;;  %v11837_v26 = vcombine.low %v1070_v14, %v1074_v15  ;;  %v11846_v28 = vcombine.high %v1078_v22, %v1082_v23  ;;  %v1134_v15 = vld [vmem:[%s13937_s20 + $0x1410] sm:$0xff] }
 0x405   : > { %8084 = vmatprep.mubr.bf16.mxu0 %v12977_v38  ;;  %8471 = vmatprep.mubr.bf16.mxu1 %v12977_v38  ;;  %v11848_v29 = vcombine.high %v1079_v24, %v1083_v25  ;;  %v1094_v38 = vld [vmem:[%s13937_s20 + $0x12d0] sm:$0xff] }
 0x407   : > { %8055 = vmatpush1.bf16.msra.mxu0 %v11781_v32  ;;  %8442 = vmatpush1.bf16.msra.mxu1 %v11783_v33  ;;  %v1087_v32 = vld [vmem:[%s13937_s20 + $0x1298] sm:$0xff] }
 0x408   : > { %8056 = vmatprep.subr.bf16.mxu0 %v11790_v34  ;;  %8443 = vmatprep.subr.bf16.mxu1 %v11792_v35  ;;  %v1091_v33 = vld [vmem:[%s13937_s20 + $0x12b8] sm:$0xff]  ;;  %v11845_v34 = vcombine.low %v1078_v22, %v1082_v23  ;;  %v11847_v35 = vcombine.low %v1079_v24, %v1083_v25  ;;  %v1142_v23 = vld [vmem:[%s13937_s20 + $0x1450] sm:$0xff] }
 0x409   : > { %v11856_v37 = vcombine.high %v1087_v32, %v1091_v33  ;;  %v1146_v24 = vld [vmem:[%s13937_s20 + $0x1470] sm:$0xff]  ;;  %v1143_v25 = vld [vmem:[%s13937_s20 + $0x1458] sm:$0xff] }
 0x40b   : > { %8057 = vmatpush1.bf16.msra.mxu0 %v11789_v41  ;;  %8444 = vmatpush1.bf16.msra.mxu1 %v11791_v42  ;;  %v1099_v41 = vld [vmem:[%s13937_s20 + $0x12f8] sm:$0xff]  ;;  %v11853_v42 = vcombine.low %v1086_v30, %v1090_v31  ;;  %v1150_v31 = vld [vmem:[%s13937_s20 + $0x1490] sm:$0xff] }
 0x40c   : > { %8058 = vmatprep.subr.bf16.mxu0 %v11798_v43  ;;  %8445 = vmatprep.subr.bf16.mxu1 %v11800_v44  ;;  %v11855_v43 = vcombine.low %v1087_v32, %v1091_v33  ;;  %v11862_v44 = vcombine.high %v1094_v38, %v1098_v39  ;;  %v11864_v45 = vcombine.high %v1095_v40, %v1099_v41  ;;  %v1154_v32 = vld [vmem:[%s13937_s20 + $0x14b0] sm:$0xff] }
 0x40d   : > { %v12978_v33 = vld [vmem:[%s13935_s27 + $0x20] ss:$68 sps:$4 sm:$0xff]  }
 0x40f   : > { %8059 = vmatpush1.bf16.msra.mxu0 %v11797_v49  ;;  %8446 = vmatpush1.bf16.msra.mxu1 %v11799_v50  ;;  %v1107_v49 = vld [vmem:[%s13937_s20 + $0x1338] sm:$0xff]  ;;  %v11861_v50 = vcombine.low %v1094_v38, %v1098_v39  ;;  %v11918_v38 = vcombine.high %v1150_v31, %v1154_v32 }
 0x410   : > { %8060 = vmatprep.subr.bf16.mxu0 %v11806_v51  ;;  %8447 = vmatprep.subr.bf16.mxu1 %v11808_v52  ;;  %v11863_v51 = vcombine.low %v1095_v40, %v1099_v41  ;;  %v11870_v52 = vcombine.high %v1102_v46, %v1106_v47  ;;  %v11872_v53 = vcombine.high %v1103_v48, %v1107_v49  ;;  %v1158_v40 = vld [vmem:[%s13937_s20 + $0x14d0] sm:$0xff] }
 0x411   : > { %v1162_v41 = vld [vmem:[%s13937_s20 + $0x14f0] sm:$0xff] }
 0x413   : > { %8061 = vmatpush1.bf16.msra.mxu0 %v11805_v57  ;;  %8448 = vmatpush1.bf16.msra.mxu1 %v11807_v58  ;;  %v1115_v57 = vld [vmem:[%s13937_s20 + $0x1378] sm:$0xff]  ;;  %v11869_v58 = vcombine.low %v1102_v46, %v1106_v47  ;;  %v11926_v47 = vcombine.high %v1158_v40, %v1162_v41 }
 0x414   : > { %8062 = vmatprep.subr.bf16.mxu0 %v11814_v60  ;;  %8449 = vmatprep.subr.bf16.mxu1 %v11816_v61  ;;  %v11871_v60 = vcombine.low %v1103_v48, %v1107_v49  ;;  %v11878_v61 = vcombine.high %v1110_v54, %v1114_v55  ;;  %v11880_v62 = vcombine.high %v1111_v56, %v1115_v57  ;;  %v1166_v49 = vld [vmem:[%s13937_s20 + $0x1510] sm:$0xff] }
 0x417   : > { %8063 = vmatpush1.bf16.msra.mxu0 %v11813_v2  ;;  %8450 = vmatpush1.bf16.msra.mxu1 %v11815_v3  ;;  %v1123_v2 = vld [vmem:[%s13937_s20 + $0x13b8] sm:$0xff]  ;;  %v11877_v3 = vcombine.low %v1110_v54, %v1114_v55 }
 0x418   : > { %8064 = vmatprep.subr.bf16.mxu0 %v11822_v4  ;;  %8451 = vmatprep.subr.bf16.mxu1 %v11824_v5  ;;  %v11879_v4 = vcombine.low %v1111_v56, %v1115_v57  ;;  %v11886_v5 = vcombine.high %v1118_v63, %v1122_v0  ;;  %v11888_v6 = vcombine.high %v1119_v1, %v1123_v2  ;;  %v1174_v57 = vld [vmem:[%s13937_s20 + $0x1550] sm:$0xff] }
 0x41b   : > { %8065 = vmatpush1.bf16.msra.mxu0 %v11821_v10  ;;  %8452 = vmatpush1.bf16.msra.mxu1 %v11823_v11  ;;  %v1131_v10 = vld [vmem:[%s13937_s20 + $0x13f8] sm:$0xff]  ;;  %v11885_v11 = vcombine.low %v1118_v63, %v1122_v0 }
 0x41c   : > { %8066 = vmatprep.subr.bf16.mxu0 %v11830_v12  ;;  %8453 = vmatprep.subr.bf16.mxu1 %v11832_v13  ;;  %v11887_v12 = vcombine.low %v1119_v1, %v1123_v2  ;;  %v11894_v13 = vcombine.high %v1126_v7, %v1130_v8  ;;  %v11896_v14 = vcombine.high %v1127_v9, %v1131_v10  ;;  %v1182_v2 = vld [vmem:[%s13937_s20 + $0x1590] sm:$0xff] }
 0x41f   : > { %8067 = vmatpush1.bf16.msra.mxu0 %v11829_v18  ;;  %8454 = vmatpush1.bf16.msra.mxu1 %v11831_v19  ;;  %v1139_v18 = vld [vmem:[%s13937_s20 + $0x1438] sm:$0xff]  ;;  %v11893_v19 = vcombine.low %v1126_v7, %v1130_v8 }
 0x420   : > { %8068 = vmatprep.subr.bf16.mxu0 %v11838_v20  ;;  %8455 = vmatprep.subr.bf16.mxu1 %v11840_v21  ;;  %v11895_v20 = vcombine.low %v1127_v9, %v1131_v10  ;;  %v11902_v21 = vcombine.high %v1134_v15, %v1138_v16  ;;  %v11904_v22 = vcombine.high %v1135_v17, %v1139_v18  ;;  %v1190_v10 = vld [vmem:[%s13937_s20 + $0x15d0] sm:$0xff] }
 0x423   : > { %8069 = vmatpush1.bf16.msra.mxu0 %v11837_v26  ;;  %8456 = vmatpush1.bf16.msra.mxu1 %v11839_v27  ;;  %v1147_v26 = vld [vmem:[%s13937_s20 + $0x1478] sm:$0xff]  ;;  %v11901_v27 = vcombine.low %v1134_v15, %v1138_v16 }
 0x424   : > { %8070 = vmatprep.subr.bf16.mxu0 %v11846_v28  ;;  %8457 = vmatprep.subr.bf16.mxu1 %v11848_v29  ;;  %v11903_v28 = vcombine.low %v1135_v17, %v1139_v18  ;;  %v11910_v29 = vcombine.high %v1142_v23, %v1146_v24  ;;  %v11912_v30 = vcombine.high %v1143_v25, %v1147_v26  ;;  %v1198_v18 = vld [vmem:[%s13937_s20 + $0x1610] sm:$0xff] }
 0x427   : > { %8071 = vmatpush1.bf16.msra.mxu0 %v11845_v34  ;;  %8458 = vmatpush1.bf16.msra.mxu1 %v11847_v35  ;;  %v1151_v34 = vld [vmem:[%s13937_s20 + $0x1498] sm:$0xff] }
 0x428   : > { %8072 = vmatprep.subr.bf16.mxu0 %v11854_v36  ;;  %8459 = vmatprep.subr.bf16.mxu1 %v11856_v37  ;;  %v1155_v35 = vld [vmem:[%s13937_s20 + $0x14b8] sm:$0xff]  ;;  %v11909_v36 = vcombine.low %v1142_v23, %v1146_v24  ;;  %v11911_v37 = vcombine.low %v1143_v25, %v1147_v26  ;;  %v1206_v26 = vld [vmem:[%s13937_s20 + $0x1650] sm:$0xff] }
 0x429   : > { %v11920_v39 = vcombine.high %v1151_v34, %v1155_v35  ;;  %v11919_v46 = vcombine.low %v1151_v34, %v1155_v35  ;;  %v1214_v34 = vld [vmem:[%s13937_s20 + $0x1690] sm:$0xff] }
 0x42a   : > { %v1218_v35 = vld [vmem:[%s13937_s20 + $0x16b0] sm:$0xff] }
 0x42b   : > { %8073 = vmatpush1.bf16.msra.mxu0 %v11853_v42  ;;  %8460 = vmatpush1.bf16.msra.mxu1 %v11855_v43  ;;  %v12979_v42 = vld [vmem:[%s13935_s27 + $0x2c] ss:$68 sps:$4 sm:$0xff]  }
 0x42c   : > { %8074 = vmatprep.subr.bf16.mxu0 %v11862_v44  ;;  %8461 = vmatprep.subr.bf16.mxu1 %v11864_v45  ;;  %v1159_v43 = vld [vmem:[%s13937_s20 + $0x14d8] sm:$0xff]  ;;  %v11917_v45 = vcombine.low %v1150_v31, %v1154_v32 }
 0x42d   : > { %v1163_v44 = vld [vmem:[%s13937_s20 + $0x14f8] sm:$0xff] }
 0x42e   : > { %v11928_v48 = vcombine.high %v1159_v43, %v1163_v44  ;;  %v11927_v54 = vcombine.low %v1159_v43, %v1163_v44  ;;  %v1226_v43 = vld [vmem:[%s13937_s20 + $0x16f0] sm:$0xff]  ;;  %v1223_v44 = vld [vmem:[%s13937_s20 + $0x16d8] sm:$0xff] }
 0x42f   : > { %8075 = vmatpush1.bf16.msra.mxu0 %v11861_v50  ;;  %8462 = vmatpush1.bf16.msra.mxu1 %v11863_v51  ;;  %v1170_v50 = vld [vmem:[%s13937_s20 + $0x1530] sm:$0xff]  ;;  %v1167_v51 = vld [vmem:[%s13937_s20 + $0x1518] sm:$0xff] }
 0x430   : > { %8076 = vmatprep.subr.bf16.mxu0 %v11870_v52  ;;  %8463 = vmatprep.subr.bf16.mxu1 %v11872_v53  ;;  %v1171_v52 = vld [vmem:[%s13937_s20 + $0x1538] sm:$0xff]  ;;  %v11925_v53 = vcombine.low %v1158_v40, %v1162_v41  ;;  %v11934_v55 = vcombine.high %v1166_v49, %v1170_v50  ;;  %v11982_v40 = vcombine.high %v1214_v34, %v1218_v35 }
 0x431   : > { %v11936_v56 = vcombine.high %v1167_v51, %v1171_v52  ;;  %v11935_v63 = vcombine.low %v1167_v51, %v1171_v52  ;;  %v1234_v51 = vld [vmem:[%s13937_s20 + $0x1730] sm:$0xff]  ;;  %v1231_v52 = vld [vmem:[%s13937_s20 + $0x1718] sm:$0xff] }
 0x433   : > { %8077 = vmatpush1.bf16.msra.mxu0 %v11869_v58  ;;  %8464 = vmatpush1.bf16.msra.mxu1 %v11871_v60  ;;  %v1178_v58 = vld [vmem:[%s13937_s20 + $0x1570] sm:$0xff]  ;;  %v1175_v60 = vld [vmem:[%s13937_s20 + $0x1558] sm:$0xff] }
 0x434   : > { %8078 = vmatprep.subr.bf16.mxu0 %v11878_v61  ;;  %8465 = vmatprep.subr.bf16.mxu1 %v11880_v62  ;;  %v1179_v61 = vld [vmem:[%s13937_s20 + $0x1578] sm:$0xff]  ;;  %v11933_v62 = vcombine.low %v1166_v49, %v1170_v50  ;;  %v11942_v0 = vcombine.high %v1174_v57, %v1178_v58  ;;  %v1230_v50 = vld [vmem:[%s13937_s20 + $0x1710] sm:$0xff] }
 0x435   : > { %v11944_v1 = vcombine.high %v1175_v60, %v1179_v61  ;;  %v11943_v7 = vcombine.low %v1175_v60, %v1179_v61  ;;  %v1242_v60 = vld [vmem:[%s13937_s20 + $0x1770] sm:$0xff]  ;;  %v1239_v61 = vld [vmem:[%s13937_s20 + $0x1758] sm:$0xff] }
 0x437   : > { %8079 = vmatpush1.bf16.msra.mxu0 %v11877_v3  ;;  %8466 = vmatpush1.bf16.msra.mxu1 %v11879_v4  ;;  %v1186_v3 = vld [vmem:[%s13937_s20 + $0x15b0] sm:$0xff]  ;;  %v1183_v4 = vld [vmem:[%s13937_s20 + $0x1598] sm:$0xff] }
 0x438   : > { %8080 = vmatprep.subr.bf16.mxu0 %v11886_v5  ;;  %8467 = vmatprep.subr.bf16.mxu1 %v11888_v6  ;;  %v1187_v5 = vld [vmem:[%s13937_s20 + $0x15b8] sm:$0xff]  ;;  %v11941_v6 = vcombine.low %v1174_v57, %v1178_v58  ;;  %v11950_v8 = vcombine.high %v1182_v2, %v1186_v3  ;;  %v1238_v58 = vld [vmem:[%s13937_s20 + $0x1750] sm:$0xff] }
 0x439   : > { %v11952_v9 = vcombine.high %v1183_v4, %v1187_v5  ;;  %v11951_v15 = vcombine.low %v1183_v4, %v1187_v5  ;;  %v1250_v4 = vld [vmem:[%s13937_s20 + $0x17b0] sm:$0xff]  ;;  %v1247_v5 = vld [vmem:[%s13937_s20 + $0x1798] sm:$0xff] }
 0x43b   : > { %8081 = vmatpush1.bf16.msra.mxu0 %v11885_v11  ;;  %8468 = vmatpush1.bf16.msra.mxu1 %v11887_v12  ;;  %v1194_v11 = vld [vmem:[%s13937_s20 + $0x15f0] sm:$0xff]  ;;  %v1191_v12 = vld [vmem:[%s13937_s20 + $0x15d8] sm:$0xff] }
 0x43c   : > { %8082 = vmatprep.subr.bf16.mxu0 %v11894_v13  ;;  %8469 = vmatprep.subr.bf16.mxu1 %v11896_v14  ;;  %v1195_v13 = vld [vmem:[%s13937_s20 + $0x15f8] sm:$0xff]  ;;  %v11949_v14 = vcombine.low %v1182_v2, %v1186_v3  ;;  %v11958_v16 = vcombine.high %v1190_v10, %v1194_v11  ;;  %v1246_v3 = vld [vmem:[%s13937_s20 + $0x1790] sm:$0xff] }
 0x43d   : > { %v11960_v17 = vcombine.high %v1191_v12, %v1195_v13  ;;  %v11959_v23 = vcombine.low %v1191_v12, %v1195_v13  ;;  %v1258_v12 = vld [vmem:[%s13937_s20 + $0x17f0] sm:$0xff]  ;;  %v1255_v13 = vld [vmem:[%s13937_s20 + $0x17d8] sm:$0xff] }
 0x43f   : > { %8083 = vmatpush1.bf16.msra.mxu0 %v11893_v19  ;;  %8470 = vmatpush1.bf16.msra.mxu1 %v11895_v20  ;;  %v1202_v19 = vld [vmem:[%s13937_s20 + $0x1630] sm:$0xff]  ;;  %v1199_v20 = vld [vmem:[%s13937_s20 + $0x1618] sm:$0xff] }
 0x440   : > { %8095 = vmatprep.subr.bf16.mxu0 %v11902_v21  ;;  %8482 = vmatprep.subr.bf16.mxu1 %v11904_v22  ;;  %v1203_v21 = vld [vmem:[%s13937_s20 + $0x1638] sm:$0xff]  ;;  %v11957_v22 = vcombine.low %v1190_v10, %v1194_v11  ;;  %v11966_v24 = vcombine.high %v1198_v18, %v1202_v19  ;;  %v1254_v11 = vld [vmem:[%s13937_s20 + $0x17d0] sm:$0xff] }
 0x441   : > { %v11968_v25 = vcombine.high %v1199_v20, %v1203_v21  ;;  %v11967_v31 = vcombine.low %v1199_v20, %v1203_v21  ;;  %v1266_v20 = vld [vmem:[%s13937_s20 + $0x1830] sm:$0xff]  ;;  %v1263_v21 = vld [vmem:[%s13937_s20 + $0x1818] sm:$0xff] }
 0x442   : > { %8085 = vmatmul.mubr.bf16.vlgmr.msra.gmra.mrb[4].mxu0 %v12978_v33  ;;  %8472 = vmatmul.mubr.bf16.vlgmr.msra.gmra.mrb[4].mxu1 %v12978_v33 }
 0x443   : > { %8096 = vmatpush1.bf16.msra.mxu0 %v11901_v27  ;;  %8483 = vmatpush1.bf16.msra.mxu1 %v11903_v28  ;;  %v1210_v27 = vld [vmem:[%s13937_s20 + $0x1670] sm:$0xff]  ;;  %v1207_v28 = vld [vmem:[%s13937_s20 + $0x1658] sm:$0xff] }
 0x444   : > { %8097 = vmatprep.subr.bf16.mxu0 %v11910_v29  ;;  %8484 = vmatprep.subr.bf16.mxu1 %v11912_v30  ;;  %v1211_v29 = vld [vmem:[%s13937_s20 + $0x1678] sm:$0xff]  ;;  %v11965_v30 = vcombine.low %v1198_v18, %v1202_v19  ;;  %v11974_v32 = vcombine.high %v1206_v26, %v1210_v27  ;;  %v1262_v19 = vld [vmem:[%s13937_s20 + $0x1810] sm:$0xff] }
 0x445   : > { %8127 = vmatprep.mubr.bf16.mxu0 %v12979_v42  ;;  %8514 = vmatprep.mubr.bf16.mxu1 %v12979_v42  ;;  %v11976_v33 = vcombine.high %v1207_v28, %v1211_v29  ;;  %v1222_v42 = vld [vmem:[%s13937_s20 + $0x16d0] sm:$0xff] }
 0x447   : > { %8098 = vmatpush1.bf16.msra.mxu0 %v11909_v36  ;;  %8485 = vmatpush1.bf16.msra.mxu1 %v11911_v37  ;;  %v1215_v36 = vld [vmem:[%s13937_s20 + $0x1698] sm:$0xff] }
 0x448   : > { %8099 = vmatprep.subr.bf16.mxu0 %v11918_v38  ;;  %8486 = vmatprep.subr.bf16.mxu1 %v11920_v39  ;;  %v1219_v37 = vld [vmem:[%s13937_s20 + $0x16b8] sm:$0xff]  ;;  %v11973_v38 = vcombine.low %v1206_v26, %v1210_v27  ;;  %v11975_v39 = vcombine.low %v1207_v28, %v1211_v29  ;;  %v1270_v27 = vld [vmem:[%s13937_s20 + $0x1850] sm:$0xff] }
 0x449   : > { %v11984_v41 = vcombine.high %v1215_v36, %v1219_v37  ;;  %v1274_v28 = vld [vmem:[%s13937_s20 + $0x1870] sm:$0xff]  ;;  %v1271_v29 = vld [vmem:[%s13937_s20 + $0x1858] sm:$0xff] }
 0x44b   : > { %8100 = vmatpush1.bf16.msra.mxu0 %v11917_v45  ;;  %8487 = vmatpush1.bf16.msra.mxu1 %v11919_v46  ;;  %v1227_v45 = vld [vmem:[%s13937_s20 + $0x16f8] sm:$0xff]  ;;  %v11981_v46 = vcombine.low %v1214_v34, %v1218_v35  ;;  %v1278_v35 = vld [vmem:[%s13937_s20 + $0x1890] sm:$0xff] }
 0x44c   : > { %8101 = vmatprep.subr.bf16.mxu0 %v11926_v47  ;;  %8488 = vmatprep.subr.bf16.mxu1 %v11928_v48  ;;  %v11983_v47 = vcombine.low %v1215_v36, %v1219_v37  ;;  %v11990_v48 = vcombine.high %v1222_v42, %v1226_v43  ;;  %v11992_v49 = vcombine.high %v1223_v44, %v1227_v45  ;;  %v1282_v36 = vld [vmem:[%s13937_s20 + $0x18b0] sm:$0xff]  ;;  %v12980_v37 = vld [vmem:[%s13935_s27 + $0x28] ss:$68 sps:$4 sm:$0xff]  }
 0x44f   : > { %8102 = vmatpush1.bf16.msra.mxu0 %v11925_v53  ;;  %8489 = vmatpush1.bf16.msra.mxu1 %v11927_v54  ;;  %v1235_v53 = vld [vmem:[%s13937_s20 + $0x1738] sm:$0xff]  ;;  %v11989_v54 = vcombine.low %v1222_v42, %v1226_v43  ;;  %v12046_v42 = vcombine.high %v1278_v35, %v1282_v36 }
 0x450   : > { %8103 = vmatprep.subr.bf16.mxu0 %v11934_v55  ;;  %8490 = vmatprep.subr.bf16.mxu1 %v11936_v56  ;;  %v11991_v55 = vcombine.low %v1223_v44, %v1227_v45  ;;  %v11998_v56 = vcombine.high %v1230_v50, %v1234_v51  ;;  %v12000_v57 = vcombine.high %v1231_v52, %v1235_v53  ;;  %v1286_v44 = vld [vmem:[%s13937_s20 + $0x18d0] sm:$0xff] }
 0x451   : > { %v1290_v45 = vld [vmem:[%s13937_s20 + $0x18f0] sm:$0xff] }
 0x453   : > { %8104 = vmatpush1.bf16.msra.mxu0 %v11933_v62  ;;  %8491 = vmatpush1.bf16.msra.mxu1 %v11935_v63  ;;  %v1243_v62 = vld [vmem:[%s13937_s20 + $0x1778] sm:$0xff]  ;;  %v11997_v63 = vcombine.low %v1230_v50, %v1234_v51  ;;  %v12054_v51 = vcombine.high %v1286_v44, %v1290_v45 }
 0x454   : > { %8105 = vmatprep.subr.bf16.mxu0 %v11942_v0  ;;  %8492 = vmatprep.subr.bf16.mxu1 %v11944_v1  ;;  %v11999_v0 = vcombine.low %v1231_v52, %v1235_v53  ;;  %v12006_v1 = vcombine.high %v1238_v58, %v1242_v60  ;;  %v12008_v2 = vcombine.high %v1239_v61, %v1243_v62  ;;  %v1294_v53 = vld [vmem:[%s13937_s20 + $0x1910] sm:$0xff] }
 0x457   : > { %8106 = vmatpush1.bf16.msra.mxu0 %v11941_v6  ;;  %8493 = vmatpush1.bf16.msra.mxu1 %v11943_v7  ;;  %v1251_v6 = vld [vmem:[%s13937_s20 + $0x17b8] sm:$0xff]  ;;  %v12005_v7 = vcombine.low %v1238_v58, %v1242_v60 }
 0x458   : > { %8107 = vmatprep.subr.bf16.mxu0 %v11950_v8  ;;  %8494 = vmatprep.subr.bf16.mxu1 %v11952_v9  ;;  %v12007_v8 = vcombine.low %v1239_v61, %v1243_v62  ;;  %v12014_v9 = vcombine.high %v1246_v3, %v1250_v4  ;;  %v12016_v10 = vcombine.high %v1247_v5, %v1251_v6  ;;  %v1302_v62 = vld [vmem:[%s13937_s20 + $0x1950] sm:$0xff] }
 0x45b   : > { %8108 = vmatpush1.bf16.msra.mxu0 %v11949_v14  ;;  %8495 = vmatpush1.bf16.msra.mxu1 %v11951_v15  ;;  %v1259_v14 = vld [vmem:[%s13937_s20 + $0x17f8] sm:$0xff]  ;;  %v12013_v15 = vcombine.low %v1246_v3, %v1250_v4 }
 0x45c   : > { %8109 = vmatprep.subr.bf16.mxu0 %v11958_v16  ;;  %8496 = vmatprep.subr.bf16.mxu1 %v11960_v17  ;;  %v12015_v16 = vcombine.low %v1247_v5, %v1251_v6  ;;  %v12022_v17 = vcombine.high %v1254_v11, %v1258_v12  ;;  %v12024_v18 = vcombine.high %v1255_v13, %v1259_v14  ;;  %v1310_v6 = vld [vmem:[%s13937_s20 + $0x1990] sm:$0xff] }
 0x45f   : > { %8110 = vmatpush1.bf16.msra.mxu0 %v11957_v22  ;;  %8497 = vmatpush1.bf16.msra.mxu1 %v11959_v23  ;;  %v1267_v22 = vld [vmem:[%s13937_s20 + $0x1838] sm:$0xff]  ;;  %v12021_v23 = vcombine.low %v1254_v11, %v1258_v12 }
 0x460   : > { %8111 = vmatprep.subr.bf16.mxu0 %v11966_v24  ;;  %8498 = vmatprep.subr.bf16.mxu1 %v11968_v25  ;;  %v12023_v24 = vcombine.low %v1255_v13, %v1259_v14  ;;  %v12030_v25 = vcombine.high %v1262_v19, %v1266_v20  ;;  %v12032_v26 = vcombine.high %v1263_v21, %v1267_v22  ;;  %v1318_v14 = vld [vmem:[%s13937_s20 + $0x19d0] sm:$0xff] }
 0x463   : > { %8112 = vmatpush1.bf16.msra.mxu0 %v11965_v30  ;;  %8499 = vmatpush1.bf16.msra.mxu1 %v11967_v31  ;;  %v1275_v30 = vld [vmem:[%s13937_s20 + $0x1878] sm:$0xff]  ;;  %v12029_v31 = vcombine.low %v1262_v19, %v1266_v20 }
 0x464   : > { %8113 = vmatprep.subr.bf16.mxu0 %v11974_v32  ;;  %8500 = vmatprep.subr.bf16.mxu1 %v11976_v33  ;;  %v12031_v32 = vcombine.low %v1263_v21, %v1267_v22  ;;  %v12038_v33 = vcombine.high %v1270_v27, %v1274_v28  ;;  %v12040_v34 = vcombine.high %v1271_v29, %v1275_v30  ;;  %v1326_v22 = vld [vmem:[%s13937_s20 + $0x1a10] sm:$0xff] }
 0x467   : > { %8114 = vmatpush1.bf16.msra.mxu0 %v11973_v38  ;;  %8501 = vmatpush1.bf16.msra.mxu1 %v11975_v39  ;;  %v1279_v38 = vld [vmem:[%s13937_s20 + $0x1898] sm:$0xff] }
 0x468   : > { %8115 = vmatprep.subr.bf16.mxu0 %v11982_v40  ;;  %8502 = vmatprep.subr.bf16.mxu1 %v11984_v41  ;;  %v1283_v39 = vld [vmem:[%s13937_s20 + $0x18b8] sm:$0xff]  ;;  %v12037_v40 = vcombine.low %v1270_v27, %v1274_v28  ;;  %v12039_v41 = vcombine.low %v1271_v29, %v1275_v30  ;;  %v1334_v30 = vld [vmem:[%s13937_s20 + $0x1a50] sm:$0xff] }
 0x469   : > { %v12048_v43 = vcombine.high %v1279_v38, %v1283_v39  ;;  %v12047_v50 = vcombine.low %v1279_v38, %v1283_v39  ;;  %v1342_v38 = vld [vmem:[%s13937_s20 + $0x1a90] sm:$0xff] }
 0x46a   : > { %v1346_v39 = vld [vmem:[%s13937_s20 + $0x1ab0] sm:$0xff] }
 0x46b   : > { %8116 = vmatpush1.bf16.msra.mxu0 %v11981_v46  ;;  %8503 = vmatpush1.bf16.msra.mxu1 %v11983_v47  ;;  %v12981_v46 = vld [vmem:[%s13935_s27 + $0x34] ss:$68 sps:$4 sm:$0xff]   ;;  %v1287_v47 = vld [vmem:[%s13937_s20 + $0x18d8] sm:$0xff] }
 0x46c   : > { %8117 = vmatprep.subr.bf16.mxu0 %v11990_v48  ;;  %8504 = vmatprep.subr.bf16.mxu1 %v11992_v49  ;;  %v1291_v48 = vld [vmem:[%s13937_s20 + $0x18f8] sm:$0xff]  ;;  %v12045_v49 = vcombine.low %v1278_v35, %v1282_v36 }
 0x46d   : > { %v12056_v52 = vcombine.high %v1287_v47, %v1291_v48  ;;  %v12055_v58 = vcombine.low %v1287_v47, %v1291_v48  ;;  %v1354_v47 = vld [vmem:[%s13937_s20 + $0x1af0] sm:$0xff]  ;;  %v1351_v48 = vld [vmem:[%s13937_s20 + $0x1ad8] sm:$0xff] }
 0x46f   : > { %8118 = vmatpush1.bf16.msra.mxu0 %v11989_v54  ;;  %8505 = vmatpush1.bf16.msra.mxu1 %v11991_v55  ;;  %v1298_v54 = vld [vmem:[%s13937_s20 + $0x1930] sm:$0xff]  ;;  %v1295_v55 = vld [vmem:[%s13937_s20 + $0x1918] sm:$0xff] }
 0x470   : > { %8119 = vmatprep.subr.bf16.mxu0 %v11998_v56  ;;  %8506 = vmatprep.subr.bf16.mxu1 %v12000_v57  ;;  %v1299_v56 = vld [vmem:[%s13937_s20 + $0x1938] sm:$0xff]  ;;  %v12053_v57 = vcombine.low %v1286_v44, %v1290_v45  ;;  %v12062_v60 = vcombine.high %v1294_v53, %v1298_v54  ;;  %v12110_v44 = vcombine.high %v1342_v38, %v1346_v39 }
 0x471   : > { %v12064_v61 = vcombine.high %v1295_v55, %v1299_v56  ;;  %v12063_v3 = vcombine.low %v1295_v55, %v1299_v56  ;;  %v1362_v55 = vld [vmem:[%s13937_s20 + $0x1b30] sm:$0xff]  ;;  %v1359_v56 = vld [vmem:[%s13937_s20 + $0x1b18] sm:$0xff] }
 0x473   : > { %8120 = vmatpush1.bf16.msra.mxu0 %v11997_v63  ;;  %8507 = vmatpush1.bf16.msra.mxu1 %v11999_v0  ;;  %v1306_v63 = vld [vmem:[%s13937_s20 + $0x1970] sm:$0xff]  ;;  %v1303_v0 = vld [vmem:[%s13937_s20 + $0x1958] sm:$0xff] }
 0x474   : > { %8121 = vmatprep.subr.bf16.mxu0 %v12006_v1  ;;  %8508 = vmatprep.subr.bf16.mxu1 %v12008_v2  ;;  %v1307_v1 = vld [vmem:[%s13937_s20 + $0x1978] sm:$0xff]  ;;  %v12061_v2 = vcombine.low %v1294_v53, %v1298_v54  ;;  %v12070_v4 = vcombine.high %v1302_v62, %v1306_v63  ;;  %v1358_v54 = vld [vmem:[%s13937_s20 + $0x1b10] sm:$0xff] }
 0x475   : > { %v12072_v5 = vcombine.high %v1303_v0, %v1307_v1  ;;  %v12071_v11 = vcombine.low %v1303_v0, %v1307_v1  ;;  %v1370_v0 = vld [vmem:[%s13937_s20 + $0x1b70] sm:$0xff]  ;;  %v1367_v1 = vld [vmem:[%s13937_s20 + $0x1b58] sm:$0xff] }
 0x477   : > { %8122 = vmatpush1.bf16.msra.mxu0 %v12005_v7  ;;  %8509 = vmatpush1.bf16.msra.mxu1 %v12007_v8  ;;  %v1314_v7 = vld [vmem:[%s13937_s20 + $0x19b0] sm:$0xff]  ;;  %v1311_v8 = vld [vmem:[%s13937_s20 + $0x1998] sm:$0xff] }
 0x478   : > { %8123 = vmatprep.subr.bf16.mxu0 %v12014_v9  ;;  %8510 = vmatprep.subr.bf16.mxu1 %v12016_v10  ;;  %v1315_v9 = vld [vmem:[%s13937_s20 + $0x19b8] sm:$0xff]  ;;  %v12069_v10 = vcombine.low %v1302_v62, %v1306_v63  ;;  %v12078_v12 = vcombine.high %v1310_v6, %v1314_v7  ;;  %v1366_v63 = vld [vmem:[%s13937_s20 + $0x1b50] sm:$0xff] }
 0x479   : > { %v12080_v13 = vcombine.high %v1311_v8, %v1315_v9  ;;  %v12079_v19 = vcombine.low %v1311_v8, %v1315_v9  ;;  %v1378_v8 = vld [vmem:[%s13937_s20 + $0x1bb0] sm:$0xff]  ;;  %v1375_v9 = vld [vmem:[%s13937_s20 + $0x1b98] sm:$0xff] }
 0x47b   : > { %8124 = vmatpush1.bf16.msra.mxu0 %v12013_v15  ;;  %8511 = vmatpush1.bf16.msra.mxu1 %v12015_v16  ;;  %v1322_v15 = vld [vmem:[%s13937_s20 + $0x19f0] sm:$0xff]  ;;  %v1319_v16 = vld [vmem:[%s13937_s20 + $0x19d8] sm:$0xff] }
 0x47c   : > { %8125 = vmatprep.subr.bf16.mxu0 %v12022_v17  ;;  %8512 = vmatprep.subr.bf16.mxu1 %v12024_v18  ;;  %v1323_v17 = vld [vmem:[%s13937_s20 + $0x19f8] sm:$0xff]  ;;  %v12077_v18 = vcombine.low %v1310_v6, %v1314_v7  ;;  %v12086_v20 = vcombine.high %v1318_v14, %v1322_v15  ;;  %v1374_v7 = vld [vmem:[%s13937_s20 + $0x1b90] sm:$0xff] }
 0x47d   : > { %v12088_v21 = vcombine.high %v1319_v16, %v1323_v17  ;;  %v12087_v27 = vcombine.low %v1319_v16, %v1323_v17  ;;  %v1386_v16 = vld [vmem:[%s13937_s20 + $0x1bf0] sm:$0xff]  ;;  %v1383_v17 = vld [vmem:[%s13937_s20 + $0x1bd8] sm:$0xff] }
 0x47f   : > { %8126 = vmatpush1.bf16.msra.mxu0 %v12021_v23  ;;  %8513 = vmatpush1.bf16.msra.mxu1 %v12023_v24  ;;  %v1330_v23 = vld [vmem:[%s13937_s20 + $0x1a30] sm:$0xff]  ;;  %v1327_v24 = vld [vmem:[%s13937_s20 + $0x1a18] sm:$0xff] }
 0x480   : > { %8138 = vmatprep.subr.bf16.mxu0 %v12030_v25  ;;  %8525 = vmatprep.subr.bf16.mxu1 %v12032_v26  ;;  %v1331_v25 = vld [vmem:[%s13937_s20 + $0x1a38] sm:$0xff]  ;;  %v12085_v26 = vcombine.low %v1318_v14, %v1322_v15  ;;  %v12094_v28 = vcombine.high %v1326_v22, %v1330_v23  ;;  %v1382_v15 = vld [vmem:[%s13937_s20 + $0x1bd0] sm:$0xff] }
 0x481   : > { %v12096_v29 = vcombine.high %v1327_v24, %v1331_v25  ;;  %v12095_v35 = vcombine.low %v1327_v24, %v1331_v25  ;;  %v1394_v24 = vld [vmem:[%s13937_s20 + $0x1c30] sm:$0xff]  ;;  %v1391_v25 = vld [vmem:[%s13937_s20 + $0x1c18] sm:$0xff] }
 0x482   : > { %8128 = vmatmul.mubr.bf16.vlgmr.msra.gmra.mrb[4].mxu0 %v12980_v37  ;;  %8515 = vmatmul.mubr.bf16.vlgmr.msra.gmra.mrb[4].mxu1 %v12980_v37 }
 0x483   : > { %8139 = vmatpush1.bf16.msra.mxu0 %v12029_v31  ;;  %8526 = vmatpush1.bf16.msra.mxu1 %v12031_v32  ;;  %v1338_v31 = vld [vmem:[%s13937_s20 + $0x1a70] sm:$0xff]  ;;  %v1335_v32 = vld [vmem:[%s13937_s20 + $0x1a58] sm:$0xff] }
 0x484   : > { %8140 = vmatprep.subr.bf16.mxu0 %v12038_v33  ;;  %8527 = vmatprep.subr.bf16.mxu1 %v12040_v34  ;;  %v1339_v33 = vld [vmem:[%s13937_s20 + $0x1a78] sm:$0xff]  ;;  %v12093_v34 = vcombine.low %v1326_v22, %v1330_v23  ;;  %v12102_v36 = vcombine.high %v1334_v30, %v1338_v31  ;;  %v1390_v23 = vld [vmem:[%s13937_s20 + $0x1c10] sm:$0xff] }
 0x485   : > { %8170 = vmatprep.mubr.bf16.mxu0 %v12981_v46  ;;  %8557 = vmatprep.mubr.bf16.mxu1 %v12981_v46  ;;  %v12104_v37 = vcombine.high %v1335_v32, %v1339_v33  ;;  %v1350_v46 = vld [vmem:[%s13937_s20 + $0x1ad0] sm:$0xff] }
 0x487   : > { %8141 = vmatpush1.bf16.msra.mxu0 %v12037_v40  ;;  %8528 = vmatpush1.bf16.msra.mxu1 %v12039_v41  ;;  %v1343_v40 = vld [vmem:[%s13937_s20 + $0x1a98] sm:$0xff] }
 0x488   : > { %8142 = vmatprep.subr.bf16.mxu0 %v12046_v42  ;;  %8529 = vmatprep.subr.bf16.mxu1 %v12048_v43  ;;  %v1347_v41 = vld [vmem:[%s13937_s20 + $0x1ab8] sm:$0xff]  ;;  %v12101_v42 = vcombine.low %v1334_v30, %v1338_v31  ;;  %v12103_v43 = vcombine.low %v1335_v32, %v1339_v33  ;;  %v1398_v31 = vld [vmem:[%s13937_s20 + $0x1c50] sm:$0xff] }
 0x489   : > { %v12112_v45 = vcombine.high %v1343_v40, %v1347_v41  ;;  %v1402_v32 = vld [vmem:[%s13937_s20 + $0x1c70] sm:$0xff]  ;;  %v1399_v33 = vld [vmem:[%s13937_s20 + $0x1c58] sm:$0xff] }
 0x48b   : > { %8143 = vmatpush1.bf16.msra.mxu0 %v12045_v49  ;;  %8530 = vmatpush1.bf16.msra.mxu1 %v12047_v50  ;;  %v1355_v49 = vld [vmem:[%s13937_s20 + $0x1af8] sm:$0xff]  ;;  %v12109_v50 = vcombine.low %v1342_v38, %v1346_v39  ;;  %v1406_v39 = vld [vmem:[%s13937_s20 + $0x1c90] sm:$0xff] }
 0x48c   : > { %8144 = vmatprep.subr.bf16.mxu0 %v12054_v51  ;;  %8531 = vmatprep.subr.bf16.mxu1 %v12056_v52  ;;  %v12111_v51 = vcombine.low %v1343_v40, %v1347_v41  ;;  %v12118_v52 = vcombine.high %v1350_v46, %v1354_v47  ;;  %v12120_v53 = vcombine.high %v1351_v48, %v1355_v49  ;;  %v1410_v40 = vld [vmem:[%s13937_s20 + $0x1cb0] sm:$0xff]  ;;  %v12982_v41 = vld [vmem:[%s13935_s27 + $0x30] ss:$68 sps:$4 sm:$0xff]  }
 0x48f   : > { %8145 = vmatpush1.bf16.msra.mxu0 %v12053_v57  ;;  %8532 = vmatpush1.bf16.msra.mxu1 %v12055_v58  ;;  %v1363_v57 = vld [vmem:[%s13937_s20 + $0x1b38] sm:$0xff]  ;;  %v12117_v58 = vcombine.low %v1350_v46, %v1354_v47  ;;  %v12174_v46 = vcombine.high %v1406_v39, %v1410_v40 }
 0x490   : > { %8146 = vmatprep.subr.bf16.mxu0 %v12062_v60  ;;  %8533 = vmatprep.subr.bf16.mxu1 %v12064_v61  ;;  %v12119_v60 = vcombine.low %v1351_v48, %v1355_v49  ;;  %v12126_v61 = vcombine.high %v1358_v54, %v1362_v55  ;;  %v12128_v62 = vcombine.high %v1359_v56, %v1363_v57  ;;  %v1414_v48 = vld [vmem:[%s13937_s20 + $0x1cd0] sm:$0xff] }
 0x491   : > { %v1418_v49 = vld [vmem:[%s13937_s20 + $0x1cf0] sm:$0xff] }
 0x493   : > { %8147 = vmatpush1.bf16.msra.mxu0 %v12061_v2  ;;  %8534 = vmatpush1.bf16.msra.mxu1 %v12063_v3  ;;  %v1371_v2 = vld [vmem:[%s13937_s20 + $0x1b78] sm:$0xff]  ;;  %v12125_v3 = vcombine.low %v1358_v54, %v1362_v55  ;;  %v12182_v55 = vcombine.high %v1414_v48, %v1418_v49 }
 0x494   : > { %8148 = vmatprep.subr.bf16.mxu0 %v12070_v4  ;;  %8535 = vmatprep.subr.bf16.mxu1 %v12072_v5  ;;  %v12127_v4 = vcombine.low %v1359_v56, %v1363_v57  ;;  %v12134_v5 = vcombine.high %v1366_v63, %v1370_v0  ;;  %v12136_v6 = vcombine.high %v1367_v1, %v1371_v2  ;;  %v1422_v57 = vld [vmem:[%s13937_s20 + $0x1d10] sm:$0xff] }
 0x497   : > { %8149 = vmatpush1.bf16.msra.mxu0 %v12069_v10  ;;  %8536 = vmatpush1.bf16.msra.mxu1 %v12071_v11  ;;  %v1379_v10 = vld [vmem:[%s13937_s20 + $0x1bb8] sm:$0xff]  ;;  %v12133_v11 = vcombine.low %v1366_v63, %v1370_v0 }
 0x498   : > { %8150 = vmatprep.subr.bf16.mxu0 %v12078_v12  ;;  %8537 = vmatprep.subr.bf16.mxu1 %v12080_v13  ;;  %v12135_v12 = vcombine.low %v1367_v1, %v1371_v2  ;;  %v12142_v13 = vcombine.high %v1374_v7, %v1378_v8  ;;  %v12144_v14 = vcombine.high %v1375_v9, %v1379_v10  ;;  %v1430_v2 = vld [vmem:[%s13937_s20 + $0x1d50] sm:$0xff] }
 0x49b   : > { %8151 = vmatpush1.bf16.msra.mxu0 %v12077_v18  ;;  %8538 = vmatpush1.bf16.msra.mxu1 %v12079_v19  ;;  %v1387_v18 = vld [vmem:[%s13937_s20 + $0x1bf8] sm:$0xff]  ;;  %v12141_v19 = vcombine.low %v1374_v7, %v1378_v8 }
 0x49c   : > { %8152 = vmatprep.subr.bf16.mxu0 %v12086_v20  ;;  %8539 = vmatprep.subr.bf16.mxu1 %v12088_v21  ;;  %v12143_v20 = vcombine.low %v1375_v9, %v1379_v10  ;;  %v12150_v21 = vcombine.high %v1382_v15, %v1386_v16  ;;  %v12152_v22 = vcombine.high %v1383_v17, %v1387_v18  ;;  %v1438_v10 = vld [vmem:[%s13937_s20 + $0x1d90] sm:$0xff] }
 0x49f   : > { %8153 = vmatpush1.bf16.msra.mxu0 %v12085_v26  ;;  %8540 = vmatpush1.bf16.msra.mxu1 %v12087_v27  ;;  %v1395_v26 = vld [vmem:[%s13937_s20 + $0x1c38] sm:$0xff]  ;;  %v12149_v27 = vcombine.low %v1382_v15, %v1386_v16 }
 0x4a0   : > { %8154 = vmatprep.subr.bf16.mxu0 %v12094_v28  ;;  %8541 = vmatprep.subr.bf16.mxu1 %v12096_v29  ;;  %v12151_v28 = vcombine.low %v1383_v17, %v1387_v18  ;;  %v12158_v29 = vcombine.high %v1390_v23, %v1394_v24  ;;  %v12160_v30 = vcombine.high %v1391_v25, %v1395_v26  ;;  %v1446_v18 = vld [vmem:[%s13937_s20 + $0x1dd0] sm:$0xff] }
 0x4a3   : > { %8155 = vmatpush1.bf16.msra.mxu0 %v12093_v34  ;;  %8542 = vmatpush1.bf16.msra.mxu1 %v12095_v35  ;;  %v1403_v34 = vld [vmem:[%s13937_s20 + $0x1c78] sm:$0xff]  ;;  %v12157_v35 = vcombine.low %v1390_v23, %v1394_v24 }
 0x4a4   : > { %8156 = vmatprep.subr.bf16.mxu0 %v12102_v36  ;;  %8543 = vmatprep.subr.bf16.mxu1 %v12104_v37  ;;  %v12159_v36 = vcombine.low %v1391_v25, %v1395_v26  ;;  %v12166_v37 = vcombine.high %v1398_v31, %v1402_v32  ;;  %v12168_v38 = vcombine.high %v1399_v33, %v1403_v34  ;;  %v1454_v26 = vld [vmem:[%s13937_s20 + $0x1e10] sm:$0xff] }
 0x4a7   : > { %8157 = vmatpush1.bf16.msra.mxu0 %v12101_v42  ;;  %8544 = vmatpush1.bf16.msra.mxu1 %v12103_v43  ;;  %v1407_v42 = vld [vmem:[%s13937_s20 + $0x1c98] sm:$0xff] }
 0x4a8   : > { %8158 = vmatprep.subr.bf16.mxu0 %v12110_v44  ;;  %8545 = vmatprep.subr.bf16.mxu1 %v12112_v45  ;;  %v1411_v43 = vld [vmem:[%s13937_s20 + $0x1cb8] sm:$0xff]  ;;  %v12165_v44 = vcombine.low %v1398_v31, %v1402_v32  ;;  %v12167_v45 = vcombine.low %v1399_v33, %v1403_v34  ;;  %v1462_v34 = vld [vmem:[%s13937_s20 + $0x1e50] sm:$0xff] }
 0x4a9   : > { %v12176_v47 = vcombine.high %v1407_v42, %v1411_v43  ;;  %v12175_v54 = vcombine.low %v1407_v42, %v1411_v43  ;;  %v1470_v42 = vld [vmem:[%s13937_s20 + $0x1e90] sm:$0xff] }
 0x4aa   : > { %v1474_v43 = vld [vmem:[%s13937_s20 + $0x1eb0] sm:$0xff] }
 0x4ab   : > { %8159 = vmatpush1.bf16.msra.mxu0 %v12109_v50  ;;  %8546 = vmatpush1.bf16.msra.mxu1 %v12111_v51  ;;  %v12983_v50 = vld [vmem:[%s13935_s27 + $0x3c] ss:$68 sps:$4 sm:$0xff]  }
 0x4ac   : > { %8160 = vmatprep.subr.bf16.mxu0 %v12118_v52  ;;  %8547 = vmatprep.subr.bf16.mxu1 %v12120_v53  ;;  %v1415_v51 = vld [vmem:[%s13937_s20 + $0x1cd8] sm:$0xff]  ;;  %v12173_v53 = vcombine.low %v1406_v39, %v1410_v40 }
 0x4ad   : > { %v1419_v52 = vld [vmem:[%s13937_s20 + $0x1cf8] sm:$0xff] }
 0x4ae   : > { %v12184_v56 = vcombine.high %v1415_v51, %v1419_v52  ;;  %v12183_v63 = vcombine.low %v1415_v51, %v1419_v52  ;;  %v1482_v51 = vld [vmem:[%s13937_s20 + $0x1ef0] sm:$0xff]  ;;  %v1479_v52 = vld [vmem:[%s13937_s20 + $0x1ed8] sm:$0xff] }
 0x4af   : > { %8161 = vmatpush1.bf16.msra.mxu0 %v12117_v58  ;;  %8548 = vmatpush1.bf16.msra.mxu1 %v12119_v60  ;;  %v1426_v58 = vld [vmem:[%s13937_s20 + $0x1d30] sm:$0xff]  ;;  %v1423_v60 = vld [vmem:[%s13937_s20 + $0x1d18] sm:$0xff] }
 0x4b0   : > { %8162 = vmatprep.subr.bf16.mxu0 %v12126_v61  ;;  %8549 = vmatprep.subr.bf16.mxu1 %v12128_v62  ;;  %v1427_v61 = vld [vmem:[%s13937_s20 + $0x1d38] sm:$0xff]  ;;  %v12181_v62 = vcombine.low %v1414_v48, %v1418_v49  ;;  %v12190_v0 = vcombine.high %v1422_v57, %v1426_v58  ;;  %v12238_v48 = vcombine.high %v1470_v42, %v1474_v43 }
 0x4b1   : > { %v12192_v1 = vcombine.high %v1423_v60, %v1427_v61  ;;  %v12191_v7 = vcombine.low %v1423_v60, %v1427_v61  ;;  %v1490_v60 = vld [vmem:[%s13937_s20 + $0x1f30] sm:$0xff]  ;;  %v1487_v61 = vld [vmem:[%s13937_s20 + $0x1f18] sm:$0xff] }
 0x4b3   : > { %8163 = vmatpush1.bf16.msra.mxu0 %v12125_v3  ;;  %8550 = vmatpush1.bf16.msra.mxu1 %v12127_v4  ;;  %v1434_v3 = vld [vmem:[%s13937_s20 + $0x1d70] sm:$0xff]  ;;  %v1431_v4 = vld [vmem:[%s13937_s20 + $0x1d58] sm:$0xff] }
 0x4b4   : > { %8164 = vmatprep.subr.bf16.mxu0 %v12134_v5  ;;  %8551 = vmatprep.subr.bf16.mxu1 %v12136_v6  ;;  %v1435_v5 = vld [vmem:[%s13937_s20 + $0x1d78] sm:$0xff]  ;;  %v12189_v6 = vcombine.low %v1422_v57, %v1426_v58  ;;  %v12198_v8 = vcombine.high %v1430_v2, %v1434_v3  ;;  %v1486_v58 = vld [vmem:[%s13937_s20 + $0x1f10] sm:$0xff] }
 0x4b5   : > { %v12200_v9 = vcombine.high %v1431_v4, %v1435_v5  ;;  %v12199_v15 = vcombine.low %v1431_v4, %v1435_v5  ;;  %v1498_v4 = vld [vmem:[%s13937_s20 + $0x1f70] sm:$0xff]  ;;  %v1495_v5 = vld [vmem:[%s13937_s20 + $0x1f58] sm:$0xff] }
 0x4b7   : > { %8165 = vmatpush1.bf16.msra.mxu0 %v12133_v11  ;;  %8552 = vmatpush1.bf16.msra.mxu1 %v12135_v12  ;;  %v1442_v11 = vld [vmem:[%s13937_s20 + $0x1db0] sm:$0xff]  ;;  %v1439_v12 = vld [vmem:[%s13937_s20 + $0x1d98] sm:$0xff] }
 0x4b8   : > { %8166 = vmatprep.subr.bf16.mxu0 %v12142_v13  ;;  %8553 = vmatprep.subr.bf16.mxu1 %v12144_v14  ;;  %v1443_v13 = vld [vmem:[%s13937_s20 + $0x1db8] sm:$0xff]  ;;  %v12197_v14 = vcombine.low %v1430_v2, %v1434_v3  ;;  %v12206_v16 = vcombine.high %v1438_v10, %v1442_v11  ;;  %v1494_v3 = vld [vmem:[%s13937_s20 + $0x1f50] sm:$0xff] }
 0x4b9   : > { %v12208_v17 = vcombine.high %v1439_v12, %v1443_v13  ;;  %v12207_v23 = vcombine.low %v1439_v12, %v1443_v13  ;;  %v1506_v12 = vld [vmem:[%s13937_s20 + $0x1fb0] sm:$0xff]  ;;  %v1503_v13 = vld [vmem:[%s13937_s20 + $0x1f98] sm:$0xff] }
 0x4bb   : > { %8167 = vmatpush1.bf16.msra.mxu0 %v12141_v19  ;;  %8554 = vmatpush1.bf16.msra.mxu1 %v12143_v20  ;;  %v1450_v19 = vld [vmem:[%s13937_s20 + $0x1df0] sm:$0xff]  ;;  %v1447_v20 = vld [vmem:[%s13937_s20 + $0x1dd8] sm:$0xff] }
 0x4bc   : > { %8168 = vmatprep.subr.bf16.mxu0 %v12150_v21  ;;  %8555 = vmatprep.subr.bf16.mxu1 %v12152_v22  ;;  %v1451_v21 = vld [vmem:[%s13937_s20 + $0x1df8] sm:$0xff]  ;;  %v12205_v22 = vcombine.low %v1438_v10, %v1442_v11  ;;  %v12214_v24 = vcombine.high %v1446_v18, %v1450_v19  ;;  %v1502_v11 = vld [vmem:[%s13937_s20 + $0x1f90] sm:$0xff] }
 0x4bd   : > { %v12216_v25 = vcombine.high %v1447_v20, %v1451_v21  ;;  %v12215_v31 = vcombine.low %v1447_v20, %v1451_v21  ;;  %v1514_v20 = vld [vmem:[%s13937_s20 + $0x1ff0] sm:$0xff]  ;;  %v1511_v21 = vld [vmem:[%s13937_s20 + $0x1fd8] sm:$0xff] }
 0x4bf   : > { %8169 = vmatpush1.bf16.msra.mxu0 %v12149_v27  ;;  %8556 = vmatpush1.bf16.msra.mxu1 %v12151_v28  ;;  %v1458_v27 = vld [vmem:[%s13937_s20 + $0x1e30] sm:$0xff]  ;;  %v1455_v28 = vld [vmem:[%s13937_s20 + $0x1e18] sm:$0xff] }
 0x4c0   : > { %8181 = vmatprep.subr.bf16.mxu0 %v12158_v29  ;;  %8568 = vmatprep.subr.bf16.mxu1 %v12160_v30  ;;  %v1459_v29 = vld [vmem:[%s13937_s20 + $0x1e38] sm:$0xff]  ;;  %v12213_v30 = vcombine.low %v1446_v18, %v1450_v19  ;;  %v12222_v32 = vcombine.high %v1454_v26, %v1458_v27  ;;  %v1510_v19 = vld [vmem:[%s13937_s20 + $0x1fd0] sm:$0xff] }
 0x4c1   : > { %v12224_v33 = vcombine.high %v1455_v28, %v1459_v29  ;;  %v12223_v39 = vcombine.low %v1455_v28, %v1459_v29  ;;  %v1522_v28 = vld [vmem:[%s13937_s20 + $0x2030] sm:$0xff]  ;;  %v1519_v29 = vld [vmem:[%s13937_s20 + $0x2018] sm:$0xff] }
 0x4c2   : > { %8171 = vmatmul.mubr.bf16.vlgmr.msra.gmra.mrb[4].mxu0 %v12982_v41  ;;  %8558 = vmatmul.mubr.bf16.vlgmr.msra.gmra.mrb[4].mxu1 %v12982_v41 }
 0x4c3   : > { %8182 = vmatpush1.bf16.msra.mxu0 %v12157_v35  ;;  %8569 = vmatpush1.bf16.msra.mxu1 %v12159_v36  ;;  %v1466_v35 = vld [vmem:[%s13937_s20 + $0x1e70] sm:$0xff]  ;;  %v1463_v36 = vld [vmem:[%s13937_s20 + $0x1e58] sm:$0xff] }
 0x4c4   : > { %8183 = vmatprep.subr.bf16.mxu0 %v12166_v37  ;;  %8570 = vmatprep.subr.bf16.mxu1 %v12168_v38  ;;  %v1467_v37 = vld [vmem:[%s13937_s20 + $0x1e78] sm:$0xff]  ;;  %v12221_v38 = vcombine.low %v1454_v26, %v1458_v27  ;;  %v12230_v40 = vcombine.high %v1462_v34, %v1466_v35  ;;  %v1518_v27 = vld [vmem:[%s13937_s20 + $0x2010] sm:$0xff] }
 0x4c5   : > { %8213 = vmatprep.mubr.bf16.mxu0 %v12983_v50  ;;  %8600 = vmatprep.mubr.bf16.mxu1 %v12983_v50  ;;  %v12232_v41 = vcombine.high %v1463_v36, %v1467_v37  ;;  %v1478_v50 = vld [vmem:[%s13937_s20 + $0x1ed0] sm:$0xff] }
 0x4c7   : > { %8184 = vmatpush1.bf16.msra.mxu0 %v12165_v44  ;;  %8571 = vmatpush1.bf16.msra.mxu1 %v12167_v45  ;;  %v1471_v44 = vld [vmem:[%s13937_s20 + $0x1e98] sm:$0xff] }
 0x4c8   : > { %8185 = vmatprep.subr.bf16.mxu0 %v12174_v46  ;;  %8572 = vmatprep.subr.bf16.mxu1 %v12176_v47  ;;  %v1475_v45 = vld [vmem:[%s13937_s20 + $0x1eb8] sm:$0xff]  ;;  %v12229_v46 = vcombine.low %v1462_v34, %v1466_v35  ;;  %v12231_v47 = vcombine.low %v1463_v36, %v1467_v37  ;;  %v1526_v35 = vld [vmem:[%s13937_s20 + $0x2050] sm:$0xff] }
 0x4c9   : > { %v12240_v49 = vcombine.high %v1471_v44, %v1475_v45  ;;  %v1530_v36 = vld [vmem:[%s13937_s20 + $0x2070] sm:$0xff]  ;;  %v1527_v37 = vld [vmem:[%s13937_s20 + $0x2058] sm:$0xff] }
 0x4cb   : > { %8186 = vmatpush1.bf16.msra.mxu0 %v12173_v53  ;;  %8573 = vmatpush1.bf16.msra.mxu1 %v12175_v54  ;;  %v1483_v53 = vld [vmem:[%s13937_s20 + $0x1ef8] sm:$0xff]  ;;  %v12237_v54 = vcombine.low %v1470_v42, %v1474_v43  ;;  %v1534_v43 = vld [vmem:[%s13937_s20 + $0x2090] sm:$0xff] }
 0x4cc   : > { %8187 = vmatprep.subr.bf16.mxu0 %v12182_v55  ;;  %8574 = vmatprep.subr.bf16.mxu1 %v12184_v56  ;;  %v12239_v55 = vcombine.low %v1471_v44, %v1475_v45  ;;  %v12246_v56 = vcombine.high %v1478_v50, %v1482_v51  ;;  %v12248_v57 = vcombine.high %v1479_v52, %v1483_v53  ;;  %v1538_v44 = vld [vmem:[%s13937_s20 + $0x20b0] sm:$0xff] }
 0x4cd   : > { %v12984_v45 = vld [vmem:[%s13935_s27 + $0x38] ss:$68 sps:$4 sm:$0xff]  }
 0x4cf   : > { %8188 = vmatpush1.bf16.msra.mxu0 %v12181_v62  ;;  %8575 = vmatpush1.bf16.msra.mxu1 %v12183_v63  ;;  %v1491_v62 = vld [vmem:[%s13937_s20 + $0x1f38] sm:$0xff]  ;;  %v12245_v63 = vcombine.low %v1478_v50, %v1482_v51  ;;  %v12302_v50 = vcombine.high %v1534_v43, %v1538_v44 }
 0x4d0   : > { %8189 = vmatprep.subr.bf16.mxu0 %v12190_v0  ;;  %8576 = vmatprep.subr.bf16.mxu1 %v12192_v1  ;;  %v12247_v0 = vcombine.low %v1479_v52, %v1483_v53  ;;  %v12254_v1 = vcombine.high %v1486_v58, %v1490_v60  ;;  %v12256_v2 = vcombine.high %v1487_v61, %v1491_v62  ;;  %v1542_v52 = vld [vmem:[%s13937_s20 + $0x20d0] sm:$0xff] }
 0x4d1   : > { %v1546_v53 = vld [vmem:[%s13937_s20 + $0x20f0] sm:$0xff] }
 0x4d3   : > { %8190 = vmatpush1.bf16.msra.mxu0 %v12189_v6  ;;  %8577 = vmatpush1.bf16.msra.mxu1 %v12191_v7  ;;  %v1499_v6 = vld [vmem:[%s13937_s20 + $0x1f78] sm:$0xff]  ;;  %v12253_v7 = vcombine.low %v1486_v58, %v1490_v60  ;;  %v12310_v58 = vcombine.high %v1542_v52, %v1546_v53 }
 0x4d4   : > { %8191 = vmatprep.subr.bf16.mxu0 %v12198_v8  ;;  %8578 = vmatprep.subr.bf16.mxu1 %v12200_v9  ;;  %v12255_v8 = vcombine.low %v1487_v61, %v1491_v62  ;;  %v12262_v9 = vcombine.high %v1494_v3, %v1498_v4  ;;  %v12264_v10 = vcombine.high %v1495_v5, %v1499_v6  ;;  %v1550_v61 = vld [vmem:[%s13937_s20 + $0x2110] sm:$0xff] }
 0x4d5   : > { %v1554_v62 = vld [vmem:[%s13937_s20 + $0x2130] sm:$0xff] }
 0x4d7   : > { %8192 = vmatpush1.bf16.msra.mxu0 %v12197_v14  ;;  %8579 = vmatpush1.bf16.msra.mxu1 %v12199_v15  ;;  %v1507_v14 = vld [vmem:[%s13937_s20 + $0x1fb8] sm:$0xff]  ;;  %v12261_v15 = vcombine.low %v1494_v3, %v1498_v4  ;;  %v1558_v4 = vld [vmem:[%s13937_s20 + $0x2150] sm:$0xff] }
 0x4d8   : > { %8193 = vmatprep.subr.bf16.mxu0 %v12206_v16  ;;  %8580 = vmatprep.subr.bf16.mxu1 %v12208_v17  ;;  %v12263_v16 = vcombine.low %v1495_v5, %v1499_v6  ;;  %v12270_v17 = vcombine.high %v1502_v11, %v1506_v12  ;;  %v12272_v18 = vcombine.high %v1503_v13, %v1507_v14  ;;  %v1562_v5 = vld [vmem:[%s13937_s20 + $0x2170] sm:$0xff]  ;;  %v1559_v6 = vld [vmem:[%s13937_s20 + $0x2158] sm:$0xff] }
 0x4db   : > { %8194 = vmatpush1.bf16.msra.mxu0 %v12205_v22  ;;  %8581 = vmatpush1.bf16.msra.mxu1 %v12207_v23  ;;  %v1515_v22 = vld [vmem:[%s13937_s20 + $0x1ff8] sm:$0xff]  ;;  %v12269_v23 = vcombine.low %v1502_v11, %v1506_v12  ;;  %v1566_v12 = vld [vmem:[%s13937_s20 + $0x2190] sm:$0xff] }
 0x4dc   : > { %8195 = vmatprep.subr.bf16.mxu0 %v12214_v24  ;;  %8582 = vmatprep.subr.bf16.mxu1 %v12216_v25  ;;  %v12271_v24 = vcombine.low %v1503_v13, %v1507_v14  ;;  %v12278_v25 = vcombine.high %v1510_v19, %v1514_v20  ;;  %v12280_v26 = vcombine.high %v1511_v21, %v1515_v22  ;;  %v1570_v13 = vld [vmem:[%s13937_s20 + $0x21b0] sm:$0xff]  ;;  %v1567_v14 = vld [vmem:[%s13937_s20 + $0x2198] sm:$0xff] }
 0x4df   : > { %8196 = vmatpush1.bf16.msra.mxu0 %v12213_v30  ;;  %8583 = vmatpush1.bf16.msra.mxu1 %v12215_v31  ;;  %v1523_v30 = vld [vmem:[%s13937_s20 + $0x2038] sm:$0xff]  ;;  %v12277_v31 = vcombine.low %v1510_v19, %v1514_v20  ;;  %v1574_v20 = vld [vmem:[%s13937_s20 + $0x21d0] sm:$0xff] }
 0x4e0   : > { %8197 = vmatprep.subr.bf16.mxu0 %v12222_v32  ;;  %8584 = vmatprep.subr.bf16.mxu1 %v12224_v33  ;;  %v12279_v32 = vcombine.low %v1511_v21, %v1515_v22  ;;  %v12286_v33 = vcombine.high %v1518_v27, %v1522_v28  ;;  %v12288_v34 = vcombine.high %v1519_v29, %v1523_v30  ;;  %v1578_v21 = vld [vmem:[%s13937_s20 + $0x21f0] sm:$0xff]  ;;  %v1575_v22 = vld [vmem:[%s13937_s20 + $0x21d8] sm:$0xff] }
 0x4e3   : > { %8198 = vmatpush1.bf16.msra.mxu0 %v12221_v38  ;;  %8585 = vmatpush1.bf16.msra.mxu1 %v12223_v39  ;;  %v1531_v38 = vld [vmem:[%s13937_s20 + $0x2078] sm:$0xff]  ;;  %v12285_v39 = vcombine.low %v1518_v27, %v1522_v28  ;;  %v12341_v28 = vcombine.low %v1574_v20, %v1578_v21 }
 0x4e4   : > { %8199 = vmatprep.subr.bf16.mxu0 %v12230_v40  ;;  %8586 = vmatprep.subr.bf16.mxu1 %v12232_v41  ;;  %v12287_v40 = vcombine.low %v1519_v29, %v1523_v30  ;;  %v12294_v41 = vcombine.high %v1526_v35, %v1530_v36  ;;  %v12296_v42 = vcombine.high %v1527_v37, %v1531_v38  ;;  %v12985_v30 = vld [vmem:[%s13935_s27 + $0x40] ss:$68 sps:$4 sm:$0xff]  }
 0x4e7   : > { %8200 = vmatpush1.bf16.msra.mxu0 %v12229_v46  ;;  %8587 = vmatpush1.bf16.msra.mxu1 %v12231_v47  ;;  %v1535_v46 = vld [vmem:[%s13937_s20 + $0x2098] sm:$0xff] }
 0x4e8   : > { %8201 = vmatprep.subr.bf16.mxu0 %v12238_v48  ;;  %8588 = vmatprep.subr.bf16.mxu1 %v12240_v49  ;;  %v1539_v47 = vld [vmem:[%s13937_s20 + $0x20b8] sm:$0xff]  ;;  %v12293_v48 = vcombine.low %v1526_v35, %v1530_v36  ;;  %v12295_v49 = vcombine.low %v1527_v37, %v1531_v38  ;;  %v465_v35 = vld [vmem:[#allocation2 + $0x38] sm:$0xff]  ;;  %v470_v36 = vld [vmem:[#allocation2 + $0x60] sm:$0xff] }
 0x4e9   : > { %v12304_v51 = vcombine.high %v1535_v46, %v1539_v47 }
 0x4eb   : > { %8202 = vmatpush1.bf16.msra.mxu0 %v12237_v54  ;;  %8589 = vmatpush1.bf16.msra.mxu1 %v12239_v55  ;;  %v1543_v54 = vld [vmem:[%s13937_s20 + $0x20d8] sm:$0xff] }
 0x4ec   : > { %8203 = vmatprep.subr.bf16.mxu0 %v12246_v56  ;;  %8590 = vmatprep.subr.bf16.mxu1 %v12248_v57  ;;  %v1547_v55 = vld [vmem:[%s13937_s20 + $0x20f8] sm:$0xff]  ;;  %v12301_v56 = vcombine.low %v1534_v43, %v1538_v44  ;;  %v12303_v57 = vcombine.low %v1535_v46, %v1539_v47  ;;  %v473_v46 = vld [vmem:[#allocation2 + $0x78] sm:$0xff] }
 0x4ed   : > { %v12312_v60 = vcombine.high %v1543_v54, %v1547_v55 }
 0x4ef   : > { %8204 = vmatpush1.bf16.msra.mxu0 %v12245_v63  ;;  %8591 = vmatpush1.bf16.msra.mxu1 %v12247_v0  ;;  %v1551_v63 = vld [vmem:[%s13937_s20 + $0x2118] sm:$0xff] }
 0x4f0   : > { %8205 = vmatprep.subr.bf16.mxu0 %v12254_v1  ;;  %8592 = vmatprep.subr.bf16.mxu1 %v12256_v2  ;;  %v1555_v0 = vld [vmem:[%s13937_s20 + $0x2138] sm:$0xff]  ;;  %v12309_v1 = vcombine.low %v1542_v52, %v1546_v53  ;;  %v12318_v2 = vcombine.high %v1550_v61, %v1554_v62 }
 0x4f1   : > { %v12320_v3 = vcombine.high %v1551_v63, %v1555_v0 }
 0x4f3   : > { %8206 = vmatpush1.bf16.msra.mxu0 %v12253_v7  ;;  %8593 = vmatpush1.bf16.msra.mxu1 %v12255_v8  ;;  %v1563_v7 = vld [vmem:[%s13937_s20 + $0x2178] sm:$0xff]  ;;  %v12317_v8 = vcombine.low %v1550_v61, %v1554_v62  ;;  %v12994_v61 = vld [vmem:[#allocation8 + $0x2c] ss:$16 sps:$4 sm:$0xff] (!%p12345_p13)  }
 0x4f4   : > { %8207 = vmatprep.subr.bf16.mxu0 %v12262_v9  ;;  %8594 = vmatprep.subr.bf16.mxu1 %v12264_v10  ;;  %v12319_v9 = vcombine.low %v1551_v63, %v1555_v0  ;;  %v12326_v10 = vcombine.high %v1558_v4, %v1562_v5  ;;  %v12328_v11 = vcombine.high %v1559_v6, %v1563_v7  ;;  %v12996_v62 = vld [vmem:[#allocation8 + $0x20] ss:$16 sps:$4 sm:$0xff] (!%p12345_p13)   ;;  %v12997_v63 = vld [vmem:[#allocation8 + $0x28] ss:$16 sps:$4 sm:$0xff] (!%p12345_p13)   ;;  %v12998_v0 = vld [vmem:[#allocation8 + $0x44] ss:$16 sps:$4 sm:$0xff] (!%p12345_p13)  }
 0x4f7   : > { %8208 = vmatpush1.bf16.msra.mxu0 %v12261_v15  ;;  %8595 = vmatpush1.bf16.msra.mxu1 %v12263_v16  ;;  %v1571_v15 = vld [vmem:[%s13937_s20 + $0x21b8] sm:$0xff]  ;;  %v12325_v16 = vcombine.low %v1558_v4, %v1562_v5  ;;  %v13006_v4 = vld [vmem:[#allocation8 + $0x6c] ss:$16 sps:$4 sm:$0xff] (!%p12345_p13)  }
 0x4f8   : > { %8209 = vmatprep.subr.bf16.mxu0 %v12270_v17  ;;  %8596 = vmatprep.subr.bf16.mxu1 %v12272_v18  ;;  %v12327_v17 = vcombine.low %v1559_v6, %v1563_v7  ;;  %v12334_v18 = vcombine.high %v1566_v12, %v1570_v13  ;;  %v12336_v19 = vcombine.high %v1567_v14, %v1571_v15  ;;  %v13008_v5 = vld [vmem:[#allocation8 + $0x60] ss:$16 sps:$4 sm:$0xff] (!%p12345_p13)   ;;  %v13009_v6 = vld [vmem:[#allocation8 + $0x68] ss:$16 sps:$4 sm:$0xff] (!%p12345_p13)   ;;  %v13010_v7 = vld [vmem:[#allocation8 + $0x84] ss:$16 sps:$4 sm:$0xff] (!%p12345_p13)  }
 0x4fb   : > { %8210 = vmatpush1.bf16.msra.mxu0 %v12269_v23  ;;  %8597 = vmatpush1.bf16.msra.mxu1 %v12271_v24  ;;  %v1579_v23 = vld [vmem:[%s13937_s20 + $0x21f8] sm:$0xff]  ;;  %v12333_v24 = vcombine.low %v1566_v12, %v1570_v13  ;;  %v13018_v12 = vld [vmem:[#allocation8 + $0xac] ss:$16 sps:$4 sm:$0xff] (!%p12345_p13)  }
 0x4fc   : > { %8211 = vmatprep.subr.bf16.mxu0 %v12278_v25  ;;  %8598 = vmatprep.subr.bf16.mxu1 %v12280_v26  ;;  %v12335_v25 = vcombine.low %v1567_v14, %v1571_v15  ;;  %v12342_v26 = vcombine.high %v1574_v20, %v1578_v21  ;;  %v12344_v27 = vcombine.high %v1575_v22, %v1579_v23  ;;  %v13020_v13 = vld [vmem:[#allocation8 + $0xa0] ss:$16 sps:$4 sm:$0xff] (!%p12345_p13)   ;;  %v13021_v14 = vld [vmem:[#allocation8 + $0xa8] ss:$16 sps:$4 sm:$0xff] (!%p12345_p13)   ;;  %v13022_v15 = vld [vmem:[#allocation8 + $0xc4] ss:$16 sps:$4 sm:$0xff] (!%p12345_p13)  }
 0x4fd   : > { %v12343_v29 = vcombine.low %v1575_v22, %v1579_v23  ;;  %v13030_v20 = vld [vmem:[#allocation8 + $0xec] ss:$16 sps:$4 sm:$0xff] (!%p12345_p13)   ;;  %v13032_v21 = vld [vmem:[#allocation8 + $0xe0] ss:$16 sps:$4 sm:$0xff] (!%p12345_p13)   ;;  %v13033_v22 = vld [vmem:[#allocation8 + $0xe8] ss:$16 sps:$4 sm:$0xff] (!%p12345_p13)  }
 0x4fe   : > { %v13034_v23 = vld [vmem:[#allocation8 + $0x104] ss:$16 sps:$4 sm:$0xff] (!%p12345_p13)  }
 0x4ff   : > { %8212 = vmatpush1.bf16.msra.mxu0 %v12277_v31  ;;  %8599 = vmatpush1.bf16.msra.mxu1 %v12279_v32  ;;  %v462_v31 = vld [vmem:[#allocation2 + $0x20] sm:$0xff]  ;;  %v464_v32 = vld [vmem:[#allocation2 + $0x30] sm:$0xff] }
 0x500   : > { %8224 = vmatprep.subr.bf16.mxu0 %v12286_v33  ;;  %8611 = vmatprep.subr.bf16.mxu1 %v12288_v34  ;;  %v463_v33 = vld [vmem:[#allocation2 + $0x28] sm:$0xff] }
 0x502   : > { %8214 = vmatmul.mubr.bf16.vlgmr.msra.gmra.mrb[4].mxu0 %v12984_v45  ;;  %8601 = vmatmul.mubr.bf16.vlgmr.msra.gmra.mrb[4].mxu1 %v12984_v45 }
 0x503   : > { %8225 = vmatpush1.bf16.msra.mxu0 %v12285_v39  ;;  %8612 = vmatpush1.bf16.msra.mxu1 %v12287_v40  ;;  %v472_v40 = vld [vmem:[#allocation2 + $0x70] sm:$0xff] }
 0x504   : > { %8226 = vmatprep.subr.bf16.mxu0 %v12294_v41  ;;  %8613 = vmatprep.subr.bf16.mxu1 %v12296_v42  ;;  %v471_v41 = vld [vmem:[#allocation2 + $0x68] sm:$0xff] }
 0x505   : > { %8256 = vmatprep.mubr.bf16.mxu0 %v13640_v59  ;;  %8643 = vmatprep.mubr.bf16.mxu1 %v13640_v59  ;;  %v12311_v59 = vcombine.low %v1543_v54, %v1547_v55  ;;  %v12986_v55 = vld [vmem:[#allocation8 + $0x4] ss:$16 sps:$4 sm:$0xff] (!%p12345_p13)  }
 0x507   : > { %8227 = vmatpush1.bf16.msra.mxu0 %v12293_v48  ;;  %8614 = vmatpush1.bf16.msra.mxu1 %v12295_v49 }
 0x508   : > { %8228 = vmatprep.subr.bf16.mxu0 %v12302_v50  ;;  %8615 = vmatprep.subr.bf16.mxu1 %v12304_v51 }
 0x50b   : > { %8229 = vmatpush1.bf16.msra.mxu0 %v12301_v56  ;;  %8616 = vmatpush1.bf16.msra.mxu1 %v12303_v57  ;;  %v12988_v56 = vld [vmem:[#allocation8 + $0xc] ss:$16 sps:$4 sm:$0xff] (!%p12345_p13)   ;;  %v12990_v57 = vld [vmem:[#allocation8] ss:$16 sps:$4 sm:$0xff] (!%p12345_p13)  }
 0x50c   : > { %8230 = vmatprep.subr.bf16.mxu0 %v12310_v58  ;;  %8617 = vmatprep.subr.bf16.mxu1 %v12312_v60  ;;  %v12991_v58 = vld [vmem:[#allocation8 + $0x8] ss:$16 sps:$4 sm:$0xff] (!%p12345_p13)   ;;  %v12992_v60 = vld [vmem:[#allocation8 + $0x24] ss:$16 sps:$4 sm:$0xff] (!%p12345_p13)  }
 0x50f   : > { %8231 = vmatpush1.bf16.msra.mxu0 %v12309_v1  ;;  %8618 = vmatpush1.bf16.msra.mxu1 %v12311_v59  ;;  %v13000_v1 = vld [vmem:[#allocation8 + $0x4c] ss:$16 sps:$4 sm:$0xff] (!%p12345_p13)   ;;  %v13002_v59 = vld [vmem:[#allocation8 + $0x40] ss:$16 sps:$4 sm:$0xff] (!%p12345_p13)  }
 0x510   : > { %8232 = vmatprep.subr.bf16.mxu0 %v12318_v2  ;;  %8619 = vmatprep.subr.bf16.mxu1 %v12320_v3  ;;  %v13003_v2 = vld [vmem:[#allocation8 + $0x48] ss:$16 sps:$4 sm:$0xff] (!%p12345_p13)   ;;  %v13004_v3 = vld [vmem:[#allocation8 + $0x64] ss:$16 sps:$4 sm:$0xff] (!%p12345_p13)  }
 0x513   : > { %8233 = vmatpush1.bf16.msra.mxu0 %v12317_v8  ;;  %8620 = vmatpush1.bf16.msra.mxu1 %v12319_v9  ;;  %v13012_v8 = vld [vmem:[#allocation8 + $0x8c] ss:$16 sps:$4 sm:$0xff] (!%p12345_p13)   ;;  %v13014_v9 = vld [vmem:[#allocation8 + $0x80] ss:$16 sps:$4 sm:$0xff] (!%p12345_p13)  }
 0x514   : > { %8234 = vmatprep.subr.bf16.mxu0 %v12326_v10  ;;  %8621 = vmatprep.subr.bf16.mxu1 %v12328_v11  ;;  %v13015_v10 = vld [vmem:[#allocation8 + $0x88] ss:$16 sps:$4 sm:$0xff] (!%p12345_p13)   ;;  %v13016_v11 = vld [vmem:[#allocation8 + $0xa4] ss:$16 sps:$4 sm:$0xff] (!%p12345_p13)  }
 0x517   : > { %8235 = vmatpush1.bf16.msra.mxu0 %v12325_v16  ;;  %8622 = vmatpush1.bf16.msra.mxu1 %v12327_v17  ;;  %v13024_v16 = vld [vmem:[#allocation8 + $0xcc] ss:$16 sps:$4 sm:$0xff] (!%p12345_p13)   ;;  %v13026_v17 = vld [vmem:[#allocation8 + $0xc0] ss:$16 sps:$4 sm:$0xff] (!%p12345_p13)  }
 0x518   : > { %8236 = vmatprep.subr.bf16.mxu0 %v12334_v18  ;;  %8623 = vmatprep.subr.bf16.mxu1 %v12336_v19  ;;  %v13027_v18 = vld [vmem:[#allocation8 + $0xc8] ss:$16 sps:$4 sm:$0xff] (!%p12345_p13)   ;;  %v13028_v19 = vld [vmem:[#allocation8 + $0xe4] ss:$16 sps:$4 sm:$0xff] (!%p12345_p13)  }
 0x51b   : > { %8237 = vmatpush1.bf16.msra.mxu0 %v12333_v24  ;;  %8624 = vmatpush1.bf16.msra.mxu1 %v12335_v25  ;;  %v13036_v24 = vld [vmem:[#allocation8 + $0x10c] ss:$16 sps:$4 sm:$0xff] (!%p12345_p13)   ;;  %v13038_v25 = vld [vmem:[#allocation8 + $0x100] ss:$16 sps:$4 sm:$0xff] (!%p12345_p13)  }
 0x51c   : > { %8238 = vmatprep.subr.bf16.mxu0 %v12342_v26  ;;  %8625 = vmatprep.subr.bf16.mxu1 %v12344_v27  ;;  %v13039_v26 = vld [vmem:[#allocation8 + $0x108] ss:$16 sps:$4 sm:$0xff] (!%p12345_p13)   ;;  %v13040_v27 = vld [vmem:[#allocation8 + $0x124] ss:$16 sps:$4 sm:$0xff] (!%p12345_p13)  }
 0x51f   : > { %8239 = vmatpush1.bf16.msra.mxu0 %v12341_v28  ;;  %8626 = vmatpush1.bf16.msra.mxu1 %v12343_v29  ;;  %v8708_v28 = vlaneseq (!%p12345_p13)  ;;  %v13042_v29 = vld [vmem:[#allocation8 + $0x12c] ss:$16 sps:$4 sm:$0xff] (!%p12345_p13)  }
 0x520   : > { %10378 = vmatprep.subr.bf16.mxu0 (!%p12345_p13), %v12986_v55  ;;  %10550 = vmatprep.subr.bf16.mxu1 (!%p12345_p13), %v12988_v56 }
 0x522   : > { %8257 = vmatmul.mubr.bf16.vlgmr.msra.gmra.mrb[4].mxu0 %v12985_v30  ;;  %8644 = vmatmul.mubr.bf16.vlgmr.msra.gmra.mrb[4].mxu1 %v12985_v30  ;;  %v13044_v30 = vld [vmem:[#allocation8 + $0x120] ss:$16 sps:$4 sm:$0xff] (!%p12345_p13)  }
 0x523   : > { %10379 = vmatpush1.bf16.msra.mxu0 (!%p12345_p13), %v12990_v57  ;;  %10551 = vmatpush1.bf16.msra.mxu1 (!%p12345_p13), %v12991_v58  ;;  %v13066_v57 = vld [vmem:[#allocation8 + $0x1ac] ss:$16 sps:$4 sm:$0xff] (!%p12345_p13)  }
 0x524   : > { %10380 = vmatprep.subr.bf16.mxu0 (!%p12345_p13), %v12992_v60  ;;  %10552 = vmatprep.subr.bf16.mxu1 (!%p12345_p13), %v12994_v61  ;;  %v8690_v58 = vld [vmem:[#allocation2] sm:$0xff] (!%p12345_p13) }
 0x525   : > { %v8698_v60 = vld [vmem:[#allocation2 + $0x40] sm:$0xff] (!%p12345_p13) }
 0x527   : > { %10381 = vmatpush1.bf16.msra.mxu0 (!%p12345_p13), %v12996_v62  ;;  %10553 = vmatpush1.bf16.msra.mxu1 (!%p12345_p13), %v12997_v63  ;;  %v13068_v63 = vld [vmem:[#allocation8 + $0x1a0] ss:$16 sps:$4 sm:$0xff] (!%p12345_p13)  }
 0x528   : > { %10382 = vmatprep.subr.bf16.mxu0 (!%p12345_p13), %v12998_v0  ;;  %10554 = vmatprep.subr.bf16.mxu1 (!%p12345_p13), %v13000_v1  ;;  %v13069_v1 = vld [vmem:[#allocation8 + $0x1a8] ss:$16 sps:$4 sm:$0xff] (!%p12345_p13)  }
 0x52b   : > { %10383 = vmatpush1.bf16.msra.mxu0 (!%p12345_p13), %v13002_v59  ;;  %10555 = vmatpush1.bf16.msra.mxu1 (!%p12345_p13), %v13003_v2  ;;  %v13070_v59 = vld [vmem:[#allocation8 + $0x1c4] ss:$16 sps:$4 sm:$0xff] (!%p12345_p13)  }
 0x52c   : > { %10384 = vmatprep.subr.bf16.mxu0 (!%p12345_p13), %v13004_v3  ;;  %10556 = vmatprep.subr.bf16.mxu1 (!%p12345_p13), %v13006_v4  ;;  %v13072_v4 = vld [vmem:[#allocation8 + $0x1cc] ss:$16 sps:$4 sm:$0xff] (!%p12345_p13)  }
 0x52f   : > { %10385 = vmatpush1.bf16.msra.mxu0 (!%p12345_p13), %v13008_v5  ;;  %10557 = vmatpush1.bf16.msra.mxu1 (!%p12345_p13), %v13009_v6  ;;  %v13074_v5 = vld [vmem:[#allocation8 + $0x1c0] ss:$16 sps:$4 sm:$0xff] (!%p12345_p13)   ;;  %v13075_v6 = vld [vmem:[#allocation8 + $0x1c8] ss:$16 sps:$4 sm:$0xff] (!%p12345_p13)  }
 0x530   : > { %10386 = vmatprep.subr.bf16.mxu0 (!%p12345_p13), %v13010_v7  ;;  %10558 = vmatprep.subr.bf16.mxu1 (!%p12345_p13), %v13012_v8  ;;  %v13076_v7 = vld [vmem:[#allocation8 + $0x1e4] ss:$16 sps:$4 sm:$0xff] (!%p12345_p13)  }
 0x533   : > { %10387 = vmatpush1.bf16.msra.mxu0 (!%p12345_p13), %v13014_v9  ;;  %10559 = vmatpush1.bf16.msra.mxu1 (!%p12345_p13), %v13015_v10  ;;  %v13078_v10 = vld [vmem:[#allocation8 + $0x1ec] ss:$16 sps:$4 sm:$0xff] (!%p12345_p13)  }
 0x534   : > { %10388 = vmatprep.subr.bf16.mxu0 (!%p12345_p13), %v13016_v11  ;;  %10560 = vmatprep.subr.bf16.mxu1 (!%p12345_p13), %v13018_v12  ;;  %v13080_v11 = vld [vmem:[#allocation8 + $0x1e0] ss:$16 sps:$4 sm:$0xff] (!%p12345_p13)   ;;  %v13081_v12 = vld [vmem:[#allocation8 + $0x1e8] ss:$16 sps:$4 sm:$0xff] (!%p12345_p13)  }
 0x537   : > { %10389 = vmatpush1.bf16.msra.mxu0 (!%p12345_p13), %v13020_v13  ;;  %10561 = vmatpush1.bf16.msra.mxu1 (!%p12345_p13), %v13021_v14  ;;  %v13084_v13 = vld [vmem:[#allocation8 + $0x204] ss:$16 sps:$4 sm:$0xff] (!%p12345_p13)  }
 0x538   : > { %10390 = vmatprep.subr.bf16.mxu0 (!%p12345_p13), %v13022_v15  ;;  %10562 = vmatprep.subr.bf16.mxu1 (!%p12345_p13), %v13024_v16  ;;  %v13087_v16 = vld [vmem:[#allocation8 + $0x20c] ss:$16 sps:$4 sm:$0xff] (!%p12345_p13)  }
 0x53b   : > { %10391 = vmatpush1.bf16.msra.mxu0 (!%p12345_p13), %v13026_v17  ;;  %10563 = vmatpush1.bf16.msra.mxu1 (!%p12345_p13), %v13027_v18  ;;  %v13082_v17 = vld [vmem:[#allocation8 + $0x200] ss:$16 sps:$4 sm:$0xff] (!%p12345_p13)  }
 0x53c   : > { %10392 = vmatprep.subr.bf16.mxu0 (!%p12345_p13), %v13028_v19  ;;  %10564 = vmatprep.subr.bf16.mxu1 (!%p12345_p13), %v13030_v20  ;;  %v13085_v19 = vld [vmem:[#allocation8 + $0x208] ss:$16 sps:$4 sm:$0xff] (!%p12345_p13)   ;;  %v13090_v20 = vld [vmem:[#allocation8 + $0x224] ss:$16 sps:$4 sm:$0xff] (!%p12345_p13)  }
 0x53f   : > { %10393 = vmatpush1.bf16.msra.mxu0 (!%p12345_p13), %v13032_v21  ;;  %10565 = vmatpush1.bf16.msra.mxu1 (!%p12345_p13), %v13033_v22  ;;  %v13093_v21 = vld [vmem:[#allocation8 + $0x22c] ss:$16 sps:$4 sm:$0xff] (!%p12345_p13)   ;;  %v13088_v22 = vld [vmem:[#allocation8 + $0x220] ss:$16 sps:$4 sm:$0xff] (!%p12345_p13)  }
 0x540   : > { %10394 = vmatprep.subr.bf16.mxu0 (!%p12345_p13), %v13034_v23  ;;  %10566 = vmatprep.subr.bf16.mxu1 (!%p12345_p13), %v13036_v24  ;;  %v13091_v23 = vld [vmem:[#allocation8 + $0x228] ss:$16 sps:$4 sm:$0xff] (!%p12345_p13)   ;;  %v13096_v24 = vld [vmem:[#allocation8 + $0x244] ss:$16 sps:$4 sm:$0xff] (!%p12345_p13)  }
 0x543   : > { %10395 = vmatpush1.bf16.msra.mxu0 (!%p12345_p13), %v13038_v25  ;;  %10567 = vmatpush1.bf16.msra.mxu1 (!%p12345_p13), %v13039_v26  ;;  %v13099_v25 = vld [vmem:[#allocation8 + $0x24c] ss:$16 sps:$4 sm:$0xff] (!%p12345_p13)   ;;  %v13094_v26 = vld [vmem:[#allocation8 + $0x240] ss:$16 sps:$4 sm:$0xff] (!%p12345_p13)  }
 0x544   : > { %10396 = vmatprep.subr.bf16.mxu0 (!%p12345_p13), %v13040_v27  ;;  %10568 = vmatprep.subr.bf16.mxu1 (!%p12345_p13), %v13042_v29  ;;  %v13097_v27 = vld [vmem:[#allocation8 + $0x248] ss:$16 sps:$4 sm:$0xff] (!%p12345_p13)   ;;  %v13105_v29 = vld [vmem:[#allocation8 + $0x26c] ss:$16 sps:$4 sm:$0xff] (!%p12345_p13)  }
 0x547   : > { %10397 = vmatpush1.bf16.msra.mxu0 (!%p12345_p13), %v13044_v30  ;;  %v13100_v30 = vld [vmem:[#allocation8 + $0x260] ss:$16 sps:$4 sm:$0xff] (!%p12345_p13)  }
 0x5f5   : > { %v8258_v34 = vpop.f32.mrb[4].mxu0  ;;  %v8645_v38 = vpop.f32.mrb[4].mxu1  ;;  %8689 = sbr.rel (%p12345_p13) target bundleno = 2218 (0x8aa), region = 106 }
 0x5f6   : > { %v8658_v37 = vadd.f32 %v8258_v34, %v462_v31  ;;  %v8260_v39 = vpop.f32.mrb[5].mxu0  ;;  %v8660_v42 = vadd.f32 %v8645_v38, %v464_v32  ;;  %v8647_v44 = vpop.f32.mrb[5].mxu1  ;;  %v13045_v31 = vld [vmem:[#allocation8 + $0x128] ss:$16 sps:$4 sm:$0xff] (!%p12345_p13)   ;;  %v13046_v32 = vld [vmem:[#allocation8 + $0x144] ss:$16 sps:$4 sm:$0xff] (!%p12345_p13)  }
 0x5f7   : > { %v8659_v43 = vadd.f32 %v8260_v39, %v463_v33  ;;  %v8262_v45 = vpop.f32.mrb[6].mxu0  ;;  %v8661_v47 = vadd.f32 %v8647_v44, %v465_v35  ;;  %v8649_v49 = vpop.f32.mrb[6].mxu1  ;;  %v15084_v33 = vshrl.u32 (!%p12345_p13), %v8708_v28, 7  ;;  %v13048_v34 = vld [vmem:[#allocation8 + $0x14c] ss:$16 sps:$4 sm:$0xff] (!%p12345_p13)   ;;  %10569 = vmatpush1.bf16.msra.mxu1 (!%p12345_p13), %v13045_v31  ;;  %10398 = vmatprep.subr.bf16.mxu0 (!%p12345_p13), %v13046_v32 }
 0x5f8   : > { %8674 = vst [vmem:[#allocation2 + $0x20] sm:$0xff] %v8658_v37  ;;  %v8666_v48 = vadd.f32 %v8262_v45, %v470_v36  ;;  %v8264_v50 = vpop.f32.mrb[7].mxu0  ;;  %8676 = vst [vmem:[#allocation2 + $0x30] sm:$0xff] %v8660_v42  ;;  %v8668_v51 = vadd.f32 %v8649_v49, %v472_v40  ;;  %v8651_v53 = vpop.f32.mrb[7].mxu1  ;;  %v13050_v35 = vld [vmem:[#allocation8 + $0x140] ss:$16 sps:$4 sm:$0xff] (!%p12345_p13)   ;;  %10570 = vmatprep.subr.bf16.mxu1 (!%p12345_p13), %v13048_v34 }
 0x5f9   : > { %8675 = vst [vmem:[#allocation2 + $0x28] sm:$0xff] %v8659_v43  ;;  %v8667_v52 = vadd.f32 %v8264_v50, %v471_v41  ;;  %8677 = vst [vmem:[#allocation2 + $0x38] sm:$0xff] %v8661_v47  ;;  %v8669_v54 = vadd.f32 %v8651_v53, %v473_v46  ;;  %v13051_v36 = vld [vmem:[#allocation8 + $0x148] ss:$16 sps:$4 sm:$0xff] (!%p12345_p13)   ;;  %v13052_v37 = vld [vmem:[#allocation8 + $0x164] ss:$16 sps:$4 sm:$0xff] (!%p12345_p13)   ;;  %10399 = vmatpush1.bf16.msra.mxu0 (!%p12345_p13), %v13050_v35 }
 0x5fa   : > { %8682 = vst [vmem:[#allocation2 + $0x60] sm:$0xff] %v8666_v48  ;;  %8684 = vst [vmem:[#allocation2 + $0x70] sm:$0xff] %v8668_v51  ;;  %v8714_v38 = vsub.s32 (!%p12345_p13), 1, %v15084_v33  ;;  %v13054_v39 = vld [vmem:[#allocation8 + $0x16c] ss:$16 sps:$4 sm:$0xff] (!%p12345_p13)   ;;  %v8691_v41 = vld [vmem:[#allocation2 + $0x8] sm:$0xff] (!%p12345_p13)  ;;  %10400 = vmatprep.subr.bf16.mxu0 (!%p12345_p13), %v13052_v37 }
 0x5fb   : > { %8683 = vst [vmem:[#allocation2 + $0x68] sm:$0xff] %v8667_v52  ;;  %8685 = vst [vmem:[#allocation2 + $0x78] sm:$0xff] %v8669_v54  ;;  %v13056_v40 = vld [vmem:[#allocation8 + $0x160] ss:$16 sps:$4 sm:$0xff] (!%p12345_p13)   ;;  %v15087_v43 = vld [vmem:[#allocation6] sm:$0xff] (!%p12345_p13)  ;;  %v8710_v44 = vsub.s32 (!%p12345_p13), 0, %v15084_v33  ;;  %10571 = vmatpush1.bf16.msra.mxu1 (!%p12345_p13), %v13051_v36 }
 0x5fc   : > { %v8699_v42 = vld [vmem:[#allocation2 + $0x48] sm:$0xff]  ;;  %v13057_v45 = vld [vmem:[#allocation8 + $0x168] ss:$16 sps:$4 sm:$0xff]   ;;  %v8715_v47 = vrot.slane %v15087_v43, %v8714_v38  ;;  %10572 = vmatprep.subr.bf16.mxu1 %v13054_v39  ;;  %v13060_v48 = vld [vmem:[#allocation8 + $0x18c] ss:$16 sps:$4 sm:$0xff]  }
 0x5fd   : > { %v13058_v46 = vld [vmem:[#allocation8 + $0x184] ss:$16 sps:$4 sm:$0xff]   ;;  %v13062_v49 = vld [vmem:[#allocation8 + $0x180] ss:$16 sps:$4 sm:$0xff]   ;;  %v13063_v50 = vld [vmem:[#allocation8 + $0x188] ss:$16 sps:$4 sm:$0xff]   ;;  %v8711_v54 = vrot.slane %v15087_v43, %v8710_v44  ;;  %10401 = vmatpush1.bf16.msra.mxu0 %v13056_v40 }
 0x5fe   : > { %v8749_v51 = vadd.f32 %v8715_v47, %v8691_v41  ;;  %v8757_v52 = vadd.f32 %v8715_v47, %v8699_v42  ;;  %v13064_v53 = vld [vmem:[#allocation8 + $0x1a4] ss:$16 sps:$4 sm:$0xff]   ;;  %10402 = vmatprep.subr.bf16.mxu0 %v13058_v46  ;;  %v13103_v31 = vld [vmem:[#allocation8 + $0x268] ss:$16 sps:$4 sm:$0xff]   ;;  %v13111_v34 = vld [vmem:[#allocation8 + $0x28c] ss:$16 sps:$4 sm:$0xff]  }
 0x5ff   : > { %10573 = vmatpush1.bf16.msra.mxu1 %v13057_v45  ;;  %v8748_v2 = vadd.f32 %v8711_v54, %v8690_v58  ;;  %v8756_v3 = vadd.f32 %v8711_v54, %v8698_v60  ;;  %v13102_v28 = vld [vmem:[#allocation8 + $0x264] ss:$16 sps:$4 sm:$0xff]   ;;  %v13106_v35 = vld [vmem:[#allocation8 + $0x280] ss:$16 sps:$4 sm:$0xff]   ;;  %v13109_v36 = vld [vmem:[#allocation8 + $0x288] ss:$16 sps:$4 sm:$0xff]  }
 0x600   : > { %vm8765_vm0 = vcmp.gt.f32.partialorder %v8749_v51, 0.0  ;;  %vm8773_vm1 = vcmp.gt.f32.partialorder %v8757_v52, 0.0  ;;  %v8781_v55 = vmul.f32 0.2, %v8749_v51  ;;  %v8789_v56 = vmul.f32 0.2, %v8757_v52  ;;  %10574 = vmatprep.subr.bf16.mxu1 %v13060_v48 }
 0x601   : > { %10403 = vmatpush1.bf16.msra.mxu0 %v13062_v49  ;;  %v8780_v8 = vmul.f32 0.2, %v8748_v2  ;;  %v8788_v9 = vmul.f32 0.2, %v8756_v3  ;;  %vm8764_vm2 = vcmp.gt.f32.partialorder %v8748_v2, 0.0  ;;  %vm8772_vm3 = vcmp.gt.f32.partialorder %v8756_v3, 0.0 }
 0x602   : > { %v8797_v61 = vsel %vm8765_vm0, %v8749_v51, %v8781_v55  ;;  %v8805_v62 = vsel %vm8773_vm1, %v8757_v52, %v8789_v56  ;;  %10404 = vmatprep.subr.bf16.mxu0 %v13064_v53  ;;  %v13108_v32 = vld [vmem:[#allocation8 + $0x284] ss:$16 sps:$4 sm:$0xff]   ;;  %v13117_v39 = vld [vmem:[#allocation8 + $0x2ac] ss:$16 sps:$4 sm:$0xff]   ;;  %v8722_v40 = vsub.s32 3, %v15084_v33 }
 0x603   : > { %v8813_v0 = vpack.c.bf16 %v8805_v62, %v8797_v61  ;;  %10575 = vmatpush1.bf16.msra.mxu1 %v13063_v50  ;;  %v8796_v14 = vsel %vm8764_vm2, %v8748_v2, %v8780_v8  ;;  %v8804_v15 = vsel %vm8772_vm3, %v8756_v3, %v8788_v9  ;;  %v13114_v37 = vld [vmem:[#allocation8 + $0x2a4] ss:$16 sps:$4 sm:$0xff]   ;;  %v13112_v41 = vld [vmem:[#allocation8 + $0x2a0] ss:$16 sps:$4 sm:$0xff]   ;;  %v13115_v42 = vld [vmem:[#allocation8 + $0x2a8] ss:$16 sps:$4 sm:$0xff]  }
 0x604   : > { %10576 = vmatprep.subr.bf16.mxu1 %v13066_v57  ;;  %v8812_v18 = vpack.c.bf16 %v8804_v15, %v8796_v14  ;;  %v13120_v45 = vld [vmem:[#allocation8 + $0x2c4] ss:$16 sps:$4 sm:$0xff]   ;;  %v13123_v46 = vld [vmem:[#allocation8 + $0x2cc] ss:$16 sps:$4 sm:$0xff]   ;;  %v8723_v47 = vrot.slane %v15087_v43, %v8722_v40  ;;  %v13118_v48 = vld [vmem:[#allocation8 + $0x2c0] ss:$16 sps:$4 sm:$0xff]  }
 0x605   : > { %10410 = vmatprep.mubr.bf16.mxu0 %v8813_v0  ;;  %10582 = vmatprep.mubr.bf16.mxu1 %v8813_v0  ;;  %v13121_v49 = vld [vmem:[#allocation8 + $0x2c8] ss:$16 sps:$4 sm:$0xff]   ;;  %v13126_v50 = vld [vmem:[#allocation8 + $0x2e4] ss:$16 sps:$4 sm:$0xff]   ;;  %v13129_v51 = vld [vmem:[#allocation8 + $0x2ec] ss:$16 sps:$4 sm:$0xff]  }
 0x606   : > { %10405 = vmatpush1.bf16.msra.mxu0 %v13068_v63  ;;  %v8693_v52 = vld [vmem:[#allocation2 + $0x18] sm:$0xff]  ;;  %v13127_v57 = vld [vmem:[#allocation8 + $0x2e8] ss:$16 sps:$4 sm:$0xff]   ;;  %v13135_v62 = vld [vmem:[#allocation8 + $0x30c] ss:$16 sps:$4 sm:$0xff]   ;;  %v8718_v15 = vsub.s32 2, %v15084_v33 }
 0x607   : > { %10577 = vmatpush1.bf16.msra.mxu1 %v13069_v1  ;;  %10406 = vmatprep.subr.bf16.mxu0 %v13070_v59  ;;  %v8701_v53 = vld [vmem:[#allocation2 + $0x58] sm:$0xff]  ;;  %v8751_v55 = vadd.f32 %v8723_v47, %v8693_v52  ;;  %v13133_v2 = vld [vmem:[#allocation8 + $0x308] ss:$16 sps:$4 sm:$0xff]   ;;  %v13147_v8 = vld [vmem:[#allocation8 + $0x34c] ss:$16 sps:$4 sm:$0xff]  }
 0x608   : > { %10578 = vmatprep.subr.bf16.mxu1 %v13072_v4  ;;  %v13124_v54 = vld [vmem:[#allocation8 + $0x2e0] ss:$16 sps:$4 sm:$0xff]   ;;  %v8759_v56 = vadd.f32 %v8723_v47, %v8701_v53  ;;  %v13132_v61 = vld [vmem:[#allocation8 + $0x304] ss:$16 sps:$4 sm:$0xff]   ;;  %v13141_v4 = vld [vmem:[#allocation8 + $0x32c] ss:$16 sps:$4 sm:$0xff]  }
 0x609   : > { %vm8767_vm4 = vcmp.gt.f32.partialorder %v8751_v55, 0.0  ;;  %v8783_v58 = vmul.f32 0.2, %v8751_v55  ;;  %v13130_v59 = vld [vmem:[#allocation8 + $0x300] ss:$16 sps:$4 sm:$0xff]  }
 0x60a   : > { %10407 = vmatpush1.bf16.msra.mxu0 %v13074_v5  ;;  %vm8775_vm5 = vcmp.gt.f32.partialorder %v8759_v56, 0.0  ;;  %v8791_v60 = vmul.f32 0.2, %v8759_v56  ;;  %v13138_v3 = vld [vmem:[#allocation8 + $0x324] ss:$16 sps:$4 sm:$0xff]  }
 0x60b   : > { %10579 = vmatpush1.bf16.msra.mxu1 %v13075_v6  ;;  %10408 = vmatprep.subr.bf16.mxu0 %v13076_v7  ;;  %v8799_v63 = vsel %vm8767_vm4, %v8751_v55, %v8783_v58  ;;  %v13136_v5 = vld [vmem:[#allocation8 + $0x320] ss:$16 sps:$4 sm:$0xff]   ;;  %v13139_v6 = vld [vmem:[#allocation8 + $0x328] ss:$16 sps:$4 sm:$0xff]   ;;  %v13144_v7 = vld [vmem:[#allocation8 + $0x344] ss:$16 sps:$4 sm:$0xff]  }
 0x60c   : > { %10580 = vmatprep.subr.bf16.mxu1 %v13078_v10  ;;  %v8807_v0 = vsel %vm8775_vm5, %v8759_v56, %v8791_v60  ;;  %v13142_v9 = vld [vmem:[#allocation8 + $0x340] ss:$16 sps:$4 sm:$0xff]   ;;  %v13145_v10 = vld [vmem:[#allocation8 + $0x348] ss:$16 sps:$4 sm:$0xff]   ;;  %v13183_v47 = vld [vmem:[#allocation8 + $0x40c] ss:$16 sps:$4 sm:$0xff]  }
 0x60d   : > { %v8815_v1 = vpack.c.bf16 %v8807_v0, %v8799_v63  ;;  %v13151_v14 = vld [vmem:[#allocation8 + $0x368] ss:$16 sps:$4 sm:$0xff]   ;;  %v13186_v52 = vld [vmem:[#allocation8 + $0x424] ss:$16 sps:$4 sm:$0xff]   ;;  %v13189_v53 = vld [vmem:[#allocation8 + $0x42c] ss:$16 sps:$4 sm:$0xff]  }
 0x60e   : > { %10409 = vmatpush1.bf16.msra.mxu0 %v13080_v11  ;;  %v13150_v11 = vld [vmem:[#allocation8 + $0x364] ss:$16 sps:$4 sm:$0xff]   ;;  %v13187_v55 = vld [vmem:[#allocation8 + $0x428] ss:$16 sps:$4 sm:$0xff]   ;;  %v13195_v58 = vld [vmem:[#allocation8 + $0x44c] ss:$16 sps:$4 sm:$0xff]  }
 0x60f   : > { %10581 = vmatpush1.bf16.msra.mxu1 %v13081_v12  ;;  %10421 = vmatprep.subr.bf16.mxu0 %v13084_v13  ;;  %v13153_v12 = vld [vmem:[#allocation8 + $0x36c] ss:$16 sps:$4 sm:$0xff]   ;;  %v13148_v13 = vld [vmem:[#allocation8 + $0x360] ss:$16 sps:$4 sm:$0xff]   ;;  %v13193_v63 = vld [vmem:[#allocation8 + $0x448] ss:$16 sps:$4 sm:$0xff]  }
 0x610   : > { %10593 = vmatprep.subr.bf16.mxu1 %v13087_v16  ;;  %v13156_v16 = vld [vmem:[#allocation8 + $0x384] ss:$16 sps:$4 sm:$0xff]   ;;  %v13190_v60 = vld [vmem:[#allocation8 + $0x440] ss:$16 sps:$4 sm:$0xff]  }
 0x611   : > { %10411 = vmatmul.mubr.bf16.vlgmr.msra.gmra.mrb[0].mxu0 %v8812_v18  ;;  %v13198_v0 = vld [vmem:[#allocation8 + $0x464] ss:$16 sps:$4 sm:$0xff]  }
 0x612   : > { %10583 = vmatmul.mubr.bf16.vlgmr.msra.gmra.mrb[0].mxu1 %v8812_v18  ;;  %10422 = vmatpush1.bf16.msra.mxu0 %v13082_v17  ;;  %v13159_v17 = vld [vmem:[#allocation8 + $0x38c] ss:$16 sps:$4 sm:$0xff]   ;;  %v13154_v18 = vld [vmem:[#allocation8 + $0x380] ss:$16 sps:$4 sm:$0xff]  }
 0x613   : > { %10594 = vmatpush1.bf16.msra.mxu1 %v13085_v19  ;;  %10423 = vmatprep.subr.bf16.mxu0 %v13090_v20  ;;  %v13157_v19 = vld [vmem:[#allocation8 + $0x388] ss:$16 sps:$4 sm:$0xff]   ;;  %v13162_v20 = vld [vmem:[#allocation8 + $0x3a4] ss:$16 sps:$4 sm:$0xff]  }
 0x614   : > { %10595 = vmatprep.subr.bf16.mxu1 %v13093_v21  ;;  %10453 = vmatprep.mubr.bf16.mxu0 %v8815_v1  ;;  %v13165_v21 = vld [vmem:[#allocation8 + $0x3ac] ss:$16 sps:$4 sm:$0xff]  }
 0x615   : > { %10625 = vmatprep.mubr.bf16.mxu1 %v8815_v1 }
 0x616   : > { %10424 = vmatpush1.bf16.msra.mxu0 %v13088_v22  ;;  %v8719_v22 = vrot.slane %v15087_v43, %v8718_v15 }
 0x617   : > { %10596 = vmatpush1.bf16.msra.mxu1 %v13091_v23  ;;  %10425 = vmatprep.subr.bf16.mxu0 %v13096_v24  ;;  %v8692_v23 = vld [vmem:[#allocation2 + $0x10] sm:$0xff] }
 0x618   : > { %10597 = vmatprep.subr.bf16.mxu1 %v13099_v25  ;;  %v8700_v24 = vld [vmem:[#allocation2 + $0x50] sm:$0xff]  ;;  %v13160_v25 = vld [vmem:[#allocation8 + $0x3a0] ss:$16 sps:$4 sm:$0xff]  }
 0x61a   : > { %10426 = vmatpush1.bf16.msra.mxu0 %v13094_v26  ;;  %v13163_v26 = vld [vmem:[#allocation8 + $0x3a8] ss:$16 sps:$4 sm:$0xff]  }
 0x61b   : > { %10598 = vmatpush1.bf16.msra.mxu1 %v13097_v27  ;;  %10427 = vmatprep.subr.bf16.mxu0 %v13102_v28  ;;  %v8750_v27 = vadd.f32 %v8719_v22, %v8692_v23  ;;  %v8758_v28 = vadd.f32 %v8719_v22, %v8700_v24  ;;  %v13222_v22 = vld [vmem:[#allocation8 + $0x4e4] ss:$16 sps:$4 sm:$0xff]   ;;  %v13225_v23 = vld [vmem:[#allocation8 + $0x4ec] ss:$16 sps:$4 sm:$0xff]   ;;  %v13220_v24 = vld [vmem:[#allocation8 + $0x4e0] ss:$16 sps:$4 sm:$0xff]  }
 0x61c   : > { %10599 = vmatprep.subr.bf16.mxu1 %v13105_v29  ;;  %v13168_v29 = vld [vmem:[#allocation8 + $0x3c4] ss:$16 sps:$4 sm:$0xff]  }
 0x61d   : > { %vm8766_vm6 = vcmp.gt.f32.partialorder %v8750_v27, 0.0  ;;  %vm8774_vm7 = vcmp.gt.f32.partialorder %v8758_v28, 0.0 }
 0x61e   : > { %10428 = vmatpush1.bf16.msra.mxu0 %v13100_v30  ;;  %v13171_v30 = vld [vmem:[#allocation8 + $0x3cc] ss:$16 sps:$4 sm:$0xff]  }
 0x61f   : > { %10600 = vmatpush1.bf16.msra.mxu1 %v13103_v31  ;;  %10429 = vmatprep.subr.bf16.mxu0 %v13108_v32  ;;  %v13166_v31 = vld [vmem:[#allocation8 + $0x3c0] ss:$16 sps:$4 sm:$0xff]   ;;  %v13169_v32 = vld [vmem:[#allocation8 + $0x3c8] ss:$16 sps:$4 sm:$0xff]  }
 0x620   : > { %10601 = vmatprep.subr.bf16.mxu1 %v13111_v34  ;;  %v13174_v34 = vld [vmem:[#allocation8 + $0x3e4] ss:$16 sps:$4 sm:$0xff]  }
 0x622   : > { %10430 = vmatpush1.bf16.msra.mxu0 %v13106_v35  ;;  %v8782_v35 = vmul.f32 0.2, %v8750_v27 }
 0x623   : > { %10602 = vmatpush1.bf16.msra.mxu1 %v13109_v36  ;;  %10431 = vmatprep.subr.bf16.mxu0 %v13114_v37  ;;  %v8790_v36 = vmul.f32 0.2, %v8758_v28  ;;  %v13177_v37 = vld [vmem:[#allocation8 + $0x3ec] ss:$16 sps:$4 sm:$0xff]  }
 0x624   : > { %10603 = vmatprep.subr.bf16.mxu1 %v13117_v39  ;;  %v13172_v39 = vld [vmem:[#allocation8 + $0x3e0] ss:$16 sps:$4 sm:$0xff]  }
 0x626   : > { %10432 = vmatpush1.bf16.msra.mxu0 %v13112_v41  ;;  %v13175_v41 = vld [vmem:[#allocation8 + $0x3e8] ss:$16 sps:$4 sm:$0xff]  }
 0x627   : > { %10604 = vmatpush1.bf16.msra.mxu1 %v13115_v42  ;;  %10433 = vmatprep.subr.bf16.mxu0 %v13120_v45  ;;  %v8798_v42 = vsel %vm8766_vm6, %v8750_v27, %v8782_v35  ;;  %v8806_v45 = vsel %vm8774_vm7, %v8758_v28, %v8790_v36  ;;  %v13231_v27 = vld [vmem:[#allocation8 + $0x50c] ss:$16 sps:$4 sm:$0xff]   ;;  %v13226_v28 = vld [vmem:[#allocation8 + $0x500] ss:$16 sps:$4 sm:$0xff]   ;;  %v13240_v35 = vld [vmem:[#allocation8 + $0x544] ss:$16 sps:$4 sm:$0xff]  }
 0x628   : > { %10605 = vmatprep.subr.bf16.mxu1 %v13123_v46  ;;  %v13180_v46 = vld [vmem:[#allocation8 + $0x404] ss:$16 sps:$4 sm:$0xff]   ;;  %v13243_v36 = vld [vmem:[#allocation8 + $0x54c] ss:$16 sps:$4 sm:$0xff]  }
 0x62a   : > { %10434 = vmatpush1.bf16.msra.mxu0 %v13118_v48  ;;  %v13178_v48 = vld [vmem:[#allocation8 + $0x400] ss:$16 sps:$4 sm:$0xff]  }
 0x62b   : > { %10606 = vmatpush1.bf16.msra.mxu1 %v13121_v49  ;;  %10435 = vmatprep.subr.bf16.mxu0 %v13126_v50  ;;  %v8814_v49 = vpack.c.bf16 %v8806_v45, %v8798_v42  ;;  %v13181_v50 = vld [vmem:[#allocation8 + $0x408] ss:$16 sps:$4 sm:$0xff]   ;;  %v13249_v42 = vld [vmem:[#allocation8 + $0x56c] ss:$16 sps:$4 sm:$0xff]   ;;  %v13244_v45 = vld [vmem:[#allocation8 + $0x560] ss:$16 sps:$4 sm:$0xff]  }
 0x62c   : > { %10607 = vmatprep.subr.bf16.mxu1 %v13129_v51  ;;  %v8730_v51 = vsub.s32 5, %v15084_v33 }
 0x62e   : > { %10436 = vmatpush1.bf16.msra.mxu0 %v13124_v54  ;;  %v13184_v54 = vld [vmem:[#allocation8 + $0x420] ss:$16 sps:$4 sm:$0xff]   ;;  %v8731_v56 = vrot.slane %v15087_v43, %v8730_v51 }
 0x62f   : > { %10608 = vmatpush1.bf16.msra.mxu1 %v13127_v57  ;;  %10437 = vmatprep.subr.bf16.mxu0 %v13132_v61  ;;  %v13192_v57 = vld [vmem:[#allocation8 + $0x444] ss:$16 sps:$4 sm:$0xff]   ;;  %v13250_v51 = vld [vmem:[#allocation8 + $0x580] ss:$16 sps:$4 sm:$0xff]  }
 0x630   : > { %10609 = vmatprep.subr.bf16.mxu1 %v13135_v62  ;;  %v8695_v61 = vld [vmem:[#allocation2 + $0x28] sm:$0xff] }
 0x631   : > { %v8703_v62 = vld [vmem:[#allocation2 + $0x68] sm:$0xff]  ;;  %v8753_v1 = vadd.f32 %v8731_v56, %v8695_v61 }
 0x632   : > { %10438 = vmatpush1.bf16.msra.mxu0 %v13130_v59  ;;  %v8761_v59 = vadd.f32 %v8731_v56, %v8703_v62  ;;  %v13256_v61 = vld [vmem:[#allocation8 + $0x5a0] ss:$16 sps:$4 sm:$0xff]   ;;  %v13259_v62 = vld [vmem:[#allocation8 + $0x5a8] ss:$16 sps:$4 sm:$0xff]  }
 0x633   : > { %10610 = vmatpush1.bf16.msra.mxu1 %v13133_v2  ;;  %10439 = vmatprep.subr.bf16.mxu0 %v13138_v3  ;;  %v13201_v2 = vld [vmem:[#allocation8 + $0x46c] ss:$16 sps:$4 sm:$0xff]   ;;  %vm8769_vm8 = vcmp.gt.f32.partialorder %v8753_v1, 0.0  ;;  %v8785_v3 = vmul.f32 0.2, %v8753_v1 }
 0x634   : > { %10611 = vmatprep.subr.bf16.mxu1 %v13141_v4  ;;  %vm8777_vm9 = vcmp.gt.f32.partialorder %v8761_v59, 0.0  ;;  %v8793_v43 = vmul.f32 0.2, %v8761_v59  ;;  %v13196_v4 = vld [vmem:[#allocation8 + $0x460] ss:$16 sps:$4 sm:$0xff]  }
 0x636   : > { %10440 = vmatpush1.bf16.msra.mxu0 %v13136_v5  ;;  %v13199_v5 = vld [vmem:[#allocation8 + $0x468] ss:$16 sps:$4 sm:$0xff]  }
 0x637   : > { %10612 = vmatpush1.bf16.msra.mxu1 %v13139_v6  ;;  %10441 = vmatprep.subr.bf16.mxu0 %v13144_v7  ;;  %v13204_v6 = vld [vmem:[#allocation8 + $0x484] ss:$16 sps:$4 sm:$0xff]   ;;  %v8801_v7 = vsel %vm8769_vm8, %v8753_v1, %v8785_v3 }
 0x638   : > { %10613 = vmatprep.subr.bf16.mxu1 %v13147_v8  ;;  %v8809_v8 = vsel %vm8777_vm9, %v8761_v59, %v8793_v43  ;;  %v8697_v1 = vld [vmem:[#allocation2 + $0x38] sm:$0xff] }
 0x639   : > { %v13264_v59 = vld [vmem:[#allocation8 + $0x5c4] ss:$16 sps:$4 sm:$0xff]  }
 0x63a   : > { %10442 = vmatpush1.bf16.msra.mxu0 %v13142_v9  ;;  %v13207_v9 = vld [vmem:[#allocation8 + $0x48c] ss:$16 sps:$4 sm:$0xff]   ;;  %v8705_v3 = vld [vmem:[#allocation2 + $0x78] sm:$0xff] }
 0x63b   : > { %10614 = vmatpush1.bf16.msra.mxu1 %v13145_v10  ;;  %10443 = vmatprep.subr.bf16.mxu0 %v13150_v11  ;;  %v8817_v10 = vpack.c.bf16 %v8809_v8, %v8801_v7  ;;  %v13202_v11 = vld [vmem:[#allocation8 + $0x480] ss:$16 sps:$4 sm:$0xff]   ;;  %v13273_v8 = vld [vmem:[#allocation8 + $0x5ec] ss:$16 sps:$4 sm:$0xff]  }
 0x63c   : > { %10615 = vmatprep.subr.bf16.mxu1 %v13153_v12  ;;  %v13205_v12 = vld [vmem:[#allocation8 + $0x488] ss:$16 sps:$4 sm:$0xff]  }
 0x63e   : > { %10444 = vmatpush1.bf16.msra.mxu0 %v13148_v13  ;;  %v13210_v13 = vld [vmem:[#allocation8 + $0x4a4] ss:$16 sps:$4 sm:$0xff]  }
 0x63f   : > { %10616 = vmatpush1.bf16.msra.mxu1 %v13151_v14  ;;  %10445 = vmatprep.subr.bf16.mxu0 %v13156_v16  ;;  %v13213_v14 = vld [vmem:[#allocation8 + $0x4ac] ss:$16 sps:$4 sm:$0xff]   ;;  %v13208_v16 = vld [vmem:[#allocation8 + $0x4a0] ss:$16 sps:$4 sm:$0xff]  }
 0x640   : > { %10617 = vmatprep.subr.bf16.mxu1 %v13159_v17  ;;  %v13211_v17 = vld [vmem:[#allocation8 + $0x4a8] ss:$16 sps:$4 sm:$0xff]  }
 0x642   : > { %10446 = vmatpush1.bf16.msra.mxu0 %v13154_v18  ;;  %v13216_v18 = vld [vmem:[#allocation8 + $0x4c4] ss:$16 sps:$4 sm:$0xff]  }
 0x643   : > { %10618 = vmatpush1.bf16.msra.mxu1 %v13157_v19  ;;  %10447 = vmatprep.subr.bf16.mxu0 %v13162_v20  ;;  %v13219_v19 = vld [vmem:[#allocation8 + $0x4cc] ss:$16 sps:$4 sm:$0xff]   ;;  %v13214_v20 = vld [vmem:[#allocation8 + $0x4c0] ss:$16 sps:$4 sm:$0xff]  }
 0x644   : > { %10619 = vmatprep.subr.bf16.mxu1 %v13165_v21  ;;  %v13217_v21 = vld [vmem:[#allocation8 + $0x4c8] ss:$16 sps:$4 sm:$0xff]  }
 0x646   : > { %10448 = vmatpush1.bf16.msra.mxu0 %v13160_v25  ;;  %v13223_v25 = vld [vmem:[#allocation8 + $0x4e8] ss:$16 sps:$4 sm:$0xff]  }
 0x647   : > { %10620 = vmatpush1.bf16.msra.mxu1 %v13163_v26  ;;  %10449 = vmatprep.subr.bf16.mxu0 %v13168_v29  ;;  %v13228_v26 = vld [vmem:[#allocation8 + $0x504] ss:$16 sps:$4 sm:$0xff]   ;;  %v13229_v29 = vld [vmem:[#allocation8 + $0x508] ss:$16 sps:$4 sm:$0xff]  }
 0x648   : > { %10621 = vmatprep.subr.bf16.mxu1 %v13171_v30  ;;  %v13234_v30 = vld [vmem:[#allocation8 + $0x524] ss:$16 sps:$4 sm:$0xff]  }
 0x64a   : > { %10450 = vmatpush1.bf16.msra.mxu0 %v13166_v31  ;;  %v13237_v31 = vld [vmem:[#allocation8 + $0x52c] ss:$16 sps:$4 sm:$0xff]  }
 0x64b   : > { %10622 = vmatpush1.bf16.msra.mxu1 %v13169_v32  ;;  %10451 = vmatprep.subr.bf16.mxu0 %v13174_v34  ;;  %v13232_v32 = vld [vmem:[#allocation8 + $0x520] ss:$16 sps:$4 sm:$0xff]   ;;  %v13235_v34 = vld [vmem:[#allocation8 + $0x528] ss:$16 sps:$4 sm:$0xff]  }
 0x64c   : > { %10623 = vmatprep.subr.bf16.mxu1 %v13177_v37  ;;  %v13238_v37 = vld [vmem:[#allocation8 + $0x540] ss:$16 sps:$4 sm:$0xff]  }
 0x64e   : > { %10452 = vmatpush1.bf16.msra.mxu0 %v13172_v39  ;;  %v13241_v39 = vld [vmem:[#allocation8 + $0x548] ss:$16 sps:$4 sm:$0xff]  }
 0x64f   : > { %10624 = vmatpush1.bf16.msra.mxu1 %v13175_v41  ;;  %10464 = vmatprep.subr.bf16.mxu0 %v13180_v46  ;;  %v13246_v41 = vld [vmem:[#allocation8 + $0x564] ss:$16 sps:$4 sm:$0xff]   ;;  %v13247_v46 = vld [vmem:[#allocation8 + $0x568] ss:$16 sps:$4 sm:$0xff]  }
 0x650   : > { %10636 = vmatprep.subr.bf16.mxu1 %v13183_v47  ;;  %v8726_v47 = vsub.s32 4, %v15084_v33 }
 0x651   : > { %10454 = vmatmul.mubr.bf16.vlgmr.msra.gmra.mrb[0].mxu0 %v8814_v49 }
 0x652   : > { %10626 = vmatmul.mubr.bf16.vlgmr.msra.gmra.mrb[0].mxu1 %v8814_v49  ;;  %10465 = vmatpush1.bf16.msra.mxu0 %v13178_v48  ;;  %v13252_v48 = vld [vmem:[#allocation8 + $0x584] ss:$16 sps:$4 sm:$0xff]   ;;  %v13255_v49 = vld [vmem:[#allocation8 + $0x58c] ss:$16 sps:$4 sm:$0xff]  }
 0x653   : > { %10637 = vmatpush1.bf16.msra.mxu1 %v13181_v50  ;;  %10466 = vmatprep.subr.bf16.mxu0 %v13186_v52  ;;  %v8738_v50 = vsub.s32 7, %v15084_v33  ;;  %v13253_v52 = vld [vmem:[#allocation8 + $0x588] ss:$16 sps:$4 sm:$0xff]  }
 0x654   : > { %10638 = vmatprep.subr.bf16.mxu1 %v13189_v53  ;;  %10496 = vmatprep.mubr.bf16.mxu0 %v8817_v10  ;;  %v13258_v53 = vld [vmem:[#allocation8 + $0x5a4] ss:$16 sps:$4 sm:$0xff]  }
 0x655   : > { %10668 = vmatprep.mubr.bf16.mxu1 %v8817_v10 }
 0x656   : > { %10467 = vmatpush1.bf16.msra.mxu0 %v13184_v54  ;;  %v13261_v54 = vld [vmem:[#allocation8 + $0x5ac] ss:$16 sps:$4 sm:$0xff]  }
 0x657   : > { %10639 = vmatpush1.bf16.msra.mxu1 %v13187_v55  ;;  %10468 = vmatprep.subr.bf16.mxu0 %v13192_v57  ;;  %v15108_v55 = vld [vmem:[#allocation6] sm:$0xff]  ;;  %v8694_v57 = vld [vmem:[#allocation2 + $0x20] sm:$0xff] }
 0x658   : > { %10640 = vmatprep.subr.bf16.mxu1 %v13195_v58  ;;  %v8727_v56 = vrot.slane %v15108_v55, %v8726_v47  ;;  %v8702_v58 = vld [vmem:[#allocation2 + $0x60] sm:$0xff]  ;;  %v13306_v47 = vld [vmem:[#allocation8 + $0x6a4] ss:$16 sps:$4 sm:$0xff]  }
 0x65a   : > { %10469 = vmatpush1.bf16.msra.mxu0 %v13190_v60  ;;  %v8739_v60 = vrot.slane %v15108_v55, %v8738_v50  ;;  %v13307_v50 = vld [vmem:[#allocation8 + $0x6a8] ss:$16 sps:$4 sm:$0xff]  }
 0x65b   : > { %10641 = vmatpush1.bf16.msra.mxu1 %v13193_v63  ;;  %10470 = vmatprep.subr.bf16.mxu0 %v13198_v0  ;;  %v8752_v63 = vadd.f32 %v8727_v56, %v8694_v57  ;;  %v8760_v0 = vadd.f32 %v8727_v56, %v8702_v58  ;;  %v13318_v56 = vld [vmem:[#allocation8 + $0x6e4] ss:$16 sps:$4 sm:$0xff]   ;;  %v13321_v57 = vld [vmem:[#allocation8 + $0x6ec] ss:$16 sps:$4 sm:$0xff]   ;;  %v13316_v58 = vld [vmem:[#allocation8 + $0x6e0] ss:$16 sps:$4 sm:$0xff]  }
 0x65c   : > { %10642 = vmatprep.subr.bf16.mxu1 %v13201_v2  ;;  %v13267_v2 = vld [vmem:[#allocation8 + $0x5cc] ss:$16 sps:$4 sm:$0xff]   ;;  %v8755_v43 = vadd.f32 %v8739_v60, %v8697_v1  ;;  %v8763_v7 = vadd.f32 %v8739_v60, %v8705_v3  ;;  %v13319_v60 = vld [vmem:[#allocation8 + $0x6e8] ss:$16 sps:$4 sm:$0xff]   ;;  %v13330_v1 = vld [vmem:[#allocation8 + $0x724] ss:$16 sps:$4 sm:$0xff]  }
 0x65d   : > { %v8792_v10 = vmul.f32 0.2, %v8760_v0  ;;  %vm8768_vm10 = vcmp.gt.f32.partialorder %v8752_v63, 0.0  ;;  %vm8776_vm11 = vcmp.gt.f32.partialorder %v8760_v0, 0.0  ;;  %v13331_v3 = vld [vmem:[#allocation8 + $0x728] ss:$16 sps:$4 sm:$0xff]  }
 0x65e   : > { %10471 = vmatpush1.bf16.msra.mxu0 %v13196_v4  ;;  %v13262_v4 = vld [vmem:[#allocation8 + $0x5c0] ss:$16 sps:$4 sm:$0xff]   ;;  %vm8771_vm12 = vcmp.gt.f32.partialorder %v8755_v43, 0.0  ;;  %vm8779_vm13 = vcmp.gt.f32.partialorder %v8763_v7, 0.0 }
 0x65f   : > { %10643 = vmatpush1.bf16.msra.mxu1 %v13199_v5  ;;  %10472 = vmatprep.subr.bf16.mxu0 %v13204_v6  ;;  %v13265_v5 = vld [vmem:[#allocation8 + $0x5c8] ss:$16 sps:$4 sm:$0xff]   ;;  %v13270_v6 = vld [vmem:[#allocation8 + $0x5e4] ss:$16 sps:$4 sm:$0xff]  }
 0x660   : > { %10644 = vmatprep.subr.bf16.mxu1 %v13207_v9  ;;  %v8784_v9 = vmul.f32 0.2, %v8752_v63 }
 0x662   : > { %10473 = vmatpush1.bf16.msra.mxu0 %v13202_v11  ;;  %v8787_v11 = vmul.f32 0.2, %v8755_v43 }
 0x663   : > { %10645 = vmatpush1.bf16.msra.mxu1 %v13205_v12  ;;  %10474 = vmatprep.subr.bf16.mxu0 %v13210_v13  ;;  %v13268_v12 = vld [vmem:[#allocation8 + $0x5e0] ss:$16 sps:$4 sm:$0xff]   ;;  %v13271_v13 = vld [vmem:[#allocation8 + $0x5e8] ss:$16 sps:$4 sm:$0xff]  }
 0x664   : > { %10646 = vmatprep.subr.bf16.mxu1 %v13213_v14  ;;  %v13276_v14 = vld [vmem:[#allocation8 + $0x604] ss:$16 sps:$4 sm:$0xff]  }
 0x666   : > { %10475 = vmatpush1.bf16.msra.mxu0 %v13208_v16  ;;  %v8795_v16 = vmul.f32 0.2, %v8763_v7 }
 0x667   : > { %10647 = vmatpush1.bf16.msra.mxu1 %v13211_v17  ;;  %10476 = vmatprep.subr.bf16.mxu0 %v13216_v18  ;;  %v8800_v17 = vsel %vm8768_vm10, %v8752_v63, %v8784_v9  ;;  %v8808_v18 = vsel %vm8776_vm11, %v8760_v0, %v8792_v10  ;;  %v13322_v63 = vld [vmem:[#allocation8 + $0x700] ss:$16 sps:$4 sm:$0xff]   ;;  %v13325_v0 = vld [vmem:[#allocation8 + $0x708] ss:$16 sps:$4 sm:$0xff]  }
 0x668   : > { %10648 = vmatprep.subr.bf16.mxu1 %v13219_v19  ;;  %v13279_v19 = vld [vmem:[#allocation8 + $0x60c] ss:$16 sps:$4 sm:$0xff]   ;;  %v13340_v9 = vld [vmem:[#allocation8 + $0x760] ss:$16 sps:$4 sm:$0xff]   ;;  %v13343_v10 = vld [vmem:[#allocation8 + $0x768] ss:$16 sps:$4 sm:$0xff]  }
 0x66a   : > { %10477 = vmatpush1.bf16.msra.mxu0 %v13214_v20  ;;  %v13274_v20 = vld [vmem:[#allocation8 + $0x600] ss:$16 sps:$4 sm:$0xff]  }
 0x66b   : > { %10649 = vmatpush1.bf16.msra.mxu1 %v13217_v21  ;;  %10478 = vmatprep.subr.bf16.mxu0 %v13222_v22  ;;  %v13277_v21 = vld [vmem:[#allocation8 + $0x608] ss:$16 sps:$4 sm:$0xff]   ;;  %v8816_v22 = vpack.c.bf16 %v8808_v18, %v8800_v17  ;;  %v13354_v17 = vld [vmem:[#allocation8 + $0x7a4] ss:$16 sps:$4 sm:$0xff]  }
 0x66c   : > { %10650 = vmatprep.subr.bf16.mxu1 %v13225_v23  ;;  %v8803_v23 = vsel %vm8771_vm12, %v8755_v43, %v8787_v11  ;;  %v13336_v43 = vld [vmem:[#allocation8 + $0x744] ss:$16 sps:$4 sm:$0xff]   ;;  %v8734_v11 = vsub.s32 6, %v15084_v33 }
 0x66e   : > { %10479 = vmatpush1.bf16.msra.mxu0 %v13220_v24  ;;  %v8811_v24 = vsel %vm8779_vm13, %v8763_v7, %v8795_v16  ;;  %v13342_v7 = vld [vmem:[#allocation8 + $0x764] ss:$16 sps:$4 sm:$0xff]   ;;  %v13349_v16 = vld [vmem:[#allocation8 + $0x788] ss:$16 sps:$4 sm:$0xff]   ;;  %v8735_v18 = vrot.slane %v15108_v55, %v8734_v11  ;;  %v9076_v11 = vld [vmem:[#allocation9] sm:$0xf] }
 0x66f   : > { %10651 = vmatpush1.bf16.msra.mxu1 %v13223_v25  ;;  %10480 = vmatprep.subr.bf16.mxu0 %v13228_v26  ;;  %v13282_v25 = vld [vmem:[#allocation8 + $0x624] ss:$16 sps:$4 sm:$0xff]   ;;  %v13285_v26 = vld [vmem:[#allocation8 + $0x62c] ss:$16 sps:$4 sm:$0xff]  }
 0x670   : > { %10652 = vmatprep.subr.bf16.mxu1 %v13231_v27  ;;  %v13280_v27 = vld [vmem:[#allocation8 + $0x620] ss:$16 sps:$4 sm:$0xff]  }
 0x672   : > { %10481 = vmatpush1.bf16.msra.mxu0 %v13226_v28  ;;  %v8819_v28 = vpack.c.bf16 %v8811_v24, %v8803_v23  ;;  %v13355_v23 = vld [vmem:[#allocation8 + $0x7a8] ss:$16 sps:$4 sm:$0xff]  }
 0x673   : > { %10653 = vmatpush1.bf16.msra.mxu1 %v13229_v29  ;;  %10482 = vmatprep.subr.bf16.mxu0 %v13234_v30  ;;  %v13283_v29 = vld [vmem:[#allocation8 + $0x628] ss:$16 sps:$4 sm:$0xff]   ;;  %v13288_v30 = vld [vmem:[#allocation8 + $0x644] ss:$16 sps:$4 sm:$0xff]  }
 0x674   : > { %10654 = vmatprep.subr.bf16.mxu1 %v13237_v31  ;;  %v13291_v31 = vld [vmem:[#allocation8 + $0x64c] ss:$16 sps:$4 sm:$0xff]  }
 0x676   : > { %10483 = vmatpush1.bf16.msra.mxu0 %v13232_v32  ;;  %v13286_v32 = vld [vmem:[#allocation8 + $0x640] ss:$16 sps:$4 sm:$0xff]  }
 0x677   : > { %10655 = vmatpush1.bf16.msra.mxu1 %v13235_v34  ;;  %10484 = vmatprep.subr.bf16.mxu0 %v13240_v35  ;;  %v13289_v34 = vld [vmem:[#allocation8 + $0x648] ss:$16 sps:$4 sm:$0xff]   ;;  %v13294_v35 = vld [vmem:[#allocation8 + $0x664] ss:$16 sps:$4 sm:$0xff]  }
 0x678   : > { %10656 = vmatprep.subr.bf16.mxu1 %v13243_v36  ;;  %v13297_v36 = vld [vmem:[#allocation8 + $0x66c] ss:$16 sps:$4 sm:$0xff]  }
 0x67a   : > { %10485 = vmatpush1.bf16.msra.mxu0 %v13238_v37  ;;  %v13292_v37 = vld [vmem:[#allocation8 + $0x660] ss:$16 sps:$4 sm:$0xff]  }
 0x67b   : > { %10657 = vmatpush1.bf16.msra.mxu1 %v13241_v39  ;;  %10486 = vmatprep.subr.bf16.mxu0 %v13246_v41  ;;  %v13295_v39 = vld [vmem:[#allocation8 + $0x668] ss:$16 sps:$4 sm:$0xff]   ;;  %v13300_v41 = vld [vmem:[#allocation8 + $0x684] ss:$16 sps:$4 sm:$0xff]  }
 0x67c   : > { %10658 = vmatprep.subr.bf16.mxu1 %v13249_v42  ;;  %v13303_v42 = vld [vmem:[#allocation8 + $0x68c] ss:$16 sps:$4 sm:$0xff]  }
 0x67e   : > { %10487 = vmatpush1.bf16.msra.mxu0 %v13244_v45  ;;  %v13298_v45 = vld [vmem:[#allocation8 + $0x680] ss:$16 sps:$4 sm:$0xff]  }
 0x67f   : > { %10659 = vmatpush1.bf16.msra.mxu1 %v13247_v46  ;;  %10488 = vmatprep.subr.bf16.mxu0 %v13252_v48  ;;  %v13301_v46 = vld [vmem:[#allocation8 + $0x688] ss:$16 sps:$4 sm:$0xff]   ;;  %v13309_v48 = vld [vmem:[#allocation8 + $0x6ac] ss:$16 sps:$4 sm:$0xff]  }
 0x680   : > { %10660 = vmatprep.subr.bf16.mxu1 %v13255_v49  ;;  %v13304_v49 = vld [vmem:[#allocation8 + $0x6a0] ss:$16 sps:$4 sm:$0xff]  }
 0x682   : > { %10489 = vmatpush1.bf16.msra.mxu0 %v13250_v51  ;;  %v13312_v51 = vld [vmem:[#allocation8 + $0x6c4] ss:$16 sps:$4 sm:$0xff]  }
 0x683   : > { %10661 = vmatpush1.bf16.msra.mxu1 %v13253_v52  ;;  %10490 = vmatprep.subr.bf16.mxu0 %v13258_v53  ;;  %v13315_v52 = vld [vmem:[#allocation8 + $0x6cc] ss:$16 sps:$4 sm:$0xff]   ;;  %v13310_v53 = vld [vmem:[#allocation8 + $0x6c0] ss:$16 sps:$4 sm:$0xff]  }
 0x684   : > { %10662 = vmatprep.subr.bf16.mxu1 %v13261_v54  ;;  %v13313_v54 = vld [vmem:[#allocation8 + $0x6c8] ss:$16 sps:$4 sm:$0xff]  }
 0x686   : > { %10491 = vmatpush1.bf16.msra.mxu0 %v13256_v61  ;;  %v13324_v61 = vld [vmem:[#allocation8 + $0x704] ss:$16 sps:$4 sm:$0xff]  }
 0x687   : > { %10663 = vmatpush1.bf16.msra.mxu1 %v13259_v62  ;;  %10492 = vmatprep.subr.bf16.mxu0 %v13264_v59  ;;  %v13327_v62 = vld [vmem:[#allocation8 + $0x70c] ss:$16 sps:$4 sm:$0xff]  }
 0x688   : > { %10664 = vmatprep.subr.bf16.mxu1 %v13267_v2  ;;  %v13333_v59 = vld [vmem:[#allocation8 + $0x72c] ss:$16 sps:$4 sm:$0xff]   ;;  %v13328_v2 = vld [vmem:[#allocation8 + $0x720] ss:$16 sps:$4 sm:$0xff]  }
 0x68a   : > { %10493 = vmatpush1.bf16.msra.mxu0 %v13262_v4  ;;  %v13339_v4 = vld [vmem:[#allocation8 + $0x74c] ss:$16 sps:$4 sm:$0xff]  }
 0x68b   : > { %10665 = vmatpush1.bf16.msra.mxu1 %v13265_v5  ;;  %10494 = vmatprep.subr.bf16.mxu0 %v13270_v6  ;;  %v13334_v5 = vld [vmem:[#allocation8 + $0x740] ss:$16 sps:$4 sm:$0xff]   ;;  %v13337_v6 = vld [vmem:[#allocation8 + $0x748] ss:$16 sps:$4 sm:$0xff]  }
 0x68c   : > { %10666 = vmatprep.subr.bf16.mxu1 %v13273_v8  ;;  %v13345_v8 = vld [vmem:[#allocation8 + $0x76c] ss:$16 sps:$4 sm:$0xff]  }
 0x68e   : > { %10495 = vmatpush1.bf16.msra.mxu0 %v13268_v12  ;;  %v13348_v12 = vld [vmem:[#allocation8 + $0x784] ss:$16 sps:$4 sm:$0xff]  }
 0x68f   : > { %10667 = vmatpush1.bf16.msra.mxu1 %v13271_v13  ;;  %10507 = vmatprep.subr.bf16.mxu0 %v13276_v14  ;;  %v13351_v13 = vld [vmem:[#allocation8 + $0x78c] ss:$16 sps:$4 sm:$0xff]   ;;  %v13346_v14 = vld [vmem:[#allocation8 + $0x780] ss:$16 sps:$4 sm:$0xff]  }
 0x690   : > { %10679 = vmatprep.subr.bf16.mxu1 %v13279_v19  ;;  %v13357_v19 = vld [vmem:[#allocation8 + $0x7ac] ss:$16 sps:$4 sm:$0xff]  }
 0x691   : > { %10497 = vmatmul.mubr.bf16.vlgmr.msra.gmra.mrb[0].mxu0 %v8816_v22 }
 0x692   : > { %10669 = vmatmul.mubr.bf16.vlgmr.msra.gmra.mrb[0].mxu1 %v8816_v22  ;;  %10508 = vmatpush1.bf16.msra.mxu0 %v13274_v20  ;;  %v8696_v20 = vld [vmem:[#allocation2 + $0x30] sm:$0xff]  ;;  %v13352_v22 = vld [vmem:[#allocation8 + $0x7a0] ss:$16 sps:$4 sm:$0xff]  }
 0x693   : > { %10680 = vmatpush1.bf16.msra.mxu1 %v13277_v21  ;;  %10509 = vmatprep.subr.bf16.mxu0 %v13282_v25  ;;  %v8704_v21 = vld [vmem:[#allocation2 + $0x70] sm:$0xff]  ;;  %v8754_v24 = vadd.f32 %v8735_v18, %v8696_v20 }
 0x694   : > { %10681 = vmatprep.subr.bf16.mxu1 %v13285_v26  ;;  %10539 = vmatprep.mubr.bf16.mxu0 %v8819_v28  ;;  %v8762_v25 = vadd.f32 %v8735_v18, %v8704_v21  ;;  %v13360_v26 = vld [vmem:[#allocation8 + $0x7c4] ss:$16 sps:$4 sm:$0xff]  }
 0x695   : > { %10711 = vmatprep.mubr.bf16.mxu1 %v8819_v28  ;;  %v13358_v28 = vld [vmem:[#allocation8 + $0x7c0] ss:$16 sps:$4 sm:$0xff]   ;;  %v8786_v55 = vmul.f32 0.2, %v8754_v24  ;;  %vm8770_vm14 = vcmp.gt.f32.partialorder %v8754_v24, 0.0 }
 0x696   : > { %10510 = vmatpush1.bf16.msra.mxu0 %v13280_v27  ;;  %v13363_v27 = vld [vmem:[#allocation8 + $0x7cc] ss:$16 sps:$4 sm:$0xff]   ;;  %vm8778_vm15 = vcmp.gt.f32.partialorder %v8762_v25, 0.0 }
 0x697   : > { %10682 = vmatpush1.bf16.msra.mxu1 %v13283_v29  ;;  %10511 = vmatprep.subr.bf16.mxu0 %v13288_v30  ;;  %v13361_v29 = vld [vmem:[#allocation8 + $0x7c8] ss:$16 sps:$4 sm:$0xff]   ;;  %v8794_v30 = vmul.f32 0.2, %v8762_v25 }
 0x698   : > { %10683 = vmatprep.subr.bf16.mxu1 %v13291_v31  ;;  %v13366_v31 = vld [vmem:[#allocation8 + $0x7e4] ss:$16 sps:$4 sm:$0xff]  }
 0x69a   : > { %10512 = vmatpush1.bf16.msra.mxu0 %v13286_v32  ;;  %v13369_v32 = vld [vmem:[#allocation8 + $0x7ec] ss:$16 sps:$4 sm:$0xff]  }
 0x69b   : > { %10684 = vmatpush1.bf16.msra.mxu1 %v13289_v34  ;;  %10513 = vmatprep.subr.bf16.mxu0 %v13294_v35  ;;  %v13364_v34 = vld [vmem:[#allocation8 + $0x7e0] ss:$16 sps:$4 sm:$0xff]   ;;  %v13367_v35 = vld [vmem:[#allocation8 + $0x7e8] ss:$16 sps:$4 sm:$0xff]  }
 0x69c   : > { %10685 = vmatprep.subr.bf16.mxu1 %v13297_v36  ;;  %v8802_v36 = vsel %vm8770_vm14, %v8754_v24, %v8786_v55 }
 0x69e   : > { %10514 = vmatpush1.bf16.msra.mxu0 %v13292_v37  ;;  %v8810_v37 = vsel %vm8778_vm15, %v8762_v25, %v8794_v30 }
 0x69f   : > { %10686 = vmatpush1.bf16.msra.mxu1 %v13295_v39  ;;  %10515 = vmatprep.subr.bf16.mxu0 %v13300_v41  ;;  %v13370_v39 = vld [vmem:[#allocation11 + $0x40] sm:$0xff]  }
 0x6a0   : > { %10687 = vmatprep.subr.bf16.mxu1 %v13303_v42  ;;  %v13371_v41 = vld [vmem:[#allocation11 + $0xc0] sm:$0xff]   ;;  %v8818_v42 = vpack.c.bf16 %v8810_v37, %v8802_v36 }
 0x6a2   : > { %10516 = vmatpush1.bf16.msra.mxu0 %v13298_v45  ;;  %v13372_v45 = vld [vmem:[#allocation11] sm:$0xff]  }
 0x6a3   : > { %10688 = vmatpush1.bf16.msra.mxu1 %v13301_v46  ;;  %10517 = vmatprep.subr.bf16.mxu0 %v13306_v47  ;;  %v13373_v46 = vld [vmem:[#allocation11 + $0x80] sm:$0xff]   ;;  %v13374_v47 = vld [vmem:[#allocation11 + $0x48] sm:$0xff]  }
 0x6a4   : > { %10689 = vmatprep.subr.bf16.mxu1 %v13309_v48  ;;  %v13375_v48 = vld [vmem:[#allocation11 + $0xc8] sm:$0xff]  }
 0x6a6   : > { %10518 = vmatpush1.bf16.msra.mxu0 %v13304_v49  ;;  %v13376_v49 = vld [vmem:[#allocation11 + $0x8] sm:$0xff]  }
 0x6a7   : > { %10690 = vmatpush1.bf16.msra.mxu1 %v13307_v50  ;;  %10519 = vmatprep.subr.bf16.mxu0 %v13312_v51  ;;  %v13377_v50 = vld [vmem:[#allocation11 + $0x88] sm:$0xff]   ;;  %v13378_v51 = vld [vmem:[#allocation11 + $0x50] sm:$0xff]  }
 0x6a8   : > { %10691 = vmatprep.subr.bf16.mxu1 %v13315_v52  ;;  %v13379_v52 = vld [vmem:[#allocation11 + $0xd0] sm:$0xff]  }
 0x6aa   : > { %10520 = vmatpush1.bf16.msra.mxu0 %v13310_v53  ;;  %v13380_v53 = vld [vmem:[#allocation11 + $0x10] sm:$0xff]  }
 0x6ab   : > { %10692 = vmatpush1.bf16.msra.mxu1 %v13313_v54  ;;  %10521 = vmatprep.subr.bf16.mxu0 %v13318_v56  ;;  %v13381_v54 = vld [vmem:[#allocation11 + $0x90] sm:$0xff]   ;;  %v13382_v56 = vld [vmem:[#allocation11 + $0x58] sm:$0xff]  }
 0x6ac   : > { %10693 = vmatprep.subr.bf16.mxu1 %v13321_v57  ;;  %v13383_v57 = vld [vmem:[#allocation11 + $0xd8] sm:$0xff]  }
 0x6ae   : > { %10522 = vmatpush1.bf16.msra.mxu0 %v13316_v58  ;;  %v13384_v58 = vld [vmem:[#allocation11 + $0x18] sm:$0xff]  }
 0x6af   : > { %10694 = vmatpush1.bf16.msra.mxu1 %v13319_v60  ;;  %10523 = vmatprep.subr.bf16.mxu0 %v13324_v61  ;;  %v13385_v60 = vld [vmem:[#allocation11 + $0x98] sm:$0xff]   ;;  %v13386_v61 = vld [vmem:[#allocation11 + $0x60] sm:$0xff]  }
 0x6b0   : > { %10695 = vmatprep.subr.bf16.mxu1 %v13327_v62  ;;  %v13387_v62 = vld [vmem:[#allocation11 + $0xe0] sm:$0xff]  }
 0x6b2   : > { %10524 = vmatpush1.bf16.msra.mxu0 %v13322_v63  ;;  %v13388_v63 = vld [vmem:[#allocation11 + $0x20] sm:$0xff]  }
 0x6b3   : > { %10696 = vmatpush1.bf16.msra.mxu1 %v13325_v0  ;;  %10525 = vmatprep.subr.bf16.mxu0 %v13330_v1  ;;  %v13389_v0 = vld [vmem:[#allocation11 + $0xa0] sm:$0xff]   ;;  %v13390_v1 = vld [vmem:[#allocation11 + $0x68] sm:$0xff]  }
 0x6b4   : > { %10697 = vmatprep.subr.bf16.mxu1 %v13333_v59  ;;  %v13391_v59 = vld [vmem:[#allocation11 + $0xe8] sm:$0xff]  }
 0x6b6   : > { %10526 = vmatpush1.bf16.msra.mxu0 %v13328_v2  ;;  %v13392_v2 = vld [vmem:[#allocation11 + $0x28] sm:$0xff]  }
 0x6b7   : > { %10698 = vmatpush1.bf16.msra.mxu1 %v13331_v3  ;;  %10527 = vmatprep.subr.bf16.mxu0 %v13336_v43  ;;  %v13393_v3 = vld [vmem:[#allocation11 + $0xa8] sm:$0xff]   ;;  %v13394_v43 = vld [vmem:[#allocation11 + $0x70] sm:$0xff]  }
 0x6b8   : > { %10699 = vmatprep.subr.bf16.mxu1 %v13339_v4  ;;  %v13395_v4 = vld [vmem:[#allocation11 + $0xf0] sm:$0xff]  }
 0x6ba   : > { %10528 = vmatpush1.bf16.msra.mxu0 %v13334_v5  ;;  %v13396_v5 = vld [vmem:[#allocation11 + $0x30] sm:$0xff]  }
 0x6bb   : > { %10700 = vmatpush1.bf16.msra.mxu1 %v13337_v6  ;;  %10529 = vmatprep.subr.bf16.mxu0 %v13342_v7  ;;  %v13397_v6 = vld [vmem:[#allocation11 + $0xb0] sm:$0xff]   ;;  %v13398_v7 = vld [vmem:[#allocation11 + $0x78] sm:$0xff]  }
 0x6bc   : > { %10701 = vmatprep.subr.bf16.mxu1 %v13345_v8  ;;  %v13399_v8 = vld [vmem:[#allocation11 + $0xf8] sm:$0xff]  }
 0x6be   : > { %10530 = vmatpush1.bf16.msra.mxu0 %v13340_v9  ;;  %v13400_v9 = vld [vmem:[#allocation11 + $0x38] sm:$0xff]  }
 0x6bf   : > { %10702 = vmatpush1.bf16.msra.mxu1 %v13343_v10  ;;  %10531 = vmatprep.subr.bf16.mxu0 %v13348_v12  ;;  %v13401_v10 = vld [vmem:[#allocation11 + $0xb8] sm:$0xff]   ;;  %v9081_v12 = vrot.slane %v9076_v11, %v8710_v44 }
 0x6c0   : > { %10703 = vmatprep.subr.bf16.mxu1 %v13351_v13  ;;  %v9089_v13 = vrot.slane %v9076_v11, %v8718_v15 }
 0x6c2   : > { %10532 = vmatpush1.bf16.msra.mxu0 %v13346_v14  ;;  %v9085_v14 = vrot.slane %v9076_v11, %v8714_v38 }
 0x6c3   : > { %10704 = vmatpush1.bf16.msra.mxu1 %v13349_v16  ;;  %10533 = vmatprep.subr.bf16.mxu0 %v13354_v17  ;;  %v9093_v16 = vrot.slane %v9076_v11, %v8722_v40 }
 0x6c4   : > { %10705 = vmatprep.subr.bf16.mxu1 %v13357_v19 }
 0x6c6   : > { %10534 = vmatpush1.bf16.msra.mxu0 %v13352_v22 }
 0x6c7   : > { %10706 = vmatpush1.bf16.msra.mxu1 %v13355_v23  ;;  %10535 = vmatprep.subr.bf16.mxu0 %v13360_v26 }
 0x6c8   : > { %10707 = vmatprep.subr.bf16.mxu1 %v13363_v27 }
 0x6ca   : > { %10536 = vmatpush1.bf16.msra.mxu0 %v13358_v28 }
 0x6cb   : > { %10708 = vmatpush1.bf16.msra.mxu1 %v13361_v29  ;;  %10537 = vmatprep.subr.bf16.mxu0 %v13366_v31 }
 0x6cc   : > { %10709 = vmatprep.subr.bf16.mxu1 %v13369_v32 }
 0x6ce   : > { %10538 = vmatpush1.bf16.msra.mxu0 %v13364_v34 }
 0x6cf   : > { %10710 = vmatpush1.bf16.msra.mxu1 %v13367_v35  ;;  %12643 = vmatprep.subr.bf16.mxu0 %v13370_v39 }
 0x6d0   : > { %12665 = vmatprep.subr.bf16.mxu1 %v13371_v41 }
 0x6d1   : > { %10540 = vmatmul.mubr.bf16.vlgmr.msra.gmra.mrb[0].mxu0 %v8818_v42 }
 0x6d2   : > { %10712 = vmatmul.mubr.bf16.vlgmr.msra.gmra.mrb[0].mxu1 %v8818_v42  ;;  %12644 = vmatpush3.bf16.msra.mxu0 %v13372_v45 }
 0x6d3   : > { %12666 = vmatpush3.bf16.msra.mxu1 %v13373_v46  ;;  %12645 = vmatprep.subr.bf16.mxu0 %v13374_v47 }
 0x6d4   : > { %12667 = vmatprep.subr.bf16.mxu1 %v13375_v48 }
 0x6d6   : > { %12646 = vmatpush3.bf16.msra.mxu0 %v13376_v49 }
 0x6d7   : > { %12668 = vmatpush3.bf16.msra.mxu1 %v13377_v50  ;;  %12647 = vmatprep.subr.bf16.mxu0 %v13378_v51 }
 0x6d8   : > { %12669 = vmatprep.subr.bf16.mxu1 %v13379_v52 }
 0x6da   : > { %12648 = vmatpush3.bf16.msra.mxu0 %v13380_v53 }
 0x6db   : > { %12670 = vmatpush3.bf16.msra.mxu1 %v13381_v54  ;;  %12649 = vmatprep.subr.bf16.mxu0 %v13382_v56  ;;  %v12602_v54 = vld [vmem:[#allocation12] ss:$0 sm:$0xff] }
 0x6dc   : > { %12671 = vmatprep.subr.bf16.mxu1 %v13383_v57 }
 0x6de   : > { %12650 = vmatpush3.bf16.msra.mxu0 %v13384_v58 }
 0x6df   : > { %12672 = vmatpush3.bf16.msra.mxu1 %v13385_v60  ;;  %12651 = vmatprep.subr.bf16.mxu0 %v13386_v61 }
 0x6e0   : > { %12673 = vmatprep.subr.bf16.mxu1 %v13387_v62 }
 0x6e2   : > { %12652 = vmatpush3.bf16.msra.mxu0 %v13388_v63 }
 0x6e3   : > { %12674 = vmatpush3.bf16.msra.mxu1 %v13389_v0  ;;  %12653 = vmatprep.subr.bf16.mxu0 %v13390_v1 }
 0x6e4   : > { %12675 = vmatprep.subr.bf16.mxu1 %v13391_v59 }
 0x6e6   : > { %12654 = vmatpush3.bf16.msra.mxu0 %v13392_v2 }
 0x6e7   : > { %12676 = vmatpush3.bf16.msra.mxu1 %v13393_v3  ;;  %12655 = vmatprep.subr.bf16.mxu0 %v13394_v43 }
 0x6e8   : > { %12677 = vmatprep.subr.bf16.mxu1 %v13395_v4 }
 0x6ea   : > { %12656 = vmatpush3.bf16.msra.mxu0 %v13396_v5 }
 0x6eb   : > { %12678 = vmatpush3.bf16.msra.mxu1 %v13397_v6  ;;  %12657 = vmatprep.subr.bf16.mxu0 %v13398_v7 }
 0x6ec   : > { %12679 = vmatprep.subr.bf16.mxu1 %v13399_v8 }
 0x6ee   : > { %12658 = vmatpush3.bf16.msra.mxu0 %v13400_v9 }
 0x6ef   : > { %12680 = vmatpush3.bf16.msra.mxu1 %v13401_v10 }
 0x7a4   : > { %v10541_v17 = vpop.f32.mrb[0].mxu0 }
 0x7a5   : > { %v10713_v18 = vpop.f32.mrb[0].mxu1  ;;  %v12815_v19 = vadd.f32 %v10541_v17, %v9081_v12  ;;  %v10543_v21 = vpop.f32.mrb[1].mxu0 }
 0x7a6   : > { %v12819_v20 = vadd.f32 %v10713_v18, %v9089_v13  ;;  %v10715_v22 = vpop.f32.mrb[1].mxu1  ;;  %v12816_v23 = vadd.f32 %v10543_v21, %v9085_v14  ;;  %v10545_v25 = vpop.f32.mrb[2].mxu0 }
 0x7a7   : > { %v12820_v24 = vadd.f32 %v10715_v22, %v9093_v16  ;;  %v10717_v26 = vpop.f32.mrb[2].mxu1  ;;  %vm10722_vm0 = vcmp.gt.f32.partialorder %v12815_v19, 0.0  ;;  %v10730_v44 = vmul.f32 0.2, %v12815_v19  ;;  %v12817_v33 = vadd.f32 %v10545_v25, %v9081_v12  ;;  %v10547_v28 = vpop.f32.mrb[3].mxu0 }
 0x7a8   : > { %vm10724_vm1 = vcmp.gt.f32.partialorder %v12819_v20, 0.0  ;;  %v10732_v15 = vmul.f32 0.2, %v12819_v20  ;;  %vm10723_vm2 = vcmp.gt.f32.partialorder %v12816_v23, 0.0  ;;  %v10731_v27 = vmul.f32 0.2, %v12816_v23 }
 0x7a9   : > { %vm10725_vm3 = vcmp.gt.f32.partialorder %v12820_v24, 0.0  ;;  %v10733_v38 = vmul.f32 0.2, %v12820_v24  ;;  %v12821_v40 = vadd.f32 %v10717_v26, %v9089_v13  ;;  %v10719_v29 = vpop.f32.mrb[3].mxu1  ;;  %v10738_v55 = vsel %vm10722_vm0, %v12815_v19, %v10730_v44 }
 0x7aa   : > { %v10740_v30 = vsel %vm10724_vm1, %v12819_v20, %v10732_v15  ;;  %v12818_v31 = vadd.f32 %v10547_v28, %v9085_v14  ;;  %v12822_v32 = vadd.f32 %v10719_v29, %v9093_v16  ;;  %vm10726_vm4 = vcmp.gt.f32.partialorder %v12817_v33, 0.0 }
 0x7ab   : > { %v10734_v34 = vmul.f32 0.2, %v12817_v33  ;;  %vm10728_vm5 = vcmp.gt.f32.partialorder %v12821_v40, 0.0  ;;  %v10736_v35 = vmul.f32 0.2, %v12821_v40  ;;  %v10739_v42 = vsel %vm10723_vm2, %v12816_v23, %v10731_v27 }
 0x7ac   : > { %vm10727_vm6 = vcmp.gt.f32.partialorder %v12818_v31, 0.0  ;;  %v10735_v36 = vmul.f32 0.2, %v12818_v31  ;;  %vm10729_vm7 = vcmp.gt.f32.partialorder %v12822_v32, 0.0  ;;  %v10737_v37 = vmul.f32 0.2, %v12822_v32 }
 0x7ad   : > { %v10742_v39 = vsel %vm10726_vm4, %v12817_v33, %v10734_v34  ;;  %v10744_v41 = vsel %vm10728_vm5, %v12821_v40, %v10736_v35  ;;  %v10741_v45 = vsel %vm10725_vm3, %v12820_v24, %v10733_v38 }
 0x7ae   : > { %v10746_v46 = vpack.c.bf16 %v10742_v39, %v10738_v55  ;;  %v10748_v47 = vpack.c.bf16 %v10744_v41, %v10740_v30  ;;  %v10743_v48 = vsel %vm10727_vm6, %v12818_v31, %v10735_v36  ;;  %v10745_v49 = vsel %vm10729_vm7, %v12822_v32, %v10737_v37 }
 0x7af   : > { %v10747_v50 = vpack.c.bf16 %v10743_v48, %v10739_v42  ;;  %v10749_v51 = vpack.c.bf16 %v10745_v49, %v10741_v45 }
 0x7b1   : > { %11045 = vmatprep.mubr.bf16.mxu0 %v10747_v50  ;;  %11086 = vmatprep.mubr.bf16.mxu1 %v10749_v51 }
 0x7b2   : > { %11046 = vmatmul.mubr.bf16.vlgmr.msra.gmra.mrb[4].mxu0 %v10746_v46  ;;  %11087 = vmatmul.mubr.bf16.vlgmr.msra.gmra.mrb[4].mxu1 %v10748_v47 }
 0x885   : > { %v12659_v52 = vpop.f32.mrb[4].mxu0  ;;  %v12681_v53 = vpop.f32.mrb[4].mxu1 }
 0x886   : > { %v12660_v56 = vpop.f32.mrb[5].mxu0  ;;  %v12682_v57 = vpop.f32.mrb[5].mxu1 }
 0x887   : > { %v12661_v58 = vadd.f32 %v12660_v56, %v12659_v52  ;;  %v12683_v60 = vadd.f32 %v12682_v57, %v12681_v53  ;;  %v12662_v61 = vpop.f32.mrb[6].mxu0  ;;  %v12684_v62 = vpop.f32.mrb[6].mxu1 }
 0x888   : > { %v12663_v63 = vpop.f32.mrb[7].mxu0  ;;  %v12685_v0 = vpop.f32.mrb[7].mxu1 }
 0x889   : > { %v11048_v1 = vadd.f32 %v12661_v58, %v12602_v54  ;;  %v12664_v59 = vadd.f32 %v12663_v63, %v12662_v61  ;;  %v12686_v2 = vadd.f32 %v12685_v0, %v12684_v62 }
 0x88b   : > { %v11089_v3 = vadd.f32 %v12683_v60, %v11048_v1  ;;  %v11051_v43 = vadd.f32 %v12664_v59, %v12602_v54 }
 0x88d   : > { %v12635_v4 = vmul.f32 -1.442695, %v11089_v3  ;;  %v11092_v5 = vadd.f32 %v12686_v2, %v11051_v43 }
 0x88f   : > { %13402 = vpow2.f32 %v12635_v4  ;;  %v12636_v6 = vmul.f32 -1.442695, %v11092_v5 }
 0x891   : > { %13404 = vpow2.f32 %v12636_v6 }
 0x899   : > { %v13403_v7 = vpop.eup %13402 }
 0x89a   : > { %v11101_v8 = vadd.f32 1.0, %v13403_v7 }
 0x89b   : > { %v13405_v9 = vpop.eup %13404 }
 0x89c   : > { %13406 = vrcp.f32 %v11101_v8  ;;  %v11102_v10 = vadd.f32 1.0, %v13405_v9 }
 0x89e   : > { %13408 = vrcp.f32 %v11102_v10 }
 0x8a6   : > { %v13407_v11 = vpop.eup %13406 }
 0x8a7   : > { %11107 = vst [vmem:[%s15150_s7] sm:$0xff] %v13407_v11 }
 0x8a8   : > { %v13409_v12 = vpop.eup %13408 }
 0x8a9   : > { %11108 = vst [vmem:[%s15150_s7 + $0x8] sm:$0xff] %v13409_v12 }
 0x8aa PF: > { %p20_p1 = scmp.ge.s32.totalorder %s13703_s29, 4   ;;  %s15175_s24 = smov %s13617_s25 }
 0x8ab   : > { %s15176_s25 = smov %s13621_s26  ;;  %s15177_s26 = smov %s13713_s9 }
 0x8ac   : > { %s15178_s27 = smov %s13703_s29  ;;  %22 = sbr.rel (!%p20_p1) target bundleno = 9 (0x9), region = 152 }
 0x8b3   :  { %11120 = vsyncpa [#allocation5], 1 }
 0x8b4   :  { %11122 = vsyncpa [#allocation5 + $0x1], 1 }
 0x8b5   :  { %11123 = vsyncpa [#allocation7], 1 }
 0x8b6   :  { %11124 = vsyncpa [#allocation10], 1 }
 0x8b7   :  { %11125 = vsyncpa [#allocation13], 1 }

</bundles_post_ra>
